<compile_context>
chip_gen: v7x
topology: tpu7x:2x2x1
jax: 0.10.0
libtpu: 0.0.40
codegen_flags: <defaults>
</compile_context>

<pallas_src>
import jax
import jax.numpy as jnp
from jax.experimental import pallas as pl
from jax.experimental.pallas import tpu as pltpu


# ----------------------------------------------------------------------------
# Tile selection: >= 2 lane-dense feature tiles when possible (v7x megacore),
# capped so the double-buffered fused (D, 2*tn) bf16 weight tile fits VMEM on
# every generation (v7x scoped default ~32 MiB is the tightest).
# ----------------------------------------------------------------------------
def _pick_tile(d, vmem_budget_bytes=24 * 1024 * 1024):
    if d >= 256 and d % 256 == 0:
        tn = d // 2
    else:
        return d  # single full-width tile (block == full array dims)
    # shrink while 2 double-buffered bf16 weight tiles of (D, 2*tn) overflow
    while (2 * d * (2 * tn) * 2 > vmem_budget_bytes
           and tn % 256 == 0 and d % (tn // 2) == 0):
        tn //= 2
    return tn


# ----------------------------------------------------------------------------
# Pallas kernel: one affine flow step, tiled over the feature dimension.
# Grid axis j walks feature tiles of width `tn`; every output block is written
# exactly once, so the axis is "parallel" (megacore-shardable on v7x).
# ----------------------------------------------------------------------------
def _make_affine_step_kernel(tn):
    def kernel(x_ref, xb_ref, w_ref, b_ref, out_ref):
        col = pl.multiple_of(pl.program_id(0) * tn, tn)

        xb = xb_ref[...]              # (B, D) bf16, resident (cast hoisted out)
        w = w_ref[0]                  # (D, 2*tn) bf16, one contiguous HBM slab
        b = b_ref[0]                  # (1, 2*tn) f32 fused bias tile

        # single fused MXU matmul producing [h_s | h_t]
        h = jnp.dot(xb, w, preferred_element_type=jnp.float32) + b   # (B, 2*tn)
        s = jnp.tanh(h[:, :tn])
        t = h[:, tn:]

        x_tile = x_ref[:, pl.ds(col, tn)]          # f32 slice of resident block
        out_ref[:, :tn] = x_tile * jnp.exp(s) + t  # z tile
        out_ref[:, tn:] = s                        # per-feature log|det J| term
    return kernel


def affine_flow_step(x, w, b):
    """One flow step.

    x: (B, D) f32.
    w: (n_tiles, D, 2*tn) bf16, pre-tiled fused [Ws-tile | Wt-tile] slabs.
    b: (n_tiles, 1, 2*tn) f32, pre-tiled fused [bs-tile | bt-tile].
    Returns z (B, D) f32 and jac (B,) f32.
    """
    B, D = x.shape
    n_tiles, d_w, two_tn = w.shape
    tn = two_tn // 2
    assert d_w == D and n_tiles * tn == D, (w.shape, x.shape)

    xb = x.astype(jnp.bfloat16)   # hoisted bf16 MXU LHS (cast once per step)

    # Rough VMEM need: double-buffered weight + output tiles, resident x/xb.
    vmem_bytes = (2 * D * two_tn * 2        # weight tile x 2 buffers (bf16)
                  + 2 * B * two_tn * 4      # output tile x 2 buffers (f32)
                  + 2 * B * D * (4 + 2)     # resident x (f32) + xb (bf16)
                  + n_tiles * two_tn * 4    # bias
                  + (2 << 20))              # headroom
    vmem_limit = int(min(max(vmem_bytes, 16 << 20), 32 << 20))

    out = pl.pallas_call(
        _make_affine_step_kernel(tn),
        out_shape=jax.ShapeDtypeStruct((B, 2 * D), jnp.float32),
        grid_spec=pltpu.PrefetchScalarGridSpec(
            num_scalar_prefetch=0,
            grid=(n_tiles,),
            in_specs=[
                pl.BlockSpec((B, D), lambda j: (0, 0)),            # x (resident, f32)
                pl.BlockSpec((B, D), lambda j: (0, 0)),            # xb (resident, bf16)
                pl.BlockSpec((1, D, two_tn), lambda j: (j, 0, 0)),  # fused weight slab
                pl.BlockSpec((1, 1, two_tn), lambda j: (j, 0, 0)),  # fused bias tile
            ],
            out_specs=pl.BlockSpec((B, two_tn), lambda j: (0, j)),  # [z | s] tile
        ),
        compiler_params=pltpu.CompilerParams(
            dimension_semantics=("parallel",),
            vmem_limit_bytes=vmem_limit),
    )(x, xb, w, b)

    out = out.reshape(B, n_tiles, 2, tn)
    z = out[:, :, 0, :].reshape(B, D)
    jac = jnp.sum(out[:, :, 1, :], axis=(1, 2))   # tiny reduction, fused by XLA
    return z, jac


# ----------------------------------------------------------------------------
# CNNormalizingFlow.forward glue (unfold / drop / concat) in plain JAX.
# Wrapped in one jax.jit at the call site so dispatch overhead is amortized.
# ----------------------------------------------------------------------------
# TODO(synk): all steps could be folded into one pallas_call (grid over steps
# with scalar-prefetched per-step offsets); under jit the benefit is small at
# these sizes, so it is left as a follow-up.
def cn_normalizing_flow_forward(x_nchw, params, img_sizes, dropping_factors):
    B = x_nchw.shape[0]
    x = x_nchw.reshape(B, -1)                  # NCHW row-major flatten
    jac_tot = jnp.zeros((B,), jnp.float32)
    z_all = []
    for p, (C, H, W), (d_c, d_h, d_w) in zip(params, img_sizes,
                                             dropping_factors):
        z, jac = affine_flow_step(x, p["w"], p["b"])
        c, h, w = C // d_c, H // d_h, W // d_w
        # torch: z.view(-1,C,H,W).unfold(1,d_c,d_c).unfold(2,d_h,d_h)
        #          .unfold(3,d_w,d_w) -> (B, c, h, w, d_c, d_h, d_w)
        zr = z.reshape(B, c, d_c, h, d_h, w, d_w)
        zr = jnp.transpose(zr, (0, 1, 3, 5, 2, 4, 6))
        zr = zr.reshape(B, c, h, w, d_c * d_h * d_w)
        z_all.append(zr[:, :, :, :, 1:].reshape(B, -1))
        x = zr[:, :, :, :, 0].reshape(B, -1)
        jac_tot = jac_tot + jac
    z_all.append(x)
    z_out = jnp.concatenate(z_all, axis=1)
    return z_out, jac_tot


# ----------------------------------------------------------------------------
# Pure-JAX reference (correctness check).  Reconstructs Ws/Wt/bs/bt from the
# pre-tiled kernel layout and uses the same bf16-valued weights / bf16-rounded
# LHS, so the only difference vs. the kernel is f32 accumulation order.
# ----------------------------------------------------------------------------
def _affine_flow_step_ref(x, p):
    n_tiles, D, two_tn = p["w"].shape
    tn = two_tn // 2
    w = p["w"].astype(jnp.float32)
    ws = jnp.transpose(w[:, :, :tn], (1, 0, 2)).reshape(D, D)
    wt = jnp.transpose(w[:, :, tn:], (1, 0, 2)).reshape(D, D)
    bs = p["b"][:, 0, :tn].reshape(1, D)
    bt = p["b"][:, 0, tn:].reshape(1, D)
    xb = x.astype(jnp.bfloat16).astype(jnp.float32)
    s = jnp.tanh(jnp.dot(xb, ws, precision=jax.lax.Precision.HIGHEST) + bs)
    t = jnp.dot(xb, wt, precision=jax.lax.Precision.HIGHEST) + bt
    return x * jnp.exp(s) + t, jnp.sum(s, axis=1)


def _cn_forward_ref(x_nchw, params, img_sizes, dropping_factors):
    B = x_nchw.shape[0]
    x = x_nchw.reshape(B, -1)
    jac_tot = jnp.zeros((B,), jnp.float32)
    z_all = []
    for p, (C, H, W), (d_c, d_h, d_w) in zip(params, img_sizes,
                                             dropping_factors):
        z, jac = _affine_flow_step_ref(x, p)
        c, h, w = C // d_c, H // d_h, W // d_w
        zr = z.reshape(B, c, d_c, h, d_h, w, d_w)
        zr = jnp.transpose(zr, (0, 1, 3, 5, 2, 4, 6))
        zr = zr.reshape(B, c, h, w, d_c * d_h * d_w)
        z_all.append(zr[:, :, :, :, 1:].reshape(B, -1))
        x = zr[:, :, :, :, 0].reshape(B, -1)
        jac_tot = jac_tot + jac
    z_all.append(x)
    return jnp.concatenate(z_all, axis=1), jac_tot


# TODO(synk): constraintsLoss / DAGness / step / invert / getConditioners of
# the abstract steps have no defined computation in the source module; not
# implemented here.


def make_step_params(key, d):
    """Build one step's conditioner params, pre-tiled for the kernel.

    'w': (n_tiles, d, 2*tn) bf16; tile j = [Ws[:, j*tn:(j+1)*tn] | Wt[:, ...]]
         so every grid block is a single contiguous HBM slab.
    'b': (n_tiles, 1, 2*tn) f32 fused [bs-tile | bt-tile].
    """
    k1, k2, k3, k4 = jax.random.split(key, 4)
    ws = (0.02 * jax.random.normal(k1, (d, d))).astype(jnp.float32)
    wt = (0.02 * jax.random.normal(k2, (d, d))).astype(jnp.float32)
    bs = (0.01 * jax.random.normal(k3, (1, d))).astype(jnp.float32)
    bt = (0.01 * jax.random.normal(k4, (1, d))).astype(jnp.float32)

    tn = _pick_tile(d)
    n_tiles = d // tn
    ws_t = jnp.transpose(ws.reshape(d, n_tiles, tn), (1, 0, 2))  # (n_tiles, d, tn)
    wt_t = jnp.transpose(wt.reshape(d, n_tiles, tn), (1, 0, 2))
    w = jnp.concatenate([ws_t, wt_t], axis=2).astype(jnp.bfloat16)
    b = jnp.concatenate([bs.reshape(n_tiles, 1, tn),
                         bt.reshape(n_tiles, 1, tn)], axis=2)
    return {"w": w, "b": b}


if __name__ == "__main__":
    key = jax.random.PRNGKey(0)
    B, C, H, W = 2, 4, 16, 16

    # Two steps: step 1 sees (4,16,16), drops (1,2,2) -> keeps (4,8,8);
    #            step 2 sees (4, 8, 8), drops (4,2,2) -> keeps (1,4,4).
    img_sizes = [(4, 16, 16), (4, 8, 8)]
    dropping_factors = [(1, 2, 2), (4, 2, 2)]

    kx, kp1, kp2 = jax.random.split(key, 3)
    x = jax.random.normal(kx, (B, C, H, W), jnp.float32)
    params = [make_step_params(kp1, 4 * 16 * 16),
              make_step_params(kp2, 4 * 8 * 8)]

    # One jit over the whole multi-step forward (kernels + glue).
    forward = jax.jit(lambda xx, pp: cn_normalizing_flow_forward(
        xx, pp, img_sizes, dropping_factors))

    z, jac_tot = forward(x, params)
    z = jax.block_until_ready(z)
    jac_tot = jax.block_until_ready(jac_tot)

    z_ref, jac_ref = _cn_forward_ref(x, params, img_sizes, dropping_factors)
    assert z.shape == (B, C * H * W), z.shape
    assert jac_tot.shape == (B,), jac_tot.shape
    assert jnp.allclose(z, z_ref, atol=2e-4, rtol=2e-4)
    assert jnp.allclose(jac_tot, jac_ref, atol=1e-3, rtol=1e-3)

    print("KERNEL_OK")
</pallas_src>

<mosaic_0001>
module attributes {stable_mosaic.version = 11 : i64} {
  func.func @kernel(%arg0: i32, %arg1: memref<2x1024xf32, #tpu.memory_space<vmem>>, %arg2: memref<2x1024xbf16, #tpu.memory_space<vmem>>, %arg3: memref<1x1024x1024xbf16, #tpu.memory_space<vmem>>, %arg4: memref<1x1x1024xf32, #tpu.memory_space<vmem>>, %arg5: memref<2x1024xf32, #tpu.memory_space<vmem>>) attributes {dimension_semantics = [#tpu.dimension_semantics<parallel>], iteration_bounds = array<i64: 2>, scalar_prefetch = 0 : i64, scratch_operands = 0 : i64, tpu.core_type = #tpu.core_type<tc>, window_params = [{pipeline_mode = #tpu.pipeline_mode<synchronous>, transform_indices = @transform_0, window_bounds = array<i64: 2, 1024>}, {pipeline_mode = #tpu.pipeline_mode<synchronous>, transform_indices = @transform_1, window_bounds = array<i64: 2, 1024>}, {transform_indices = @transform_2, window_bounds = array<i64: 1, 1024, 1024>}, {transform_indices = @transform_3, window_bounds = array<i64: 1, 1, 1024>}, {transform_indices = @transform_4, window_bounds = array<i64: 2, 1024>}]} {
    %c512_i32 = arith.constant 512 : i32
    %0 = arith.muli %arg0, %c512_i32 : i32
    %1 = tpu.assume_multiple %0, 512 : i32
    %c0 = arith.constant 0 : index
    %c0_0 = arith.constant 0 : index
    %2 = vector.load %arg2[%c0, %c0_0] : memref<2x1024xbf16, #tpu.memory_space<vmem>>, vector<2x1024xbf16>
    %c0_1 = arith.constant 0 : index
    %c0_2 = arith.constant 0 : index
    %c0_3 = arith.constant 0 : index
    %3 = vector.load %arg3[%c0_1, %c0_2, %c0_3] : memref<1x1024x1024xbf16, #tpu.memory_space<vmem>>, vector<1x1024x1024xbf16>
    %4 = vector.shape_cast %3 : vector<1x1024x1024xbf16> to vector<1024x1024xbf16>
    %c0_4 = arith.constant 0 : index
    %c0_5 = arith.constant 0 : index
    %c0_6 = arith.constant 0 : index
    %5 = vector.load %arg4[%c0_4, %c0_5, %c0_6] : memref<1x1x1024xf32, #tpu.memory_space<vmem>>, vector<1x1x1024xf32>
    %6 = vector.shape_cast %5 : vector<1x1x1024xf32> to vector<1x1024xf32>
    %cst = arith.constant dense<0.000000e+00> : vector<2x1024xf32>
    %7 = tpu.matmul %2, %4, %cst {dimension_numbers = #tpu.dot_dimension_numbers<[1], [0], [0], [1], [0, 0, 1, 1], [], []>} : vector<2x1024xbf16>, vector<1024x1024xbf16>, vector<2x1024xf32> -> vector<2x1024xf32>
    %8 = vector.broadcast %6 : vector<1x1024xf32> to vector<2x1024xf32>
    %9 = arith.addf %7, %8 : vector<2x1024xf32>
    %10 = vector.extract_strided_slice %9 {offsets = [0, 0], sizes = [2, 512], strides = [1, 1]} : vector<2x1024xf32> to vector<2x512xf32>
    %11 = math.tanh %10 : vector<2x512xf32>
    %12 = vector.extract_strided_slice %9 {offsets = [0, 512], sizes = [2, 512], strides = [1, 1]} : vector<2x1024xf32> to vector<2x512xf32>
    %c0_7 = arith.constant 0 : index
    %13 = arith.index_cast %1 : i32 to index
    %14 = vector.load %arg1[%c0_7, %13] : memref<2x1024xf32, #tpu.memory_space<vmem>>, vector<2x512xf32>
    %15 = math.exp %11 : vector<2x512xf32>
    %16 = arith.mulf %14, %15 : vector<2x512xf32>
    %17 = arith.addf %16, %12 : vector<2x512xf32>
    %c0_8 = arith.constant 0 : index
    %c0_9 = arith.constant 0 : index
    %18 = vector.load %arg5[%c0_8, %c0_9] : memref<2x1024xf32, #tpu.memory_space<vmem>>, vector<2x512xf32>
    tpu.vector_store %arg5[%c0_8, %c0_9], %17 {strides = array<i32>} : memref<2x1024xf32, #tpu.memory_space<vmem>>, vector<2x512xf32>,
    %c0_10 = arith.constant 0 : index
    %c512 = arith.constant 512 : index
    %19 = vector.load %arg5[%c0_10, %c512] : memref<2x1024xf32, #tpu.memory_space<vmem>>, vector<2x512xf32>
    tpu.vector_store %arg5[%c0_10, %c512], %11 {strides = array<i32>} : memref<2x1024xf32, #tpu.memory_space<vmem>>, vector<2x512xf32>,
    return
  }
  func.func @transform_0(%arg0: i32) -> (i32, i32) {
    %c0_i32 = arith.constant 0 : i32
    %c0_i32_0 = arith.constant 0 : i32
    %c0_i32_1 = arith.constant 0 : i32
    return %c0_i32, %c0_i32_0 : i32, i32
  }
  func.func @transform_1(%arg0: i32) -> (i32, i32) {
    %c0_i32 = arith.constant 0 : i32
    %c0_i32_0 = arith.constant 0 : i32
    %c0_i32_1 = arith.constant 0 : i32
    return %c0_i32, %c0_i32_0 : i32, i32
  }
  func.func @transform_2(%arg0: i32) -> (i32, i32, i32) {
    %c0_i32 = arith.constant 0 : i32
    %c0_i32_0 = arith.constant 0 : i32
    %c0_i32_1 = arith.constant 0 : i32
    return %arg0, %c0_i32, %c0_i32_0 : i32, i32, i32
  }
  func.func @transform_3(%arg0: i32) -> (i32, i32, i32) {
    %c0_i32 = arith.constant 0 : i32
    %c0_i32_0 = arith.constant 0 : i32
    %c0_i32_1 = arith.constant 0 : i32
    return %arg0, %c0_i32, %c0_i32_0 : i32, i32, i32
  }
  func.func @transform_4(%arg0: i32) -> (i32, i32) {
    %c0_i32 = arith.constant 0 : i32
    %c0_i32_0 = arith.constant 0 : i32
    return %c0_i32, %arg0 : i32, i32
  }
}

module attributes {stable_mosaic.version = 11 : i64} {
  func.func @kernel(%arg0: i32, %arg1: memref<2x256xf32, #tpu.memory_space<vmem>>, %arg2: memref<2x256xbf16, #tpu.memory_space<vmem>>, %arg3: memref<1x256x256xbf16, #tpu.memory_space<vmem>>, %arg4: memref<1x1x256xf32, #tpu.memory_space<vmem>>, %arg5: memref<2x256xf32, #tpu.memory_space<vmem>>) attributes {dimension_semantics = [#tpu.dimension_semantics<parallel>], iteration_bounds = array<i64: 2>, scalar_prefetch = 0 : i64, scratch_operands = 0 : i64, tpu.core_type = #tpu.core_type<tc>, window_params = [{pipeline_mode = #tpu.pipeline_mode<synchronous>, transform_indices = @transform_0, window_bounds = array<i64: 2, 256>}, {pipeline_mode = #tpu.pipeline_mode<synchronous>, transform_indices = @transform_1, window_bounds = array<i64: 2, 256>}, {transform_indices = @transform_2, window_bounds = array<i64: 1, 256, 256>}, {transform_indices = @transform_3, window_bounds = array<i64: 1, 1, 256>}, {transform_indices = @transform_4, window_bounds = array<i64: 2, 256>}]} {
    %c128_i32 = arith.constant 128 : i32
    %0 = arith.muli %arg0, %c128_i32 : i32
    %1 = tpu.assume_multiple %0, 128 : i32
    %c0 = arith.constant 0 : index
    %c0_0 = arith.constant 0 : index
    %2 = vector.load %arg2[%c0, %c0_0] : memref<2x256xbf16, #tpu.memory_space<vmem>>, vector<2x256xbf16>
    %c0_1 = arith.constant 0 : index
    %c0_2 = arith.constant 0 : index
    %c0_3 = arith.constant 0 : index
    %3 = vector.load %arg3[%c0_1, %c0_2, %c0_3] : memref<1x256x256xbf16, #tpu.memory_space<vmem>>, vector<1x256x256xbf16>
    %4 = vector.shape_cast %3 : vector<1x256x256xbf16> to vector<256x256xbf16>
    %c0_4 = arith.constant 0 : index
    %c0_5 = arith.constant 0 : index
    %c0_6 = arith.constant 0 : index
    %5 = vector.load %arg4[%c0_4, %c0_5, %c0_6] : memref<1x1x256xf32, #tpu.memory_space<vmem>>, vector<1x1x256xf32>
    %6 = vector.shape_cast %5 : vector<1x1x256xf32> to vector<1x256xf32>
    %cst = arith.constant dense<0.000000e+00> : vector<2x256xf32>
    %7 = tpu.matmul %2, %4, %cst {dimension_numbers = #tpu.dot_dimension_numbers<[1], [0], [0], [1], [0, 0, 1, 1], [], []>} : vector<2x256xbf16>, vector<256x256xbf16>, vector<2x256xf32> -> vector<2x256xf32>
    %8 = vector.broadcast %6 : vector<1x256xf32> to vector<2x256xf32>
    %9 = arith.addf %7, %8 : vector<2x256xf32>
    %10 = vector.extract_strided_slice %9 {offsets = [0, 0], sizes = [2, 128], strides = [1, 1]} : vector<2x256xf32> to vector<2x128xf32>
    %11 = math.tanh %10 : vector<2x128xf32>
    %12 = vector.extract_strided_slice %9 {offsets = [0, 128], sizes = [2, 128], strides = [1, 1]} : vector<2x256xf32> to vector<2x128xf32>
    %c0_7 = arith.constant 0 : index
    %13 = arith.index_cast %1 : i32 to index
    %14 = vector.load %arg1[%c0_7, %13] : memref<2x256xf32, #tpu.memory_space<vmem>>, vector<2x128xf32>
    %15 = math.exp %11 : vector<2x128xf32>
    %16 = arith.mulf %14, %15 : vector<2x128xf32>
    %17 = arith.addf %16, %12 : vector<2x128xf32>
    %c0_8 = arith.constant 0 : index
    %c0_9 = arith.constant 0 : index
    %18 = vector.load %arg5[%c0_8, %c0_9] : memref<2x256xf32, #tpu.memory_space<vmem>>, vector<2x128xf32>
    tpu.vector_store %arg5[%c0_8, %c0_9], %17 {strides = array<i32>} : memref<2x256xf32, #tpu.memory_space<vmem>>, vector<2x128xf32>,
    %c0_10 = arith.constant 0 : index
    %c128 = arith.constant 128 : index
    %19 = vector.load %arg5[%c0_10, %c128] : memref<2x256xf32, #tpu.memory_space<vmem>>, vector<2x128xf32>
    tpu.vector_store %arg5[%c0_10, %c128], %11 {strides = array<i32>} : memref<2x256xf32, #tpu.memory_space<vmem>>, vector<2x128xf32>,
    return
  }
  func.func @transform_0(%arg0: i32) -> (i32, i32) {
    %c0_i32 = arith.constant 0 : i32
    %c0_i32_0 = arith.constant 0 : i32
    %c0_i32_1 = arith.constant 0 : i32
    return %c0_i32, %c0_i32_0 : i32, i32
  }
  func.func @transform_1(%arg0: i32) -> (i32, i32) {
    %c0_i32 = arith.constant 0 : i32
    %c0_i32_0 = arith.constant 0 : i32
    %c0_i32_1 = arith.constant 0 : i32
    return %c0_i32, %c0_i32_0 : i32, i32
  }
  func.func @transform_2(%arg0: i32) -> (i32, i32, i32) {
    %c0_i32 = arith.constant 0 : i32
    %c0_i32_0 = arith.constant 0 : i32
    %c0_i32_1 = arith.constant 0 : i32
    return %arg0, %c0_i32, %c0_i32_0 : i32, i32, i32
  }
  func.func @transform_3(%arg0: i32) -> (i32, i32, i32) {
    %c0_i32 = arith.constant 0 : i32
    %c0_i32_0 = arith.constant 0 : i32
    %c0_i32_1 = arith.constant 0 : i32
    return %arg0, %c0_i32, %c0_i32_0 : i32, i32, i32
  }
  func.func @transform_4(%arg0: i32) -> (i32, i32) {
    %c0_i32 = arith.constant 0 : i32
    %c0_i32_0 = arith.constant 0 : i32
    return %c0_i32, %arg0 : i32, i32
  }
}

</mosaic_0001>

<bundles_post_ra>
// kernel: squeeze.7
= control target key start
LH: loop header
LB: loop body
LE: loop exit
PB: predicated region body
PF: predicated region fallthrough
CT: control target
= control target key end

     0   :  { %vm97_vm0 = vcmask 1047556   ;;  %s4281_s22 = smov 126   ;;  %s4282_s23 = smov 122   ;;  %vm41_vm1 = vcmask 15360   ;;  %s8617_s0 = inlined_call_operand.vmem [shape: f32[2,2,1,512], index: 0, kind: input, shape index: {}]   ;;  %s8618_s1 = inlined_call_operand.vmem [shape: f32[2,4,1,8,2,8,2], index: 1, kind: output, shape index: {}]  }
   0x1   :  { %v3191_v0 = vld [vmem:[%s8617_s0 + $0x6] sm:$0x3]  ;;  %v3192_v1 = vld [vmem:[%s8617_s0 + $0x4] sm:$0x3]  ;;  %v3193_v2 = vld [vmem:[%s8617_s0 + $0x2] sm:$0x3] }
   0x2   :  { %28 = vst [vmem:[#allocation0 + $0x18] sm:$0x3] %v3191_v0  ;;  %33 = vst [vmem:[#allocation0 + $0x10] sm:$0x3] %v3192_v1  ;;  %v38_v3 = vld [vmem:[%s8617_s0] sm:$0x3] }
   0x3   :  { %37 = vst [vmem:[#allocation0 + $0x8] sm:$0x3] %v3193_v2  ;;  %39 = vst [vmem:[#allocation0] sm:$0x3] %v38_v3  ;;  %v3187_v4 = vld [vmem:[%s8617_s0 + $0xe] sm:$0x3] }
   0x4   :  { %v3188_v5 = vld [vmem:[%s8617_s0 + $0xc] sm:$0x3]  ;;  %v3189_v6 = vld [vmem:[%s8617_s0 + $0xa] sm:$0x3]  ;;  %8 = vst [vmem:[#allocation0 + $0x38] sm:$0x3] %v3187_v4 }
   0x5   :  { %13 = vst [vmem:[#allocation0 + $0x30] sm:$0x3] %v3188_v5  ;;  %18 = vst [vmem:[#allocation0 + $0x28] sm:$0x3] %v3189_v6  ;;  %v3190_v7 = vld [vmem:[%s8617_s0 + $0x8] sm:$0x3] }
   0x6   :  { %23 = vst [vmem:[#allocation0 + $0x20] sm:$0x3] %v3190_v7  ;;  %s4280_s0 = smov 124   ;;  %s4283_s24 = smov 120  }
   0x7   :  { %s4284_s25 = smov 118   ;;  %s4285_s26 = smov 116  }
   0x8   :  { %s4286_s27 = smov 114   ;;  %s4287_s28 = smov 112  }
   0x9   :  { %v145_v8 = vld.sshfl [vmem:[#allocation0 + $0x10] sm:$0xff pattern:$0x98100000]   ;;  %s4288_s29 = smov 110   ;;  %s4289_s30 = smov 108  }
   0xa   :  { %v143_v9 = vld.sshfl [vmem:[#allocation0] sm:$0xff pattern:$0x99999810]   ;;  %s4290_s2 = smov 106   ;;  %s4291_s3 = smov 104  }
   0xb   :  { %v4378_v10 = vsel %vm97_vm0, %v145_v8, %v143_v9  ;;  %s4292_s4 = smov 102   ;;  %s4293_s5 = smov 100   ;;  %v1956_v34 = vld.sshfl [vmem:[#allocation0] sm:$0xff pattern:$0x99999810]  }
   0xc   :  { %v170_v11 = vld.sshfl [vmem:[#allocation0 + $0x30] sm:$0xff pattern:$0x98100000]   ;;  %148 = vrot.lane.b32.xlu1 %v4378_v10, %s4280_s0  ;;  %99 = vrot.lane.b32.xlu0 %v4378_v10, %s4281_s22  ;;  %s4294_s6 = smov 98   ;;  %s4295_s7 = smov 96  }
   0xd   :  { %v168_v12 = vld.sshfl [vmem:[#allocation0 + $0x20] sm:$0xff pattern:$0x99999810]   ;;  %s4296_s8 = smov 94   ;;  %s4297_s9 = smov 92  }
   0xe   :  { %v4383_v13 = vsel %vm97_vm0, %v170_v11, %v168_v12  ;;  %s4298_s10 = smov 90   ;;  %s4299_s11 = smov 88   ;;  %v1981_v30 = vld.sshfl [vmem:[#allocation0 + $0x20] sm:$0xff pattern:$0x99999810]  }
   0xf   :  { %s4300_s12 = smov 86   ;;  %s4301_s13 = smov 84   ;;  %v1983_v31 = vld.sshfl [vmem:[#allocation0 + $0x30] sm:$0xff pattern:$0x98100000]  }
  0x10   :  { %173 = vrot.lane.b32.xlu1 %v4383_v13, %s4280_s0  ;;  %124 = vrot.lane.b32.xlu0 %v4383_v13, %s4281_s22  ;;  %s4302_s14 = smov 82   ;;  %s4303_s15 = smov 80   ;;  %v1958_v35 = vld.sshfl [vmem:[#allocation0 + $0x10] sm:$0xff pattern:$0x98100000]   ;;  %v5036_v36 = vsel %vm97_vm0, %v1983_v31, %v1981_v30 }
  0x11   :  { %s4304_s16 = smov 78   ;;  %s4305_s17 = smov 76   ;;  %v5039_v37 = vsel %vm97_vm0, %v1958_v35, %v1956_v34  ;;  %v2914_v11 = vld.sshfl [vmem:[#allocation0 + $0x30] sm:$0xff pattern:$0x98100000]  }
  0x12   :  { %s4306_s18 = smov 74   ;;  %s4307_s19 = smov 72   ;;  %v81_v30 = vld [vmem:[#allocation0 + $0x30] sm:$0x3]   ;;  %v88_v31 = vld [vmem:[#allocation0 + $0x38] sm:$0x3]  }
  0x13   :  { %s4308_s20 = smov 70   ;;  %s4309_s22 = smov 68   ;;  %3205 = vst.msk [vmem:[%s8618_s1 + $0x280] sm:$0x1] %vm41_vm1, %v81_v30   ;;  %3206 = vst.msk [vmem:[%s8618_s1 + $0x37f] sm:$0x2] %vm41_vm1, %v81_v30  }
  0x14   :  { %222 = vrot.lane.b32.xlu1 %v4383_v13, %s4282_s23  ;;  %197 = vrot.lane.b32.xlu0 %v4378_v10, %s4282_s23  ;;  %3207 = vst.msk [vmem:[%s8618_s1 + $0x2c0] sm:$0x1] %vm41_vm1, %v88_v31   ;;  %3208 = vst.msk [vmem:[%s8618_s1 + $0x3bf] sm:$0x2] %vm41_vm1, %v88_v31  }
  0x18   :  { %271 = vrot.lane.b32.xlu1 %v4383_v13, %s4283_s24  ;;  %246 = vrot.lane.b32.xlu0 %v4378_v10, %s4283_s24 }
  0x1c   :  { %320 = vrot.lane.b32.xlu1 %v4383_v13, %s4284_s25  ;;  %295 = vrot.lane.b32.xlu0 %v4378_v10, %s4284_s25  ;;  %s4310_s25 = smov 66  }
  0x20   :  { %369 = vrot.lane.b32.xlu1 %v4383_v13, %s4285_s26  ;;  %344 = vrot.lane.b32.xlu0 %v4378_v10, %s4285_s26 }
  0x24   :  { %418 = vrot.lane.b32.xlu1 %v4383_v13, %s4286_s27  ;;  %393 = vrot.lane.b32.xlu0 %v4378_v10, %s4286_s27  ;;  %s4340_s27 = smov 6  }
  0x28   :  { %467 = vrot.lane.b32.xlu1 %v4383_v13, %s4287_s28  ;;  %442 = vrot.lane.b32.xlu0 %v4378_v10, %s4287_s28  ;;  %s4311_s28 = smov 64  }
  0x2c   :  { %516 = vrot.lane.b32.xlu1 %v4383_v13, %s4288_s29  ;;  %491 = vrot.lane.b32.xlu0 %v4378_v10, %s4288_s29 }
  0x30   :  { %565 = vrot.lane.b32.xlu1 %v4383_v13, %s4289_s30  ;;  %540 = vrot.lane.b32.xlu0 %v4378_v10, %s4289_s30  ;;  %s4341_s30 = smov 4  }
  0x34   :  { %614 = vrot.lane.b32.xlu1 %v4383_v13, %s4290_s2  ;;  %589 = vrot.lane.b32.xlu0 %v4378_v10, %s4290_s2  ;;  %s4312_s2 = smov 62  }
  0x38   :  { %663 = vrot.lane.b32.xlu1 %v4383_v13, %s4291_s3  ;;  %638 = vrot.lane.b32.xlu0 %v4378_v10, %s4291_s3 }
  0x3c   :  { %712 = vrot.lane.b32.xlu1 %v4383_v13, %s4292_s4  ;;  %687 = vrot.lane.b32.xlu0 %v4378_v10, %s4292_s4  ;;  %s4342_s4 = smov 2  }
  0x40   :  { %761 = vrot.lane.b32.xlu1 %v4383_v13, %s4293_s5  ;;  %736 = vrot.lane.b32.xlu0 %v4378_v10, %s4293_s5  ;;  %s4313_s5 = smov 60  }
  0x44   :  { %810 = vrot.lane.b32.xlu1 %v4383_v13, %s4294_s6  ;;  %785 = vrot.lane.b32.xlu0 %v4378_v10, %s4294_s6 }
  0x48   :  { %859 = vrot.lane.b32.xlu1 %v4383_v13, %s4295_s7  ;;  %834 = vrot.lane.b32.xlu0 %v4378_v10, %s4295_s7 }
  0x4c   :  { %908 = vrot.lane.b32.xlu1 %v4383_v13, %s4296_s8  ;;  %883 = vrot.lane.b32.xlu0 %v4378_v10, %s4296_s8  ;;  %s4314_s8 = smov 58  }
  0x50   :  { %957 = vrot.lane.b32.xlu1 %v4383_v13, %s4297_s9  ;;  %932 = vrot.lane.b32.xlu0 %v4378_v10, %s4297_s9 }
  0x54   :  { %1006 = vrot.lane.b32.xlu1 %v4383_v13, %s4298_s10  ;;  %981 = vrot.lane.b32.xlu0 %v4378_v10, %s4298_s10 }
  0x58   :  { %1055 = vrot.lane.b32.xlu1 %v4383_v13, %s4299_s11  ;;  %1030 = vrot.lane.b32.xlu0 %v4378_v10, %s4299_s11  ;;  %s4315_s11 = smov 56  }
  0x5c   :  { %1104 = vrot.lane.b32.xlu1 %v4383_v13, %s4300_s12  ;;  %1079 = vrot.lane.b32.xlu0 %v4378_v10, %s4300_s12 }
  0x60   :  { %1153 = vrot.lane.b32.xlu1 %v4383_v13, %s4301_s13  ;;  %1128 = vrot.lane.b32.xlu0 %v4378_v10, %s4301_s13 }
  0x64   :  { %1202 = vrot.lane.b32.xlu1 %v4383_v13, %s4302_s14  ;;  %1177 = vrot.lane.b32.xlu0 %v4378_v10, %s4302_s14  ;;  %s4316_s14 = smov 54  }
  0x68   :  { %1251 = vrot.lane.b32.xlu1 %v4383_v13, %s4303_s15  ;;  %1226 = vrot.lane.b32.xlu0 %v4378_v10, %s4303_s15 }
  0x6c   :  { %1300 = vrot.lane.b32.xlu1 %v4383_v13, %s4304_s16  ;;  %1275 = vrot.lane.b32.xlu0 %v4378_v10, %s4304_s16 }
  0x70   :  { %1349 = vrot.lane.b32.xlu1 %v4383_v13, %s4305_s17  ;;  %1324 = vrot.lane.b32.xlu0 %v4378_v10, %s4305_s17  ;;  %s4317_s17 = smov 52  }
  0x74   :  { %1398 = vrot.lane.b32.xlu1 %v4383_v13, %s4306_s18  ;;  %1373 = vrot.lane.b32.xlu0 %v4378_v10, %s4306_s18 }
  0x78   :  { %1447 = vrot.lane.b32.xlu1 %v4383_v13, %s4307_s19  ;;  %1422 = vrot.lane.b32.xlu0 %v4378_v10, %s4307_s19 }
  0x7c   :  { %1496 = vrot.lane.b32.xlu1 %v4383_v13, %s4308_s20  ;;  %1471 = vrot.lane.b32.xlu0 %v4378_v10, %s4308_s20  ;;  %s4318_s20 = smov 50  }
  0x7e   :  { %v149_v14 = vpop.permute.xlu1 %148   ;;  %v100_v15 = vpop.permute.xlu0 %99  }
  0x7f   :  { %3225 = vst.msk [vmem:[%s8618_s1 + $0x2] sm:$0x1] %vm41_vm1, %v149_v14   ;;  %3226 = vst.msk [vmem:[%s8618_s1 + $0x101] sm:$0x2] %vm41_vm1, %v149_v14  }
  0x80   :  { %3227 = vst.msk [vmem:[%s8618_s1 + $0x40] sm:$0x4] %vm41_vm1, %v149_v14   ;;  %3228 = vst.msk [vmem:[%s8618_s1 + $0x13f] sm:$0x8] %vm41_vm1, %v149_v14   ;;  %1545 = vrot.lane.b32.xlu1 %v4383_v13, %s4309_s22  ;;  %1520 = vrot.lane.b32.xlu0 %v4378_v10, %s4309_s22  ;;  %s4319_s22 = smov 48  }
  0x81   :  { %3229 = vst.msk [vmem:[%s8618_s1 + $0x7e] sm:$0x10] %vm41_vm1, %v149_v14   ;;  %3230 = vst.msk [vmem:[%s8618_s1 + $0x17d] sm:$0x20] %vm41_vm1, %v149_v14  }
  0x82   :  { %3231 = vst.msk [vmem:[%s8618_s1 + $0xbc] sm:$0x40] %vm41_vm1, %v149_v14   ;;  %3232 = vst.msk [vmem:[%s8618_s1 + $0x1bb] sm:$0x80] %vm41_vm1, %v149_v14   ;;  %v174_v16 = vpop.permute.xlu1 %173   ;;  %v125_v17 = vpop.permute.xlu0 %124  }
  0x83   :  { %3209 = vst.msk [vmem:[%s8618_s1 + $0x1] sm:$0x1] %vm41_vm1, %v100_v15   ;;  %3210 = vst.msk [vmem:[%s8618_s1 + $0x100] sm:$0x2] %vm41_vm1, %v100_v15  }
  0x84   :  { %3211 = vst.msk [vmem:[%s8618_s1 + $0x3f] sm:$0x4] %vm41_vm1, %v100_v15   ;;  %3212 = vst.msk [vmem:[%s8618_s1 + $0x13e] sm:$0x8] %vm41_vm1, %v100_v15   ;;  %1594 = vrot.lane.b32.xlu1 %v4383_v13, %s4310_s25  ;;  %1569 = vrot.lane.b32.xlu0 %v4378_v10, %s4310_s25  ;;  %s4320_s25 = smov 46  }
  0x85   :  { %3213 = vst.msk [vmem:[%s8618_s1 + $0x7d] sm:$0x10] %vm41_vm1, %v100_v15   ;;  %3214 = vst.msk [vmem:[%s8618_s1 + $0x17c] sm:$0x20] %vm41_vm1, %v100_v15  }
  0x86   :  { %3215 = vst.msk [vmem:[%s8618_s1 + $0xbb] sm:$0x40] %vm41_vm1, %v100_v15   ;;  %3216 = vst.msk [vmem:[%s8618_s1 + $0x1ba] sm:$0x80] %vm41_vm1, %v100_v15   ;;  %v223_v18 = vpop.permute.xlu1 %222   ;;  %v198_v19 = vpop.permute.xlu0 %197  }
  0x87   :  { %3233 = vst.msk [vmem:[%s8618_s1 + $0x202] sm:$0x1] %vm41_vm1, %v174_v16   ;;  %3234 = vst.msk [vmem:[%s8618_s1 + $0x301] sm:$0x2] %vm41_vm1, %v174_v16  }
  0x88   :  { %3235 = vst.msk [vmem:[%s8618_s1 + $0x240] sm:$0x4] %vm41_vm1, %v174_v16   ;;  %3236 = vst.msk [vmem:[%s8618_s1 + $0x33f] sm:$0x8] %vm41_vm1, %v174_v16   ;;  %1643 = vrot.lane.b32.xlu1 %v4383_v13, %s4311_s28  ;;  %1618 = vrot.lane.b32.xlu0 %v4378_v10, %s4311_s28  ;;  %s4321_s28 = smov 44  }
  0x89   :  { %3237 = vst.msk [vmem:[%s8618_s1 + $0x27e] sm:$0x10] %vm41_vm1, %v174_v16   ;;  %3238 = vst.msk [vmem:[%s8618_s1 + $0x37d] sm:$0x20] %vm41_vm1, %v174_v16  }
  0x8a   :  { %3239 = vst.msk [vmem:[%s8618_s1 + $0x2bc] sm:$0x40] %vm41_vm1, %v174_v16   ;;  %3240 = vst.msk [vmem:[%s8618_s1 + $0x3bb] sm:$0x80] %vm41_vm1, %v174_v16   ;;  %v272_v20 = vpop.permute.xlu1 %271   ;;  %v247_v21 = vpop.permute.xlu0 %246  }
  0x8b   :  { %3217 = vst.msk [vmem:[%s8618_s1 + $0x201] sm:$0x1] %vm41_vm1, %v125_v17   ;;  %3218 = vst.msk [vmem:[%s8618_s1 + $0x300] sm:$0x2] %vm41_vm1, %v125_v17  }
  0x8c   :  { %3219 = vst.msk [vmem:[%s8618_s1 + $0x23f] sm:$0x4] %vm41_vm1, %v125_v17   ;;  %3220 = vst.msk [vmem:[%s8618_s1 + $0x33e] sm:$0x8] %vm41_vm1, %v125_v17   ;;  %1692 = vrot.lane.b32.xlu1 %v4383_v13, %s4312_s2  ;;  %1667 = vrot.lane.b32.xlu0 %v4378_v10, %s4312_s2  ;;  %s4322_s2 = smov 42  }
  0x8d   :  { %3221 = vst.msk [vmem:[%s8618_s1 + $0x27d] sm:$0x10] %vm41_vm1, %v125_v17   ;;  %3222 = vst.msk [vmem:[%s8618_s1 + $0x37c] sm:$0x20] %vm41_vm1, %v125_v17  }
  0x8e   :  { %3223 = vst.msk [vmem:[%s8618_s1 + $0x2bb] sm:$0x40] %vm41_vm1, %v125_v17   ;;  %3224 = vst.msk [vmem:[%s8618_s1 + $0x3ba] sm:$0x80] %vm41_vm1, %v125_v17   ;;  %v321_v22 = vpop.permute.xlu1 %320   ;;  %v296_v23 = vpop.permute.xlu0 %295  }
  0x8f   :  { %3249 = vst.msk [vmem:[%s8618_s1 + $0x203] sm:$0x1] %vm41_vm1, %v223_v18   ;;  %3250 = vst.msk [vmem:[%s8618_s1 + $0x302] sm:$0x2] %vm41_vm1, %v223_v18  }
  0x90   :  { %3251 = vst.msk [vmem:[%s8618_s1 + $0x241] sm:$0x4] %vm41_vm1, %v223_v18   ;;  %3252 = vst.msk [vmem:[%s8618_s1 + $0x340] sm:$0x8] %vm41_vm1, %v223_v18   ;;  %1741 = vrot.lane.b32.xlu1 %v4383_v13, %s4313_s5  ;;  %1716 = vrot.lane.b32.xlu0 %v4378_v10, %s4313_s5  ;;  %s4323_s5 = smov 40  }
  0x91   :  { %3253 = vst.msk [vmem:[%s8618_s1 + $0x27f] sm:$0x10] %vm41_vm1, %v223_v18   ;;  %3254 = vst.msk [vmem:[%s8618_s1 + $0x37e] sm:$0x20] %vm41_vm1, %v223_v18  }
  0x92   :  { %3255 = vst.msk [vmem:[%s8618_s1 + $0x2bd] sm:$0x40] %vm41_vm1, %v223_v18   ;;  %3256 = vst.msk [vmem:[%s8618_s1 + $0x3bc] sm:$0x80] %vm41_vm1, %v223_v18   ;;  %v370_v24 = vpop.permute.xlu1 %369   ;;  %v345_v25 = vpop.permute.xlu0 %344  }
  0x93   :  { %3241 = vst.msk [vmem:[%s8618_s1 + $0x3] sm:$0x1] %vm41_vm1, %v198_v19   ;;  %3242 = vst.msk [vmem:[%s8618_s1 + $0x102] sm:$0x2] %vm41_vm1, %v198_v19  }
  0x94   :  { %3243 = vst.msk [vmem:[%s8618_s1 + $0x41] sm:$0x4] %vm41_vm1, %v198_v19   ;;  %3244 = vst.msk [vmem:[%s8618_s1 + $0x140] sm:$0x8] %vm41_vm1, %v198_v19   ;;  %1790 = vrot.lane.b32.xlu1 %v4383_v13, %s4314_s8  ;;  %1765 = vrot.lane.b32.xlu0 %v4378_v10, %s4314_s8  ;;  %s4324_s8 = smov 38  }
  0x95   :  { %3245 = vst.msk [vmem:[%s8618_s1 + $0x7f] sm:$0x10] %vm41_vm1, %v198_v19   ;;  %3246 = vst.msk [vmem:[%s8618_s1 + $0x17e] sm:$0x20] %vm41_vm1, %v198_v19  }
  0x96   :  { %3247 = vst.msk [vmem:[%s8618_s1 + $0xbd] sm:$0x40] %vm41_vm1, %v198_v19   ;;  %3248 = vst.msk [vmem:[%s8618_s1 + $0x1bc] sm:$0x80] %vm41_vm1, %v198_v19   ;;  %v419_v26 = vpop.permute.xlu1 %418   ;;  %v394_v27 = vpop.permute.xlu0 %393  }
  0x97   :  { %3265 = vst.msk [vmem:[%s8618_s1 + $0x204] sm:$0x1] %vm41_vm1, %v272_v20   ;;  %3266 = vst.msk [vmem:[%s8618_s1 + $0x303] sm:$0x2] %vm41_vm1, %v272_v20  }
  0x98   :  { %3267 = vst.msk [vmem:[%s8618_s1 + $0x242] sm:$0x4] %vm41_vm1, %v272_v20   ;;  %3268 = vst.msk [vmem:[%s8618_s1 + $0x341] sm:$0x8] %vm41_vm1, %v272_v20   ;;  %1839 = vrot.lane.b32.xlu1 %v4383_v13, %s4315_s11  ;;  %1814 = vrot.lane.b32.xlu0 %v4378_v10, %s4315_s11  ;;  %s4325_s11 = smov 36  }
  0x99   :  { %3269 = vst.msk [vmem:[%s8618_s1 + $0x280] sm:$0x10] %vm41_vm1, %v272_v20   ;;  %3270 = vst.msk [vmem:[%s8618_s1 + $0x37f] sm:$0x20] %vm41_vm1, %v272_v20  }
  0x9a   :  { %3271 = vst.msk [vmem:[%s8618_s1 + $0x2be] sm:$0x40] %vm41_vm1, %v272_v20   ;;  %3272 = vst.msk [vmem:[%s8618_s1 + $0x3bd] sm:$0x80] %vm41_vm1, %v272_v20   ;;  %v468_v28 = vpop.permute.xlu1 %467   ;;  %v443_v29 = vpop.permute.xlu0 %442  }
  0x9b   :  { %3257 = vst.msk [vmem:[%s8618_s1 + $0x4] sm:$0x1] %vm41_vm1, %v247_v21   ;;  %3258 = vst.msk [vmem:[%s8618_s1 + $0x103] sm:$0x2] %vm41_vm1, %v247_v21  }
  0x9c   :  { %3259 = vst.msk [vmem:[%s8618_s1 + $0x42] sm:$0x4] %vm41_vm1, %v247_v21   ;;  %3260 = vst.msk [vmem:[%s8618_s1 + $0x141] sm:$0x8] %vm41_vm1, %v247_v21   ;;  %1888 = vrot.lane.b32.xlu1 %v4383_v13, %s4316_s14  ;;  %1863 = vrot.lane.b32.xlu0 %v4378_v10, %s4316_s14  ;;  %s4326_s14 = smov 34  }
  0x9d   :  { %3261 = vst.msk [vmem:[%s8618_s1 + $0x80] sm:$0x10] %vm41_vm1, %v247_v21   ;;  %3262 = vst.msk [vmem:[%s8618_s1 + $0x17f] sm:$0x20] %vm41_vm1, %v247_v21  }
  0x9e   :  { %3263 = vst.msk [vmem:[%s8618_s1 + $0xbe] sm:$0x40] %vm41_vm1, %v247_v21   ;;  %3264 = vst.msk [vmem:[%s8618_s1 + $0x1bd] sm:$0x80] %vm41_vm1, %v247_v21   ;;  %v517_v32 = vpop.permute.xlu1 %516   ;;  %v492_v33 = vpop.permute.xlu0 %491  }
  0x9f   :  { %3281 = vst.msk [vmem:[%s8618_s1 + $0x205] sm:$0x1] %vm41_vm1, %v321_v22   ;;  %3282 = vst.msk [vmem:[%s8618_s1 + $0x304] sm:$0x2] %vm41_vm1, %v321_v22  }
  0xa0   :  { %3283 = vst.msk [vmem:[%s8618_s1 + $0x243] sm:$0x4] %vm41_vm1, %v321_v22   ;;  %3284 = vst.msk [vmem:[%s8618_s1 + $0x342] sm:$0x8] %vm41_vm1, %v321_v22   ;;  %1937 = vrot.lane.b32.xlu1 %v4383_v13, %s4317_s17  ;;  %1912 = vrot.lane.b32.xlu0 %v4378_v10, %s4317_s17  ;;  %s4327_s17 = smov 32  }
  0xa1   :  { %3285 = vst.msk [vmem:[%s8618_s1 + $0x281] sm:$0x10] %vm41_vm1, %v321_v22   ;;  %3286 = vst.msk [vmem:[%s8618_s1 + $0x380] sm:$0x20] %vm41_vm1, %v321_v22  }
  0xa2   :  { %3287 = vst.msk [vmem:[%s8618_s1 + $0x2bf] sm:$0x40] %vm41_vm1, %v321_v22   ;;  %3288 = vst.msk [vmem:[%s8618_s1 + $0x3be] sm:$0x80] %vm41_vm1, %v321_v22   ;;  %v566_v38 = vpop.permute.xlu1 %565   ;;  %v541_v39 = vpop.permute.xlu0 %540  }
  0xa3   :  { %3273 = vst.msk [vmem:[%s8618_s1 + $0x5] sm:$0x1] %vm41_vm1, %v296_v23   ;;  %3274 = vst.msk [vmem:[%s8618_s1 + $0x104] sm:$0x2] %vm41_vm1, %v296_v23  }
  0xa4   :  { %3275 = vst.msk [vmem:[%s8618_s1 + $0x43] sm:$0x4] %vm41_vm1, %v296_v23   ;;  %3276 = vst.msk [vmem:[%s8618_s1 + $0x142] sm:$0x8] %vm41_vm1, %v296_v23   ;;  %1986 = vrot.lane.b32.xlu1 %v5036_v36, %s4318_s20  ;;  %1961 = vrot.lane.b32.xlu0 %v5039_v37, %s4318_s20  ;;  %s4328_s20 = smov 30  }
  0xa5   :  { %3277 = vst.msk [vmem:[%s8618_s1 + $0x81] sm:$0x10] %vm41_vm1, %v296_v23   ;;  %3278 = vst.msk [vmem:[%s8618_s1 + $0x180] sm:$0x20] %vm41_vm1, %v296_v23  }
  0xa6   :  { %3279 = vst.msk [vmem:[%s8618_s1 + $0xbf] sm:$0x40] %vm41_vm1, %v296_v23   ;;  %3280 = vst.msk [vmem:[%s8618_s1 + $0x1be] sm:$0x80] %vm41_vm1, %v296_v23   ;;  %v615_v40 = vpop.permute.xlu1 %614   ;;  %v590_v41 = vpop.permute.xlu0 %589  }
  0xa7   :  { %3297 = vst.msk [vmem:[%s8618_s1 + $0x206] sm:$0x1] %vm41_vm1, %v370_v24   ;;  %3298 = vst.msk [vmem:[%s8618_s1 + $0x305] sm:$0x2] %vm41_vm1, %v370_v24  }
  0xa8   :  { %3299 = vst.msk [vmem:[%s8618_s1 + $0x244] sm:$0x4] %vm41_vm1, %v370_v24   ;;  %3300 = vst.msk [vmem:[%s8618_s1 + $0x343] sm:$0x8] %vm41_vm1, %v370_v24   ;;  %2035 = vrot.lane.b32.xlu1 %v5036_v36, %s4319_s22  ;;  %2010 = vrot.lane.b32.xlu0 %v5039_v37, %s4319_s22  ;;  %s4329_s22 = smov 28  }
  0xa9   :  { %3301 = vst.msk [vmem:[%s8618_s1 + $0x282] sm:$0x10] %vm41_vm1, %v370_v24   ;;  %3302 = vst.msk [vmem:[%s8618_s1 + $0x381] sm:$0x20] %vm41_vm1, %v370_v24  }
  0xaa   :  { %3303 = vst.msk [vmem:[%s8618_s1 + $0x2c0] sm:$0x40] %vm41_vm1, %v370_v24   ;;  %3304 = vst.msk [vmem:[%s8618_s1 + $0x3bf] sm:$0x80] %vm41_vm1, %v370_v24   ;;  %v664_v42 = vpop.permute.xlu1 %663   ;;  %v639_v43 = vpop.permute.xlu0 %638   ;;  %v40_v24 = vld [vmem:[#allocation0] sm:$0x3]  }
  0xab   :  { %3289 = vst.msk [vmem:[%s8618_s1 + $0x6] sm:$0x1] %vm41_vm1, %v345_v25   ;;  %3290 = vst.msk [vmem:[%s8618_s1 + $0x105] sm:$0x2] %vm41_vm1, %v345_v25  }
  0xac   :  { %3291 = vst.msk [vmem:[%s8618_s1 + $0x44] sm:$0x4] %vm41_vm1, %v345_v25   ;;  %3292 = vst.msk [vmem:[%s8618_s1 + $0x143] sm:$0x8] %vm41_vm1, %v345_v25   ;;  %2084 = vrot.lane.b32.xlu1 %v5036_v36, %s4320_s25  ;;  %2059 = vrot.lane.b32.xlu0 %v5039_v37, %s4320_s25  ;;  %s4330_s25 = smov 26  }
  0xad   :  { %3293 = vst.msk [vmem:[%s8618_s1 + $0x82] sm:$0x10] %vm41_vm1, %v345_v25   ;;  %3294 = vst.msk [vmem:[%s8618_s1 + $0x181] sm:$0x20] %vm41_vm1, %v345_v25  }
  0xae   :  { %3295 = vst.msk [vmem:[%s8618_s1 + $0xc0] sm:$0x40] %vm41_vm1, %v345_v25   ;;  %3296 = vst.msk [vmem:[%s8618_s1 + $0x1bf] sm:$0x80] %vm41_vm1, %v345_v25   ;;  %v713_v44 = vpop.permute.xlu1 %712   ;;  %v688_v45 = vpop.permute.xlu0 %687   ;;  %v46_v25 = vld [vmem:[#allocation0 + $0x8] sm:$0x3]  }
  0xaf   :  { %3313 = vst.msk [vmem:[%s8618_s1 + $0x207] sm:$0x1] %vm41_vm1, %v419_v26   ;;  %3314 = vst.msk [vmem:[%s8618_s1 + $0x306] sm:$0x2] %vm41_vm1, %v419_v26  }
  0xb0   :  { %3315 = vst.msk [vmem:[%s8618_s1 + $0x245] sm:$0x4] %vm41_vm1, %v419_v26   ;;  %3316 = vst.msk [vmem:[%s8618_s1 + $0x344] sm:$0x8] %vm41_vm1, %v419_v26   ;;  %2133 = vrot.lane.b32.xlu1 %v5036_v36, %s4321_s28  ;;  %2108 = vrot.lane.b32.xlu0 %v5039_v37, %s4321_s28  ;;  %s4331_s28 = smov 24  }
  0xb1   :  { %3317 = vst.msk [vmem:[%s8618_s1 + $0x283] sm:$0x10] %vm41_vm1, %v419_v26   ;;  %3318 = vst.msk [vmem:[%s8618_s1 + $0x382] sm:$0x20] %vm41_vm1, %v419_v26  }
  0xb2   :  { %3319 = vst.msk [vmem:[%s8618_s1 + $0x2c1] sm:$0x40] %vm41_vm1, %v419_v26   ;;  %3320 = vst.msk [vmem:[%s8618_s1 + $0x3c0] sm:$0x80] %vm41_vm1, %v419_v26   ;;  %v762_v46 = vpop.permute.xlu1 %761   ;;  %v737_v47 = vpop.permute.xlu0 %736   ;;  %v53_v26 = vld [vmem:[#allocation0 + $0x10] sm:$0x3]  }
  0xb3   :  { %3305 = vst.msk [vmem:[%s8618_s1 + $0x7] sm:$0x1] %vm41_vm1, %v394_v27   ;;  %3306 = vst.msk [vmem:[%s8618_s1 + $0x106] sm:$0x2] %vm41_vm1, %v394_v27  }
  0xb4   :  { %3307 = vst.msk [vmem:[%s8618_s1 + $0x45] sm:$0x4] %vm41_vm1, %v394_v27   ;;  %3308 = vst.msk [vmem:[%s8618_s1 + $0x144] sm:$0x8] %vm41_vm1, %v394_v27   ;;  %2182 = vrot.lane.b32.xlu1 %v5036_v36, %s4322_s2  ;;  %2157 = vrot.lane.b32.xlu0 %v5039_v37, %s4322_s2  ;;  %s4332_s2 = smov 22  }
  0xb5   :  { %3309 = vst.msk [vmem:[%s8618_s1 + $0x83] sm:$0x10] %vm41_vm1, %v394_v27   ;;  %3310 = vst.msk [vmem:[%s8618_s1 + $0x182] sm:$0x20] %vm41_vm1, %v394_v27  }
  0xb6   :  { %3311 = vst.msk [vmem:[%s8618_s1 + $0xc1] sm:$0x40] %vm41_vm1, %v394_v27   ;;  %3312 = vst.msk [vmem:[%s8618_s1 + $0x1c0] sm:$0x80] %vm41_vm1, %v394_v27   ;;  %v811_v48 = vpop.permute.xlu1 %810   ;;  %v786_v49 = vpop.permute.xlu0 %785   ;;  %v60_v27 = vld [vmem:[#allocation0 + $0x18] sm:$0x3]  }
  0xb7   :  { %3329 = vst.msk [vmem:[%s8618_s1 + $0x208] sm:$0x1] %vm41_vm1, %v468_v28   ;;  %3330 = vst.msk [vmem:[%s8618_s1 + $0x307] sm:$0x2] %vm41_vm1, %v468_v28  }
  0xb8   :  { %3331 = vst.msk [vmem:[%s8618_s1 + $0x246] sm:$0x4] %vm41_vm1, %v468_v28   ;;  %3332 = vst.msk [vmem:[%s8618_s1 + $0x345] sm:$0x8] %vm41_vm1, %v468_v28   ;;  %2231 = vrot.lane.b32.xlu1 %v5036_v36, %s4323_s5  ;;  %2206 = vrot.lane.b32.xlu0 %v5039_v37, %s4323_s5  ;;  %s4333_s5 = smov 20  }
  0xb9   :  { %3333 = vst.msk [vmem:[%s8618_s1 + $0x284] sm:$0x10] %vm41_vm1, %v468_v28   ;;  %3334 = vst.msk [vmem:[%s8618_s1 + $0x383] sm:$0x20] %vm41_vm1, %v468_v28  }
  0xba   :  { %3335 = vst.msk [vmem:[%s8618_s1 + $0x2c2] sm:$0x40] %vm41_vm1, %v468_v28   ;;  %3336 = vst.msk [vmem:[%s8618_s1 + $0x3c1] sm:$0x80] %vm41_vm1, %v468_v28   ;;  %v860_v50 = vpop.permute.xlu1 %859   ;;  %v835_v51 = vpop.permute.xlu0 %834   ;;  %v67_v28 = vld [vmem:[#allocation0 + $0x20] sm:$0x3]  }
  0xbb   :  { %3321 = vst.msk [vmem:[%s8618_s1 + $0x8] sm:$0x1] %vm41_vm1, %v443_v29   ;;  %3322 = vst.msk [vmem:[%s8618_s1 + $0x107] sm:$0x2] %vm41_vm1, %v443_v29  }
  0xbc   :  { %3323 = vst.msk [vmem:[%s8618_s1 + $0x46] sm:$0x4] %vm41_vm1, %v443_v29   ;;  %3324 = vst.msk [vmem:[%s8618_s1 + $0x145] sm:$0x8] %vm41_vm1, %v443_v29   ;;  %2280 = vrot.lane.b32.xlu1 %v5036_v36, %s4324_s8  ;;  %2255 = vrot.lane.b32.xlu0 %v5039_v37, %s4324_s8  ;;  %s4334_s8 = smov 18  }
  0xbd   :  { %3325 = vst.msk [vmem:[%s8618_s1 + $0x84] sm:$0x10] %vm41_vm1, %v443_v29   ;;  %3326 = vst.msk [vmem:[%s8618_s1 + $0x183] sm:$0x20] %vm41_vm1, %v443_v29  }
  0xbe   :  { %3327 = vst.msk [vmem:[%s8618_s1 + $0xc2] sm:$0x40] %vm41_vm1, %v443_v29   ;;  %3328 = vst.msk [vmem:[%s8618_s1 + $0x1c1] sm:$0x80] %vm41_vm1, %v443_v29   ;;  %v909_v52 = vpop.permute.xlu1 %908   ;;  %v884_v53 = vpop.permute.xlu0 %883   ;;  %v74_v29 = vld [vmem:[#allocation0 + $0x28] sm:$0x3]  }
  0xbf   :  { %3345 = vst.msk [vmem:[%s8618_s1 + $0x209] sm:$0x1] %vm41_vm1, %v517_v32   ;;  %3346 = vst.msk [vmem:[%s8618_s1 + $0x308] sm:$0x2] %vm41_vm1, %v517_v32  }
  0xc0   :  { %3347 = vst.msk [vmem:[%s8618_s1 + $0x247] sm:$0x4] %vm41_vm1, %v517_v32   ;;  %3348 = vst.msk [vmem:[%s8618_s1 + $0x346] sm:$0x8] %vm41_vm1, %v517_v32   ;;  %2329 = vrot.lane.b32.xlu1 %v5036_v36, %s4325_s11  ;;  %2304 = vrot.lane.b32.xlu0 %v5039_v37, %s4325_s11  ;;  %s4335_s11 = smov 16  }
  0xc1   :  { %3349 = vst.msk [vmem:[%s8618_s1 + $0x285] sm:$0x10] %vm41_vm1, %v517_v32   ;;  %3350 = vst.msk [vmem:[%s8618_s1 + $0x384] sm:$0x20] %vm41_vm1, %v517_v32  }
  0xc2   :  { %3351 = vst.msk [vmem:[%s8618_s1 + $0x2c3] sm:$0x40] %vm41_vm1, %v517_v32   ;;  %3352 = vst.msk [vmem:[%s8618_s1 + $0x3c2] sm:$0x80] %vm41_vm1, %v517_v32   ;;  %v958_v54 = vpop.permute.xlu1 %957   ;;  %v933_v55 = vpop.permute.xlu0 %932  }
  0xc3   :  { %3337 = vst.msk [vmem:[%s8618_s1 + $0x9] sm:$0x1] %vm41_vm1, %v492_v33   ;;  %3338 = vst.msk [vmem:[%s8618_s1 + $0x108] sm:$0x2] %vm41_vm1, %v492_v33  }
  0xc4   :  { %3339 = vst.msk [vmem:[%s8618_s1 + $0x47] sm:$0x4] %vm41_vm1, %v492_v33   ;;  %3340 = vst.msk [vmem:[%s8618_s1 + $0x146] sm:$0x8] %vm41_vm1, %v492_v33   ;;  %2378 = vrot.lane.b32.xlu1 %v5036_v36, %s4326_s14  ;;  %2353 = vrot.lane.b32.xlu0 %v5039_v37, %s4326_s14  ;;  %s4336_s14 = smov 14  }
  0xc5   :  { %3341 = vst.msk [vmem:[%s8618_s1 + $0x85] sm:$0x10] %vm41_vm1, %v492_v33   ;;  %3342 = vst.msk [vmem:[%s8618_s1 + $0x184] sm:$0x20] %vm41_vm1, %v492_v33  }
  0xc6   :  { %3343 = vst.msk [vmem:[%s8618_s1 + $0xc3] sm:$0x40] %vm41_vm1, %v492_v33   ;;  %3344 = vst.msk [vmem:[%s8618_s1 + $0x1c2] sm:$0x80] %vm41_vm1, %v492_v33   ;;  %v1007_v56 = vpop.permute.xlu1 %1006   ;;  %v982_v57 = vpop.permute.xlu0 %981  }
  0xc7   :  { %3361 = vst.msk [vmem:[%s8618_s1 + $0x20a] sm:$0x1] %vm41_vm1, %v566_v38   ;;  %3362 = vst.msk [vmem:[%s8618_s1 + $0x309] sm:$0x2] %vm41_vm1, %v566_v38  }
  0xc8   :  { %3363 = vst.msk [vmem:[%s8618_s1 + $0x248] sm:$0x4] %vm41_vm1, %v566_v38   ;;  %3364 = vst.msk [vmem:[%s8618_s1 + $0x347] sm:$0x8] %vm41_vm1, %v566_v38   ;;  %2427 = vrot.lane.b32.xlu1 %v5036_v36, %s4327_s17  ;;  %2402 = vrot.lane.b32.xlu0 %v5039_v37, %s4327_s17  ;;  %s4337_s17 = smov 12  }
  0xc9   :  { %3365 = vst.msk [vmem:[%s8618_s1 + $0x286] sm:$0x10] %vm41_vm1, %v566_v38   ;;  %3366 = vst.msk [vmem:[%s8618_s1 + $0x385] sm:$0x20] %vm41_vm1, %v566_v38  }
  0xca   :  { %3367 = vst.msk [vmem:[%s8618_s1 + $0x2c4] sm:$0x40] %vm41_vm1, %v566_v38   ;;  %3368 = vst.msk [vmem:[%s8618_s1 + $0x3c3] sm:$0x80] %vm41_vm1, %v566_v38   ;;  %v1056_v58 = vpop.permute.xlu1 %1055   ;;  %v1031_v59 = vpop.permute.xlu0 %1030  }
  0xcb   :  { %3353 = vst.msk [vmem:[%s8618_s1 + $0xa] sm:$0x1] %vm41_vm1, %v541_v39   ;;  %3354 = vst.msk [vmem:[%s8618_s1 + $0x109] sm:$0x2] %vm41_vm1, %v541_v39  }
  0xcc   :  { %3355 = vst.msk [vmem:[%s8618_s1 + $0x48] sm:$0x4] %vm41_vm1, %v541_v39   ;;  %3356 = vst.msk [vmem:[%s8618_s1 + $0x147] sm:$0x8] %vm41_vm1, %v541_v39   ;;  %2476 = vrot.lane.b32.xlu1 %v5036_v36, %s4328_s20  ;;  %2451 = vrot.lane.b32.xlu0 %v5039_v37, %s4328_s20  ;;  %s4338_s20 = smov 10  }
  0xcd   :  { %3357 = vst.msk [vmem:[%s8618_s1 + $0x86] sm:$0x10] %vm41_vm1, %v541_v39   ;;  %3358 = vst.msk [vmem:[%s8618_s1 + $0x185] sm:$0x20] %vm41_vm1, %v541_v39  }
  0xce   :  { %3359 = vst.msk [vmem:[%s8618_s1 + $0xc4] sm:$0x40] %vm41_vm1, %v541_v39   ;;  %3360 = vst.msk [vmem:[%s8618_s1 + $0x1c3] sm:$0x80] %vm41_vm1, %v541_v39   ;;  %v1105_v60 = vpop.permute.xlu1 %1104   ;;  %v1080_v61 = vpop.permute.xlu0 %1079  }
  0xcf   :  { %3377 = vst.msk [vmem:[%s8618_s1 + $0x20b] sm:$0x1] %vm41_vm1, %v615_v40   ;;  %3378 = vst.msk [vmem:[%s8618_s1 + $0x30a] sm:$0x2] %vm41_vm1, %v615_v40  }
  0xd0   :  { %3379 = vst.msk [vmem:[%s8618_s1 + $0x249] sm:$0x4] %vm41_vm1, %v615_v40   ;;  %3380 = vst.msk [vmem:[%s8618_s1 + $0x348] sm:$0x8] %vm41_vm1, %v615_v40   ;;  %2525 = vrot.lane.b32.xlu1 %v5036_v36, %s4329_s22  ;;  %2500 = vrot.lane.b32.xlu0 %v5039_v37, %s4329_s22 }
  0xd1   :  { %3381 = vst.msk [vmem:[%s8618_s1 + $0x287] sm:$0x10] %vm41_vm1, %v615_v40   ;;  %3382 = vst.msk [vmem:[%s8618_s1 + $0x386] sm:$0x20] %vm41_vm1, %v615_v40  }
  0xd2   :  { %3383 = vst.msk [vmem:[%s8618_s1 + $0x2c5] sm:$0x40] %vm41_vm1, %v615_v40   ;;  %3384 = vst.msk [vmem:[%s8618_s1 + $0x3c4] sm:$0x80] %vm41_vm1, %v615_v40   ;;  %v1154_v62 = vpop.permute.xlu1 %1153   ;;  %v1129_v63 = vpop.permute.xlu0 %1128  }
  0xd3   :  { %3369 = vst.msk [vmem:[%s8618_s1 + $0xb] sm:$0x1] %vm41_vm1, %v590_v41   ;;  %3370 = vst.msk [vmem:[%s8618_s1 + $0x10a] sm:$0x2] %vm41_vm1, %v590_v41  }
  0xd4   :  { %3371 = vst.msk [vmem:[%s8618_s1 + $0x49] sm:$0x4] %vm41_vm1, %v590_v41   ;;  %3372 = vst.msk [vmem:[%s8618_s1 + $0x148] sm:$0x8] %vm41_vm1, %v590_v41   ;;  %2574 = vrot.lane.b32.xlu1 %v5036_v36, %s4330_s25  ;;  %2549 = vrot.lane.b32.xlu0 %v5039_v37, %s4330_s25 }
  0xd5   :  { %3373 = vst.msk [vmem:[%s8618_s1 + $0x87] sm:$0x10] %vm41_vm1, %v590_v41   ;;  %3374 = vst.msk [vmem:[%s8618_s1 + $0x186] sm:$0x20] %vm41_vm1, %v590_v41  }
  0xd6   :  { %3375 = vst.msk [vmem:[%s8618_s1 + $0xc5] sm:$0x40] %vm41_vm1, %v590_v41   ;;  %3376 = vst.msk [vmem:[%s8618_s1 + $0x1c4] sm:$0x80] %vm41_vm1, %v590_v41   ;;  %v1203_v0 = vpop.permute.xlu1 %1202   ;;  %v1178_v1 = vpop.permute.xlu0 %1177  }
  0xd7   :  { %3393 = vst.msk [vmem:[%s8618_s1 + $0x20c] sm:$0x1] %vm41_vm1, %v664_v42   ;;  %3394 = vst.msk [vmem:[%s8618_s1 + $0x30b] sm:$0x2] %vm41_vm1, %v664_v42  }
  0xd8   :  { %3395 = vst.msk [vmem:[%s8618_s1 + $0x24a] sm:$0x4] %vm41_vm1, %v664_v42   ;;  %3396 = vst.msk [vmem:[%s8618_s1 + $0x349] sm:$0x8] %vm41_vm1, %v664_v42   ;;  %2623 = vrot.lane.b32.xlu1 %v5036_v36, %s4331_s28  ;;  %2598 = vrot.lane.b32.xlu0 %v5039_v37, %s4331_s28 }
  0xd9   :  { %3397 = vst.msk [vmem:[%s8618_s1 + $0x288] sm:$0x10] %vm41_vm1, %v664_v42   ;;  %3398 = vst.msk [vmem:[%s8618_s1 + $0x387] sm:$0x20] %vm41_vm1, %v664_v42  }
  0xda   :  { %3399 = vst.msk [vmem:[%s8618_s1 + $0x2c6] sm:$0x40] %vm41_vm1, %v664_v42   ;;  %3400 = vst.msk [vmem:[%s8618_s1 + $0x3c5] sm:$0x80] %vm41_vm1, %v664_v42   ;;  %v1252_v2 = vpop.permute.xlu1 %1251   ;;  %v1227_v3 = vpop.permute.xlu0 %1226  }
  0xdb   :  { %3385 = vst.msk [vmem:[%s8618_s1 + $0xc] sm:$0x1] %vm41_vm1, %v639_v43   ;;  %3386 = vst.msk [vmem:[%s8618_s1 + $0x10b] sm:$0x2] %vm41_vm1, %v639_v43  }
  0xdc   :  { %3387 = vst.msk [vmem:[%s8618_s1 + $0x4a] sm:$0x4] %vm41_vm1, %v639_v43   ;;  %3388 = vst.msk [vmem:[%s8618_s1 + $0x149] sm:$0x8] %vm41_vm1, %v639_v43   ;;  %2672 = vrot.lane.b32.xlu1 %v5036_v36, %s4332_s2  ;;  %2647 = vrot.lane.b32.xlu0 %v5039_v37, %s4332_s2 }
  0xdd   :  { %3389 = vst.msk [vmem:[%s8618_s1 + $0x88] sm:$0x10] %vm41_vm1, %v639_v43   ;;  %3390 = vst.msk [vmem:[%s8618_s1 + $0x187] sm:$0x20] %vm41_vm1, %v639_v43  }
  0xde   :  { %3391 = vst.msk [vmem:[%s8618_s1 + $0xc6] sm:$0x40] %vm41_vm1, %v639_v43   ;;  %3392 = vst.msk [vmem:[%s8618_s1 + $0x1c5] sm:$0x80] %vm41_vm1, %v639_v43   ;;  %v1301_v4 = vpop.permute.xlu1 %1300   ;;  %v1276_v5 = vpop.permute.xlu0 %1275  }
  0xdf   :  { %3409 = vst.msk [vmem:[%s8618_s1 + $0x20d] sm:$0x1] %vm41_vm1, %v713_v44   ;;  %3410 = vst.msk [vmem:[%s8618_s1 + $0x30c] sm:$0x2] %vm41_vm1, %v713_v44  }
  0xe0   :  { %3411 = vst.msk [vmem:[%s8618_s1 + $0x24b] sm:$0x4] %vm41_vm1, %v713_v44   ;;  %3412 = vst.msk [vmem:[%s8618_s1 + $0x34a] sm:$0x8] %vm41_vm1, %v713_v44   ;;  %2721 = vrot.lane.b32.xlu1 %v5036_v36, %s4333_s5  ;;  %2696 = vrot.lane.b32.xlu0 %v5039_v37, %s4333_s5  ;;  %s4339_s5 = smov 8  }
  0xe1   :  { %3413 = vst.msk [vmem:[%s8618_s1 + $0x289] sm:$0x10] %vm41_vm1, %v713_v44   ;;  %3414 = vst.msk [vmem:[%s8618_s1 + $0x388] sm:$0x20] %vm41_vm1, %v713_v44  }
  0xe2   :  { %3415 = vst.msk [vmem:[%s8618_s1 + $0x2c7] sm:$0x40] %vm41_vm1, %v713_v44   ;;  %3416 = vst.msk [vmem:[%s8618_s1 + $0x3c6] sm:$0x80] %vm41_vm1, %v713_v44   ;;  %v1350_v6 = vpop.permute.xlu1 %1349   ;;  %v1325_v7 = vpop.permute.xlu0 %1324  }
  0xe3   :  { %3401 = vst.msk [vmem:[%s8618_s1 + $0xd] sm:$0x1] %vm41_vm1, %v688_v45   ;;  %3402 = vst.msk [vmem:[%s8618_s1 + $0x10c] sm:$0x2] %vm41_vm1, %v688_v45  }
  0xe4   :  { %3403 = vst.msk [vmem:[%s8618_s1 + $0x4b] sm:$0x4] %vm41_vm1, %v688_v45   ;;  %3404 = vst.msk [vmem:[%s8618_s1 + $0x14a] sm:$0x8] %vm41_vm1, %v688_v45   ;;  %2770 = vrot.lane.b32.xlu1 %v5036_v36, %s4334_s8  ;;  %2745 = vrot.lane.b32.xlu0 %v5039_v37, %s4334_s8 }
  0xe5   :  { %3405 = vst.msk [vmem:[%s8618_s1 + $0x89] sm:$0x10] %vm41_vm1, %v688_v45   ;;  %3406 = vst.msk [vmem:[%s8618_s1 + $0x188] sm:$0x20] %vm41_vm1, %v688_v45  }
  0xe6   :  { %3407 = vst.msk [vmem:[%s8618_s1 + $0xc7] sm:$0x40] %vm41_vm1, %v688_v45   ;;  %3408 = vst.msk [vmem:[%s8618_s1 + $0x1c6] sm:$0x80] %vm41_vm1, %v688_v45   ;;  %v1399_v8 = vpop.permute.xlu1 %1398   ;;  %v1374_v9 = vpop.permute.xlu0 %1373  }
  0xe7   :  { %3425 = vst.msk [vmem:[%s8618_s1 + $0x20e] sm:$0x1] %vm41_vm1, %v762_v46   ;;  %3426 = vst.msk [vmem:[%s8618_s1 + $0x30d] sm:$0x2] %vm41_vm1, %v762_v46  }
  0xe8   :  { %3427 = vst.msk [vmem:[%s8618_s1 + $0x24c] sm:$0x4] %vm41_vm1, %v762_v46   ;;  %3428 = vst.msk [vmem:[%s8618_s1 + $0x34b] sm:$0x8] %vm41_vm1, %v762_v46   ;;  %2819 = vrot.lane.b32.xlu1 %v5036_v36, %s4335_s11  ;;  %2794 = vrot.lane.b32.xlu0 %v5039_v37, %s4335_s11 }
  0xe9   :  { %3429 = vst.msk [vmem:[%s8618_s1 + $0x28a] sm:$0x10] %vm41_vm1, %v762_v46   ;;  %3430 = vst.msk [vmem:[%s8618_s1 + $0x389] sm:$0x20] %vm41_vm1, %v762_v46  }
  0xea   :  { %3431 = vst.msk [vmem:[%s8618_s1 + $0x2c8] sm:$0x40] %vm41_vm1, %v762_v46   ;;  %3432 = vst.msk [vmem:[%s8618_s1 + $0x3c7] sm:$0x80] %vm41_vm1, %v762_v46   ;;  %v1448_v12 = vpop.permute.xlu1 %1447   ;;  %v1423_v13 = vpop.permute.xlu0 %1422  }
  0xeb   :  { %3417 = vst.msk [vmem:[%s8618_s1 + $0xe] sm:$0x1] %vm41_vm1, %v737_v47   ;;  %3418 = vst.msk [vmem:[%s8618_s1 + $0x10d] sm:$0x2] %vm41_vm1, %v737_v47  }
  0xec   :  { %3419 = vst.msk [vmem:[%s8618_s1 + $0x4c] sm:$0x4] %vm41_vm1, %v737_v47   ;;  %3420 = vst.msk [vmem:[%s8618_s1 + $0x14b] sm:$0x8] %vm41_vm1, %v737_v47   ;;  %2868 = vrot.lane.b32.xlu1 %v5036_v36, %s4336_s14  ;;  %2843 = vrot.lane.b32.xlu0 %v5039_v37, %s4336_s14 }
  0xed   :  { %3421 = vst.msk [vmem:[%s8618_s1 + $0x8a] sm:$0x10] %vm41_vm1, %v737_v47   ;;  %3422 = vst.msk [vmem:[%s8618_s1 + $0x189] sm:$0x20] %vm41_vm1, %v737_v47  }
  0xee   :  { %3423 = vst.msk [vmem:[%s8618_s1 + $0xc8] sm:$0x40] %vm41_vm1, %v737_v47   ;;  %3424 = vst.msk [vmem:[%s8618_s1 + $0x1c7] sm:$0x80] %vm41_vm1, %v737_v47   ;;  %v1497_v18 = vpop.permute.xlu1 %1496   ;;  %v1472_v19 = vpop.permute.xlu0 %1471  }
  0xef   :  { %3441 = vst.msk [vmem:[%s8618_s1 + $0x20f] sm:$0x1] %vm41_vm1, %v811_v48   ;;  %3442 = vst.msk [vmem:[%s8618_s1 + $0x30e] sm:$0x2] %vm41_vm1, %v811_v48  }
  0xf0   :  { %3443 = vst.msk [vmem:[%s8618_s1 + $0x24d] sm:$0x4] %vm41_vm1, %v811_v48   ;;  %3444 = vst.msk [vmem:[%s8618_s1 + $0x34c] sm:$0x8] %vm41_vm1, %v811_v48  }
  0xf1   :  { %3445 = vst.msk [vmem:[%s8618_s1 + $0x28b] sm:$0x10] %vm41_vm1, %v811_v48   ;;  %3446 = vst.msk [vmem:[%s8618_s1 + $0x38a] sm:$0x20] %vm41_vm1, %v811_v48  }
  0xf2   :  { %3447 = vst.msk [vmem:[%s8618_s1 + $0x2c9] sm:$0x40] %vm41_vm1, %v811_v48   ;;  %3448 = vst.msk [vmem:[%s8618_s1 + $0x3c8] sm:$0x80] %vm41_vm1, %v811_v48   ;;  %v1546_v20 = vpop.permute.xlu1 %1545   ;;  %v1521_v21 = vpop.permute.xlu0 %1520  }
  0xf3   :  { %3433 = vst.msk [vmem:[%s8618_s1 + $0xf] sm:$0x1] %vm41_vm1, %v786_v49   ;;  %3434 = vst.msk [vmem:[%s8618_s1 + $0x10e] sm:$0x2] %vm41_vm1, %v786_v49  }
  0xf4   :  { %3435 = vst.msk [vmem:[%s8618_s1 + $0x4d] sm:$0x4] %vm41_vm1, %v786_v49   ;;  %3436 = vst.msk [vmem:[%s8618_s1 + $0x14c] sm:$0x8] %vm41_vm1, %v786_v49  }
  0xf5   :  { %3437 = vst.msk [vmem:[%s8618_s1 + $0x8b] sm:$0x10] %vm41_vm1, %v786_v49   ;;  %3438 = vst.msk [vmem:[%s8618_s1 + $0x18a] sm:$0x20] %vm41_vm1, %v786_v49  }
  0xf6   :  { %3439 = vst.msk [vmem:[%s8618_s1 + $0xc9] sm:$0x40] %vm41_vm1, %v786_v49   ;;  %3440 = vst.msk [vmem:[%s8618_s1 + $0x1c8] sm:$0x80] %vm41_vm1, %v786_v49   ;;  %v1595_v22 = vpop.permute.xlu1 %1594   ;;  %v1570_v23 = vpop.permute.xlu0 %1569  }
  0xf7   :  { %3457 = vst.msk [vmem:[%s8618_s1 + $0x210] sm:$0x1] %vm41_vm1, %v860_v50   ;;  %3458 = vst.msk [vmem:[%s8618_s1 + $0x30f] sm:$0x2] %vm41_vm1, %v860_v50  }
  0xf8   :  { %3459 = vst.msk [vmem:[%s8618_s1 + $0x24e] sm:$0x4] %vm41_vm1, %v860_v50   ;;  %3460 = vst.msk [vmem:[%s8618_s1 + $0x34d] sm:$0x8] %vm41_vm1, %v860_v50  }
  0xf9   :  { %3461 = vst.msk [vmem:[%s8618_s1 + $0x28c] sm:$0x10] %vm41_vm1, %v860_v50   ;;  %3462 = vst.msk [vmem:[%s8618_s1 + $0x38b] sm:$0x20] %vm41_vm1, %v860_v50  }
  0xfa   :  { %3463 = vst.msk [vmem:[%s8618_s1 + $0x2ca] sm:$0x40] %vm41_vm1, %v860_v50   ;;  %3464 = vst.msk [vmem:[%s8618_s1 + $0x3c9] sm:$0x80] %vm41_vm1, %v860_v50   ;;  %v1644_v32 = vpop.permute.xlu1 %1643   ;;  %v1619_v33 = vpop.permute.xlu0 %1618  }
  0xfb   :  { %3449 = vst.msk [vmem:[%s8618_s1 + $0x10] sm:$0x1] %vm41_vm1, %v835_v51   ;;  %3450 = vst.msk [vmem:[%s8618_s1 + $0x10f] sm:$0x2] %vm41_vm1, %v835_v51  }
  0xfc   :  { %3451 = vst.msk [vmem:[%s8618_s1 + $0x4e] sm:$0x4] %vm41_vm1, %v835_v51   ;;  %3452 = vst.msk [vmem:[%s8618_s1 + $0x14d] sm:$0x8] %vm41_vm1, %v835_v51  }
  0xfd   :  { %3453 = vst.msk [vmem:[%s8618_s1 + $0x8c] sm:$0x10] %vm41_vm1, %v835_v51   ;;  %3454 = vst.msk [vmem:[%s8618_s1 + $0x18b] sm:$0x20] %vm41_vm1, %v835_v51  }
  0xfe   :  { %3455 = vst.msk [vmem:[%s8618_s1 + $0xca] sm:$0x40] %vm41_vm1, %v835_v51   ;;  %3456 = vst.msk [vmem:[%s8618_s1 + $0x1c9] sm:$0x80] %vm41_vm1, %v835_v51   ;;  %v1693_v34 = vpop.permute.xlu1 %1692   ;;  %v1668_v35 = vpop.permute.xlu0 %1667  }
  0xff   :  { %3473 = vst.msk [vmem:[%s8618_s1 + $0x211] sm:$0x1] %vm41_vm1, %v909_v52   ;;  %3474 = vst.msk [vmem:[%s8618_s1 + $0x310] sm:$0x2] %vm41_vm1, %v909_v52  }
 0x100   :  { %3475 = vst.msk [vmem:[%s8618_s1 + $0x24f] sm:$0x4] %vm41_vm1, %v909_v52   ;;  %3476 = vst.msk [vmem:[%s8618_s1 + $0x34e] sm:$0x8] %vm41_vm1, %v909_v52  }
 0x101   :  { %3477 = vst.msk [vmem:[%s8618_s1 + $0x28d] sm:$0x10] %vm41_vm1, %v909_v52   ;;  %3478 = vst.msk [vmem:[%s8618_s1 + $0x38c] sm:$0x20] %vm41_vm1, %v909_v52  }
 0x102   :  { %3479 = vst.msk [vmem:[%s8618_s1 + $0x2cb] sm:$0x40] %vm41_vm1, %v909_v52   ;;  %3480 = vst.msk [vmem:[%s8618_s1 + $0x3ca] sm:$0x80] %vm41_vm1, %v909_v52   ;;  %v1742_v36 = vpop.permute.xlu1 %1741   ;;  %v1717_v37 = vpop.permute.xlu0 %1716  }
 0x103   :  { %3465 = vst.msk [vmem:[%s8618_s1 + $0x11] sm:$0x1] %vm41_vm1, %v884_v53   ;;  %3466 = vst.msk [vmem:[%s8618_s1 + $0x110] sm:$0x2] %vm41_vm1, %v884_v53  }
 0x104   :  { %3467 = vst.msk [vmem:[%s8618_s1 + $0x4f] sm:$0x4] %vm41_vm1, %v884_v53   ;;  %3468 = vst.msk [vmem:[%s8618_s1 + $0x14e] sm:$0x8] %vm41_vm1, %v884_v53  }
 0x105   :  { %3469 = vst.msk [vmem:[%s8618_s1 + $0x8d] sm:$0x10] %vm41_vm1, %v884_v53   ;;  %3470 = vst.msk [vmem:[%s8618_s1 + $0x18c] sm:$0x20] %vm41_vm1, %v884_v53  }
 0x106   :  { %3471 = vst.msk [vmem:[%s8618_s1 + $0xcb] sm:$0x40] %vm41_vm1, %v884_v53   ;;  %3472 = vst.msk [vmem:[%s8618_s1 + $0x1ca] sm:$0x80] %vm41_vm1, %v884_v53   ;;  %v1791_v38 = vpop.permute.xlu1 %1790   ;;  %v1766_v39 = vpop.permute.xlu0 %1765  }
 0x107   :  { %3489 = vst.msk [vmem:[%s8618_s1 + $0x212] sm:$0x1] %vm41_vm1, %v958_v54   ;;  %3490 = vst.msk [vmem:[%s8618_s1 + $0x311] sm:$0x2] %vm41_vm1, %v958_v54  }
 0x108   :  { %3491 = vst.msk [vmem:[%s8618_s1 + $0x250] sm:$0x4] %vm41_vm1, %v958_v54   ;;  %3492 = vst.msk [vmem:[%s8618_s1 + $0x34f] sm:$0x8] %vm41_vm1, %v958_v54  }
 0x109   :  { %3493 = vst.msk [vmem:[%s8618_s1 + $0x28e] sm:$0x10] %vm41_vm1, %v958_v54   ;;  %3494 = vst.msk [vmem:[%s8618_s1 + $0x38d] sm:$0x20] %vm41_vm1, %v958_v54  }
 0x10a   :  { %3495 = vst.msk [vmem:[%s8618_s1 + $0x2cc] sm:$0x40] %vm41_vm1, %v958_v54   ;;  %3496 = vst.msk [vmem:[%s8618_s1 + $0x3cb] sm:$0x80] %vm41_vm1, %v958_v54   ;;  %v1840_v40 = vpop.permute.xlu1 %1839   ;;  %v1815_v41 = vpop.permute.xlu0 %1814  }
 0x10b   :  { %3481 = vst.msk [vmem:[%s8618_s1 + $0x12] sm:$0x1] %vm41_vm1, %v933_v55   ;;  %3482 = vst.msk [vmem:[%s8618_s1 + $0x111] sm:$0x2] %vm41_vm1, %v933_v55  }
 0x10c   :  { %3483 = vst.msk [vmem:[%s8618_s1 + $0x50] sm:$0x4] %vm41_vm1, %v933_v55   ;;  %3484 = vst.msk [vmem:[%s8618_s1 + $0x14f] sm:$0x8] %vm41_vm1, %v933_v55  }
 0x10d   :  { %3485 = vst.msk [vmem:[%s8618_s1 + $0x8e] sm:$0x10] %vm41_vm1, %v933_v55   ;;  %3486 = vst.msk [vmem:[%s8618_s1 + $0x18d] sm:$0x20] %vm41_vm1, %v933_v55  }
 0x10e   :  { %3487 = vst.msk [vmem:[%s8618_s1 + $0xcc] sm:$0x40] %vm41_vm1, %v933_v55   ;;  %3488 = vst.msk [vmem:[%s8618_s1 + $0x1cb] sm:$0x80] %vm41_vm1, %v933_v55   ;;  %v1889_v42 = vpop.permute.xlu1 %1888   ;;  %v1864_v43 = vpop.permute.xlu0 %1863  }
 0x10f   :  { %3505 = vst.msk [vmem:[%s8618_s1 + $0x213] sm:$0x1] %vm41_vm1, %v1007_v56   ;;  %3506 = vst.msk [vmem:[%s8618_s1 + $0x312] sm:$0x2] %vm41_vm1, %v1007_v56  }
 0x110   :  { %3507 = vst.msk [vmem:[%s8618_s1 + $0x251] sm:$0x4] %vm41_vm1, %v1007_v56   ;;  %3508 = vst.msk [vmem:[%s8618_s1 + $0x350] sm:$0x8] %vm41_vm1, %v1007_v56  }
 0x111   :  { %3509 = vst.msk [vmem:[%s8618_s1 + $0x28f] sm:$0x10] %vm41_vm1, %v1007_v56   ;;  %3510 = vst.msk [vmem:[%s8618_s1 + $0x38e] sm:$0x20] %vm41_vm1, %v1007_v56  }
 0x112   :  { %3511 = vst.msk [vmem:[%s8618_s1 + $0x2cd] sm:$0x40] %vm41_vm1, %v1007_v56   ;;  %3512 = vst.msk [vmem:[%s8618_s1 + $0x3cc] sm:$0x80] %vm41_vm1, %v1007_v56   ;;  %v1938_v44 = vpop.permute.xlu1 %1937   ;;  %v1913_v45 = vpop.permute.xlu0 %1912  }
 0x113   :  { %3497 = vst.msk [vmem:[%s8618_s1 + $0x13] sm:$0x1] %vm41_vm1, %v982_v57   ;;  %3498 = vst.msk [vmem:[%s8618_s1 + $0x112] sm:$0x2] %vm41_vm1, %v982_v57  }
 0x114   :  { %3499 = vst.msk [vmem:[%s8618_s1 + $0x51] sm:$0x4] %vm41_vm1, %v982_v57   ;;  %3500 = vst.msk [vmem:[%s8618_s1 + $0x150] sm:$0x8] %vm41_vm1, %v982_v57  }
 0x115   :  { %3501 = vst.msk [vmem:[%s8618_s1 + $0x8f] sm:$0x10] %vm41_vm1, %v982_v57   ;;  %3502 = vst.msk [vmem:[%s8618_s1 + $0x18e] sm:$0x20] %vm41_vm1, %v982_v57  }
 0x116   :  { %3503 = vst.msk [vmem:[%s8618_s1 + $0xcd] sm:$0x40] %vm41_vm1, %v982_v57   ;;  %3504 = vst.msk [vmem:[%s8618_s1 + $0x1cc] sm:$0x80] %vm41_vm1, %v982_v57   ;;  %v1987_v46 = vpop.permute.xlu1 %1986   ;;  %v1962_v47 = vpop.permute.xlu0 %1961  }
 0x117   :  { %3521 = vst.msk [vmem:[%s8618_s1 + $0x214] sm:$0x1] %vm41_vm1, %v1056_v58   ;;  %3522 = vst.msk [vmem:[%s8618_s1 + $0x313] sm:$0x2] %vm41_vm1, %v1056_v58  }
 0x118   :  { %3523 = vst.msk [vmem:[%s8618_s1 + $0x252] sm:$0x4] %vm41_vm1, %v1056_v58   ;;  %3524 = vst.msk [vmem:[%s8618_s1 + $0x351] sm:$0x8] %vm41_vm1, %v1056_v58  }
 0x119   :  { %3525 = vst.msk [vmem:[%s8618_s1 + $0x290] sm:$0x10] %vm41_vm1, %v1056_v58   ;;  %3526 = vst.msk [vmem:[%s8618_s1 + $0x38f] sm:$0x20] %vm41_vm1, %v1056_v58  }
 0x11a   :  { %3527 = vst.msk [vmem:[%s8618_s1 + $0x2ce] sm:$0x40] %vm41_vm1, %v1056_v58   ;;  %3528 = vst.msk [vmem:[%s8618_s1 + $0x3cd] sm:$0x80] %vm41_vm1, %v1056_v58   ;;  %v2036_v48 = vpop.permute.xlu1 %2035   ;;  %v2011_v49 = vpop.permute.xlu0 %2010  }
 0x11b   :  { %3513 = vst.msk [vmem:[%s8618_s1 + $0x14] sm:$0x1] %vm41_vm1, %v1031_v59   ;;  %3514 = vst.msk [vmem:[%s8618_s1 + $0x113] sm:$0x2] %vm41_vm1, %v1031_v59  }
 0x11c   :  { %3515 = vst.msk [vmem:[%s8618_s1 + $0x52] sm:$0x4] %vm41_vm1, %v1031_v59   ;;  %3516 = vst.msk [vmem:[%s8618_s1 + $0x151] sm:$0x8] %vm41_vm1, %v1031_v59  }
 0x11d   :  { %3517 = vst.msk [vmem:[%s8618_s1 + $0x90] sm:$0x10] %vm41_vm1, %v1031_v59   ;;  %3518 = vst.msk [vmem:[%s8618_s1 + $0x18f] sm:$0x20] %vm41_vm1, %v1031_v59  }
 0x11e   :  { %3519 = vst.msk [vmem:[%s8618_s1 + $0xce] sm:$0x40] %vm41_vm1, %v1031_v59   ;;  %3520 = vst.msk [vmem:[%s8618_s1 + $0x1cd] sm:$0x80] %vm41_vm1, %v1031_v59   ;;  %v2085_v50 = vpop.permute.xlu1 %2084   ;;  %v2060_v51 = vpop.permute.xlu0 %2059  }
 0x11f   :  { %3537 = vst.msk [vmem:[%s8618_s1 + $0x215] sm:$0x1] %vm41_vm1, %v1105_v60   ;;  %3538 = vst.msk [vmem:[%s8618_s1 + $0x314] sm:$0x2] %vm41_vm1, %v1105_v60  }
 0x120   :  { %3539 = vst.msk [vmem:[%s8618_s1 + $0x253] sm:$0x4] %vm41_vm1, %v1105_v60   ;;  %3540 = vst.msk [vmem:[%s8618_s1 + $0x352] sm:$0x8] %vm41_vm1, %v1105_v60  }
 0x121   :  { %3541 = vst.msk [vmem:[%s8618_s1 + $0x291] sm:$0x10] %vm41_vm1, %v1105_v60   ;;  %3542 = vst.msk [vmem:[%s8618_s1 + $0x390] sm:$0x20] %vm41_vm1, %v1105_v60  }
 0x122   :  { %3543 = vst.msk [vmem:[%s8618_s1 + $0x2cf] sm:$0x40] %vm41_vm1, %v1105_v60   ;;  %3544 = vst.msk [vmem:[%s8618_s1 + $0x3ce] sm:$0x80] %vm41_vm1, %v1105_v60   ;;  %v2134_v52 = vpop.permute.xlu1 %2133   ;;  %v2109_v53 = vpop.permute.xlu0 %2108  }
 0x123   :  { %3529 = vst.msk [vmem:[%s8618_s1 + $0x15] sm:$0x1] %vm41_vm1, %v1080_v61   ;;  %3530 = vst.msk [vmem:[%s8618_s1 + $0x114] sm:$0x2] %vm41_vm1, %v1080_v61  }
 0x124   :  { %3531 = vst.msk [vmem:[%s8618_s1 + $0x53] sm:$0x4] %vm41_vm1, %v1080_v61   ;;  %3532 = vst.msk [vmem:[%s8618_s1 + $0x152] sm:$0x8] %vm41_vm1, %v1080_v61  }
 0x125   :  { %3533 = vst.msk [vmem:[%s8618_s1 + $0x91] sm:$0x10] %vm41_vm1, %v1080_v61   ;;  %3534 = vst.msk [vmem:[%s8618_s1 + $0x190] sm:$0x20] %vm41_vm1, %v1080_v61  }
 0x126   :  { %3535 = vst.msk [vmem:[%s8618_s1 + $0xcf] sm:$0x40] %vm41_vm1, %v1080_v61   ;;  %3536 = vst.msk [vmem:[%s8618_s1 + $0x1ce] sm:$0x80] %vm41_vm1, %v1080_v61   ;;  %v2183_v54 = vpop.permute.xlu1 %2182   ;;  %v2158_v55 = vpop.permute.xlu0 %2157  }
 0x127   :  { %3553 = vst.msk [vmem:[%s8618_s1 + $0x216] sm:$0x1] %vm41_vm1, %v1154_v62   ;;  %3554 = vst.msk [vmem:[%s8618_s1 + $0x315] sm:$0x2] %vm41_vm1, %v1154_v62  }
 0x128   :  { %3555 = vst.msk [vmem:[%s8618_s1 + $0x254] sm:$0x4] %vm41_vm1, %v1154_v62   ;;  %3556 = vst.msk [vmem:[%s8618_s1 + $0x353] sm:$0x8] %vm41_vm1, %v1154_v62  }
 0x129   :  { %3557 = vst.msk [vmem:[%s8618_s1 + $0x292] sm:$0x10] %vm41_vm1, %v1154_v62   ;;  %3558 = vst.msk [vmem:[%s8618_s1 + $0x391] sm:$0x20] %vm41_vm1, %v1154_v62  }
 0x12a   :  { %3559 = vst.msk [vmem:[%s8618_s1 + $0x2d0] sm:$0x40] %vm41_vm1, %v1154_v62   ;;  %3560 = vst.msk [vmem:[%s8618_s1 + $0x3cf] sm:$0x80] %vm41_vm1, %v1154_v62   ;;  %v2232_v56 = vpop.permute.xlu1 %2231   ;;  %v2207_v57 = vpop.permute.xlu0 %2206  }
 0x12b   :  { %3545 = vst.msk [vmem:[%s8618_s1 + $0x16] sm:$0x1] %vm41_vm1, %v1129_v63   ;;  %3546 = vst.msk [vmem:[%s8618_s1 + $0x115] sm:$0x2] %vm41_vm1, %v1129_v63  }
 0x12c   :  { %3547 = vst.msk [vmem:[%s8618_s1 + $0x54] sm:$0x4] %vm41_vm1, %v1129_v63   ;;  %3548 = vst.msk [vmem:[%s8618_s1 + $0x153] sm:$0x8] %vm41_vm1, %v1129_v63  }
 0x12d   :  { %3549 = vst.msk [vmem:[%s8618_s1 + $0x92] sm:$0x10] %vm41_vm1, %v1129_v63   ;;  %3550 = vst.msk [vmem:[%s8618_s1 + $0x191] sm:$0x20] %vm41_vm1, %v1129_v63  }
 0x12e   :  { %3551 = vst.msk [vmem:[%s8618_s1 + $0xd0] sm:$0x40] %vm41_vm1, %v1129_v63   ;;  %3552 = vst.msk [vmem:[%s8618_s1 + $0x1cf] sm:$0x80] %vm41_vm1, %v1129_v63   ;;  %v2281_v58 = vpop.permute.xlu1 %2280   ;;  %v2256_v59 = vpop.permute.xlu0 %2255  }
 0x12f   :  { %3569 = vst.msk [vmem:[%s8618_s1 + $0x217] sm:$0x1] %vm41_vm1, %v1203_v0   ;;  %3570 = vst.msk [vmem:[%s8618_s1 + $0x316] sm:$0x2] %vm41_vm1, %v1203_v0  }
 0x130   :  { %3571 = vst.msk [vmem:[%s8618_s1 + $0x255] sm:$0x4] %vm41_vm1, %v1203_v0   ;;  %3572 = vst.msk [vmem:[%s8618_s1 + $0x354] sm:$0x8] %vm41_vm1, %v1203_v0  }
 0x131   :  { %3573 = vst.msk [vmem:[%s8618_s1 + $0x293] sm:$0x10] %vm41_vm1, %v1203_v0   ;;  %3574 = vst.msk [vmem:[%s8618_s1 + $0x392] sm:$0x20] %vm41_vm1, %v1203_v0  }
 0x132   :  { %3575 = vst.msk [vmem:[%s8618_s1 + $0x2d1] sm:$0x40] %vm41_vm1, %v1203_v0   ;;  %3576 = vst.msk [vmem:[%s8618_s1 + $0x3d0] sm:$0x80] %vm41_vm1, %v1203_v0   ;;  %v2330_v60 = vpop.permute.xlu1 %2329   ;;  %v2305_v61 = vpop.permute.xlu0 %2304  }
 0x133   :  { %3561 = vst.msk [vmem:[%s8618_s1 + $0x17] sm:$0x1] %vm41_vm1, %v1178_v1   ;;  %3562 = vst.msk [vmem:[%s8618_s1 + $0x116] sm:$0x2] %vm41_vm1, %v1178_v1  }
 0x134   :  { %3563 = vst.msk [vmem:[%s8618_s1 + $0x55] sm:$0x4] %vm41_vm1, %v1178_v1   ;;  %3564 = vst.msk [vmem:[%s8618_s1 + $0x154] sm:$0x8] %vm41_vm1, %v1178_v1  }
 0x135   :  { %3565 = vst.msk [vmem:[%s8618_s1 + $0x93] sm:$0x10] %vm41_vm1, %v1178_v1   ;;  %3566 = vst.msk [vmem:[%s8618_s1 + $0x192] sm:$0x20] %vm41_vm1, %v1178_v1  }
 0x136   :  { %3567 = vst.msk [vmem:[%s8618_s1 + $0xd1] sm:$0x40] %vm41_vm1, %v1178_v1   ;;  %3568 = vst.msk [vmem:[%s8618_s1 + $0x1d0] sm:$0x80] %vm41_vm1, %v1178_v1   ;;  %v2379_v62 = vpop.permute.xlu1 %2378   ;;  %v2354_v63 = vpop.permute.xlu0 %2353  }
 0x137   :  { %3585 = vst.msk [vmem:[%s8618_s1 + $0x218] sm:$0x1] %vm41_vm1, %v1252_v2   ;;  %3586 = vst.msk [vmem:[%s8618_s1 + $0x317] sm:$0x2] %vm41_vm1, %v1252_v2  }
 0x138   :  { %3587 = vst.msk [vmem:[%s8618_s1 + $0x256] sm:$0x4] %vm41_vm1, %v1252_v2   ;;  %3588 = vst.msk [vmem:[%s8618_s1 + $0x355] sm:$0x8] %vm41_vm1, %v1252_v2  }
 0x139   :  { %3589 = vst.msk [vmem:[%s8618_s1 + $0x294] sm:$0x10] %vm41_vm1, %v1252_v2   ;;  %3590 = vst.msk [vmem:[%s8618_s1 + $0x393] sm:$0x20] %vm41_vm1, %v1252_v2  }
 0x13a   :  { %3591 = vst.msk [vmem:[%s8618_s1 + $0x2d2] sm:$0x40] %vm41_vm1, %v1252_v2   ;;  %3592 = vst.msk [vmem:[%s8618_s1 + $0x3d1] sm:$0x80] %vm41_vm1, %v1252_v2   ;;  %v2428_v0 = vpop.permute.xlu1 %2427   ;;  %v2403_v1 = vpop.permute.xlu0 %2402  }
 0x13b   :  { %3577 = vst.msk [vmem:[%s8618_s1 + $0x18] sm:$0x1] %vm41_vm1, %v1227_v3   ;;  %3578 = vst.msk [vmem:[%s8618_s1 + $0x117] sm:$0x2] %vm41_vm1, %v1227_v3  }
 0x13c   :  { %3579 = vst.msk [vmem:[%s8618_s1 + $0x56] sm:$0x4] %vm41_vm1, %v1227_v3   ;;  %3580 = vst.msk [vmem:[%s8618_s1 + $0x155] sm:$0x8] %vm41_vm1, %v1227_v3  }
 0x13d   :  { %3581 = vst.msk [vmem:[%s8618_s1 + $0x94] sm:$0x10] %vm41_vm1, %v1227_v3   ;;  %3582 = vst.msk [vmem:[%s8618_s1 + $0x193] sm:$0x20] %vm41_vm1, %v1227_v3  }
 0x13e   :  { %3583 = vst.msk [vmem:[%s8618_s1 + $0xd2] sm:$0x40] %vm41_vm1, %v1227_v3   ;;  %3584 = vst.msk [vmem:[%s8618_s1 + $0x1d1] sm:$0x80] %vm41_vm1, %v1227_v3   ;;  %v2477_v2 = vpop.permute.xlu1 %2476   ;;  %v2452_v3 = vpop.permute.xlu0 %2451  }
 0x13f   :  { %3601 = vst.msk [vmem:[%s8618_s1 + $0x219] sm:$0x1] %vm41_vm1, %v1301_v4   ;;  %3602 = vst.msk [vmem:[%s8618_s1 + $0x318] sm:$0x2] %vm41_vm1, %v1301_v4  }
 0x140   :  { %3603 = vst.msk [vmem:[%s8618_s1 + $0x257] sm:$0x4] %vm41_vm1, %v1301_v4   ;;  %3604 = vst.msk [vmem:[%s8618_s1 + $0x356] sm:$0x8] %vm41_vm1, %v1301_v4  }
 0x141   :  { %3605 = vst.msk [vmem:[%s8618_s1 + $0x295] sm:$0x10] %vm41_vm1, %v1301_v4   ;;  %3606 = vst.msk [vmem:[%s8618_s1 + $0x394] sm:$0x20] %vm41_vm1, %v1301_v4  }
 0x142   :  { %3607 = vst.msk [vmem:[%s8618_s1 + $0x2d3] sm:$0x40] %vm41_vm1, %v1301_v4   ;;  %3608 = vst.msk [vmem:[%s8618_s1 + $0x3d2] sm:$0x80] %vm41_vm1, %v1301_v4   ;;  %v2526_v4 = vpop.permute.xlu1 %2525  }
 0x143   :  { %3593 = vst.msk [vmem:[%s8618_s1 + $0x19] sm:$0x1] %vm41_vm1, %v1276_v5   ;;  %3594 = vst.msk [vmem:[%s8618_s1 + $0x118] sm:$0x2] %vm41_vm1, %v1276_v5  }
 0x144   :  { %3595 = vst.msk [vmem:[%s8618_s1 + $0x57] sm:$0x4] %vm41_vm1, %v1276_v5   ;;  %3596 = vst.msk [vmem:[%s8618_s1 + $0x156] sm:$0x8] %vm41_vm1, %v1276_v5  }
 0x145   :  { %3597 = vst.msk [vmem:[%s8618_s1 + $0x95] sm:$0x10] %vm41_vm1, %v1276_v5   ;;  %3598 = vst.msk [vmem:[%s8618_s1 + $0x194] sm:$0x20] %vm41_vm1, %v1276_v5  }
 0x146   :  { %3599 = vst.msk [vmem:[%s8618_s1 + $0xd3] sm:$0x40] %vm41_vm1, %v1276_v5   ;;  %3600 = vst.msk [vmem:[%s8618_s1 + $0x1d2] sm:$0x80] %vm41_vm1, %v1276_v5   ;;  %v2501_v5 = vpop.permute.xlu0 %2500  }
 0x147   :  { %3617 = vst.msk [vmem:[%s8618_s1 + $0x21a] sm:$0x1] %vm41_vm1, %v1350_v6   ;;  %3618 = vst.msk [vmem:[%s8618_s1 + $0x319] sm:$0x2] %vm41_vm1, %v1350_v6  }
 0x148   :  { %3619 = vst.msk [vmem:[%s8618_s1 + $0x258] sm:$0x4] %vm41_vm1, %v1350_v6   ;;  %3620 = vst.msk [vmem:[%s8618_s1 + $0x357] sm:$0x8] %vm41_vm1, %v1350_v6  }
 0x149   :  { %3621 = vst.msk [vmem:[%s8618_s1 + $0x296] sm:$0x10] %vm41_vm1, %v1350_v6   ;;  %3622 = vst.msk [vmem:[%s8618_s1 + $0x395] sm:$0x20] %vm41_vm1, %v1350_v6  }
 0x14a   :  { %3623 = vst.msk [vmem:[%s8618_s1 + $0x2d4] sm:$0x40] %vm41_vm1, %v1350_v6   ;;  %3624 = vst.msk [vmem:[%s8618_s1 + $0x3d3] sm:$0x80] %vm41_vm1, %v1350_v6   ;;  %v2575_v6 = vpop.permute.xlu1 %2574  }
 0x14b   :  { %3609 = vst.msk [vmem:[%s8618_s1 + $0x1a] sm:$0x1] %vm41_vm1, %v1325_v7   ;;  %3610 = vst.msk [vmem:[%s8618_s1 + $0x119] sm:$0x2] %vm41_vm1, %v1325_v7  }
 0x14c   :  { %3611 = vst.msk [vmem:[%s8618_s1 + $0x58] sm:$0x4] %vm41_vm1, %v1325_v7   ;;  %3612 = vst.msk [vmem:[%s8618_s1 + $0x157] sm:$0x8] %vm41_vm1, %v1325_v7  }
 0x14d   :  { %3613 = vst.msk [vmem:[%s8618_s1 + $0x96] sm:$0x10] %vm41_vm1, %v1325_v7   ;;  %3614 = vst.msk [vmem:[%s8618_s1 + $0x195] sm:$0x20] %vm41_vm1, %v1325_v7  }
 0x14e   :  { %3615 = vst.msk [vmem:[%s8618_s1 + $0xd4] sm:$0x40] %vm41_vm1, %v1325_v7   ;;  %3616 = vst.msk [vmem:[%s8618_s1 + $0x1d3] sm:$0x80] %vm41_vm1, %v1325_v7   ;;  %v2550_v7 = vpop.permute.xlu0 %2549  }
 0x14f   :  { %3633 = vst.msk [vmem:[%s8618_s1 + $0x21b] sm:$0x1] %vm41_vm1, %v1399_v8   ;;  %3634 = vst.msk [vmem:[%s8618_s1 + $0x31a] sm:$0x2] %vm41_vm1, %v1399_v8  }
 0x150   :  { %3635 = vst.msk [vmem:[%s8618_s1 + $0x259] sm:$0x4] %vm41_vm1, %v1399_v8   ;;  %3636 = vst.msk [vmem:[%s8618_s1 + $0x358] sm:$0x8] %vm41_vm1, %v1399_v8  }
 0x151   :  { %3637 = vst.msk [vmem:[%s8618_s1 + $0x297] sm:$0x10] %vm41_vm1, %v1399_v8   ;;  %3638 = vst.msk [vmem:[%s8618_s1 + $0x396] sm:$0x20] %vm41_vm1, %v1399_v8  }
 0x152   :  { %3639 = vst.msk [vmem:[%s8618_s1 + $0x2d5] sm:$0x40] %vm41_vm1, %v1399_v8   ;;  %3640 = vst.msk [vmem:[%s8618_s1 + $0x3d4] sm:$0x80] %vm41_vm1, %v1399_v8   ;;  %v2624_v8 = vpop.permute.xlu1 %2623  }
 0x153   :  { %3625 = vst.msk [vmem:[%s8618_s1 + $0x1b] sm:$0x1] %vm41_vm1, %v1374_v9   ;;  %3626 = vst.msk [vmem:[%s8618_s1 + $0x11a] sm:$0x2] %vm41_vm1, %v1374_v9  }
 0x154   :  { %3627 = vst.msk [vmem:[%s8618_s1 + $0x59] sm:$0x4] %vm41_vm1, %v1374_v9   ;;  %3628 = vst.msk [vmem:[%s8618_s1 + $0x158] sm:$0x8] %vm41_vm1, %v1374_v9  }
 0x155   :  { %3629 = vst.msk [vmem:[%s8618_s1 + $0x97] sm:$0x10] %vm41_vm1, %v1374_v9   ;;  %3630 = vst.msk [vmem:[%s8618_s1 + $0x196] sm:$0x20] %vm41_vm1, %v1374_v9  }
 0x156   :  { %3631 = vst.msk [vmem:[%s8618_s1 + $0xd5] sm:$0x40] %vm41_vm1, %v1374_v9   ;;  %3632 = vst.msk [vmem:[%s8618_s1 + $0x1d4] sm:$0x80] %vm41_vm1, %v1374_v9   ;;  %v2599_v9 = vpop.permute.xlu0 %2598  }
 0x157   :  { %v2912_v10 = vld.sshfl [vmem:[#allocation0 + $0x20] sm:$0xff pattern:$0x99999810]   ;;  %v2889_v15 = vld.sshfl [vmem:[#allocation0 + $0x10] sm:$0xff pattern:$0x98100000]  }
 0x158   :  { %v2887_v14 = vld.sshfl [vmem:[#allocation0] sm:$0xff pattern:$0x99999810]   ;;  %3649 = vst.msk [vmem:[%s8618_s1 + $0x21c] sm:$0x1] %vm41_vm1, %v1448_v12   ;;  %v6296_v16 = vsel %vm97_vm0, %v2914_v11, %v2912_v10  ;;  %v2673_v10 = vpop.permute.xlu1 %2672  }
 0x159   :  { %3650 = vst.msk [vmem:[%s8618_s1 + $0x31b] sm:$0x2] %vm41_vm1, %v1448_v12   ;;  %3651 = vst.msk [vmem:[%s8618_s1 + $0x25a] sm:$0x4] %vm41_vm1, %v1448_v12   ;;  %v6299_v17 = vsel %vm97_vm0, %v2889_v15, %v2887_v14  ;;  %2917 = vrot.lane.b32.xlu1 %v6296_v16, %s4337_s17 }
 0x15a   :  { %3652 = vst.msk [vmem:[%s8618_s1 + $0x359] sm:$0x8] %vm41_vm1, %v1448_v12   ;;  %3653 = vst.msk [vmem:[%s8618_s1 + $0x298] sm:$0x10] %vm41_vm1, %v1448_v12   ;;  %2892 = vrot.lane.b32.xlu0 %v6299_v17, %s4337_s17  ;;  %v2648_v11 = vpop.permute.xlu0 %2647  }
 0x15b   :  { %3654 = vst.msk [vmem:[%s8618_s1 + $0x397] sm:$0x20] %vm41_vm1, %v1448_v12   ;;  %3655 = vst.msk [vmem:[%s8618_s1 + $0x2d6] sm:$0x40] %vm41_vm1, %v1448_v12  }
 0x15c   :  { %3656 = vst.msk [vmem:[%s8618_s1 + $0x3d5] sm:$0x80] %vm41_vm1, %v1448_v12   ;;  %3641 = vst.msk [vmem:[%s8618_s1 + $0x1c] sm:$0x1] %vm41_vm1, %v1423_v13   ;;  %v2722_v12 = vpop.permute.xlu1 %2721  }
 0x15d   :  { %3642 = vst.msk [vmem:[%s8618_s1 + $0x11b] sm:$0x2] %vm41_vm1, %v1423_v13   ;;  %3643 = vst.msk [vmem:[%s8618_s1 + $0x5a] sm:$0x4] %vm41_vm1, %v1423_v13   ;;  %2966 = vrot.lane.b32.xlu1 %v6296_v16, %s4338_s20 }
 0x15e   :  { %3644 = vst.msk [vmem:[%s8618_s1 + $0x159] sm:$0x8] %vm41_vm1, %v1423_v13   ;;  %3645 = vst.msk [vmem:[%s8618_s1 + $0x98] sm:$0x10] %vm41_vm1, %v1423_v13   ;;  %2941 = vrot.lane.b32.xlu0 %v6299_v17, %s4338_s20 }
 0x15f   :  { %3646 = vst.msk [vmem:[%s8618_s1 + $0x197] sm:$0x20] %vm41_vm1, %v1423_v13   ;;  %3647 = vst.msk [vmem:[%s8618_s1 + $0xd6] sm:$0x40] %vm41_vm1, %v1423_v13  }
 0x160   :  { %3648 = vst.msk [vmem:[%s8618_s1 + $0x1d5] sm:$0x80] %vm41_vm1, %v1423_v13   ;;  %3665 = vst.msk [vmem:[%s8618_s1 + $0x21d] sm:$0x1] %vm41_vm1, %v1497_v18   ;;  %v2697_v13 = vpop.permute.xlu0 %2696   ;;  %v2771_v14 = vpop.permute.xlu1 %2770  }
 0x161   :  { %3666 = vst.msk [vmem:[%s8618_s1 + $0x31c] sm:$0x2] %vm41_vm1, %v1497_v18   ;;  %3667 = vst.msk [vmem:[%s8618_s1 + $0x25b] sm:$0x4] %vm41_vm1, %v1497_v18   ;;  %3015 = vrot.lane.b32.xlu1 %v6296_v16, %s4339_s5 }
 0x162   :  { %3668 = vst.msk [vmem:[%s8618_s1 + $0x35a] sm:$0x8] %vm41_vm1, %v1497_v18   ;;  %3669 = vst.msk [vmem:[%s8618_s1 + $0x299] sm:$0x10] %vm41_vm1, %v1497_v18   ;;  %2990 = vrot.lane.b32.xlu0 %v6299_v17, %s4339_s5 }
 0x163   :  { %3670 = vst.msk [vmem:[%s8618_s1 + $0x398] sm:$0x20] %vm41_vm1, %v1497_v18   ;;  %3671 = vst.msk [vmem:[%s8618_s1 + $0x2d7] sm:$0x40] %vm41_vm1, %v1497_v18  }
 0x164   :  { %3672 = vst.msk [vmem:[%s8618_s1 + $0x3d6] sm:$0x80] %vm41_vm1, %v1497_v18   ;;  %3657 = vst.msk [vmem:[%s8618_s1 + $0x1d] sm:$0x1] %vm41_vm1, %v1472_v19   ;;  %v2746_v15 = vpop.permute.xlu0 %2745  }
 0x165   :  { %3658 = vst.msk [vmem:[%s8618_s1 + $0x11c] sm:$0x2] %vm41_vm1, %v1472_v19   ;;  %3659 = vst.msk [vmem:[%s8618_s1 + $0x5b] sm:$0x4] %vm41_vm1, %v1472_v19   ;;  %3064 = vrot.lane.b32.xlu1 %v6296_v16, %s4340_s27 }
 0x166   :  { %3660 = vst.msk [vmem:[%s8618_s1 + $0x15a] sm:$0x8] %vm41_vm1, %v1472_v19   ;;  %3661 = vst.msk [vmem:[%s8618_s1 + $0x99] sm:$0x10] %vm41_vm1, %v1472_v19   ;;  %3039 = vrot.lane.b32.xlu0 %v6299_v17, %s4340_s27 }
 0x167   :  { %3662 = vst.msk [vmem:[%s8618_s1 + $0x198] sm:$0x20] %vm41_vm1, %v1472_v19   ;;  %3663 = vst.msk [vmem:[%s8618_s1 + $0xd7] sm:$0x40] %vm41_vm1, %v1472_v19  }
 0x168   :  { %3664 = vst.msk [vmem:[%s8618_s1 + $0x1d6] sm:$0x80] %vm41_vm1, %v1472_v19   ;;  %3681 = vst.msk [vmem:[%s8618_s1 + $0x21e] sm:$0x1] %vm41_vm1, %v1546_v20  }
 0x169   :  { %3682 = vst.msk [vmem:[%s8618_s1 + $0x31d] sm:$0x2] %vm41_vm1, %v1546_v20   ;;  %3683 = vst.msk [vmem:[%s8618_s1 + $0x25c] sm:$0x4] %vm41_vm1, %v1546_v20   ;;  %3113 = vrot.lane.b32.xlu1 %v6296_v16, %s4341_s30 }
 0x16a   :  { %3684 = vst.msk [vmem:[%s8618_s1 + $0x35b] sm:$0x8] %vm41_vm1, %v1546_v20   ;;  %3685 = vst.msk [vmem:[%s8618_s1 + $0x29a] sm:$0x10] %vm41_vm1, %v1546_v20   ;;  %3088 = vrot.lane.b32.xlu0 %v6299_v17, %s4341_s30 }
 0x16b   :  { %3686 = vst.msk [vmem:[%s8618_s1 + $0x399] sm:$0x20] %vm41_vm1, %v1546_v20   ;;  %3687 = vst.msk [vmem:[%s8618_s1 + $0x2d8] sm:$0x40] %vm41_vm1, %v1546_v20  }
 0x16c   :  { %3688 = vst.msk [vmem:[%s8618_s1 + $0x3d7] sm:$0x80] %vm41_vm1, %v1546_v20   ;;  %3673 = vst.msk [vmem:[%s8618_s1 + $0x1e] sm:$0x1] %vm41_vm1, %v1521_v21  }
 0x16d   :  { %3674 = vst.msk [vmem:[%s8618_s1 + $0x11d] sm:$0x2] %vm41_vm1, %v1521_v21   ;;  %3675 = vst.msk [vmem:[%s8618_s1 + $0x5c] sm:$0x4] %vm41_vm1, %v1521_v21   ;;  %3162 = vrot.lane.b32.xlu1 %v6296_v16, %s4342_s4  ;;  %v2820_v16 = vpop.permute.xlu1 %2819  }
 0x16e   :  { %3676 = vst.msk [vmem:[%s8618_s1 + $0x15b] sm:$0x8] %vm41_vm1, %v1521_v21   ;;  %3677 = vst.msk [vmem:[%s8618_s1 + $0x9a] sm:$0x10] %vm41_vm1, %v1521_v21   ;;  %3137 = vrot.lane.b32.xlu0 %v6299_v17, %s4342_s4  ;;  %v2795_v17 = vpop.permute.xlu0 %2794  }
 0x16f   :  { %3678 = vst.msk [vmem:[%s8618_s1 + $0x199] sm:$0x20] %vm41_vm1, %v1521_v21   ;;  %3679 = vst.msk [vmem:[%s8618_s1 + $0xd8] sm:$0x40] %vm41_vm1, %v1521_v21  }
 0x170   :  { %3680 = vst.msk [vmem:[%s8618_s1 + $0x1d7] sm:$0x80] %vm41_vm1, %v1521_v21   ;;  %3697 = vst.msk [vmem:[%s8618_s1 + $0x21f] sm:$0x1] %vm41_vm1, %v1595_v22  }
 0x171   :  { %3698 = vst.msk [vmem:[%s8618_s1 + $0x31e] sm:$0x2] %vm41_vm1, %v1595_v22   ;;  %3699 = vst.msk [vmem:[%s8618_s1 + $0x25d] sm:$0x4] %vm41_vm1, %v1595_v22   ;;  %v2869_v18 = vpop.permute.xlu1 %2868  }
 0x172   :  { %3700 = vst.msk [vmem:[%s8618_s1 + $0x35c] sm:$0x8] %vm41_vm1, %v1595_v22   ;;  %3701 = vst.msk [vmem:[%s8618_s1 + $0x29b] sm:$0x10] %vm41_vm1, %v1595_v22   ;;  %v2844_v19 = vpop.permute.xlu0 %2843  }
 0x173   :  { %3702 = vst.msk [vmem:[%s8618_s1 + $0x39a] sm:$0x20] %vm41_vm1, %v1595_v22   ;;  %3703 = vst.msk [vmem:[%s8618_s1 + $0x2d9] sm:$0x40] %vm41_vm1, %v1595_v22  }
 0x174   :  { %3704 = vst.msk [vmem:[%s8618_s1 + $0x3d8] sm:$0x80] %vm41_vm1, %v1595_v22   ;;  %3689 = vst.msk [vmem:[%s8618_s1 + $0x1f] sm:$0x1] %vm41_vm1, %v1570_v23  }
 0x175   :  { %3690 = vst.msk [vmem:[%s8618_s1 + $0x11e] sm:$0x2] %vm41_vm1, %v1570_v23   ;;  %3691 = vst.msk [vmem:[%s8618_s1 + $0x5d] sm:$0x4] %vm41_vm1, %v1570_v23  }
 0x176   :  { %3692 = vst.msk [vmem:[%s8618_s1 + $0x15c] sm:$0x8] %vm41_vm1, %v1570_v23   ;;  %3693 = vst.msk [vmem:[%s8618_s1 + $0x9b] sm:$0x10] %vm41_vm1, %v1570_v23  }
 0x177   :  { %3694 = vst.msk [vmem:[%s8618_s1 + $0x19a] sm:$0x20] %vm41_vm1, %v1570_v23   ;;  %3695 = vst.msk [vmem:[%s8618_s1 + $0xd9] sm:$0x40] %vm41_vm1, %v1570_v23  }
 0x178   :  { %3696 = vst.msk [vmem:[%s8618_s1 + $0x1d8] sm:$0x80] %vm41_vm1, %v1570_v23   ;;  %42 = vst.msk [vmem:[%s8618_s1] sm:$0x1] %vm41_vm1, %v40_v24  }
 0x179   :  { %3194 = vst.msk [vmem:[%s8618_s1 + $0xff] sm:$0x2] %vm41_vm1, %v40_v24   ;;  %3195 = vst.msk [vmem:[%s8618_s1 + $0x40] sm:$0x1] %vm41_vm1, %v46_v25  }
 0x17a   :  { %3196 = vst.msk [vmem:[%s8618_s1 + $0x13f] sm:$0x2] %vm41_vm1, %v46_v25   ;;  %3197 = vst.msk [vmem:[%s8618_s1 + $0x80] sm:$0x1] %vm41_vm1, %v53_v26  }
 0x17b   :  { %3198 = vst.msk [vmem:[%s8618_s1 + $0x17f] sm:$0x2] %vm41_vm1, %v53_v26   ;;  %3199 = vst.msk [vmem:[%s8618_s1 + $0xc0] sm:$0x1] %vm41_vm1, %v60_v27  }
 0x17c   :  { %3200 = vst.msk [vmem:[%s8618_s1 + $0x1bf] sm:$0x2] %vm41_vm1, %v60_v27   ;;  %3201 = vst.msk [vmem:[%s8618_s1 + $0x200] sm:$0x1] %vm41_vm1, %v67_v28  }
 0x17d   :  { %3202 = vst.msk [vmem:[%s8618_s1 + $0x2ff] sm:$0x2] %vm41_vm1, %v67_v28   ;;  %3203 = vst.msk [vmem:[%s8618_s1 + $0x240] sm:$0x1] %vm41_vm1, %v74_v29  }
 0x17e   :  { %3204 = vst.msk [vmem:[%s8618_s1 + $0x33f] sm:$0x2] %vm41_vm1, %v74_v29   ;;  %3713 = vst.msk [vmem:[%s8618_s1 + $0x220] sm:$0x1] %vm41_vm1, %v1644_v32  }
 0x17f   :  { %3714 = vst.msk [vmem:[%s8618_s1 + $0x31f] sm:$0x2] %vm41_vm1, %v1644_v32   ;;  %3715 = vst.msk [vmem:[%s8618_s1 + $0x25e] sm:$0x4] %vm41_vm1, %v1644_v32  }
 0x180   :  { %3716 = vst.msk [vmem:[%s8618_s1 + $0x35d] sm:$0x8] %vm41_vm1, %v1644_v32   ;;  %3717 = vst.msk [vmem:[%s8618_s1 + $0x29c] sm:$0x10] %vm41_vm1, %v1644_v32  }
 0x181   :  { %3718 = vst.msk [vmem:[%s8618_s1 + $0x39b] sm:$0x20] %vm41_vm1, %v1644_v32   ;;  %3719 = vst.msk [vmem:[%s8618_s1 + $0x2da] sm:$0x40] %vm41_vm1, %v1644_v32  }
 0x182   :  { %3720 = vst.msk [vmem:[%s8618_s1 + $0x3d9] sm:$0x80] %vm41_vm1, %v1644_v32   ;;  %3705 = vst.msk [vmem:[%s8618_s1 + $0x20] sm:$0x1] %vm41_vm1, %v1619_v33  }
 0x183   :  { %3706 = vst.msk [vmem:[%s8618_s1 + $0x11f] sm:$0x2] %vm41_vm1, %v1619_v33   ;;  %3707 = vst.msk [vmem:[%s8618_s1 + $0x5e] sm:$0x4] %vm41_vm1, %v1619_v33  }
 0x184   :  { %3708 = vst.msk [vmem:[%s8618_s1 + $0x15d] sm:$0x8] %vm41_vm1, %v1619_v33   ;;  %3709 = vst.msk [vmem:[%s8618_s1 + $0x9c] sm:$0x10] %vm41_vm1, %v1619_v33  }
 0x185   :  { %3710 = vst.msk [vmem:[%s8618_s1 + $0x19b] sm:$0x20] %vm41_vm1, %v1619_v33   ;;  %3711 = vst.msk [vmem:[%s8618_s1 + $0xda] sm:$0x40] %vm41_vm1, %v1619_v33  }
 0x186   :  { %3712 = vst.msk [vmem:[%s8618_s1 + $0x1d9] sm:$0x80] %vm41_vm1, %v1619_v33   ;;  %3729 = vst.msk [vmem:[%s8618_s1 + $0x221] sm:$0x1] %vm41_vm1, %v1693_v34  }
 0x187   :  { %3730 = vst.msk [vmem:[%s8618_s1 + $0x320] sm:$0x2] %vm41_vm1, %v1693_v34   ;;  %3731 = vst.msk [vmem:[%s8618_s1 + $0x25f] sm:$0x4] %vm41_vm1, %v1693_v34  }
 0x188   :  { %3732 = vst.msk [vmem:[%s8618_s1 + $0x35e] sm:$0x8] %vm41_vm1, %v1693_v34   ;;  %3733 = vst.msk [vmem:[%s8618_s1 + $0x29d] sm:$0x10] %vm41_vm1, %v1693_v34  }
 0x189   :  { %3734 = vst.msk [vmem:[%s8618_s1 + $0x39c] sm:$0x20] %vm41_vm1, %v1693_v34   ;;  %3735 = vst.msk [vmem:[%s8618_s1 + $0x2db] sm:$0x40] %vm41_vm1, %v1693_v34  }
 0x18a   :  { %3736 = vst.msk [vmem:[%s8618_s1 + $0x3da] sm:$0x80] %vm41_vm1, %v1693_v34   ;;  %3721 = vst.msk [vmem:[%s8618_s1 + $0x21] sm:$0x1] %vm41_vm1, %v1668_v35  }
 0x18b   :  { %3722 = vst.msk [vmem:[%s8618_s1 + $0x120] sm:$0x2] %vm41_vm1, %v1668_v35   ;;  %3723 = vst.msk [vmem:[%s8618_s1 + $0x5f] sm:$0x4] %vm41_vm1, %v1668_v35  }
 0x18c   :  { %3724 = vst.msk [vmem:[%s8618_s1 + $0x15e] sm:$0x8] %vm41_vm1, %v1668_v35   ;;  %3725 = vst.msk [vmem:[%s8618_s1 + $0x9d] sm:$0x10] %vm41_vm1, %v1668_v35  }
 0x18d   :  { %3726 = vst.msk [vmem:[%s8618_s1 + $0x19c] sm:$0x20] %vm41_vm1, %v1668_v35   ;;  %3727 = vst.msk [vmem:[%s8618_s1 + $0xdb] sm:$0x40] %vm41_vm1, %v1668_v35  }
 0x18e   :  { %3728 = vst.msk [vmem:[%s8618_s1 + $0x1da] sm:$0x80] %vm41_vm1, %v1668_v35   ;;  %3745 = vst.msk [vmem:[%s8618_s1 + $0x222] sm:$0x1] %vm41_vm1, %v1742_v36  }
 0x18f   :  { %3746 = vst.msk [vmem:[%s8618_s1 + $0x321] sm:$0x2] %vm41_vm1, %v1742_v36   ;;  %3747 = vst.msk [vmem:[%s8618_s1 + $0x260] sm:$0x4] %vm41_vm1, %v1742_v36  }
 0x190   :  { %3748 = vst.msk [vmem:[%s8618_s1 + $0x35f] sm:$0x8] %vm41_vm1, %v1742_v36   ;;  %3749 = vst.msk [vmem:[%s8618_s1 + $0x29e] sm:$0x10] %vm41_vm1, %v1742_v36  }
 0x191   :  { %3750 = vst.msk [vmem:[%s8618_s1 + $0x39d] sm:$0x20] %vm41_vm1, %v1742_v36   ;;  %3751 = vst.msk [vmem:[%s8618_s1 + $0x2dc] sm:$0x40] %vm41_vm1, %v1742_v36  }
 0x192   :  { %3752 = vst.msk [vmem:[%s8618_s1 + $0x3db] sm:$0x80] %vm41_vm1, %v1742_v36   ;;  %3737 = vst.msk [vmem:[%s8618_s1 + $0x22] sm:$0x1] %vm41_vm1, %v1717_v37  }
 0x193   :  { %3738 = vst.msk [vmem:[%s8618_s1 + $0x121] sm:$0x2] %vm41_vm1, %v1717_v37   ;;  %3739 = vst.msk [vmem:[%s8618_s1 + $0x60] sm:$0x4] %vm41_vm1, %v1717_v37  }
 0x194   :  { %3740 = vst.msk [vmem:[%s8618_s1 + $0x15f] sm:$0x8] %vm41_vm1, %v1717_v37   ;;  %3741 = vst.msk [vmem:[%s8618_s1 + $0x9e] sm:$0x10] %vm41_vm1, %v1717_v37  }
 0x195   :  { %3742 = vst.msk [vmem:[%s8618_s1 + $0x19d] sm:$0x20] %vm41_vm1, %v1717_v37   ;;  %3743 = vst.msk [vmem:[%s8618_s1 + $0xdc] sm:$0x40] %vm41_vm1, %v1717_v37  }
 0x196   :  { %3744 = vst.msk [vmem:[%s8618_s1 + $0x1db] sm:$0x80] %vm41_vm1, %v1717_v37   ;;  %3761 = vst.msk [vmem:[%s8618_s1 + $0x223] sm:$0x1] %vm41_vm1, %v1791_v38  }
 0x197   :  { %3762 = vst.msk [vmem:[%s8618_s1 + $0x322] sm:$0x2] %vm41_vm1, %v1791_v38   ;;  %3763 = vst.msk [vmem:[%s8618_s1 + $0x261] sm:$0x4] %vm41_vm1, %v1791_v38  }
 0x198   :  { %3764 = vst.msk [vmem:[%s8618_s1 + $0x360] sm:$0x8] %vm41_vm1, %v1791_v38   ;;  %3765 = vst.msk [vmem:[%s8618_s1 + $0x29f] sm:$0x10] %vm41_vm1, %v1791_v38  }
 0x199   :  { %3766 = vst.msk [vmem:[%s8618_s1 + $0x39e] sm:$0x20] %vm41_vm1, %v1791_v38   ;;  %3767 = vst.msk [vmem:[%s8618_s1 + $0x2dd] sm:$0x40] %vm41_vm1, %v1791_v38  }
 0x19a   :  { %3768 = vst.msk [vmem:[%s8618_s1 + $0x3dc] sm:$0x80] %vm41_vm1, %v1791_v38   ;;  %3753 = vst.msk [vmem:[%s8618_s1 + $0x23] sm:$0x1] %vm41_vm1, %v1766_v39  }
 0x19b   :  { %3754 = vst.msk [vmem:[%s8618_s1 + $0x122] sm:$0x2] %vm41_vm1, %v1766_v39   ;;  %3755 = vst.msk [vmem:[%s8618_s1 + $0x61] sm:$0x4] %vm41_vm1, %v1766_v39  }
 0x19c   :  { %3756 = vst.msk [vmem:[%s8618_s1 + $0x160] sm:$0x8] %vm41_vm1, %v1766_v39   ;;  %3757 = vst.msk [vmem:[%s8618_s1 + $0x9f] sm:$0x10] %vm41_vm1, %v1766_v39  }
 0x19d   :  { %3758 = vst.msk [vmem:[%s8618_s1 + $0x19e] sm:$0x20] %vm41_vm1, %v1766_v39   ;;  %3759 = vst.msk [vmem:[%s8618_s1 + $0xdd] sm:$0x40] %vm41_vm1, %v1766_v39  }
 0x19e   :  { %3760 = vst.msk [vmem:[%s8618_s1 + $0x1dc] sm:$0x80] %vm41_vm1, %v1766_v39   ;;  %3777 = vst.msk [vmem:[%s8618_s1 + $0x224] sm:$0x1] %vm41_vm1, %v1840_v40  }
 0x19f   :  { %3778 = vst.msk [vmem:[%s8618_s1 + $0x323] sm:$0x2] %vm41_vm1, %v1840_v40   ;;  %3779 = vst.msk [vmem:[%s8618_s1 + $0x262] sm:$0x4] %vm41_vm1, %v1840_v40  }
 0x1a0   :  { %3780 = vst.msk [vmem:[%s8618_s1 + $0x361] sm:$0x8] %vm41_vm1, %v1840_v40   ;;  %3781 = vst.msk [vmem:[%s8618_s1 + $0x2a0] sm:$0x10] %vm41_vm1, %v1840_v40  }
 0x1a1   :  { %3782 = vst.msk [vmem:[%s8618_s1 + $0x39f] sm:$0x20] %vm41_vm1, %v1840_v40   ;;  %3783 = vst.msk [vmem:[%s8618_s1 + $0x2de] sm:$0x40] %vm41_vm1, %v1840_v40  }
 0x1a2   :  { %3784 = vst.msk [vmem:[%s8618_s1 + $0x3dd] sm:$0x80] %vm41_vm1, %v1840_v40   ;;  %3769 = vst.msk [vmem:[%s8618_s1 + $0x24] sm:$0x1] %vm41_vm1, %v1815_v41  }
 0x1a3   :  { %3770 = vst.msk [vmem:[%s8618_s1 + $0x123] sm:$0x2] %vm41_vm1, %v1815_v41   ;;  %3771 = vst.msk [vmem:[%s8618_s1 + $0x62] sm:$0x4] %vm41_vm1, %v1815_v41  }
 0x1a4   :  { %3772 = vst.msk [vmem:[%s8618_s1 + $0x161] sm:$0x8] %vm41_vm1, %v1815_v41   ;;  %3773 = vst.msk [vmem:[%s8618_s1 + $0xa0] sm:$0x10] %vm41_vm1, %v1815_v41  }
 0x1a5   :  { %3774 = vst.msk [vmem:[%s8618_s1 + $0x19f] sm:$0x20] %vm41_vm1, %v1815_v41   ;;  %3775 = vst.msk [vmem:[%s8618_s1 + $0xde] sm:$0x40] %vm41_vm1, %v1815_v41  }
 0x1a6   :  { %3776 = vst.msk [vmem:[%s8618_s1 + $0x1dd] sm:$0x80] %vm41_vm1, %v1815_v41   ;;  %3793 = vst.msk [vmem:[%s8618_s1 + $0x225] sm:$0x1] %vm41_vm1, %v1889_v42  }
 0x1a7   :  { %3794 = vst.msk [vmem:[%s8618_s1 + $0x324] sm:$0x2] %vm41_vm1, %v1889_v42   ;;  %3795 = vst.msk [vmem:[%s8618_s1 + $0x263] sm:$0x4] %vm41_vm1, %v1889_v42  }
 0x1a8   :  { %3796 = vst.msk [vmem:[%s8618_s1 + $0x362] sm:$0x8] %vm41_vm1, %v1889_v42   ;;  %3797 = vst.msk [vmem:[%s8618_s1 + $0x2a1] sm:$0x10] %vm41_vm1, %v1889_v42  }
 0x1a9   :  { %3798 = vst.msk [vmem:[%s8618_s1 + $0x3a0] sm:$0x20] %vm41_vm1, %v1889_v42   ;;  %3799 = vst.msk [vmem:[%s8618_s1 + $0x2df] sm:$0x40] %vm41_vm1, %v1889_v42  }
 0x1aa   :  { %3800 = vst.msk [vmem:[%s8618_s1 + $0x3de] sm:$0x80] %vm41_vm1, %v1889_v42   ;;  %3785 = vst.msk [vmem:[%s8618_s1 + $0x25] sm:$0x1] %vm41_vm1, %v1864_v43  }
 0x1ab   :  { %3786 = vst.msk [vmem:[%s8618_s1 + $0x124] sm:$0x2] %vm41_vm1, %v1864_v43   ;;  %3787 = vst.msk [vmem:[%s8618_s1 + $0x63] sm:$0x4] %vm41_vm1, %v1864_v43  }
 0x1ac   :  { %3788 = vst.msk [vmem:[%s8618_s1 + $0x162] sm:$0x8] %vm41_vm1, %v1864_v43   ;;  %3789 = vst.msk [vmem:[%s8618_s1 + $0xa1] sm:$0x10] %vm41_vm1, %v1864_v43  }
 0x1ad   :  { %3790 = vst.msk [vmem:[%s8618_s1 + $0x1a0] sm:$0x20] %vm41_vm1, %v1864_v43   ;;  %3791 = vst.msk [vmem:[%s8618_s1 + $0xdf] sm:$0x40] %vm41_vm1, %v1864_v43  }
 0x1ae   :  { %3792 = vst.msk [vmem:[%s8618_s1 + $0x1de] sm:$0x80] %vm41_vm1, %v1864_v43   ;;  %3809 = vst.msk [vmem:[%s8618_s1 + $0x226] sm:$0x1] %vm41_vm1, %v1938_v44  }
 0x1af   :  { %3810 = vst.msk [vmem:[%s8618_s1 + $0x325] sm:$0x2] %vm41_vm1, %v1938_v44   ;;  %3811 = vst.msk [vmem:[%s8618_s1 + $0x264] sm:$0x4] %vm41_vm1, %v1938_v44  }
 0x1b0   :  { %3812 = vst.msk [vmem:[%s8618_s1 + $0x363] sm:$0x8] %vm41_vm1, %v1938_v44   ;;  %3813 = vst.msk [vmem:[%s8618_s1 + $0x2a2] sm:$0x10] %vm41_vm1, %v1938_v44  }
 0x1b1   :  { %3814 = vst.msk [vmem:[%s8618_s1 + $0x3a1] sm:$0x20] %vm41_vm1, %v1938_v44   ;;  %3815 = vst.msk [vmem:[%s8618_s1 + $0x2e0] sm:$0x40] %vm41_vm1, %v1938_v44  }
 0x1b2   :  { %3816 = vst.msk [vmem:[%s8618_s1 + $0x3df] sm:$0x80] %vm41_vm1, %v1938_v44   ;;  %3801 = vst.msk [vmem:[%s8618_s1 + $0x26] sm:$0x1] %vm41_vm1, %v1913_v45  }
 0x1b3   :  { %3802 = vst.msk [vmem:[%s8618_s1 + $0x125] sm:$0x2] %vm41_vm1, %v1913_v45   ;;  %3803 = vst.msk [vmem:[%s8618_s1 + $0x64] sm:$0x4] %vm41_vm1, %v1913_v45  }
 0x1b4   :  { %3804 = vst.msk [vmem:[%s8618_s1 + $0x163] sm:$0x8] %vm41_vm1, %v1913_v45   ;;  %3805 = vst.msk [vmem:[%s8618_s1 + $0xa2] sm:$0x10] %vm41_vm1, %v1913_v45  }
 0x1b5   :  { %3806 = vst.msk [vmem:[%s8618_s1 + $0x1a1] sm:$0x20] %vm41_vm1, %v1913_v45   ;;  %3807 = vst.msk [vmem:[%s8618_s1 + $0xe0] sm:$0x40] %vm41_vm1, %v1913_v45  }
 0x1b6   :  { %3808 = vst.msk [vmem:[%s8618_s1 + $0x1df] sm:$0x80] %vm41_vm1, %v1913_v45   ;;  %3825 = vst.msk [vmem:[%s8618_s1 + $0x227] sm:$0x1] %vm41_vm1, %v1987_v46  }
 0x1b7   :  { %3826 = vst.msk [vmem:[%s8618_s1 + $0x326] sm:$0x2] %vm41_vm1, %v1987_v46   ;;  %3827 = vst.msk [vmem:[%s8618_s1 + $0x265] sm:$0x4] %vm41_vm1, %v1987_v46  }
 0x1b8   :  { %3828 = vst.msk [vmem:[%s8618_s1 + $0x364] sm:$0x8] %vm41_vm1, %v1987_v46   ;;  %3829 = vst.msk [vmem:[%s8618_s1 + $0x2a3] sm:$0x10] %vm41_vm1, %v1987_v46  }
 0x1b9   :  { %3830 = vst.msk [vmem:[%s8618_s1 + $0x3a2] sm:$0x20] %vm41_vm1, %v1987_v46   ;;  %3831 = vst.msk [vmem:[%s8618_s1 + $0x2e1] sm:$0x40] %vm41_vm1, %v1987_v46  }
 0x1ba   :  { %3832 = vst.msk [vmem:[%s8618_s1 + $0x3e0] sm:$0x80] %vm41_vm1, %v1987_v46   ;;  %3817 = vst.msk [vmem:[%s8618_s1 + $0x27] sm:$0x1] %vm41_vm1, %v1962_v47  }
 0x1bb   :  { %3818 = vst.msk [vmem:[%s8618_s1 + $0x126] sm:$0x2] %vm41_vm1, %v1962_v47   ;;  %3819 = vst.msk [vmem:[%s8618_s1 + $0x65] sm:$0x4] %vm41_vm1, %v1962_v47  }
 0x1bc   :  { %3820 = vst.msk [vmem:[%s8618_s1 + $0x164] sm:$0x8] %vm41_vm1, %v1962_v47   ;;  %3821 = vst.msk [vmem:[%s8618_s1 + $0xa3] sm:$0x10] %vm41_vm1, %v1962_v47  }
 0x1bd   :  { %3822 = vst.msk [vmem:[%s8618_s1 + $0x1a2] sm:$0x20] %vm41_vm1, %v1962_v47   ;;  %3823 = vst.msk [vmem:[%s8618_s1 + $0xe1] sm:$0x40] %vm41_vm1, %v1962_v47  }
 0x1be   :  { %3824 = vst.msk [vmem:[%s8618_s1 + $0x1e0] sm:$0x80] %vm41_vm1, %v1962_v47   ;;  %3841 = vst.msk [vmem:[%s8618_s1 + $0x228] sm:$0x1] %vm41_vm1, %v2036_v48  }
 0x1bf   :  { %3842 = vst.msk [vmem:[%s8618_s1 + $0x327] sm:$0x2] %vm41_vm1, %v2036_v48   ;;  %3843 = vst.msk [vmem:[%s8618_s1 + $0x266] sm:$0x4] %vm41_vm1, %v2036_v48  }
 0x1c0   :  { %3844 = vst.msk [vmem:[%s8618_s1 + $0x365] sm:$0x8] %vm41_vm1, %v2036_v48   ;;  %3845 = vst.msk [vmem:[%s8618_s1 + $0x2a4] sm:$0x10] %vm41_vm1, %v2036_v48  }
 0x1c1   :  { %3846 = vst.msk [vmem:[%s8618_s1 + $0x3a3] sm:$0x20] %vm41_vm1, %v2036_v48   ;;  %3847 = vst.msk [vmem:[%s8618_s1 + $0x2e2] sm:$0x40] %vm41_vm1, %v2036_v48  }
 0x1c2   :  { %3848 = vst.msk [vmem:[%s8618_s1 + $0x3e1] sm:$0x80] %vm41_vm1, %v2036_v48   ;;  %3833 = vst.msk [vmem:[%s8618_s1 + $0x28] sm:$0x1] %vm41_vm1, %v2011_v49  }
 0x1c3   :  { %3834 = vst.msk [vmem:[%s8618_s1 + $0x127] sm:$0x2] %vm41_vm1, %v2011_v49   ;;  %3835 = vst.msk [vmem:[%s8618_s1 + $0x66] sm:$0x4] %vm41_vm1, %v2011_v49  }
 0x1c4   :  { %3836 = vst.msk [vmem:[%s8618_s1 + $0x165] sm:$0x8] %vm41_vm1, %v2011_v49   ;;  %3837 = vst.msk [vmem:[%s8618_s1 + $0xa4] sm:$0x10] %vm41_vm1, %v2011_v49  }
 0x1c5   :  { %3838 = vst.msk [vmem:[%s8618_s1 + $0x1a3] sm:$0x20] %vm41_vm1, %v2011_v49   ;;  %3839 = vst.msk [vmem:[%s8618_s1 + $0xe2] sm:$0x40] %vm41_vm1, %v2011_v49  }
 0x1c6   :  { %3840 = vst.msk [vmem:[%s8618_s1 + $0x1e1] sm:$0x80] %vm41_vm1, %v2011_v49   ;;  %3857 = vst.msk [vmem:[%s8618_s1 + $0x229] sm:$0x1] %vm41_vm1, %v2085_v50  }
 0x1c7   :  { %3858 = vst.msk [vmem:[%s8618_s1 + $0x328] sm:$0x2] %vm41_vm1, %v2085_v50   ;;  %3859 = vst.msk [vmem:[%s8618_s1 + $0x267] sm:$0x4] %vm41_vm1, %v2085_v50  }
 0x1c8   :  { %3860 = vst.msk [vmem:[%s8618_s1 + $0x366] sm:$0x8] %vm41_vm1, %v2085_v50   ;;  %3861 = vst.msk [vmem:[%s8618_s1 + $0x2a5] sm:$0x10] %vm41_vm1, %v2085_v50  }
 0x1c9   :  { %3862 = vst.msk [vmem:[%s8618_s1 + $0x3a4] sm:$0x20] %vm41_vm1, %v2085_v50   ;;  %3863 = vst.msk [vmem:[%s8618_s1 + $0x2e3] sm:$0x40] %vm41_vm1, %v2085_v50  }
 0x1ca   :  { %3864 = vst.msk [vmem:[%s8618_s1 + $0x3e2] sm:$0x80] %vm41_vm1, %v2085_v50   ;;  %3849 = vst.msk [vmem:[%s8618_s1 + $0x29] sm:$0x1] %vm41_vm1, %v2060_v51  }
 0x1cb   :  { %3850 = vst.msk [vmem:[%s8618_s1 + $0x128] sm:$0x2] %vm41_vm1, %v2060_v51   ;;  %3851 = vst.msk [vmem:[%s8618_s1 + $0x67] sm:$0x4] %vm41_vm1, %v2060_v51   ;;  %v2918_v20 = vpop.permute.xlu1 %2917  }
 0x1cc   :  { %3852 = vst.msk [vmem:[%s8618_s1 + $0x166] sm:$0x8] %vm41_vm1, %v2060_v51   ;;  %3853 = vst.msk [vmem:[%s8618_s1 + $0xa5] sm:$0x10] %vm41_vm1, %v2060_v51   ;;  %v2893_v21 = vpop.permute.xlu0 %2892  }
 0x1cd   :  { %3854 = vst.msk [vmem:[%s8618_s1 + $0x1a4] sm:$0x20] %vm41_vm1, %v2060_v51   ;;  %3855 = vst.msk [vmem:[%s8618_s1 + $0xe3] sm:$0x40] %vm41_vm1, %v2060_v51  }
 0x1ce   :  { %3856 = vst.msk [vmem:[%s8618_s1 + $0x1e2] sm:$0x80] %vm41_vm1, %v2060_v51   ;;  %3873 = vst.msk [vmem:[%s8618_s1 + $0x22a] sm:$0x1] %vm41_vm1, %v2134_v52  }
 0x1cf   :  { %3874 = vst.msk [vmem:[%s8618_s1 + $0x329] sm:$0x2] %vm41_vm1, %v2134_v52   ;;  %3875 = vst.msk [vmem:[%s8618_s1 + $0x268] sm:$0x4] %vm41_vm1, %v2134_v52   ;;  %v2967_v22 = vpop.permute.xlu1 %2966  }
 0x1d0   :  { %3876 = vst.msk [vmem:[%s8618_s1 + $0x367] sm:$0x8] %vm41_vm1, %v2134_v52   ;;  %3877 = vst.msk [vmem:[%s8618_s1 + $0x2a6] sm:$0x10] %vm41_vm1, %v2134_v52   ;;  %v2942_v23 = vpop.permute.xlu0 %2941  }
 0x1d1   :  { %3878 = vst.msk [vmem:[%s8618_s1 + $0x3a5] sm:$0x20] %vm41_vm1, %v2134_v52   ;;  %3879 = vst.msk [vmem:[%s8618_s1 + $0x2e4] sm:$0x40] %vm41_vm1, %v2134_v52  }
 0x1d2   :  { %3880 = vst.msk [vmem:[%s8618_s1 + $0x3e3] sm:$0x80] %vm41_vm1, %v2134_v52   ;;  %3865 = vst.msk [vmem:[%s8618_s1 + $0x2a] sm:$0x1] %vm41_vm1, %v2109_v53  }
 0x1d3   :  { %3866 = vst.msk [vmem:[%s8618_s1 + $0x129] sm:$0x2] %vm41_vm1, %v2109_v53   ;;  %3867 = vst.msk [vmem:[%s8618_s1 + $0x68] sm:$0x4] %vm41_vm1, %v2109_v53   ;;  %v3016_v24 = vpop.permute.xlu1 %3015  }
 0x1d4   :  { %3868 = vst.msk [vmem:[%s8618_s1 + $0x167] sm:$0x8] %vm41_vm1, %v2109_v53   ;;  %3869 = vst.msk [vmem:[%s8618_s1 + $0xa6] sm:$0x10] %vm41_vm1, %v2109_v53   ;;  %v2991_v25 = vpop.permute.xlu0 %2990  }
 0x1d5   :  { %3870 = vst.msk [vmem:[%s8618_s1 + $0x1a5] sm:$0x20] %vm41_vm1, %v2109_v53   ;;  %3871 = vst.msk [vmem:[%s8618_s1 + $0xe4] sm:$0x40] %vm41_vm1, %v2109_v53  }
 0x1d6   :  { %3872 = vst.msk [vmem:[%s8618_s1 + $0x1e3] sm:$0x80] %vm41_vm1, %v2109_v53   ;;  %3889 = vst.msk [vmem:[%s8618_s1 + $0x22b] sm:$0x1] %vm41_vm1, %v2183_v54  }
 0x1d7   :  { %3890 = vst.msk [vmem:[%s8618_s1 + $0x32a] sm:$0x2] %vm41_vm1, %v2183_v54   ;;  %3891 = vst.msk [vmem:[%s8618_s1 + $0x269] sm:$0x4] %vm41_vm1, %v2183_v54   ;;  %v3065_v26 = vpop.permute.xlu1 %3064  }
 0x1d8   :  { %3892 = vst.msk [vmem:[%s8618_s1 + $0x368] sm:$0x8] %vm41_vm1, %v2183_v54   ;;  %3893 = vst.msk [vmem:[%s8618_s1 + $0x2a7] sm:$0x10] %vm41_vm1, %v2183_v54   ;;  %v3040_v27 = vpop.permute.xlu0 %3039  }
 0x1d9   :  { %3894 = vst.msk [vmem:[%s8618_s1 + $0x3a6] sm:$0x20] %vm41_vm1, %v2183_v54   ;;  %3895 = vst.msk [vmem:[%s8618_s1 + $0x2e5] sm:$0x40] %vm41_vm1, %v2183_v54  }
 0x1da   :  { %3896 = vst.msk [vmem:[%s8618_s1 + $0x3e4] sm:$0x80] %vm41_vm1, %v2183_v54   ;;  %3881 = vst.msk [vmem:[%s8618_s1 + $0x2b] sm:$0x1] %vm41_vm1, %v2158_v55  }
 0x1db   :  { %3882 = vst.msk [vmem:[%s8618_s1 + $0x12a] sm:$0x2] %vm41_vm1, %v2158_v55   ;;  %3883 = vst.msk [vmem:[%s8618_s1 + $0x69] sm:$0x4] %vm41_vm1, %v2158_v55   ;;  %v3114_v28 = vpop.permute.xlu1 %3113  }
 0x1dc   :  { %3884 = vst.msk [vmem:[%s8618_s1 + $0x168] sm:$0x8] %vm41_vm1, %v2158_v55   ;;  %3885 = vst.msk [vmem:[%s8618_s1 + $0xa7] sm:$0x10] %vm41_vm1, %v2158_v55   ;;  %v3089_v29 = vpop.permute.xlu0 %3088  }
 0x1dd   :  { %3886 = vst.msk [vmem:[%s8618_s1 + $0x1a6] sm:$0x20] %vm41_vm1, %v2158_v55   ;;  %3887 = vst.msk [vmem:[%s8618_s1 + $0xe5] sm:$0x40] %vm41_vm1, %v2158_v55  }
 0x1de   :  { %3888 = vst.msk [vmem:[%s8618_s1 + $0x1e4] sm:$0x80] %vm41_vm1, %v2158_v55   ;;  %3905 = vst.msk [vmem:[%s8618_s1 + $0x22c] sm:$0x1] %vm41_vm1, %v2232_v56  }
 0x1df   :  { %3906 = vst.msk [vmem:[%s8618_s1 + $0x32b] sm:$0x2] %vm41_vm1, %v2232_v56   ;;  %3907 = vst.msk [vmem:[%s8618_s1 + $0x26a] sm:$0x4] %vm41_vm1, %v2232_v56   ;;  %v3163_v30 = vpop.permute.xlu1 %3162  }
 0x1e0   :  { %3908 = vst.msk [vmem:[%s8618_s1 + $0x369] sm:$0x8] %vm41_vm1, %v2232_v56   ;;  %3909 = vst.msk [vmem:[%s8618_s1 + $0x2a8] sm:$0x10] %vm41_vm1, %v2232_v56   ;;  %v3138_v31 = vpop.permute.xlu0 %3137  }
 0x1e1   :  { %3910 = vst.msk [vmem:[%s8618_s1 + $0x3a7] sm:$0x20] %vm41_vm1, %v2232_v56   ;;  %3911 = vst.msk [vmem:[%s8618_s1 + $0x2e6] sm:$0x40] %vm41_vm1, %v2232_v56  }
 0x1e2   :  { %3912 = vst.msk [vmem:[%s8618_s1 + $0x3e5] sm:$0x80] %vm41_vm1, %v2232_v56   ;;  %3897 = vst.msk [vmem:[%s8618_s1 + $0x2c] sm:$0x1] %vm41_vm1, %v2207_v57  }
 0x1e3   :  { %3898 = vst.msk [vmem:[%s8618_s1 + $0x12b] sm:$0x2] %vm41_vm1, %v2207_v57   ;;  %3899 = vst.msk [vmem:[%s8618_s1 + $0x6a] sm:$0x4] %vm41_vm1, %v2207_v57  }
 0x1e4   :  { %3900 = vst.msk [vmem:[%s8618_s1 + $0x169] sm:$0x8] %vm41_vm1, %v2207_v57   ;;  %3901 = vst.msk [vmem:[%s8618_s1 + $0xa8] sm:$0x10] %vm41_vm1, %v2207_v57  }
 0x1e5   :  { %3902 = vst.msk [vmem:[%s8618_s1 + $0x1a7] sm:$0x20] %vm41_vm1, %v2207_v57   ;;  %3903 = vst.msk [vmem:[%s8618_s1 + $0xe6] sm:$0x40] %vm41_vm1, %v2207_v57  }
 0x1e6   :  { %3904 = vst.msk [vmem:[%s8618_s1 + $0x1e5] sm:$0x80] %vm41_vm1, %v2207_v57   ;;  %3921 = vst.msk [vmem:[%s8618_s1 + $0x22d] sm:$0x1] %vm41_vm1, %v2281_v58  }
 0x1e7   :  { %3922 = vst.msk [vmem:[%s8618_s1 + $0x32c] sm:$0x2] %vm41_vm1, %v2281_v58   ;;  %3923 = vst.msk [vmem:[%s8618_s1 + $0x26b] sm:$0x4] %vm41_vm1, %v2281_v58  }
 0x1e8   :  { %3924 = vst.msk [vmem:[%s8618_s1 + $0x36a] sm:$0x8] %vm41_vm1, %v2281_v58   ;;  %3925 = vst.msk [vmem:[%s8618_s1 + $0x2a9] sm:$0x10] %vm41_vm1, %v2281_v58  }
 0x1e9   :  { %3926 = vst.msk [vmem:[%s8618_s1 + $0x3a8] sm:$0x20] %vm41_vm1, %v2281_v58   ;;  %3927 = vst.msk [vmem:[%s8618_s1 + $0x2e7] sm:$0x40] %vm41_vm1, %v2281_v58  }
 0x1ea   :  { %3928 = vst.msk [vmem:[%s8618_s1 + $0x3e6] sm:$0x80] %vm41_vm1, %v2281_v58   ;;  %3913 = vst.msk [vmem:[%s8618_s1 + $0x2d] sm:$0x1] %vm41_vm1, %v2256_v59  }
 0x1eb   :  { %3914 = vst.msk [vmem:[%s8618_s1 + $0x12c] sm:$0x2] %vm41_vm1, %v2256_v59   ;;  %3915 = vst.msk [vmem:[%s8618_s1 + $0x6b] sm:$0x4] %vm41_vm1, %v2256_v59  }
 0x1ec   :  { %3916 = vst.msk [vmem:[%s8618_s1 + $0x16a] sm:$0x8] %vm41_vm1, %v2256_v59   ;;  %3917 = vst.msk [vmem:[%s8618_s1 + $0xa9] sm:$0x10] %vm41_vm1, %v2256_v59  }
 0x1ed   :  { %3918 = vst.msk [vmem:[%s8618_s1 + $0x1a8] sm:$0x20] %vm41_vm1, %v2256_v59   ;;  %3919 = vst.msk [vmem:[%s8618_s1 + $0xe7] sm:$0x40] %vm41_vm1, %v2256_v59  }
 0x1ee   :  { %3920 = vst.msk [vmem:[%s8618_s1 + $0x1e6] sm:$0x80] %vm41_vm1, %v2256_v59   ;;  %3937 = vst.msk [vmem:[%s8618_s1 + $0x22e] sm:$0x1] %vm41_vm1, %v2330_v60  }
 0x1ef   :  { %3938 = vst.msk [vmem:[%s8618_s1 + $0x32d] sm:$0x2] %vm41_vm1, %v2330_v60   ;;  %3939 = vst.msk [vmem:[%s8618_s1 + $0x26c] sm:$0x4] %vm41_vm1, %v2330_v60  }
 0x1f0   :  { %3940 = vst.msk [vmem:[%s8618_s1 + $0x36b] sm:$0x8] %vm41_vm1, %v2330_v60   ;;  %3941 = vst.msk [vmem:[%s8618_s1 + $0x2aa] sm:$0x10] %vm41_vm1, %v2330_v60  }
 0x1f1   :  { %3942 = vst.msk [vmem:[%s8618_s1 + $0x3a9] sm:$0x20] %vm41_vm1, %v2330_v60   ;;  %3943 = vst.msk [vmem:[%s8618_s1 + $0x2e8] sm:$0x40] %vm41_vm1, %v2330_v60  }
 0x1f2   :  { %3944 = vst.msk [vmem:[%s8618_s1 + $0x3e7] sm:$0x80] %vm41_vm1, %v2330_v60   ;;  %3929 = vst.msk [vmem:[%s8618_s1 + $0x2e] sm:$0x1] %vm41_vm1, %v2305_v61  }
 0x1f3   :  { %3930 = vst.msk [vmem:[%s8618_s1 + $0x12d] sm:$0x2] %vm41_vm1, %v2305_v61   ;;  %3931 = vst.msk [vmem:[%s8618_s1 + $0x6c] sm:$0x4] %vm41_vm1, %v2305_v61  }
 0x1f4   :  { %3932 = vst.msk [vmem:[%s8618_s1 + $0x16b] sm:$0x8] %vm41_vm1, %v2305_v61   ;;  %3933 = vst.msk [vmem:[%s8618_s1 + $0xaa] sm:$0x10] %vm41_vm1, %v2305_v61  }
 0x1f5   :  { %3934 = vst.msk [vmem:[%s8618_s1 + $0x1a9] sm:$0x20] %vm41_vm1, %v2305_v61   ;;  %3935 = vst.msk [vmem:[%s8618_s1 + $0xe8] sm:$0x40] %vm41_vm1, %v2305_v61  }
 0x1f6   :  { %3936 = vst.msk [vmem:[%s8618_s1 + $0x1e7] sm:$0x80] %vm41_vm1, %v2305_v61   ;;  %3953 = vst.msk [vmem:[%s8618_s1 + $0x22f] sm:$0x1] %vm41_vm1, %v2379_v62  }
 0x1f7   :  { %3954 = vst.msk [vmem:[%s8618_s1 + $0x32e] sm:$0x2] %vm41_vm1, %v2379_v62   ;;  %3955 = vst.msk [vmem:[%s8618_s1 + $0x26d] sm:$0x4] %vm41_vm1, %v2379_v62  }
 0x1f8   :  { %3956 = vst.msk [vmem:[%s8618_s1 + $0x36c] sm:$0x8] %vm41_vm1, %v2379_v62   ;;  %3957 = vst.msk [vmem:[%s8618_s1 + $0x2ab] sm:$0x10] %vm41_vm1, %v2379_v62  }
 0x1f9   :  { %3958 = vst.msk [vmem:[%s8618_s1 + $0x3aa] sm:$0x20] %vm41_vm1, %v2379_v62   ;;  %3959 = vst.msk [vmem:[%s8618_s1 + $0x2e9] sm:$0x40] %vm41_vm1, %v2379_v62  }
 0x1fa   :  { %3960 = vst.msk [vmem:[%s8618_s1 + $0x3e8] sm:$0x80] %vm41_vm1, %v2379_v62   ;;  %3945 = vst.msk [vmem:[%s8618_s1 + $0x2f] sm:$0x1] %vm41_vm1, %v2354_v63  }
 0x1fb   :  { %3946 = vst.msk [vmem:[%s8618_s1 + $0x12e] sm:$0x2] %vm41_vm1, %v2354_v63   ;;  %3947 = vst.msk [vmem:[%s8618_s1 + $0x6d] sm:$0x4] %vm41_vm1, %v2354_v63  }
 0x1fc   :  { %3948 = vst.msk [vmem:[%s8618_s1 + $0x16c] sm:$0x8] %vm41_vm1, %v2354_v63   ;;  %3949 = vst.msk [vmem:[%s8618_s1 + $0xab] sm:$0x10] %vm41_vm1, %v2354_v63  }
 0x1fd   :  { %3950 = vst.msk [vmem:[%s8618_s1 + $0x1aa] sm:$0x20] %vm41_vm1, %v2354_v63   ;;  %3951 = vst.msk [vmem:[%s8618_s1 + $0xe9] sm:$0x40] %vm41_vm1, %v2354_v63  }
 0x1fe   :  { %3952 = vst.msk [vmem:[%s8618_s1 + $0x1e8] sm:$0x80] %vm41_vm1, %v2354_v63   ;;  %3969 = vst.msk [vmem:[%s8618_s1 + $0x230] sm:$0x1] %vm41_vm1, %v2428_v0  }
 0x1ff   :  { %3970 = vst.msk [vmem:[%s8618_s1 + $0x32f] sm:$0x2] %vm41_vm1, %v2428_v0   ;;  %3971 = vst.msk [vmem:[%s8618_s1 + $0x26e] sm:$0x4] %vm41_vm1, %v2428_v0  }
 0x200   :  { %3972 = vst.msk [vmem:[%s8618_s1 + $0x36d] sm:$0x8] %vm41_vm1, %v2428_v0   ;;  %3973 = vst.msk [vmem:[%s8618_s1 + $0x2ac] sm:$0x10] %vm41_vm1, %v2428_v0  }
 0x201   :  { %3974 = vst.msk [vmem:[%s8618_s1 + $0x3ab] sm:$0x20] %vm41_vm1, %v2428_v0   ;;  %3975 = vst.msk [vmem:[%s8618_s1 + $0x2ea] sm:$0x40] %vm41_vm1, %v2428_v0  }
 0x202   :  { %3976 = vst.msk [vmem:[%s8618_s1 + $0x3e9] sm:$0x80] %vm41_vm1, %v2428_v0   ;;  %3961 = vst.msk [vmem:[%s8618_s1 + $0x30] sm:$0x1] %vm41_vm1, %v2403_v1  }
 0x203   :  { %3962 = vst.msk [vmem:[%s8618_s1 + $0x12f] sm:$0x2] %vm41_vm1, %v2403_v1   ;;  %3963 = vst.msk [vmem:[%s8618_s1 + $0x6e] sm:$0x4] %vm41_vm1, %v2403_v1  }
 0x204   :  { %3964 = vst.msk [vmem:[%s8618_s1 + $0x16d] sm:$0x8] %vm41_vm1, %v2403_v1   ;;  %3965 = vst.msk [vmem:[%s8618_s1 + $0xac] sm:$0x10] %vm41_vm1, %v2403_v1  }
 0x205   :  { %3966 = vst.msk [vmem:[%s8618_s1 + $0x1ab] sm:$0x20] %vm41_vm1, %v2403_v1   ;;  %3967 = vst.msk [vmem:[%s8618_s1 + $0xea] sm:$0x40] %vm41_vm1, %v2403_v1  }
 0x206   :  { %3968 = vst.msk [vmem:[%s8618_s1 + $0x1e9] sm:$0x80] %vm41_vm1, %v2403_v1   ;;  %3985 = vst.msk [vmem:[%s8618_s1 + $0x231] sm:$0x1] %vm41_vm1, %v2477_v2  }
 0x207   :  { %3986 = vst.msk [vmem:[%s8618_s1 + $0x330] sm:$0x2] %vm41_vm1, %v2477_v2   ;;  %3987 = vst.msk [vmem:[%s8618_s1 + $0x26f] sm:$0x4] %vm41_vm1, %v2477_v2  }
 0x208   :  { %3988 = vst.msk [vmem:[%s8618_s1 + $0x36e] sm:$0x8] %vm41_vm1, %v2477_v2   ;;  %3989 = vst.msk [vmem:[%s8618_s1 + $0x2ad] sm:$0x10] %vm41_vm1, %v2477_v2  }
 0x209   :  { %3990 = vst.msk [vmem:[%s8618_s1 + $0x3ac] sm:$0x20] %vm41_vm1, %v2477_v2   ;;  %3991 = vst.msk [vmem:[%s8618_s1 + $0x2eb] sm:$0x40] %vm41_vm1, %v2477_v2  }
 0x20a   :  { %3992 = vst.msk [vmem:[%s8618_s1 + $0x3ea] sm:$0x80] %vm41_vm1, %v2477_v2   ;;  %3977 = vst.msk [vmem:[%s8618_s1 + $0x31] sm:$0x1] %vm41_vm1, %v2452_v3  }
 0x20b   :  { %3978 = vst.msk [vmem:[%s8618_s1 + $0x130] sm:$0x2] %vm41_vm1, %v2452_v3   ;;  %3979 = vst.msk [vmem:[%s8618_s1 + $0x6f] sm:$0x4] %vm41_vm1, %v2452_v3  }
 0x20c   :  { %3980 = vst.msk [vmem:[%s8618_s1 + $0x16e] sm:$0x8] %vm41_vm1, %v2452_v3   ;;  %3981 = vst.msk [vmem:[%s8618_s1 + $0xad] sm:$0x10] %vm41_vm1, %v2452_v3  }
 0x20d   :  { %3982 = vst.msk [vmem:[%s8618_s1 + $0x1ac] sm:$0x20] %vm41_vm1, %v2452_v3   ;;  %3983 = vst.msk [vmem:[%s8618_s1 + $0xeb] sm:$0x40] %vm41_vm1, %v2452_v3  }
 0x20e   :  { %3984 = vst.msk [vmem:[%s8618_s1 + $0x1ea] sm:$0x80] %vm41_vm1, %v2452_v3   ;;  %4001 = vst.msk [vmem:[%s8618_s1 + $0x232] sm:$0x1] %vm41_vm1, %v2526_v4  }
 0x20f   :  { %4002 = vst.msk [vmem:[%s8618_s1 + $0x331] sm:$0x2] %vm41_vm1, %v2526_v4   ;;  %4003 = vst.msk [vmem:[%s8618_s1 + $0x270] sm:$0x4] %vm41_vm1, %v2526_v4  }
 0x210   :  { %4004 = vst.msk [vmem:[%s8618_s1 + $0x36f] sm:$0x8] %vm41_vm1, %v2526_v4   ;;  %4005 = vst.msk [vmem:[%s8618_s1 + $0x2ae] sm:$0x10] %vm41_vm1, %v2526_v4  }
 0x211   :  { %4006 = vst.msk [vmem:[%s8618_s1 + $0x3ad] sm:$0x20] %vm41_vm1, %v2526_v4   ;;  %4007 = vst.msk [vmem:[%s8618_s1 + $0x2ec] sm:$0x40] %vm41_vm1, %v2526_v4  }
 0x212   :  { %4008 = vst.msk [vmem:[%s8618_s1 + $0x3eb] sm:$0x80] %vm41_vm1, %v2526_v4   ;;  %3993 = vst.msk [vmem:[%s8618_s1 + $0x32] sm:$0x1] %vm41_vm1, %v2501_v5  }
 0x213   :  { %3994 = vst.msk [vmem:[%s8618_s1 + $0x131] sm:$0x2] %vm41_vm1, %v2501_v5   ;;  %3995 = vst.msk [vmem:[%s8618_s1 + $0x70] sm:$0x4] %vm41_vm1, %v2501_v5  }
 0x214   :  { %3996 = vst.msk [vmem:[%s8618_s1 + $0x16f] sm:$0x8] %vm41_vm1, %v2501_v5   ;;  %3997 = vst.msk [vmem:[%s8618_s1 + $0xae] sm:$0x10] %vm41_vm1, %v2501_v5  }
 0x215   :  { %3998 = vst.msk [vmem:[%s8618_s1 + $0x1ad] sm:$0x20] %vm41_vm1, %v2501_v5   ;;  %3999 = vst.msk [vmem:[%s8618_s1 + $0xec] sm:$0x40] %vm41_vm1, %v2501_v5  }
 0x216   :  { %4000 = vst.msk [vmem:[%s8618_s1 + $0x1eb] sm:$0x80] %vm41_vm1, %v2501_v5   ;;  %4017 = vst.msk [vmem:[%s8618_s1 + $0x233] sm:$0x1] %vm41_vm1, %v2575_v6  }
 0x217   :  { %4018 = vst.msk [vmem:[%s8618_s1 + $0x332] sm:$0x2] %vm41_vm1, %v2575_v6   ;;  %4019 = vst.msk [vmem:[%s8618_s1 + $0x271] sm:$0x4] %vm41_vm1, %v2575_v6  }
 0x218   :  { %4020 = vst.msk [vmem:[%s8618_s1 + $0x370] sm:$0x8] %vm41_vm1, %v2575_v6   ;;  %4021 = vst.msk [vmem:[%s8618_s1 + $0x2af] sm:$0x10] %vm41_vm1, %v2575_v6  }
 0x219   :  { %4022 = vst.msk [vmem:[%s8618_s1 + $0x3ae] sm:$0x20] %vm41_vm1, %v2575_v6   ;;  %4023 = vst.msk [vmem:[%s8618_s1 + $0x2ed] sm:$0x40] %vm41_vm1, %v2575_v6  }
 0x21a   :  { %4024 = vst.msk [vmem:[%s8618_s1 + $0x3ec] sm:$0x80] %vm41_vm1, %v2575_v6   ;;  %4009 = vst.msk [vmem:[%s8618_s1 + $0x33] sm:$0x1] %vm41_vm1, %v2550_v7  }
 0x21b   :  { %4010 = vst.msk [vmem:[%s8618_s1 + $0x132] sm:$0x2] %vm41_vm1, %v2550_v7   ;;  %4011 = vst.msk [vmem:[%s8618_s1 + $0x71] sm:$0x4] %vm41_vm1, %v2550_v7  }
 0x21c   :  { %4012 = vst.msk [vmem:[%s8618_s1 + $0x170] sm:$0x8] %vm41_vm1, %v2550_v7   ;;  %4013 = vst.msk [vmem:[%s8618_s1 + $0xaf] sm:$0x10] %vm41_vm1, %v2550_v7  }
 0x21d   :  { %4014 = vst.msk [vmem:[%s8618_s1 + $0x1ae] sm:$0x20] %vm41_vm1, %v2550_v7   ;;  %4015 = vst.msk [vmem:[%s8618_s1 + $0xed] sm:$0x40] %vm41_vm1, %v2550_v7  }
 0x21e   :  { %4016 = vst.msk [vmem:[%s8618_s1 + $0x1ec] sm:$0x80] %vm41_vm1, %v2550_v7   ;;  %4033 = vst.msk [vmem:[%s8618_s1 + $0x234] sm:$0x1] %vm41_vm1, %v2624_v8  }
 0x21f   :  { %4034 = vst.msk [vmem:[%s8618_s1 + $0x333] sm:$0x2] %vm41_vm1, %v2624_v8   ;;  %4035 = vst.msk [vmem:[%s8618_s1 + $0x272] sm:$0x4] %vm41_vm1, %v2624_v8  }
 0x220   :  { %4036 = vst.msk [vmem:[%s8618_s1 + $0x371] sm:$0x8] %vm41_vm1, %v2624_v8   ;;  %4037 = vst.msk [vmem:[%s8618_s1 + $0x2b0] sm:$0x10] %vm41_vm1, %v2624_v8  }
 0x221   :  { %4038 = vst.msk [vmem:[%s8618_s1 + $0x3af] sm:$0x20] %vm41_vm1, %v2624_v8   ;;  %4039 = vst.msk [vmem:[%s8618_s1 + $0x2ee] sm:$0x40] %vm41_vm1, %v2624_v8  }
 0x222   :  { %4040 = vst.msk [vmem:[%s8618_s1 + $0x3ed] sm:$0x80] %vm41_vm1, %v2624_v8   ;;  %4025 = vst.msk [vmem:[%s8618_s1 + $0x34] sm:$0x1] %vm41_vm1, %v2599_v9  }
 0x223   :  { %4026 = vst.msk [vmem:[%s8618_s1 + $0x133] sm:$0x2] %vm41_vm1, %v2599_v9   ;;  %4027 = vst.msk [vmem:[%s8618_s1 + $0x72] sm:$0x4] %vm41_vm1, %v2599_v9  }
 0x224   :  { %4028 = vst.msk [vmem:[%s8618_s1 + $0x171] sm:$0x8] %vm41_vm1, %v2599_v9   ;;  %4029 = vst.msk [vmem:[%s8618_s1 + $0xb0] sm:$0x10] %vm41_vm1, %v2599_v9  }
 0x225   :  { %4030 = vst.msk [vmem:[%s8618_s1 + $0x1af] sm:$0x20] %vm41_vm1, %v2599_v9   ;;  %4031 = vst.msk [vmem:[%s8618_s1 + $0xee] sm:$0x40] %vm41_vm1, %v2599_v9  }
 0x226   :  { %4032 = vst.msk [vmem:[%s8618_s1 + $0x1ed] sm:$0x80] %vm41_vm1, %v2599_v9   ;;  %4049 = vst.msk [vmem:[%s8618_s1 + $0x235] sm:$0x1] %vm41_vm1, %v2673_v10  }
 0x227   :  { %4050 = vst.msk [vmem:[%s8618_s1 + $0x334] sm:$0x2] %vm41_vm1, %v2673_v10   ;;  %4051 = vst.msk [vmem:[%s8618_s1 + $0x273] sm:$0x4] %vm41_vm1, %v2673_v10  }
 0x228   :  { %4052 = vst.msk [vmem:[%s8618_s1 + $0x372] sm:$0x8] %vm41_vm1, %v2673_v10   ;;  %4053 = vst.msk [vmem:[%s8618_s1 + $0x2b1] sm:$0x10] %vm41_vm1, %v2673_v10  }
 0x229   :  { %4054 = vst.msk [vmem:[%s8618_s1 + $0x3b0] sm:$0x20] %vm41_vm1, %v2673_v10   ;;  %4055 = vst.msk [vmem:[%s8618_s1 + $0x2ef] sm:$0x40] %vm41_vm1, %v2673_v10  }
 0x22a   :  { %4056 = vst.msk [vmem:[%s8618_s1 + $0x3ee] sm:$0x80] %vm41_vm1, %v2673_v10   ;;  %4041 = vst.msk [vmem:[%s8618_s1 + $0x35] sm:$0x1] %vm41_vm1, %v2648_v11  }
 0x22b   :  { %4042 = vst.msk [vmem:[%s8618_s1 + $0x134] sm:$0x2] %vm41_vm1, %v2648_v11   ;;  %4043 = vst.msk [vmem:[%s8618_s1 + $0x73] sm:$0x4] %vm41_vm1, %v2648_v11  }
 0x22c   :  { %4044 = vst.msk [vmem:[%s8618_s1 + $0x172] sm:$0x8] %vm41_vm1, %v2648_v11   ;;  %4045 = vst.msk [vmem:[%s8618_s1 + $0xb1] sm:$0x10] %vm41_vm1, %v2648_v11  }
 0x22d   :  { %4046 = vst.msk [vmem:[%s8618_s1 + $0x1b0] sm:$0x20] %vm41_vm1, %v2648_v11   ;;  %4047 = vst.msk [vmem:[%s8618_s1 + $0xef] sm:$0x40] %vm41_vm1, %v2648_v11  }
 0x22e   :  { %4048 = vst.msk [vmem:[%s8618_s1 + $0x1ee] sm:$0x80] %vm41_vm1, %v2648_v11   ;;  %4065 = vst.msk [vmem:[%s8618_s1 + $0x236] sm:$0x1] %vm41_vm1, %v2722_v12  }
 0x22f   :  { %4066 = vst.msk [vmem:[%s8618_s1 + $0x335] sm:$0x2] %vm41_vm1, %v2722_v12   ;;  %4067 = vst.msk [vmem:[%s8618_s1 + $0x274] sm:$0x4] %vm41_vm1, %v2722_v12  }
 0x230   :  { %4068 = vst.msk [vmem:[%s8618_s1 + $0x373] sm:$0x8] %vm41_vm1, %v2722_v12   ;;  %4069 = vst.msk [vmem:[%s8618_s1 + $0x2b2] sm:$0x10] %vm41_vm1, %v2722_v12  }
 0x231   :  { %4070 = vst.msk [vmem:[%s8618_s1 + $0x3b1] sm:$0x20] %vm41_vm1, %v2722_v12   ;;  %4071 = vst.msk [vmem:[%s8618_s1 + $0x2f0] sm:$0x40] %vm41_vm1, %v2722_v12  }
 0x232   :  { %4072 = vst.msk [vmem:[%s8618_s1 + $0x3ef] sm:$0x80] %vm41_vm1, %v2722_v12   ;;  %4057 = vst.msk [vmem:[%s8618_s1 + $0x36] sm:$0x1] %vm41_vm1, %v2697_v13  }
 0x233   :  { %4058 = vst.msk [vmem:[%s8618_s1 + $0x135] sm:$0x2] %vm41_vm1, %v2697_v13   ;;  %4059 = vst.msk [vmem:[%s8618_s1 + $0x74] sm:$0x4] %vm41_vm1, %v2697_v13  }
 0x234   :  { %4060 = vst.msk [vmem:[%s8618_s1 + $0x173] sm:$0x8] %vm41_vm1, %v2697_v13   ;;  %4061 = vst.msk [vmem:[%s8618_s1 + $0xb2] sm:$0x10] %vm41_vm1, %v2697_v13  }
 0x235   :  { %4062 = vst.msk [vmem:[%s8618_s1 + $0x1b1] sm:$0x20] %vm41_vm1, %v2697_v13   ;;  %4063 = vst.msk [vmem:[%s8618_s1 + $0xf0] sm:$0x40] %vm41_vm1, %v2697_v13  }
 0x236   :  { %4064 = vst.msk [vmem:[%s8618_s1 + $0x1ef] sm:$0x80] %vm41_vm1, %v2697_v13   ;;  %4081 = vst.msk [vmem:[%s8618_s1 + $0x237] sm:$0x1] %vm41_vm1, %v2771_v14  }
 0x237   :  { %4082 = vst.msk [vmem:[%s8618_s1 + $0x336] sm:$0x2] %vm41_vm1, %v2771_v14   ;;  %4083 = vst.msk [vmem:[%s8618_s1 + $0x275] sm:$0x4] %vm41_vm1, %v2771_v14  }
 0x238   :  { %4084 = vst.msk [vmem:[%s8618_s1 + $0x374] sm:$0x8] %vm41_vm1, %v2771_v14   ;;  %4085 = vst.msk [vmem:[%s8618_s1 + $0x2b3] sm:$0x10] %vm41_vm1, %v2771_v14  }
 0x239   :  { %4086 = vst.msk [vmem:[%s8618_s1 + $0x3b2] sm:$0x20] %vm41_vm1, %v2771_v14   ;;  %4087 = vst.msk [vmem:[%s8618_s1 + $0x2f1] sm:$0x40] %vm41_vm1, %v2771_v14  }
 0x23a   :  { %4088 = vst.msk [vmem:[%s8618_s1 + $0x3f0] sm:$0x80] %vm41_vm1, %v2771_v14   ;;  %4073 = vst.msk [vmem:[%s8618_s1 + $0x37] sm:$0x1] %vm41_vm1, %v2746_v15  }
 0x23b   :  { %4074 = vst.msk [vmem:[%s8618_s1 + $0x136] sm:$0x2] %vm41_vm1, %v2746_v15   ;;  %4075 = vst.msk [vmem:[%s8618_s1 + $0x75] sm:$0x4] %vm41_vm1, %v2746_v15  }
 0x23c   :  { %4076 = vst.msk [vmem:[%s8618_s1 + $0x174] sm:$0x8] %vm41_vm1, %v2746_v15   ;;  %4077 = vst.msk [vmem:[%s8618_s1 + $0xb3] sm:$0x10] %vm41_vm1, %v2746_v15  }
 0x23d   :  { %4078 = vst.msk [vmem:[%s8618_s1 + $0x1b2] sm:$0x20] %vm41_vm1, %v2746_v15   ;;  %4079 = vst.msk [vmem:[%s8618_s1 + $0xf1] sm:$0x40] %vm41_vm1, %v2746_v15  }
 0x23e   :  { %4080 = vst.msk [vmem:[%s8618_s1 + $0x1f0] sm:$0x80] %vm41_vm1, %v2746_v15   ;;  %4097 = vst.msk [vmem:[%s8618_s1 + $0x238] sm:$0x1] %vm41_vm1, %v2820_v16  }
 0x23f   :  { %4098 = vst.msk [vmem:[%s8618_s1 + $0x337] sm:$0x2] %vm41_vm1, %v2820_v16   ;;  %4099 = vst.msk [vmem:[%s8618_s1 + $0x276] sm:$0x4] %vm41_vm1, %v2820_v16  }
 0x240   :  { %4100 = vst.msk [vmem:[%s8618_s1 + $0x375] sm:$0x8] %vm41_vm1, %v2820_v16   ;;  %4101 = vst.msk [vmem:[%s8618_s1 + $0x2b4] sm:$0x10] %vm41_vm1, %v2820_v16  }
 0x241   :  { %4102 = vst.msk [vmem:[%s8618_s1 + $0x3b3] sm:$0x20] %vm41_vm1, %v2820_v16   ;;  %4103 = vst.msk [vmem:[%s8618_s1 + $0x2f2] sm:$0x40] %vm41_vm1, %v2820_v16  }
 0x242   :  { %4104 = vst.msk [vmem:[%s8618_s1 + $0x3f1] sm:$0x80] %vm41_vm1, %v2820_v16   ;;  %4089 = vst.msk [vmem:[%s8618_s1 + $0x38] sm:$0x1] %vm41_vm1, %v2795_v17  }
 0x243   :  { %4090 = vst.msk [vmem:[%s8618_s1 + $0x137] sm:$0x2] %vm41_vm1, %v2795_v17   ;;  %4091 = vst.msk [vmem:[%s8618_s1 + $0x76] sm:$0x4] %vm41_vm1, %v2795_v17  }
 0x244   :  { %4092 = vst.msk [vmem:[%s8618_s1 + $0x175] sm:$0x8] %vm41_vm1, %v2795_v17   ;;  %4093 = vst.msk [vmem:[%s8618_s1 + $0xb4] sm:$0x10] %vm41_vm1, %v2795_v17  }
 0x245   :  { %4094 = vst.msk [vmem:[%s8618_s1 + $0x1b3] sm:$0x20] %vm41_vm1, %v2795_v17   ;;  %4095 = vst.msk [vmem:[%s8618_s1 + $0xf2] sm:$0x40] %vm41_vm1, %v2795_v17  }
 0x246   :  { %4096 = vst.msk [vmem:[%s8618_s1 + $0x1f1] sm:$0x80] %vm41_vm1, %v2795_v17   ;;  %4113 = vst.msk [vmem:[%s8618_s1 + $0x239] sm:$0x1] %vm41_vm1, %v2869_v18  }
 0x247   :  { %4114 = vst.msk [vmem:[%s8618_s1 + $0x338] sm:$0x2] %vm41_vm1, %v2869_v18   ;;  %4115 = vst.msk [vmem:[%s8618_s1 + $0x277] sm:$0x4] %vm41_vm1, %v2869_v18  }
 0x248   :  { %4116 = vst.msk [vmem:[%s8618_s1 + $0x376] sm:$0x8] %vm41_vm1, %v2869_v18   ;;  %4117 = vst.msk [vmem:[%s8618_s1 + $0x2b5] sm:$0x10] %vm41_vm1, %v2869_v18  }
 0x249   :  { %4118 = vst.msk [vmem:[%s8618_s1 + $0x3b4] sm:$0x20] %vm41_vm1, %v2869_v18   ;;  %4119 = vst.msk [vmem:[%s8618_s1 + $0x2f3] sm:$0x40] %vm41_vm1, %v2869_v18  }
 0x24a   :  { %4120 = vst.msk [vmem:[%s8618_s1 + $0x3f2] sm:$0x80] %vm41_vm1, %v2869_v18   ;;  %4105 = vst.msk [vmem:[%s8618_s1 + $0x39] sm:$0x1] %vm41_vm1, %v2844_v19  }
 0x24b   :  { %4106 = vst.msk [vmem:[%s8618_s1 + $0x138] sm:$0x2] %vm41_vm1, %v2844_v19   ;;  %4107 = vst.msk [vmem:[%s8618_s1 + $0x77] sm:$0x4] %vm41_vm1, %v2844_v19  }
 0x24c   :  { %4108 = vst.msk [vmem:[%s8618_s1 + $0x176] sm:$0x8] %vm41_vm1, %v2844_v19   ;;  %4109 = vst.msk [vmem:[%s8618_s1 + $0xb5] sm:$0x10] %vm41_vm1, %v2844_v19  }
 0x24d   :  { %4110 = vst.msk [vmem:[%s8618_s1 + $0x1b4] sm:$0x20] %vm41_vm1, %v2844_v19   ;;  %4111 = vst.msk [vmem:[%s8618_s1 + $0xf3] sm:$0x40] %vm41_vm1, %v2844_v19  }
 0x24e   :  { %4112 = vst.msk [vmem:[%s8618_s1 + $0x1f2] sm:$0x80] %vm41_vm1, %v2844_v19   ;;  %4129 = vst.msk [vmem:[%s8618_s1 + $0x23a] sm:$0x1] %vm41_vm1, %v2918_v20  }
 0x24f   :  { %4130 = vst.msk [vmem:[%s8618_s1 + $0x339] sm:$0x2] %vm41_vm1, %v2918_v20   ;;  %4131 = vst.msk [vmem:[%s8618_s1 + $0x278] sm:$0x4] %vm41_vm1, %v2918_v20  }
 0x250   :  { %4132 = vst.msk [vmem:[%s8618_s1 + $0x377] sm:$0x8] %vm41_vm1, %v2918_v20   ;;  %4133 = vst.msk [vmem:[%s8618_s1 + $0x2b6] sm:$0x10] %vm41_vm1, %v2918_v20  }
 0x251   :  { %4134 = vst.msk [vmem:[%s8618_s1 + $0x3b5] sm:$0x20] %vm41_vm1, %v2918_v20   ;;  %4135 = vst.msk [vmem:[%s8618_s1 + $0x2f4] sm:$0x40] %vm41_vm1, %v2918_v20  }
 0x252   :  { %4136 = vst.msk [vmem:[%s8618_s1 + $0x3f3] sm:$0x80] %vm41_vm1, %v2918_v20   ;;  %4121 = vst.msk [vmem:[%s8618_s1 + $0x3a] sm:$0x1] %vm41_vm1, %v2893_v21  }
 0x253   :  { %4122 = vst.msk [vmem:[%s8618_s1 + $0x139] sm:$0x2] %vm41_vm1, %v2893_v21   ;;  %4123 = vst.msk [vmem:[%s8618_s1 + $0x78] sm:$0x4] %vm41_vm1, %v2893_v21  }
 0x254   :  { %4124 = vst.msk [vmem:[%s8618_s1 + $0x177] sm:$0x8] %vm41_vm1, %v2893_v21   ;;  %4125 = vst.msk [vmem:[%s8618_s1 + $0xb6] sm:$0x10] %vm41_vm1, %v2893_v21  }
 0x255   :  { %4126 = vst.msk [vmem:[%s8618_s1 + $0x1b5] sm:$0x20] %vm41_vm1, %v2893_v21   ;;  %4127 = vst.msk [vmem:[%s8618_s1 + $0xf4] sm:$0x40] %vm41_vm1, %v2893_v21  }
 0x256   :  { %4128 = vst.msk [vmem:[%s8618_s1 + $0x1f3] sm:$0x80] %vm41_vm1, %v2893_v21   ;;  %4145 = vst.msk [vmem:[%s8618_s1 + $0x23b] sm:$0x1] %vm41_vm1, %v2967_v22  }
 0x257   :  { %4146 = vst.msk [vmem:[%s8618_s1 + $0x33a] sm:$0x2] %vm41_vm1, %v2967_v22   ;;  %4147 = vst.msk [vmem:[%s8618_s1 + $0x279] sm:$0x4] %vm41_vm1, %v2967_v22  }
 0x258   :  { %4148 = vst.msk [vmem:[%s8618_s1 + $0x378] sm:$0x8] %vm41_vm1, %v2967_v22   ;;  %4149 = vst.msk [vmem:[%s8618_s1 + $0x2b7] sm:$0x10] %vm41_vm1, %v2967_v22  }
 0x259   :  { %4150 = vst.msk [vmem:[%s8618_s1 + $0x3b6] sm:$0x20] %vm41_vm1, %v2967_v22   ;;  %4151 = vst.msk [vmem:[%s8618_s1 + $0x2f5] sm:$0x40] %vm41_vm1, %v2967_v22  }
 0x25a   :  { %4152 = vst.msk [vmem:[%s8618_s1 + $0x3f4] sm:$0x80] %vm41_vm1, %v2967_v22   ;;  %4137 = vst.msk [vmem:[%s8618_s1 + $0x3b] sm:$0x1] %vm41_vm1, %v2942_v23  }
 0x25b   :  { %4138 = vst.msk [vmem:[%s8618_s1 + $0x13a] sm:$0x2] %vm41_vm1, %v2942_v23   ;;  %4139 = vst.msk [vmem:[%s8618_s1 + $0x79] sm:$0x4] %vm41_vm1, %v2942_v23  }
 0x25c   :  { %4140 = vst.msk [vmem:[%s8618_s1 + $0x178] sm:$0x8] %vm41_vm1, %v2942_v23   ;;  %4141 = vst.msk [vmem:[%s8618_s1 + $0xb7] sm:$0x10] %vm41_vm1, %v2942_v23  }
 0x25d   :  { %4142 = vst.msk [vmem:[%s8618_s1 + $0x1b6] sm:$0x20] %vm41_vm1, %v2942_v23   ;;  %4143 = vst.msk [vmem:[%s8618_s1 + $0xf5] sm:$0x40] %vm41_vm1, %v2942_v23  }
 0x25e   :  { %4144 = vst.msk [vmem:[%s8618_s1 + $0x1f4] sm:$0x80] %vm41_vm1, %v2942_v23   ;;  %4161 = vst.msk [vmem:[%s8618_s1 + $0x23c] sm:$0x1] %vm41_vm1, %v3016_v24  }
 0x25f   :  { %4162 = vst.msk [vmem:[%s8618_s1 + $0x33b] sm:$0x2] %vm41_vm1, %v3016_v24   ;;  %4163 = vst.msk [vmem:[%s8618_s1 + $0x27a] sm:$0x4] %vm41_vm1, %v3016_v24  }
 0x260   :  { %4164 = vst.msk [vmem:[%s8618_s1 + $0x379] sm:$0x8] %vm41_vm1, %v3016_v24   ;;  %4165 = vst.msk [vmem:[%s8618_s1 + $0x2b8] sm:$0x10] %vm41_vm1, %v3016_v24  }
 0x261   :  { %4166 = vst.msk [vmem:[%s8618_s1 + $0x3b7] sm:$0x20] %vm41_vm1, %v3016_v24   ;;  %4167 = vst.msk [vmem:[%s8618_s1 + $0x2f6] sm:$0x40] %vm41_vm1, %v3016_v24  }
 0x262   :  { %4168 = vst.msk [vmem:[%s8618_s1 + $0x3f5] sm:$0x80] %vm41_vm1, %v3016_v24   ;;  %4153 = vst.msk [vmem:[%s8618_s1 + $0x3c] sm:$0x1] %vm41_vm1, %v2991_v25  }
 0x263   :  { %4154 = vst.msk [vmem:[%s8618_s1 + $0x13b] sm:$0x2] %vm41_vm1, %v2991_v25   ;;  %4155 = vst.msk [vmem:[%s8618_s1 + $0x7a] sm:$0x4] %vm41_vm1, %v2991_v25  }
 0x264   :  { %4156 = vst.msk [vmem:[%s8618_s1 + $0x179] sm:$0x8] %vm41_vm1, %v2991_v25   ;;  %4157 = vst.msk [vmem:[%s8618_s1 + $0xb8] sm:$0x10] %vm41_vm1, %v2991_v25  }
 0x265   :  { %4158 = vst.msk [vmem:[%s8618_s1 + $0x1b7] sm:$0x20] %vm41_vm1, %v2991_v25   ;;  %4159 = vst.msk [vmem:[%s8618_s1 + $0xf6] sm:$0x40] %vm41_vm1, %v2991_v25  }
 0x266   :  { %4160 = vst.msk [vmem:[%s8618_s1 + $0x1f5] sm:$0x80] %vm41_vm1, %v2991_v25   ;;  %4177 = vst.msk [vmem:[%s8618_s1 + $0x23d] sm:$0x1] %vm41_vm1, %v3065_v26  }
 0x267   :  { %4178 = vst.msk [vmem:[%s8618_s1 + $0x33c] sm:$0x2] %vm41_vm1, %v3065_v26   ;;  %4179 = vst.msk [vmem:[%s8618_s1 + $0x27b] sm:$0x4] %vm41_vm1, %v3065_v26  }
 0x268   :  { %4180 = vst.msk [vmem:[%s8618_s1 + $0x37a] sm:$0x8] %vm41_vm1, %v3065_v26   ;;  %4181 = vst.msk [vmem:[%s8618_s1 + $0x2b9] sm:$0x10] %vm41_vm1, %v3065_v26  }
 0x269   :  { %4182 = vst.msk [vmem:[%s8618_s1 + $0x3b8] sm:$0x20] %vm41_vm1, %v3065_v26   ;;  %4183 = vst.msk [vmem:[%s8618_s1 + $0x2f7] sm:$0x40] %vm41_vm1, %v3065_v26  }
 0x26a   :  { %4184 = vst.msk [vmem:[%s8618_s1 + $0x3f6] sm:$0x80] %vm41_vm1, %v3065_v26   ;;  %4169 = vst.msk [vmem:[%s8618_s1 + $0x3d] sm:$0x1] %vm41_vm1, %v3040_v27  }
 0x26b   :  { %4170 = vst.msk [vmem:[%s8618_s1 + $0x13c] sm:$0x2] %vm41_vm1, %v3040_v27   ;;  %4171 = vst.msk [vmem:[%s8618_s1 + $0x7b] sm:$0x4] %vm41_vm1, %v3040_v27  }
 0x26c   :  { %4172 = vst.msk [vmem:[%s8618_s1 + $0x17a] sm:$0x8] %vm41_vm1, %v3040_v27   ;;  %4173 = vst.msk [vmem:[%s8618_s1 + $0xb9] sm:$0x10] %vm41_vm1, %v3040_v27  }
 0x26d   :  { %4174 = vst.msk [vmem:[%s8618_s1 + $0x1b8] sm:$0x20] %vm41_vm1, %v3040_v27   ;;  %4175 = vst.msk [vmem:[%s8618_s1 + $0xf7] sm:$0x40] %vm41_vm1, %v3040_v27  }
 0x26e   :  { %4176 = vst.msk [vmem:[%s8618_s1 + $0x1f6] sm:$0x80] %vm41_vm1, %v3040_v27   ;;  %4193 = vst.msk [vmem:[%s8618_s1 + $0x23e] sm:$0x1] %vm41_vm1, %v3114_v28  }
 0x26f   :  { %4194 = vst.msk [vmem:[%s8618_s1 + $0x33d] sm:$0x2] %vm41_vm1, %v3114_v28   ;;  %4195 = vst.msk [vmem:[%s8618_s1 + $0x27c] sm:$0x4] %vm41_vm1, %v3114_v28  }
 0x270   :  { %4196 = vst.msk [vmem:[%s8618_s1 + $0x37b] sm:$0x8] %vm41_vm1, %v3114_v28   ;;  %4197 = vst.msk [vmem:[%s8618_s1 + $0x2ba] sm:$0x10] %vm41_vm1, %v3114_v28  }
 0x271   :  { %4198 = vst.msk [vmem:[%s8618_s1 + $0x3b9] sm:$0x20] %vm41_vm1, %v3114_v28   ;;  %4199 = vst.msk [vmem:[%s8618_s1 + $0x2f8] sm:$0x40] %vm41_vm1, %v3114_v28  }
 0x272   :  { %4200 = vst.msk [vmem:[%s8618_s1 + $0x3f7] sm:$0x80] %vm41_vm1, %v3114_v28   ;;  %4185 = vst.msk [vmem:[%s8618_s1 + $0x3e] sm:$0x1] %vm41_vm1, %v3089_v29  }
 0x273   :  { %4186 = vst.msk [vmem:[%s8618_s1 + $0x13d] sm:$0x2] %vm41_vm1, %v3089_v29   ;;  %4187 = vst.msk [vmem:[%s8618_s1 + $0x7c] sm:$0x4] %vm41_vm1, %v3089_v29  }
 0x274   :  { %4188 = vst.msk [vmem:[%s8618_s1 + $0x17b] sm:$0x8] %vm41_vm1, %v3089_v29   ;;  %4189 = vst.msk [vmem:[%s8618_s1 + $0xba] sm:$0x10] %vm41_vm1, %v3089_v29  }
 0x275   :  { %4190 = vst.msk [vmem:[%s8618_s1 + $0x1b9] sm:$0x20] %vm41_vm1, %v3089_v29   ;;  %4191 = vst.msk [vmem:[%s8618_s1 + $0xf8] sm:$0x40] %vm41_vm1, %v3089_v29  }
 0x276   :  { %4192 = vst.msk [vmem:[%s8618_s1 + $0x1f7] sm:$0x80] %vm41_vm1, %v3089_v29   ;;  %4209 = vst.msk [vmem:[%s8618_s1 + $0x23f] sm:$0x1] %vm41_vm1, %v3163_v30  }
 0x277   :  { %4210 = vst.msk [vmem:[%s8618_s1 + $0x33e] sm:$0x2] %vm41_vm1, %v3163_v30   ;;  %4211 = vst.msk [vmem:[%s8618_s1 + $0x27d] sm:$0x4] %vm41_vm1, %v3163_v30  }
 0x278   :  { %4212 = vst.msk [vmem:[%s8618_s1 + $0x37c] sm:$0x8] %vm41_vm1, %v3163_v30   ;;  %4213 = vst.msk [vmem:[%s8618_s1 + $0x2bb] sm:$0x10] %vm41_vm1, %v3163_v30  }
 0x279   :  { %4214 = vst.msk [vmem:[%s8618_s1 + $0x3ba] sm:$0x20] %vm41_vm1, %v3163_v30   ;;  %4215 = vst.msk [vmem:[%s8618_s1 + $0x2f9] sm:$0x40] %vm41_vm1, %v3163_v30  }
 0x27a   :  { %4216 = vst.msk [vmem:[%s8618_s1 + $0x3f8] sm:$0x80] %vm41_vm1, %v3163_v30   ;;  %4201 = vst.msk [vmem:[%s8618_s1 + $0x3f] sm:$0x1] %vm41_vm1, %v3138_v31  }
 0x27b   :  { %4202 = vst.msk [vmem:[%s8618_s1 + $0x13e] sm:$0x2] %vm41_vm1, %v3138_v31   ;;  %4203 = vst.msk [vmem:[%s8618_s1 + $0x7d] sm:$0x4] %vm41_vm1, %v3138_v31  }
 0x27c   :  { %4204 = vst.msk [vmem:[%s8618_s1 + $0x17c] sm:$0x8] %vm41_vm1, %v3138_v31   ;;  %4205 = vst.msk [vmem:[%s8618_s1 + $0xbb] sm:$0x10] %vm41_vm1, %v3138_v31  }
 0x27d   :  { %4206 = vst.msk [vmem:[%s8618_s1 + $0x1ba] sm:$0x20] %vm41_vm1, %v3138_v31   ;;  %4207 = vst.msk [vmem:[%s8618_s1 + $0xf9] sm:$0x40] %vm41_vm1, %v3138_v31  }
 0x27e   :  { %4208 = vst.msk [vmem:[%s8618_s1 + $0x1f8] sm:$0x80] %vm41_vm1, %v3138_v31  }

// kernel: squeeze.8
= control target key start
LH: loop header
LB: loop body
LE: loop exit
PB: predicated region body
PF: predicated region fallthrough
CT: control target
= control target key end

     0   :  { %s15_s8 = smov 6  ;;  %vm17_vm0 = vcmask 1042433   ;;  %vm21_vm1 = vcmask 1043459   ;;  %s49_s15 = smov 6  ;;  %vm6_vm2 = vcmask 1043458   ;;  %vm8_vm3 = vcmask 64512   ;;  %s541_s0 = inlined_call_operand.vmem [shape: f32[2,4,8,8,1], index: 0, kind: input, shape index: {}]   ;;  %s542_s1 = inlined_call_operand.vmem [shape: f32[2,256], index: 1, kind: output, shape index: {}]  }
   0x1   :  { %v278_v0 = vld [vmem:[%s541_s0 + $0xf] sm:$0x1]   ;;  %v280_v1 = vld [vmem:[%s541_s0 + $0x3c] sm:$0x8]   ;;  %v284_v3 = vld [vmem:[%s541_s0 + $0xd] sm:$0x1]  }
   0x2   :  { %v279_v2 = vld [vmem:[%s541_s0 + $0x3f] ss:$-16 sm:%s15_s8]   ;;  %v286_v5 = vld [vmem:[%s541_s0 + $0x3a] sm:$0x8]   ;;  %v281_v6 = vld [vmem:[%s541_s0 + $0xe] sm:$0x1]  }
   0x3   :  { %v18_v4 = vsel %vm17_vm0, %v279_v2, %v278_v0  ;;  %v285_v8 = vld [vmem:[%s541_s0 + $0x3d] ss:$-16 sm:%s49_s15]   ;;  %s32_s22 = smov 6  ;;  %v283_v9 = vld [vmem:[%s541_s0 + $0x3b] sm:$0x8]   ;;  %s339_s25 = smov 120  }
   0x4   :  { %v22_v7 = vsel %vm21_vm1, %v280_v1, %v18_v4  ;;  %v52_v10 = vsel %vm17_vm0, %v285_v8, %v284_v3  ;;  %v282_v11 = vld [vmem:[%s541_s0 + $0x3e] ss:$-16 sm:%s32_s22]   ;;  %v287_v12 = vld [vmem:[%s541_s0 + $0xc] sm:$0x1]   ;;  %s66_s30 = smov 6  ;;  %s340_s8 = smov 104  }
   0x5   :  { %23 = vrot.lane.b32.xlu0 %v22_v7, %s339_s25  ;;  %v56_v13 = vsel %vm21_vm1, %v286_v5, %v52_v10  ;;  %v35_v14 = vsel %vm17_vm0, %v282_v11, %v281_v6  ;;  %v288_v15 = vld [vmem:[%s541_s0 + $0x3c] ss:$-16 sm:%s66_s30]   ;;  %v290_v17 = vld [vmem:[%s541_s0 + $0xb] sm:$0x1]   ;;  %s83_s9 = smov 6  ;;  %s100_s16 = smov 6 }
   0x6   :  { %v289_v16 = vld [vmem:[%s541_s0 + $0x39] sm:$0x8]   ;;  %57 = vrot.lane.b32.xlu1 %v56_v13, %s340_s8  ;;  %v39_v18 = vsel %vm21_vm1, %v283_v9, %v35_v14  ;;  %v69_v19 = vsel %vm17_vm0, %v288_v15, %v287_v12  ;;  %v292_v20 = vld [vmem:[%s541_s0 + $0x38] sm:$0x8]   ;;  %v293_v21 = vld [vmem:[%s541_s0 + $0xa] sm:$0x1]  }
   0x7   :  { %v73_v22 = vsel %vm21_vm1, %v289_v16, %v69_v19  ;;  %v291_v23 = vld [vmem:[%s541_s0 + $0x3b] ss:$-16 sm:%s83_s9]   ;;  %v295_v24 = vld [vmem:[%s541_s0 + $0x37] sm:$0x8]   ;;  %s341_s19 = smov 112   ;;  %s117_s24 = smov 6 }
   0x8   :  { %v86_v25 = vsel %vm17_vm0, %v291_v23, %v290_v17  ;;  %v294_v26 = vld [vmem:[%s541_s0 + $0x3a] ss:$-16 sm:%s100_s16]   ;;  %v296_v27 = vld [vmem:[%s541_s0 + $0x9] sm:$0x1]   ;;  %v299_v31 = vld [vmem:[%s541_s0 + $0x8] sm:$0x1]  }
   0x9   :  { %40 = vrot.lane.b32.xlu0 %v39_v18, %s341_s19  ;;  %v90_v28 = vsel %vm21_vm1, %v292_v20, %v86_v25  ;;  %v103_v29 = vsel %vm17_vm0, %v294_v26, %v293_v21  ;;  %v297_v30 = vld [vmem:[%s541_s0 + $0x39] ss:$-16 sm:%s117_s24]   ;;  %s342_s29 = smov 96   ;;  %s134_s3 = smov 6  ;;  %v302_v36 = vld [vmem:[%s541_s0 + $0x7] sm:$0x1]  }
   0xa   :  { %74 = vrot.lane.b32.xlu1 %v73_v22, %s342_s29  ;;  %v120_v32 = vsel %vm17_vm0, %v297_v30, %v296_v27  ;;  %v298_v33 = vld [vmem:[%s541_s0 + $0x36] sm:$0x8]   ;;  %v107_v34 = vsel %vm21_vm1, %v295_v24, %v103_v29  ;;  %v300_v35 = vld [vmem:[%s541_s0 + $0x38] ss:$-16 sm:%s134_s3]   ;;  %s151_s8 = smov 6  ;;  %s343_s9 = smov 88  }
   0xb   :  { %v137_v37 = vsel %vm17_vm0, %v300_v35, %v299_v31  ;;  %v301_v38 = vld [vmem:[%s541_s0 + $0x35] sm:$0x8]   ;;  %v303_v39 = vld [vmem:[%s541_s0 + $0x37] ss:$-16 sm:%s151_s8]   ;;  %s168_s14 = smov 6  ;;  %v124_v40 = vsel %vm21_vm1, %v298_v33, %v120_v32  ;;  %s344_s19 = smov 80  }
   0xc   :  { %v305_v41 = vld [vmem:[%s541_s0 + $0x6] sm:$0x1]   ;;  %v154_v43 = vsel %vm17_vm0, %v303_v39, %v302_v36  ;;  %v304_v44 = vld [vmem:[%s541_s0 + $0x34] sm:$0x8]   ;;  %s185_s22 = smov 6  ;;  %v141_v45 = vsel %vm21_vm1, %v301_v38, %v137_v37  ;;  %s202_s27 = smov 6 }
   0xd   :  { %91 = vrot.lane.b32.xlu0 %v90_v28, %s343_s9  ;;  %v306_v42 = vld [vmem:[%s541_s0 + $0x36] ss:$-16 sm:%s168_s14]   ;;  %v308_v46 = vld [vmem:[%s541_s0 + $0x5] sm:$0x1]   ;;  %s345_s28 = smov 72   ;;  %s219_s2 = smov 6  ;;  %v158_v50 = vsel %vm21_vm1, %v304_v44, %v154_v43 }
   0xe   :  { %108 = vrot.lane.b32.xlu1 %v107_v34, %s344_s19  ;;  %v309_v47 = vld [vmem:[%s541_s0 + $0x35] ss:$-16 sm:%s185_s22]   ;;  %v171_v48 = vsel %vm17_vm0, %v306_v42, %v305_v41  ;;  %v307_v49 = vld [vmem:[%s541_s0 + $0x33] sm:$0x8]   ;;  %s346_s9 = smov 64   ;;  %s236_s14 = smov 6 }
   0xf   :  { %v310_v51 = vld [vmem:[%s541_s0 + $0x32] sm:$0x8]   ;;  %v311_v52 = vld [vmem:[%s541_s0 + $0x4] sm:$0x1]   ;;  %v188_v54 = vsel %vm17_vm0, %v309_v47, %v308_v46  ;;  %v313_v55 = vld [vmem:[%s541_s0 + $0x31] sm:$0x8]   ;;  %v175_v57 = vsel %vm21_vm1, %v307_v49, %v171_v48 }
  0x10   :  { %v312_v53 = vld [vmem:[%s541_s0 + $0x34] ss:$-16 sm:%s202_s27]   ;;  %v314_v56 = vld [vmem:[%s541_s0 + $0x3] sm:$0x1]   ;;  %v317_v59 = vld [vmem:[%s541_s0 + $0x2] sm:$0x1]   ;;  %v192_v62 = vsel %vm21_vm1, %v310_v51, %v188_v54 }
  0x11   :  { %125 = vrot.lane.b32.xlu0 %v124_v40, %s345_s28  ;;  %v315_v58 = vld [vmem:[%s541_s0 + $0x33] ss:$-16 sm:%s219_s2]   ;;  %s253_s19 = smov 6  ;;  %s347_s20 = smov 56   ;;  %v205_v60 = vsel %vm17_vm0, %v312_v53, %v311_v52  ;;  %v320_v5 = vld [vmem:[%s541_s0 + $0x1] sm:$0x1]  }
  0x12   :  { %142 = vrot.lane.b32.xlu1 %v141_v45, %s346_s9  ;;  %v318_v61 = vld [vmem:[%s541_s0 + $0x32] ss:$-16 sm:%s236_s14]   ;;  %s2_s23 = smov 3  ;;  %s4_s24 = smov 12  ;;  %v222_v1 = vsel %vm17_vm0, %v315_v58, %v314_v56  ;;  %v316_v2 = vld [vmem:[%s541_s0 + $0x30] sm:$0x8]   ;;  %v209_v4 = vsel %vm21_vm1, %v313_v55, %v205_v60 }
  0x13   :  { %v3_v63 = vld [vmem:[%s541_s0] ss:$16 sm:%s2_s23]   ;;  %s348_s29 = smov 48   ;;  %v321_v6 = vld [vmem:[%s541_s0 + $0x31] ss:$-16 sm:%s253_s19]   ;;  %s349_s7 = smov 40   ;;  %v239_v7 = vsel %vm17_vm0, %v318_v61, %v317_v59  ;;  %v226_v9 = vsel %vm21_vm1, %v316_v2, %v222_v1 }
  0x14   :  { %v5_v0 = vld [vmem:[%s541_s0] ss:$16 sm:%s4_s24]   ;;  %v319_v8 = vld [vmem:[%s541_s0 + $0x2f] sm:$0x8]   ;;  %s350_s10 = smov 32   ;;  %v256_v10 = vsel %vm17_vm0, %v321_v6, %v320_v5  ;;  %s352_s13 = smov 16  }
  0x15   :  { %159 = vrot.lane.b32.xlu0 %v158_v50, %s347_s20  ;;  %v7_v3 = vsel %vm6_vm2, %v5_v0, %v3_v63  ;;  %v322_v11 = vld [vmem:[%s541_s0 + $0x2e] sm:$0x8]   ;;  %v243_v12 = vsel %vm21_vm1, %v319_v8, %v239_v7  ;;  %s351_s0 = smov 24   ;;  %s353_s14 = smov 8   ;;  %vm25_vm4 = vcmask 1048512   ;;  %vm42_vm5 = vcmask 982912  }
  0x16   :  { %176 = vrot.lane.b32.xlu1 %v175_v57, %s348_s29  ;;  %9 = vst.msk [vmem:[#allocation0] ss:$8 sm:$0x3] %vm8_vm3, %v7_v3   ;;  %11 = vst.msk [vmem:[#allocation0 - $0xf] ss:$8 sm:$0xc] %vm8_vm3, %v7_v3   ;;  %v260_v13 = vsel %vm21_vm1, %v322_v11, %v256_v10 }
  0x17   :  { %vm59_vm6 = vcmask 917312   ;;  %vm76_vm7 = vcmask 851712   ;;  %vm93_vm8 = vcmask 786112   ;;  %vm110_vm9 = vcmask 720512  }
  0x18   :  { %vm127_vm10 = vcmask 654912   ;;  %vm144_vm11 = vcmask 589312   ;;  %vm161_vm12 = vcmask 523712   ;;  %vm178_vm13 = vcmask 458112  }
  0x19   :  { %193 = vrot.lane.b32.xlu0 %v192_v62, %s349_s7  ;;  %vm195_vm14 = vcmask 392512   ;;  %vm212_vm15 = vcmask 326912   ;;  %vm229_vm0 = vcmask 261312   ;;  %vm246_vm1 = vcmask 195712  }
  0x1a   :  { %210 = vrot.lane.b32.xlu1 %v209_v4, %s350_s10  ;;  %vm263_vm2 = vcmask 130112  }
  0x1d   :  { %227 = vrot.lane.b32.xlu0 %v226_v9, %s351_s0 }
  0x1e   :  { %244 = vrot.lane.b32.xlu1 %v243_v12, %s352_s13 }
  0x21   :  { %261 = vrot.lane.b32.xlu0 %v260_v13, %s353_s14 }
  0x77   :  { %v24_v14 = vpop.permute.xlu0 %23  }
  0x78   :  { %26 = vst.msk [vmem:[#allocation0] sm:$0x3] %vm25_vm4, %v24_v14   ;;  %28 = vst.msk [vmem:[#allocation0 + $0x6] sm:$0xc] %vm25_vm4, %v24_v14   ;;  %v58_v15 = vpop.permute.xlu1 %57  }
  0x7b   :  { %v41_v16 = vpop.permute.xlu0 %40  }
  0x7c   :  { %43 = vst.msk [vmem:[#allocation0] sm:$0x3] %vm42_vm5, %v41_v16   ;;  %45 = vst.msk [vmem:[#allocation0 + $0x6] sm:$0xc] %vm42_vm5, %v41_v16   ;;  %v75_v17 = vpop.permute.xlu1 %74  }
  0x7d   :  { %60 = vst.msk [vmem:[#allocation0] sm:$0x3] %vm59_vm6, %v58_v15   ;;  %62 = vst.msk [vmem:[#allocation0 + $0x6] sm:$0xc] %vm59_vm6, %v58_v15  }
  0x7e   :  { %77 = vst.msk [vmem:[#allocation0] sm:$0x3] %vm76_vm7, %v75_v17   ;;  %79 = vst.msk [vmem:[#allocation0 + $0x6] sm:$0xc] %vm76_vm7, %v75_v17  }
  0x7f   :  { %v92_v18 = vpop.permute.xlu0 %91  }
  0x80   :  { %94 = vst.msk [vmem:[#allocation0] sm:$0x3] %vm93_vm8, %v92_v18   ;;  %96 = vst.msk [vmem:[#allocation0 + $0x6] sm:$0xc] %vm93_vm8, %v92_v18   ;;  %v109_v19 = vpop.permute.xlu1 %108  }
  0x81   :  { %111 = vst.msk [vmem:[#allocation0] sm:$0x3] %vm110_vm9, %v109_v19   ;;  %113 = vst.msk [vmem:[#allocation0 + $0x6] sm:$0xc] %vm110_vm9, %v109_v19  }
  0x83   :  { %v126_v20 = vpop.permute.xlu0 %125  }
  0x84   :  { %128 = vst.msk [vmem:[#allocation0] sm:$0x3] %vm127_vm10, %v126_v20   ;;  %130 = vst.msk [vmem:[#allocation0 + $0x6] sm:$0xc] %vm127_vm10, %v126_v20   ;;  %v143_v21 = vpop.permute.xlu1 %142  }
  0x85   :  { %145 = vst.msk [vmem:[#allocation0] sm:$0x3] %vm144_vm11, %v143_v21   ;;  %147 = vst.msk [vmem:[#allocation0 + $0x6] sm:$0xc] %vm144_vm11, %v143_v21  }
  0x87   :  { %v160_v22 = vpop.permute.xlu0 %159  }
  0x88   :  { %162 = vst.msk [vmem:[#allocation0] sm:$0x3] %vm161_vm12, %v160_v22   ;;  %164 = vst.msk [vmem:[#allocation0 + $0x6] sm:$0xc] %vm161_vm12, %v160_v22   ;;  %v177_v23 = vpop.permute.xlu1 %176  }
  0x89   :  { %179 = vst.msk [vmem:[#allocation0] sm:$0x3] %vm178_vm13, %v177_v23   ;;  %181 = vst.msk [vmem:[#allocation0 + $0x6] sm:$0xc] %vm178_vm13, %v177_v23  }
  0x8b   :  { %v194_v24 = vpop.permute.xlu0 %193  }
  0x8c   :  { %196 = vst.msk [vmem:[#allocation0] sm:$0x3] %vm195_vm14, %v194_v24   ;;  %198 = vst.msk [vmem:[#allocation0 + $0x6] sm:$0xc] %vm195_vm14, %v194_v24   ;;  %v211_v25 = vpop.permute.xlu1 %210  }
  0x8d   :  { %213 = vst.msk [vmem:[#allocation0] sm:$0x3] %vm212_vm15, %v211_v25   ;;  %215 = vst.msk [vmem:[#allocation0 + $0x6] sm:$0xc] %vm212_vm15, %v211_v25  }
  0x8f   :  { %v228_v26 = vpop.permute.xlu0 %227  }
  0x90   :  { %230 = vst.msk [vmem:[#allocation0] sm:$0x3] %vm229_vm0, %v228_v26   ;;  %232 = vst.msk [vmem:[#allocation0 + $0x6] sm:$0xc] %vm229_vm0, %v228_v26   ;;  %v245_v27 = vpop.permute.xlu1 %244  }
  0x91   :  { %247 = vst.msk [vmem:[#allocation0] sm:$0x3] %vm246_vm1, %v245_v27   ;;  %249 = vst.msk [vmem:[#allocation0 + $0x6] sm:$0xc] %vm246_vm1, %v245_v27  }
  0x93   :  { %v262_v28 = vpop.permute.xlu0 %261  }
  0x94   :  { %264 = vst.msk [vmem:[#allocation0] sm:$0x3] %vm263_vm2, %v262_v28   ;;  %266 = vst.msk [vmem:[#allocation0 + $0x6] sm:$0xc] %vm263_vm2, %v262_v28  }
  0x9b   :  { %v270_v29 = vld [vmem:[#allocation0] sm:$0x3]  ;;  %v274_v30 = vld [vmem:[#allocation0 + $0x8] sm:$0x3] }
  0x9c   :  { %272 = vst [vmem:[%s542_s1] sm:$0x3] %v270_v29  ;;  %323 = vst [vmem:[%s542_s1 + $0x2] sm:$0x3] %v274_v30 }

// kernel: squeeze.10
= control target key start
LH: loop header
LB: loop body
LE: loop exit
PB: predicated region body
PF: predicated region fallthrough
CT: control target
= control target key end

     0   :  { %s1351_s10 = smov 122   ;;  %vm11_vm0 = vcmask 15360   ;;  %s1352_s11 = smov 124   ;;  %s1942_s0 = inlined_call_operand.vmem [shape: f32[2,2,1,128], index: 0, kind: input, shape index: {}]   ;;  %s1943_s1 = inlined_call_operand.vmem [shape: f32[2,1,4,4,2,4,2], index: 1, kind: output, shape index: {}]  }
   0x1   :  { %v1223_v0 = vld [vmem:[%s1942_s0 + $0x2] sm:$0x3]  ;;  %v8_v1 = vld [vmem:[%s1942_s0] sm:$0x3]  ;;  %s1350_s0 = smov 126   ;;  %s1353_s12 = smov 120  }
   0x2   :  { %7 = vst [vmem:[#allocation1 + $0x8] sm:$0x3] %v1223_v0  ;;  %9 = vst [vmem:[#allocation1] sm:$0x3] %v8_v1  ;;  %s1354_s13 = smov 118   ;;  %s1355_s14 = smov 116  }
   0x3   :  { %s1356_s15 = smov 114   ;;  %s1357_s16 = smov 112  }
   0x4   :  { %s1358_s17 = smov 110   ;;  %s1359_s18 = smov 108  }
   0x5   :  { %s1360_s19 = smov 106   ;;  %s1361_s20 = smov 104  }
   0x6   :  { %s1362_s21 = smov 102   ;;  %s1363_s22 = smov 100  }
   0x7   :  { %s1364_s23 = smov 98   ;;  %s1365_s24 = smov 96  }
   0x8   :  { %s1366_s25 = smov 94   ;;  %s1367_s26 = smov 92  }
   0x9   :  { %v1429_v2 = vld.sshfl [vmem:[#allocation1] sm:$0xff pattern:$0x99999810]   ;;  %s1368_s27 = smov 90   ;;  %s1369_s28 = smov 88  }
   0xa   :  { %23 = vrot.lane.b32.xlu0 %v1429_v2, %s1350_s0  ;;  %47 = vrot.lane.b32.xlu1 %v1429_v2, %s1351_s10  ;;  %v16_v3 = vld [vmem:[#allocation1 + $0x8] sm:$0x3]   ;;  %v10_v4 = vld [vmem:[#allocation1] sm:$0x3]   ;;  %s1370_s29 = smov 86   ;;  %s1371_s30 = smov 84  }
   0xb   :  { %21 = vst.msk [vmem:[#allocation0 + $0x17f] sm:$0x2] %vm11_vm0, %v16_v3   ;;  %19 = vst.msk [vmem:[#allocation0 + $0x100] sm:$0x1] %vm11_vm0, %v16_v3   ;;  %s1372_s2 = smov 82   ;;  %s1373_s3 = smov 80  }
   0xc   :  { %12 = vst.msk [vmem:[#allocation0] sm:$0x1] %vm11_vm0, %v10_v4   ;;  %14 = vst.msk [vmem:[#allocation0 + $0x7f] sm:$0x2] %vm11_vm0, %v10_v4   ;;  %s1374_s4 = smov 78   ;;  %s1375_s5 = smov 76  }
   0xd   :  { %s1376_s6 = smov 74   ;;  %s1377_s7 = smov 72  }
   0xe   :  { %35 = vrot.lane.b32.xlu0 %v1429_v2, %s1352_s11  ;;  %59 = vrot.lane.b32.xlu1 %v1429_v2, %s1353_s12  ;;  %s1378_s8 = smov 70   ;;  %s1379_s9 = smov 68  }
   0xf   :  { %s1380_s0 = smov 66   ;;  %s1381_s10 = smov 64  }
  0x10   :  { %s1382_s11 = smov 62   ;;  %s1383_s12 = smov 60  }
  0x12   :  { %71 = vrot.lane.b32.xlu0 %v1429_v2, %s1354_s13  ;;  %83 = vrot.lane.b32.xlu1 %v1429_v2, %s1355_s14  ;;  %s1384_s13 = smov 58   ;;  %s1385_s14 = smov 56  }
  0x16   :  { %95 = vrot.lane.b32.xlu0 %v1429_v2, %s1356_s15  ;;  %107 = vrot.lane.b32.xlu1 %v1429_v2, %s1357_s16  ;;  %s1386_s15 = smov 54   ;;  %s1387_s16 = smov 52  }
  0x1a   :  { %119 = vrot.lane.b32.xlu0 %v1429_v2, %s1358_s17  ;;  %131 = vrot.lane.b32.xlu1 %v1429_v2, %s1359_s18  ;;  %s1388_s17 = smov 50   ;;  %s1389_s18 = smov 48  }
  0x1e   :  { %143 = vrot.lane.b32.xlu0 %v1429_v2, %s1360_s19  ;;  %155 = vrot.lane.b32.xlu1 %v1429_v2, %s1361_s20  ;;  %s1390_s19 = smov 46   ;;  %s1391_s20 = smov 44  }
  0x22   :  { %167 = vrot.lane.b32.xlu0 %v1429_v2, %s1362_s21  ;;  %179 = vrot.lane.b32.xlu1 %v1429_v2, %s1363_s22  ;;  %s1392_s21 = smov 42   ;;  %s1393_s22 = smov 40  }
  0x26   :  { %191 = vrot.lane.b32.xlu0 %v1429_v2, %s1364_s23  ;;  %203 = vrot.lane.b32.xlu1 %v1429_v2, %s1365_s24  ;;  %s1394_s23 = smov 38   ;;  %s1395_s24 = smov 36  }
  0x2a   :  { %215 = vrot.lane.b32.xlu0 %v1429_v2, %s1366_s25  ;;  %227 = vrot.lane.b32.xlu1 %v1429_v2, %s1367_s26  ;;  %s1396_s25 = smov 34   ;;  %s1397_s26 = smov 32  }
  0x2e   :  { %239 = vrot.lane.b32.xlu0 %v1429_v2, %s1368_s27  ;;  %251 = vrot.lane.b32.xlu1 %v1429_v2, %s1369_s28  ;;  %s1398_s27 = smov 30   ;;  %s1399_s28 = smov 28  }
  0x32   :  { %263 = vrot.lane.b32.xlu0 %v1429_v2, %s1370_s29  ;;  %275 = vrot.lane.b32.xlu1 %v1429_v2, %s1371_s30  ;;  %s1400_s29 = smov 26   ;;  %s1401_s30 = smov 24  }
  0x36   :  { %287 = vrot.lane.b32.xlu0 %v1429_v2, %s1372_s2  ;;  %299 = vrot.lane.b32.xlu1 %v1429_v2, %s1373_s3  ;;  %s1402_s2 = smov 22   ;;  %s1403_s3 = smov 20  }
  0x3a   :  { %311 = vrot.lane.b32.xlu0 %v1429_v2, %s1374_s4  ;;  %323 = vrot.lane.b32.xlu1 %v1429_v2, %s1375_s5  ;;  %s1404_s4 = smov 18   ;;  %s1405_s5 = smov 16  }
  0x3e   :  { %335 = vrot.lane.b32.xlu0 %v1429_v2, %s1376_s6  ;;  %347 = vrot.lane.b32.xlu1 %v1429_v2, %s1377_s7  ;;  %s1406_s6 = smov 14   ;;  %s1407_s7 = smov 12  }
  0x42   :  { %359 = vrot.lane.b32.xlu0 %v1429_v2, %s1378_s8  ;;  %371 = vrot.lane.b32.xlu1 %v1429_v2, %s1379_s9  ;;  %s1408_s8 = smov 10   ;;  %s1409_s9 = smov 8  }
  0x46   :  { %383 = vrot.lane.b32.xlu0 %v1429_v2, %s1380_s0  ;;  %395 = vrot.lane.b32.xlu1 %v1429_v2, %s1381_s10  ;;  %s1410_s0 = smov 6   ;;  %s1411_s10 = smov 4  }
  0x4a   :  { %407 = vrot.lane.b32.xlu0 %v1429_v2, %s1382_s11  ;;  %419 = vrot.lane.b32.xlu1 %v1429_v2, %s1383_s12  ;;  %s1412_s11 = smov 2  }
  0x4e   :  { %431 = vrot.lane.b32.xlu0 %v1429_v2, %s1384_s13  ;;  %443 = vrot.lane.b32.xlu1 %v1429_v2, %s1385_s14 }
  0x52   :  { %455 = vrot.lane.b32.xlu0 %v1429_v2, %s1386_s15  ;;  %467 = vrot.lane.b32.xlu1 %v1429_v2, %s1387_s16 }
  0x56   :  { %479 = vrot.lane.b32.xlu0 %v1429_v2, %s1388_s17  ;;  %491 = vrot.lane.b32.xlu1 %v1429_v2, %s1389_s18 }
  0x5a   :  { %503 = vrot.lane.b32.xlu0 %v1429_v2, %s1390_s19  ;;  %515 = vrot.lane.b32.xlu1 %v1429_v2, %s1391_s20 }
  0x5e   :  { %527 = vrot.lane.b32.xlu0 %v1429_v2, %s1392_s21  ;;  %539 = vrot.lane.b32.xlu1 %v1429_v2, %s1393_s22 }
  0x62   :  { %551 = vrot.lane.b32.xlu0 %v1429_v2, %s1394_s23  ;;  %563 = vrot.lane.b32.xlu1 %v1429_v2, %s1395_s24 }
  0x66   :  { %575 = vrot.lane.b32.xlu0 %v1429_v2, %s1396_s25  ;;  %587 = vrot.lane.b32.xlu1 %v1429_v2, %s1397_s26 }
  0x6a   :  { %599 = vrot.lane.b32.xlu0 %v1429_v2, %s1398_s27  ;;  %611 = vrot.lane.b32.xlu1 %v1429_v2, %s1399_s28 }
  0x6e   :  { %623 = vrot.lane.b32.xlu0 %v1429_v2, %s1400_s29  ;;  %635 = vrot.lane.b32.xlu1 %v1429_v2, %s1401_s30 }
  0x72   :  { %647 = vrot.lane.b32.xlu0 %v1429_v2, %s1402_s2  ;;  %659 = vrot.lane.b32.xlu1 %v1429_v2, %s1403_s3 }
  0x76   :  { %671 = vrot.lane.b32.xlu0 %v1429_v2, %s1404_s4  ;;  %683 = vrot.lane.b32.xlu1 %v1429_v2, %s1405_s5 }
  0x7a   :  { %695 = vrot.lane.b32.xlu0 %v1429_v2, %s1406_s6  ;;  %707 = vrot.lane.b32.xlu1 %v1429_v2, %s1407_s7 }
  0x7c   :  { %v24_v5 = vpop.permute.xlu0 %23   ;;  %v48_v6 = vpop.permute.xlu1 %47  }
  0x7d   :  { %27 = vst.msk [vmem:[#allocation0 + $0x1] sm:$0x1] %vm11_vm0, %v24_v5   ;;  %29 = vst.msk [vmem:[#allocation0 + $0x80] sm:$0x2] %vm11_vm0, %v24_v5  }
  0x7e   :  { %31 = vst.msk [vmem:[#allocation0 + $0xff] sm:$0x4] %vm11_vm0, %v24_v5   ;;  %33 = vst.msk [vmem:[#allocation0 + $0x17e] sm:$0x8] %vm11_vm0, %v24_v5   ;;  %719 = vrot.lane.b32.xlu0 %v1429_v2, %s1408_s8  ;;  %731 = vrot.lane.b32.xlu1 %v1429_v2, %s1409_s9 }
  0x7f   :  { %51 = vst.msk [vmem:[#allocation0 + $0x3] sm:$0x1] %vm11_vm0, %v48_v6   ;;  %53 = vst.msk [vmem:[#allocation0 + $0x82] sm:$0x2] %vm11_vm0, %v48_v6  }
  0x80   :  { %55 = vst.msk [vmem:[#allocation0 + $0x101] sm:$0x4] %vm11_vm0, %v48_v6   ;;  %57 = vst.msk [vmem:[#allocation0 + $0x180] sm:$0x8] %vm11_vm0, %v48_v6   ;;  %v36_v7 = vpop.permute.xlu0 %35   ;;  %v60_v8 = vpop.permute.xlu1 %59  }
  0x81   :  { %39 = vst.msk [vmem:[#allocation0 + $0x2] sm:$0x1] %vm11_vm0, %v36_v7   ;;  %41 = vst.msk [vmem:[#allocation0 + $0x81] sm:$0x2] %vm11_vm0, %v36_v7  }
  0x82   :  { %43 = vst.msk [vmem:[#allocation0 + $0x100] sm:$0x4] %vm11_vm0, %v36_v7   ;;  %45 = vst.msk [vmem:[#allocation0 + $0x17f] sm:$0x8] %vm11_vm0, %v36_v7   ;;  %743 = vrot.lane.b32.xlu0 %v1429_v2, %s1410_s0  ;;  %755 = vrot.lane.b32.xlu1 %v1429_v2, %s1411_s10 }
  0x83   :  { %63 = vst.msk [vmem:[#allocation0 + $0x8] sm:$0x1] %vm11_vm0, %v60_v8   ;;  %65 = vst.msk [vmem:[#allocation0 + $0x87] sm:$0x2] %vm11_vm0, %v60_v8  }
  0x84   :  { %67 = vst.msk [vmem:[#allocation0 + $0x106] sm:$0x4] %vm11_vm0, %v60_v8   ;;  %69 = vst.msk [vmem:[#allocation0 + $0x185] sm:$0x8] %vm11_vm0, %v60_v8   ;;  %v72_v9 = vpop.permute.xlu0 %71   ;;  %v84_v10 = vpop.permute.xlu1 %83  }
  0x85   :  { %75 = vst.msk [vmem:[#allocation0 + $0x9] sm:$0x1] %vm11_vm0, %v72_v9   ;;  %77 = vst.msk [vmem:[#allocation0 + $0x88] sm:$0x2] %vm11_vm0, %v72_v9  }
  0x86   :  { %79 = vst.msk [vmem:[#allocation0 + $0x107] sm:$0x4] %vm11_vm0, %v72_v9   ;;  %81 = vst.msk [vmem:[#allocation0 + $0x186] sm:$0x8] %vm11_vm0, %v72_v9   ;;  %767 = vrot.lane.b32.xlu0 %v1429_v2, %s1412_s11 }
  0x87   :  { %87 = vst.msk [vmem:[#allocation0 + $0xa] sm:$0x1] %vm11_vm0, %v84_v10   ;;  %89 = vst.msk [vmem:[#allocation0 + $0x89] sm:$0x2] %vm11_vm0, %v84_v10  }
  0x88   :  { %91 = vst.msk [vmem:[#allocation0 + $0x108] sm:$0x4] %vm11_vm0, %v84_v10   ;;  %93 = vst.msk [vmem:[#allocation0 + $0x187] sm:$0x8] %vm11_vm0, %v84_v10   ;;  %v874_v11 = vld [vmem:[#allocation0 + $0x80] sm:$0xf]  ;;  %v96_v14 = vpop.permute.xlu0 %95   ;;  %v108_v15 = vpop.permute.xlu1 %107  }
  0x89   :  { %v970_v12 = vld [vmem:[#allocation0 + $0x100] sm:$0xf]  ;;  %1239 = vst [vmem:[%s1943_s1 + $0x40] sm:$0xf] %v874_v11  ;;  %99 = vst.msk [vmem:[#allocation0 + $0xb] sm:$0x1] %vm11_vm0, %v96_v14  }
  0x8a   :  { %v781_v13 = vld [vmem:[#allocation0] sm:$0xf]  ;;  %1255 = vst [vmem:[%s1943_s1 + $0x80] sm:$0xf] %v970_v12  ;;  %101 = vst.msk [vmem:[#allocation0 + $0x8a] sm:$0x2] %vm11_vm0, %v96_v14  }
  0x8b   :  { %v1066_v16 = vld [vmem:[#allocation0 + $0x180] sm:$0xf]  ;;  %783 = vst [vmem:[%s1943_s1] sm:$0xf] %v781_v13  ;;  %103 = vst.msk [vmem:[#allocation0 + $0x109] sm:$0x4] %vm11_vm0, %v96_v14  }
  0x8c   :  { %105 = vst.msk [vmem:[#allocation0 + $0x188] sm:$0x8] %vm11_vm0, %v96_v14   ;;  %111 = vst.msk [vmem:[#allocation0 + $0x10] sm:$0x1] %vm11_vm0, %v108_v15   ;;  %v120_v17 = vpop.permute.xlu0 %119   ;;  %v132_v18 = vpop.permute.xlu1 %131  }
  0x8d   :  { %113 = vst.msk [vmem:[#allocation0 + $0x8f] sm:$0x2] %vm11_vm0, %v108_v15   ;;  %115 = vst.msk [vmem:[#allocation0 + $0x10e] sm:$0x4] %vm11_vm0, %v108_v15  }
  0x8e   :  { %117 = vst.msk [vmem:[#allocation0 + $0x18d] sm:$0x8] %vm11_vm0, %v108_v15   ;;  %1271 = vst [vmem:[%s1943_s1 + $0xc0] sm:$0xf] %v1066_v16 }
  0x8f   :  { %123 = vst.msk [vmem:[#allocation0 + $0x11] sm:$0x1] %vm11_vm0, %v120_v17   ;;  %125 = vst.msk [vmem:[#allocation0 + $0x90] sm:$0x2] %vm11_vm0, %v120_v17  }
  0x90   :  { %127 = vst.msk [vmem:[#allocation0 + $0x10f] sm:$0x4] %vm11_vm0, %v120_v17   ;;  %129 = vst.msk [vmem:[#allocation0 + $0x18e] sm:$0x8] %vm11_vm0, %v120_v17   ;;  %v785_v20 = vld [vmem:[#allocation0 + $0x8] sm:$0xf]  ;;  %v144_v22 = vpop.permute.xlu0 %143   ;;  %v156_v23 = vpop.permute.xlu1 %155  }
  0x91   :  { %135 = vst.msk [vmem:[#allocation0 + $0x12] sm:$0x1] %vm11_vm0, %v132_v18   ;;  %137 = vst.msk [vmem:[#allocation0 + $0x91] sm:$0x2] %vm11_vm0, %v132_v18   ;;  %v880_v21 = vld [vmem:[#allocation0 + $0x88] sm:$0xf] }
  0x92   :  { %139 = vst.msk [vmem:[#allocation0 + $0x110] sm:$0x4] %vm11_vm0, %v132_v18   ;;  %141 = vst.msk [vmem:[#allocation0 + $0x18f] sm:$0x8] %vm11_vm0, %v132_v18   ;;  %v976_v24 = vld [vmem:[#allocation0 + $0x108] sm:$0xf] }
  0x93   :  { %v1072_v19 = vld [vmem:[#allocation0 + $0x188] sm:$0xf]  ;;  %1224 = vst [vmem:[%s1943_s1 + $0x4] sm:$0xf] %v785_v20  ;;  %1240 = vst [vmem:[%s1943_s1 + $0x44] sm:$0xf] %v880_v21 }
  0x94   :  { %1272 = vst [vmem:[%s1943_s1 + $0xc4] sm:$0xf] %v1072_v19  ;;  %147 = vst.msk [vmem:[#allocation0 + $0x13] sm:$0x1] %vm11_vm0, %v144_v22   ;;  %v168_v25 = vpop.permute.xlu0 %167   ;;  %v180_v26 = vpop.permute.xlu1 %179  }
  0x95   :  { %149 = vst.msk [vmem:[#allocation0 + $0x92] sm:$0x2] %vm11_vm0, %v144_v22   ;;  %151 = vst.msk [vmem:[#allocation0 + $0x111] sm:$0x4] %vm11_vm0, %v144_v22  }
  0x96   :  { %153 = vst.msk [vmem:[#allocation0 + $0x190] sm:$0x8] %vm11_vm0, %v144_v22   ;;  %159 = vst.msk [vmem:[#allocation0 + $0x18] sm:$0x1] %vm11_vm0, %v156_v23  }
  0x97   :  { %161 = vst.msk [vmem:[#allocation0 + $0x97] sm:$0x2] %vm11_vm0, %v156_v23   ;;  %163 = vst.msk [vmem:[#allocation0 + $0x116] sm:$0x4] %vm11_vm0, %v156_v23  }
  0x98   :  { %165 = vst.msk [vmem:[#allocation0 + $0x195] sm:$0x8] %vm11_vm0, %v156_v23   ;;  %1256 = vst [vmem:[%s1943_s1 + $0x84] sm:$0xf] %v976_v24  ;;  %v192_v30 = vpop.permute.xlu0 %191   ;;  %v204_v31 = vpop.permute.xlu1 %203  }
  0x99   :  { %171 = vst.msk [vmem:[#allocation0 + $0x19] sm:$0x1] %vm11_vm0, %v168_v25   ;;  %173 = vst.msk [vmem:[#allocation0 + $0x98] sm:$0x2] %vm11_vm0, %v168_v25  }
  0x9a   :  { %175 = vst.msk [vmem:[#allocation0 + $0x117] sm:$0x4] %vm11_vm0, %v168_v25   ;;  %177 = vst.msk [vmem:[#allocation0 + $0x196] sm:$0x8] %vm11_vm0, %v168_v25  }
  0x9b   :  { %183 = vst.msk [vmem:[#allocation0 + $0x1a] sm:$0x1] %vm11_vm0, %v180_v26   ;;  %185 = vst.msk [vmem:[#allocation0 + $0x99] sm:$0x2] %vm11_vm0, %v180_v26   ;;  %v790_v27 = vld [vmem:[#allocation0 + $0x10] sm:$0xf] }
  0x9c   :  { %187 = vst.msk [vmem:[#allocation0 + $0x118] sm:$0x4] %vm11_vm0, %v180_v26   ;;  %189 = vst.msk [vmem:[#allocation0 + $0x197] sm:$0x8] %vm11_vm0, %v180_v26   ;;  %v886_v28 = vld [vmem:[#allocation0 + $0x90] sm:$0xf]  ;;  %v216_v33 = vpop.permute.xlu0 %215   ;;  %v228_v34 = vpop.permute.xlu1 %227  }
  0x9d   :  { %v982_v29 = vld [vmem:[#allocation0 + $0x110] sm:$0xf]  ;;  %1225 = vst [vmem:[%s1943_s1 + $0x8] sm:$0xf] %v790_v27  ;;  %1241 = vst [vmem:[%s1943_s1 + $0x48] sm:$0xf] %v886_v28 }
  0x9e   :  { %v1078_v32 = vld [vmem:[#allocation0 + $0x190] sm:$0xf]  ;;  %1257 = vst [vmem:[%s1943_s1 + $0x88] sm:$0xf] %v982_v29  ;;  %195 = vst.msk [vmem:[#allocation0 + $0x1b] sm:$0x1] %vm11_vm0, %v192_v30  }
  0x9f   :  { %197 = vst.msk [vmem:[#allocation0 + $0x9a] sm:$0x2] %vm11_vm0, %v192_v30   ;;  %199 = vst.msk [vmem:[#allocation0 + $0x119] sm:$0x4] %vm11_vm0, %v192_v30  }
  0xa0   :  { %201 = vst.msk [vmem:[#allocation0 + $0x198] sm:$0x8] %vm11_vm0, %v192_v30   ;;  %207 = vst.msk [vmem:[#allocation0 + $0x20] sm:$0x1] %vm11_vm0, %v204_v31   ;;  %v240_v38 = vpop.permute.xlu0 %239   ;;  %v252_v39 = vpop.permute.xlu1 %251  }
  0xa1   :  { %209 = vst.msk [vmem:[#allocation0 + $0x9f] sm:$0x2] %vm11_vm0, %v204_v31   ;;  %211 = vst.msk [vmem:[#allocation0 + $0x11e] sm:$0x4] %vm11_vm0, %v204_v31  }
  0xa2   :  { %213 = vst.msk [vmem:[#allocation0 + $0x19d] sm:$0x8] %vm11_vm0, %v204_v31   ;;  %1273 = vst [vmem:[%s1943_s1 + $0xc8] sm:$0xf] %v1078_v32 }
  0xa3   :  { %219 = vst.msk [vmem:[#allocation0 + $0x21] sm:$0x1] %vm11_vm0, %v216_v33   ;;  %221 = vst.msk [vmem:[#allocation0 + $0xa0] sm:$0x2] %vm11_vm0, %v216_v33  }
  0xa4   :  { %223 = vst.msk [vmem:[#allocation0 + $0x11f] sm:$0x4] %vm11_vm0, %v216_v33   ;;  %225 = vst.msk [vmem:[#allocation0 + $0x19e] sm:$0x8] %vm11_vm0, %v216_v33   ;;  %v264_v41 = vpop.permute.xlu0 %263   ;;  %v276_v42 = vpop.permute.xlu1 %275  }
  0xa5   :  { %231 = vst.msk [vmem:[#allocation0 + $0x22] sm:$0x1] %vm11_vm0, %v228_v34   ;;  %233 = vst.msk [vmem:[#allocation0 + $0xa1] sm:$0x2] %vm11_vm0, %v228_v34   ;;  %v796_v36 = vld [vmem:[#allocation0 + $0x18] sm:$0xf] }
  0xa6   :  { %235 = vst.msk [vmem:[#allocation0 + $0x120] sm:$0x4] %vm11_vm0, %v228_v34   ;;  %237 = vst.msk [vmem:[#allocation0 + $0x19f] sm:$0x8] %vm11_vm0, %v228_v34   ;;  %v988_v35 = vld [vmem:[#allocation0 + $0x118] sm:$0xf] }
  0xa7   :  { %v892_v37 = vld [vmem:[#allocation0 + $0x98] sm:$0xf]  ;;  %1258 = vst [vmem:[%s1943_s1 + $0x8c] sm:$0xf] %v988_v35  ;;  %1226 = vst [vmem:[%s1943_s1 + $0xc] sm:$0xf] %v796_v36 }
  0xa8   :  { %v1084_v40 = vld [vmem:[#allocation0 + $0x198] sm:$0xf]  ;;  %1242 = vst [vmem:[%s1943_s1 + $0x4c] sm:$0xf] %v892_v37  ;;  %243 = vst.msk [vmem:[#allocation0 + $0x23] sm:$0x1] %vm11_vm0, %v240_v38   ;;  %v288_v46 = vpop.permute.xlu0 %287   ;;  %v300_v47 = vpop.permute.xlu1 %299  }
  0xa9   :  { %245 = vst.msk [vmem:[#allocation0 + $0xa2] sm:$0x2] %vm11_vm0, %v240_v38   ;;  %247 = vst.msk [vmem:[#allocation0 + $0x121] sm:$0x4] %vm11_vm0, %v240_v38  }
  0xaa   :  { %249 = vst.msk [vmem:[#allocation0 + $0x1a0] sm:$0x8] %vm11_vm0, %v240_v38   ;;  %255 = vst.msk [vmem:[#allocation0 + $0x28] sm:$0x1] %vm11_vm0, %v252_v39  }
  0xab   :  { %257 = vst.msk [vmem:[#allocation0 + $0xa7] sm:$0x2] %vm11_vm0, %v252_v39   ;;  %259 = vst.msk [vmem:[#allocation0 + $0x126] sm:$0x4] %vm11_vm0, %v252_v39  }
  0xac   :  { %261 = vst.msk [vmem:[#allocation0 + $0x1a5] sm:$0x8] %vm11_vm0, %v252_v39   ;;  %1274 = vst [vmem:[%s1943_s1 + $0xcc] sm:$0xf] %v1084_v40  ;;  %v312_v49 = vpop.permute.xlu0 %311   ;;  %v324_v50 = vpop.permute.xlu1 %323  }
  0xad   :  { %267 = vst.msk [vmem:[#allocation0 + $0x29] sm:$0x1] %vm11_vm0, %v264_v41   ;;  %269 = vst.msk [vmem:[#allocation0 + $0xa8] sm:$0x2] %vm11_vm0, %v264_v41  }
  0xae   :  { %271 = vst.msk [vmem:[#allocation0 + $0x127] sm:$0x4] %vm11_vm0, %v264_v41   ;;  %273 = vst.msk [vmem:[#allocation0 + $0x1a6] sm:$0x8] %vm11_vm0, %v264_v41  }
  0xaf   :  { %279 = vst.msk [vmem:[#allocation0 + $0x2a] sm:$0x1] %vm11_vm0, %v276_v42   ;;  %281 = vst.msk [vmem:[#allocation0 + $0xa9] sm:$0x2] %vm11_vm0, %v276_v42   ;;  %v802_v43 = vld [vmem:[#allocation0 + $0x20] sm:$0xf] }
  0xb0   :  { %283 = vst.msk [vmem:[#allocation0 + $0x128] sm:$0x4] %vm11_vm0, %v276_v42   ;;  %285 = vst.msk [vmem:[#allocation0 + $0x1a7] sm:$0x8] %vm11_vm0, %v276_v42   ;;  %v898_v44 = vld [vmem:[#allocation0 + $0xa0] sm:$0xf]  ;;  %v336_v54 = vpop.permute.xlu0 %335   ;;  %v348_v55 = vpop.permute.xlu1 %347  }
  0xb1   :  { %v994_v45 = vld [vmem:[#allocation0 + $0x120] sm:$0xf]  ;;  %1227 = vst [vmem:[%s1943_s1 + $0x10] sm:$0xf] %v802_v43  ;;  %1243 = vst [vmem:[%s1943_s1 + $0x50] sm:$0xf] %v898_v44 }
  0xb2   :  { %v1090_v48 = vld [vmem:[#allocation0 + $0x1a0] sm:$0xf]  ;;  %1259 = vst [vmem:[%s1943_s1 + $0x90] sm:$0xf] %v994_v45  ;;  %291 = vst.msk [vmem:[#allocation0 + $0x2b] sm:$0x1] %vm11_vm0, %v288_v46  }
  0xb3   :  { %293 = vst.msk [vmem:[#allocation0 + $0xaa] sm:$0x2] %vm11_vm0, %v288_v46   ;;  %295 = vst.msk [vmem:[#allocation0 + $0x129] sm:$0x4] %vm11_vm0, %v288_v46  }
  0xb4   :  { %297 = vst.msk [vmem:[#allocation0 + $0x1a8] sm:$0x8] %vm11_vm0, %v288_v46   ;;  %303 = vst.msk [vmem:[#allocation0 + $0x30] sm:$0x1] %vm11_vm0, %v300_v47   ;;  %v360_v57 = vpop.permute.xlu0 %359   ;;  %v372_v58 = vpop.permute.xlu1 %371  }
  0xb5   :  { %305 = vst.msk [vmem:[#allocation0 + $0xaf] sm:$0x2] %vm11_vm0, %v300_v47   ;;  %307 = vst.msk [vmem:[#allocation0 + $0x12e] sm:$0x4] %vm11_vm0, %v300_v47  }
  0xb6   :  { %309 = vst.msk [vmem:[#allocation0 + $0x1ad] sm:$0x8] %vm11_vm0, %v300_v47   ;;  %1275 = vst [vmem:[%s1943_s1 + $0xd0] sm:$0xf] %v1090_v48 }
  0xb7   :  { %315 = vst.msk [vmem:[#allocation0 + $0x31] sm:$0x1] %vm11_vm0, %v312_v49   ;;  %317 = vst.msk [vmem:[#allocation0 + $0xb0] sm:$0x2] %vm11_vm0, %v312_v49  }
  0xb8   :  { %319 = vst.msk [vmem:[#allocation0 + $0x12f] sm:$0x4] %vm11_vm0, %v312_v49   ;;  %321 = vst.msk [vmem:[#allocation0 + $0x1ae] sm:$0x8] %vm11_vm0, %v312_v49   ;;  %v384_v62 = vpop.permute.xlu0 %383   ;;  %v396_v63 = vpop.permute.xlu1 %395  }
  0xb9   :  { %327 = vst.msk [vmem:[#allocation0 + $0x32] sm:$0x1] %vm11_vm0, %v324_v50   ;;  %329 = vst.msk [vmem:[#allocation0 + $0xb1] sm:$0x2] %vm11_vm0, %v324_v50   ;;  %v808_v51 = vld [vmem:[#allocation0 + $0x28] sm:$0xf] }
  0xba   :  { %331 = vst.msk [vmem:[#allocation0 + $0x130] sm:$0x4] %vm11_vm0, %v324_v50   ;;  %333 = vst.msk [vmem:[#allocation0 + $0x1af] sm:$0x8] %vm11_vm0, %v324_v50   ;;  %v1000_v52 = vld [vmem:[#allocation0 + $0x128] sm:$0xf] }
  0xbb   :  { %v1096_v53 = vld [vmem:[#allocation0 + $0x1a8] sm:$0xf]  ;;  %1228 = vst [vmem:[%s1943_s1 + $0x14] sm:$0xf] %v808_v51  ;;  %1260 = vst [vmem:[%s1943_s1 + $0x94] sm:$0xf] %v1000_v52 }
  0xbc   :  { %1276 = vst [vmem:[%s1943_s1 + $0xd4] sm:$0xf] %v1096_v53  ;;  %v904_v56 = vld [vmem:[#allocation0 + $0xa8] sm:$0xf]  ;;  %339 = vst.msk [vmem:[#allocation0 + $0x33] sm:$0x1] %vm11_vm0, %v336_v54   ;;  %v408_v1 = vpop.permute.xlu0 %407   ;;  %v420_v2 = vpop.permute.xlu1 %419  }
  0xbd   :  { %341 = vst.msk [vmem:[#allocation0 + $0xb2] sm:$0x2] %vm11_vm0, %v336_v54   ;;  %343 = vst.msk [vmem:[#allocation0 + $0x131] sm:$0x4] %vm11_vm0, %v336_v54  }
  0xbe   :  { %345 = vst.msk [vmem:[#allocation0 + $0x1b0] sm:$0x8] %vm11_vm0, %v336_v54   ;;  %351 = vst.msk [vmem:[#allocation0 + $0x38] sm:$0x1] %vm11_vm0, %v348_v55  }
  0xbf   :  { %353 = vst.msk [vmem:[#allocation0 + $0xb7] sm:$0x2] %vm11_vm0, %v348_v55   ;;  %355 = vst.msk [vmem:[#allocation0 + $0x136] sm:$0x4] %vm11_vm0, %v348_v55  }
  0xc0   :  { %357 = vst.msk [vmem:[#allocation0 + $0x1b5] sm:$0x8] %vm11_vm0, %v348_v55   ;;  %1244 = vst [vmem:[%s1943_s1 + $0x54] sm:$0xf] %v904_v56  ;;  %v432_v6 = vpop.permute.xlu0 %431   ;;  %v444_v7 = vpop.permute.xlu1 %443  }
  0xc1   :  { %363 = vst.msk [vmem:[#allocation0 + $0x39] sm:$0x1] %vm11_vm0, %v360_v57   ;;  %365 = vst.msk [vmem:[#allocation0 + $0xb8] sm:$0x2] %vm11_vm0, %v360_v57  }
  0xc2   :  { %367 = vst.msk [vmem:[#allocation0 + $0x137] sm:$0x4] %vm11_vm0, %v360_v57   ;;  %369 = vst.msk [vmem:[#allocation0 + $0x1b6] sm:$0x8] %vm11_vm0, %v360_v57  }
  0xc3   :  { %375 = vst.msk [vmem:[#allocation0 + $0x3a] sm:$0x1] %vm11_vm0, %v372_v58   ;;  %377 = vst.msk [vmem:[#allocation0 + $0xb9] sm:$0x2] %vm11_vm0, %v372_v58   ;;  %v814_v59 = vld [vmem:[#allocation0 + $0x30] sm:$0xf] }
  0xc4   :  { %379 = vst.msk [vmem:[#allocation0 + $0x138] sm:$0x4] %vm11_vm0, %v372_v58   ;;  %381 = vst.msk [vmem:[#allocation0 + $0x1b7] sm:$0x8] %vm11_vm0, %v372_v58   ;;  %v1006_v60 = vld [vmem:[#allocation0 + $0x130] sm:$0xf]  ;;  %v456_v9 = vpop.permute.xlu0 %455   ;;  %v468_v10 = vpop.permute.xlu1 %467  }
  0xc5   :  { %v910_v61 = vld [vmem:[#allocation0 + $0xb0] sm:$0xf]  ;;  %1229 = vst [vmem:[%s1943_s1 + $0x18] sm:$0xf] %v814_v59  ;;  %1261 = vst [vmem:[%s1943_s1 + $0x98] sm:$0xf] %v1006_v60 }
  0xc6   :  { %v1102_v0 = vld [vmem:[#allocation0 + $0x1b0] sm:$0xf]  ;;  %1245 = vst [vmem:[%s1943_s1 + $0x58] sm:$0xf] %v910_v61  ;;  %387 = vst.msk [vmem:[#allocation0 + $0x3b] sm:$0x1] %vm11_vm0, %v384_v62  }
  0xc7   :  { %389 = vst.msk [vmem:[#allocation0 + $0xba] sm:$0x2] %vm11_vm0, %v384_v62   ;;  %391 = vst.msk [vmem:[#allocation0 + $0x139] sm:$0x4] %vm11_vm0, %v384_v62  }
  0xc8   :  { %393 = vst.msk [vmem:[#allocation0 + $0x1b8] sm:$0x8] %vm11_vm0, %v384_v62   ;;  %399 = vst.msk [vmem:[#allocation0 + $0x40] sm:$0x1] %vm11_vm0, %v396_v63   ;;  %v480_v14 = vpop.permute.xlu0 %479   ;;  %v492_v15 = vpop.permute.xlu1 %491  }
  0xc9   :  { %401 = vst.msk [vmem:[#allocation0 + $0xbf] sm:$0x2] %vm11_vm0, %v396_v63   ;;  %403 = vst.msk [vmem:[#allocation0 + $0x13e] sm:$0x4] %vm11_vm0, %v396_v63  }
  0xca   :  { %405 = vst.msk [vmem:[#allocation0 + $0x1bd] sm:$0x8] %vm11_vm0, %v396_v63   ;;  %1277 = vst [vmem:[%s1943_s1 + $0xd8] sm:$0xf] %v1102_v0 }
  0xcb   :  { %411 = vst.msk [vmem:[#allocation0 + $0x41] sm:$0x1] %vm11_vm0, %v408_v1   ;;  %413 = vst.msk [vmem:[#allocation0 + $0xc0] sm:$0x2] %vm11_vm0, %v408_v1  }
  0xcc   :  { %415 = vst.msk [vmem:[#allocation0 + $0x13f] sm:$0x4] %vm11_vm0, %v408_v1   ;;  %417 = vst.msk [vmem:[#allocation0 + $0x1be] sm:$0x8] %vm11_vm0, %v408_v1   ;;  %v504_v17 = vpop.permute.xlu0 %503   ;;  %v516_v18 = vpop.permute.xlu1 %515  }
  0xcd   :  { %423 = vst.msk [vmem:[#allocation0 + $0x42] sm:$0x1] %vm11_vm0, %v420_v2   ;;  %425 = vst.msk [vmem:[#allocation0 + $0xc1] sm:$0x2] %vm11_vm0, %v420_v2   ;;  %v820_v4 = vld [vmem:[#allocation0 + $0x38] sm:$0xf] }
  0xce   :  { %427 = vst.msk [vmem:[#allocation0 + $0x140] sm:$0x4] %vm11_vm0, %v420_v2   ;;  %429 = vst.msk [vmem:[#allocation0 + $0x1bf] sm:$0x8] %vm11_vm0, %v420_v2   ;;  %v916_v3 = vld [vmem:[#allocation0 + $0xb8] sm:$0xf] }
  0xcf   :  { %v1012_v5 = vld [vmem:[#allocation0 + $0x138] sm:$0xf]  ;;  %1246 = vst [vmem:[%s1943_s1 + $0x5c] sm:$0xf] %v916_v3  ;;  %1230 = vst [vmem:[%s1943_s1 + $0x1c] sm:$0xf] %v820_v4 }
  0xd0   :  { %v1108_v8 = vld [vmem:[#allocation0 + $0x1b8] sm:$0xf]  ;;  %1262 = vst [vmem:[%s1943_s1 + $0x9c] sm:$0xf] %v1012_v5  ;;  %435 = vst.msk [vmem:[#allocation0 + $0x43] sm:$0x1] %vm11_vm0, %v432_v6   ;;  %v528_v22 = vpop.permute.xlu0 %527   ;;  %v540_v23 = vpop.permute.xlu1 %539  }
  0xd1   :  { %437 = vst.msk [vmem:[#allocation0 + $0xc2] sm:$0x2] %vm11_vm0, %v432_v6   ;;  %439 = vst.msk [vmem:[#allocation0 + $0x141] sm:$0x4] %vm11_vm0, %v432_v6  }
  0xd2   :  { %441 = vst.msk [vmem:[#allocation0 + $0x1c0] sm:$0x8] %vm11_vm0, %v432_v6   ;;  %447 = vst.msk [vmem:[#allocation0 + $0x48] sm:$0x1] %vm11_vm0, %v444_v7  }
  0xd3   :  { %449 = vst.msk [vmem:[#allocation0 + $0xc7] sm:$0x2] %vm11_vm0, %v444_v7   ;;  %451 = vst.msk [vmem:[#allocation0 + $0x146] sm:$0x4] %vm11_vm0, %v444_v7  }
  0xd4   :  { %453 = vst.msk [vmem:[#allocation0 + $0x1c5] sm:$0x8] %vm11_vm0, %v444_v7   ;;  %1278 = vst [vmem:[%s1943_s1 + $0xdc] sm:$0xf] %v1108_v8  ;;  %v552_v25 = vpop.permute.xlu0 %551   ;;  %v564_v26 = vpop.permute.xlu1 %563  }
  0xd5   :  { %459 = vst.msk [vmem:[#allocation0 + $0x49] sm:$0x1] %vm11_vm0, %v456_v9   ;;  %461 = vst.msk [vmem:[#allocation0 + $0xc8] sm:$0x2] %vm11_vm0, %v456_v9  }
  0xd6   :  { %463 = vst.msk [vmem:[#allocation0 + $0x147] sm:$0x4] %vm11_vm0, %v456_v9   ;;  %465 = vst.msk [vmem:[#allocation0 + $0x1c6] sm:$0x8] %vm11_vm0, %v456_v9  }
  0xd7   :  { %471 = vst.msk [vmem:[#allocation0 + $0x4a] sm:$0x1] %vm11_vm0, %v468_v10   ;;  %473 = vst.msk [vmem:[#allocation0 + $0xc9] sm:$0x2] %vm11_vm0, %v468_v10   ;;  %v826_v12 = vld [vmem:[#allocation0 + $0x40] sm:$0xf] }
  0xd8   :  { %475 = vst.msk [vmem:[#allocation0 + $0x148] sm:$0x4] %vm11_vm0, %v468_v10   ;;  %477 = vst.msk [vmem:[#allocation0 + $0x1c7] sm:$0x8] %vm11_vm0, %v468_v10   ;;  %v1018_v11 = vld [vmem:[#allocation0 + $0x140] sm:$0xf]  ;;  %v576_v30 = vpop.permute.xlu0 %575   ;;  %v588_v31 = vpop.permute.xlu1 %587  }
  0xd9   :  { %v922_v13 = vld [vmem:[#allocation0 + $0xc0] sm:$0xf]  ;;  %1263 = vst [vmem:[%s1943_s1 + $0xa0] sm:$0xf] %v1018_v11  ;;  %1231 = vst [vmem:[%s1943_s1 + $0x20] sm:$0xf] %v826_v12 }
  0xda   :  { %v1114_v16 = vld [vmem:[#allocation0 + $0x1c0] sm:$0xf]  ;;  %1247 = vst [vmem:[%s1943_s1 + $0x60] sm:$0xf] %v922_v13  ;;  %483 = vst.msk [vmem:[#allocation0 + $0x4b] sm:$0x1] %vm11_vm0, %v480_v14  }
  0xdb   :  { %485 = vst.msk [vmem:[#allocation0 + $0xca] sm:$0x2] %vm11_vm0, %v480_v14   ;;  %487 = vst.msk [vmem:[#allocation0 + $0x149] sm:$0x4] %vm11_vm0, %v480_v14  }
  0xdc   :  { %489 = vst.msk [vmem:[#allocation0 + $0x1c8] sm:$0x8] %vm11_vm0, %v480_v14   ;;  %495 = vst.msk [vmem:[#allocation0 + $0x50] sm:$0x1] %vm11_vm0, %v492_v15   ;;  %v600_v33 = vpop.permute.xlu0 %599   ;;  %v612_v34 = vpop.permute.xlu1 %611  }
  0xdd   :  { %497 = vst.msk [vmem:[#allocation0 + $0xcf] sm:$0x2] %vm11_vm0, %v492_v15   ;;  %499 = vst.msk [vmem:[#allocation0 + $0x14e] sm:$0x4] %vm11_vm0, %v492_v15  }
  0xde   :  { %501 = vst.msk [vmem:[#allocation0 + $0x1cd] sm:$0x8] %vm11_vm0, %v492_v15   ;;  %1279 = vst [vmem:[%s1943_s1 + $0xe0] sm:$0xf] %v1114_v16 }
  0xdf   :  { %507 = vst.msk [vmem:[#allocation0 + $0x51] sm:$0x1] %vm11_vm0, %v504_v17   ;;  %509 = vst.msk [vmem:[#allocation0 + $0xd0] sm:$0x2] %vm11_vm0, %v504_v17  }
  0xe0   :  { %511 = vst.msk [vmem:[#allocation0 + $0x14f] sm:$0x4] %vm11_vm0, %v504_v17   ;;  %513 = vst.msk [vmem:[#allocation0 + $0x1ce] sm:$0x8] %vm11_vm0, %v504_v17   ;;  %v624_v38 = vpop.permute.xlu0 %623   ;;  %v636_v39 = vpop.permute.xlu1 %635  }
  0xe1   :  { %519 = vst.msk [vmem:[#allocation0 + $0x52] sm:$0x1] %vm11_vm0, %v516_v18   ;;  %521 = vst.msk [vmem:[#allocation0 + $0xd1] sm:$0x2] %vm11_vm0, %v516_v18   ;;  %v832_v20 = vld [vmem:[#allocation0 + $0x48] sm:$0xf] }
  0xe2   :  { %523 = vst.msk [vmem:[#allocation0 + $0x150] sm:$0x4] %vm11_vm0, %v516_v18   ;;  %525 = vst.msk [vmem:[#allocation0 + $0x1cf] sm:$0x8] %vm11_vm0, %v516_v18   ;;  %v928_v21 = vld [vmem:[#allocation0 + $0xc8] sm:$0xf] }
  0xe3   :  { %v1120_v19 = vld [vmem:[#allocation0 + $0x1c8] sm:$0xf]  ;;  %1232 = vst [vmem:[%s1943_s1 + $0x24] sm:$0xf] %v832_v20  ;;  %1248 = vst [vmem:[%s1943_s1 + $0x64] sm:$0xf] %v928_v21 }
  0xe4   :  { %1280 = vst [vmem:[%s1943_s1 + $0xe4] sm:$0xf] %v1120_v19  ;;  %v1024_v24 = vld [vmem:[#allocation0 + $0x148] sm:$0xf]  ;;  %531 = vst.msk [vmem:[#allocation0 + $0x53] sm:$0x1] %vm11_vm0, %v528_v22   ;;  %v648_v41 = vpop.permute.xlu0 %647   ;;  %v660_v42 = vpop.permute.xlu1 %659  }
  0xe5   :  { %533 = vst.msk [vmem:[#allocation0 + $0xd2] sm:$0x2] %vm11_vm0, %v528_v22   ;;  %535 = vst.msk [vmem:[#allocation0 + $0x151] sm:$0x4] %vm11_vm0, %v528_v22  }
  0xe6   :  { %537 = vst.msk [vmem:[#allocation0 + $0x1d0] sm:$0x8] %vm11_vm0, %v528_v22   ;;  %543 = vst.msk [vmem:[#allocation0 + $0x58] sm:$0x1] %vm11_vm0, %v540_v23  }
  0xe7   :  { %545 = vst.msk [vmem:[#allocation0 + $0xd7] sm:$0x2] %vm11_vm0, %v540_v23   ;;  %547 = vst.msk [vmem:[#allocation0 + $0x156] sm:$0x4] %vm11_vm0, %v540_v23  }
  0xe8   :  { %549 = vst.msk [vmem:[#allocation0 + $0x1d5] sm:$0x8] %vm11_vm0, %v540_v23   ;;  %1264 = vst [vmem:[%s1943_s1 + $0xa4] sm:$0xf] %v1024_v24  ;;  %v672_v46 = vpop.permute.xlu0 %671   ;;  %v684_v47 = vpop.permute.xlu1 %683  }
  0xe9   :  { %555 = vst.msk [vmem:[#allocation0 + $0x59] sm:$0x1] %vm11_vm0, %v552_v25   ;;  %557 = vst.msk [vmem:[#allocation0 + $0xd8] sm:$0x2] %vm11_vm0, %v552_v25  }
  0xea   :  { %559 = vst.msk [vmem:[#allocation0 + $0x157] sm:$0x4] %vm11_vm0, %v552_v25   ;;  %561 = vst.msk [vmem:[#allocation0 + $0x1d6] sm:$0x8] %vm11_vm0, %v552_v25  }
  0xeb   :  { %567 = vst.msk [vmem:[#allocation0 + $0x5a] sm:$0x1] %vm11_vm0, %v564_v26   ;;  %569 = vst.msk [vmem:[#allocation0 + $0xd9] sm:$0x2] %vm11_vm0, %v564_v26   ;;  %v838_v27 = vld [vmem:[#allocation0 + $0x50] sm:$0xf] }
  0xec   :  { %571 = vst.msk [vmem:[#allocation0 + $0x158] sm:$0x4] %vm11_vm0, %v564_v26   ;;  %573 = vst.msk [vmem:[#allocation0 + $0x1d7] sm:$0x8] %vm11_vm0, %v564_v26   ;;  %v934_v28 = vld [vmem:[#allocation0 + $0xd0] sm:$0xf]  ;;  %v696_v49 = vpop.permute.xlu0 %695   ;;  %v708_v50 = vpop.permute.xlu1 %707  }
  0xed   :  { %v1030_v29 = vld [vmem:[#allocation0 + $0x150] sm:$0xf]  ;;  %1233 = vst [vmem:[%s1943_s1 + $0x28] sm:$0xf] %v838_v27  ;;  %1249 = vst [vmem:[%s1943_s1 + $0x68] sm:$0xf] %v934_v28 }
  0xee   :  { %v1126_v32 = vld [vmem:[#allocation0 + $0x1d0] sm:$0xf]  ;;  %1265 = vst [vmem:[%s1943_s1 + $0xa8] sm:$0xf] %v1030_v29  ;;  %579 = vst.msk [vmem:[#allocation0 + $0x5b] sm:$0x1] %vm11_vm0, %v576_v30  }
  0xef   :  { %581 = vst.msk [vmem:[#allocation0 + $0xda] sm:$0x2] %vm11_vm0, %v576_v30   ;;  %583 = vst.msk [vmem:[#allocation0 + $0x159] sm:$0x4] %vm11_vm0, %v576_v30  }
  0xf0   :  { %585 = vst.msk [vmem:[#allocation0 + $0x1d8] sm:$0x8] %vm11_vm0, %v576_v30   ;;  %591 = vst.msk [vmem:[#allocation0 + $0x60] sm:$0x1] %vm11_vm0, %v588_v31   ;;  %v720_v54 = vpop.permute.xlu0 %719   ;;  %v732_v55 = vpop.permute.xlu1 %731  }
  0xf1   :  { %593 = vst.msk [vmem:[#allocation0 + $0xdf] sm:$0x2] %vm11_vm0, %v588_v31   ;;  %595 = vst.msk [vmem:[#allocation0 + $0x15e] sm:$0x4] %vm11_vm0, %v588_v31  }
  0xf2   :  { %597 = vst.msk [vmem:[#allocation0 + $0x1dd] sm:$0x8] %vm11_vm0, %v588_v31   ;;  %1281 = vst [vmem:[%s1943_s1 + $0xe8] sm:$0xf] %v1126_v32 }
  0xf3   :  { %603 = vst.msk [vmem:[#allocation0 + $0x61] sm:$0x1] %vm11_vm0, %v600_v33   ;;  %605 = vst.msk [vmem:[#allocation0 + $0xe0] sm:$0x2] %vm11_vm0, %v600_v33  }
  0xf4   :  { %607 = vst.msk [vmem:[#allocation0 + $0x15f] sm:$0x4] %vm11_vm0, %v600_v33   ;;  %609 = vst.msk [vmem:[#allocation0 + $0x1de] sm:$0x8] %vm11_vm0, %v600_v33   ;;  %v744_v57 = vpop.permute.xlu0 %743   ;;  %v756_v58 = vpop.permute.xlu1 %755  }
  0xf5   :  { %615 = vst.msk [vmem:[#allocation0 + $0x62] sm:$0x1] %vm11_vm0, %v612_v34   ;;  %617 = vst.msk [vmem:[#allocation0 + $0xe1] sm:$0x2] %vm11_vm0, %v612_v34   ;;  %v844_v35 = vld [vmem:[#allocation0 + $0x58] sm:$0xf] }
  0xf6   :  { %619 = vst.msk [vmem:[#allocation0 + $0x160] sm:$0x4] %vm11_vm0, %v612_v34   ;;  %621 = vst.msk [vmem:[#allocation0 + $0x1df] sm:$0x8] %vm11_vm0, %v612_v34   ;;  %v940_v36 = vld [vmem:[#allocation0 + $0xd8] sm:$0xf] }
  0xf7   :  { %v1036_v37 = vld [vmem:[#allocation0 + $0x158] sm:$0xf]  ;;  %1234 = vst [vmem:[%s1943_s1 + $0x2c] sm:$0xf] %v844_v35  ;;  %1250 = vst [vmem:[%s1943_s1 + $0x6c] sm:$0xf] %v940_v36 }
  0xf8   :  { %v1132_v40 = vld [vmem:[#allocation0 + $0x1d8] sm:$0xf]  ;;  %1266 = vst [vmem:[%s1943_s1 + $0xac] sm:$0xf] %v1036_v37  ;;  %627 = vst.msk [vmem:[#allocation0 + $0x63] sm:$0x1] %vm11_vm0, %v624_v38   ;;  %v768_v62 = vpop.permute.xlu0 %767  }
  0xf9   :  { %629 = vst.msk [vmem:[#allocation0 + $0xe2] sm:$0x2] %vm11_vm0, %v624_v38   ;;  %631 = vst.msk [vmem:[#allocation0 + $0x161] sm:$0x4] %vm11_vm0, %v624_v38  }
  0xfa   :  { %633 = vst.msk [vmem:[#allocation0 + $0x1e0] sm:$0x8] %vm11_vm0, %v624_v38   ;;  %639 = vst.msk [vmem:[#allocation0 + $0x68] sm:$0x1] %vm11_vm0, %v636_v39  }
  0xfb   :  { %641 = vst.msk [vmem:[#allocation0 + $0xe7] sm:$0x2] %vm11_vm0, %v636_v39   ;;  %643 = vst.msk [vmem:[#allocation0 + $0x166] sm:$0x4] %vm11_vm0, %v636_v39  }
  0xfc   :  { %645 = vst.msk [vmem:[#allocation0 + $0x1e5] sm:$0x8] %vm11_vm0, %v636_v39   ;;  %1282 = vst [vmem:[%s1943_s1 + $0xec] sm:$0xf] %v1132_v40 }
  0xfd   :  { %651 = vst.msk [vmem:[#allocation0 + $0x69] sm:$0x1] %vm11_vm0, %v648_v41   ;;  %653 = vst.msk [vmem:[#allocation0 + $0xe8] sm:$0x2] %vm11_vm0, %v648_v41  }
  0xfe   :  { %655 = vst.msk [vmem:[#allocation0 + $0x167] sm:$0x4] %vm11_vm0, %v648_v41   ;;  %657 = vst.msk [vmem:[#allocation0 + $0x1e6] sm:$0x8] %vm11_vm0, %v648_v41  }
  0xff   :  { %663 = vst.msk [vmem:[#allocation0 + $0x6a] sm:$0x1] %vm11_vm0, %v660_v42   ;;  %665 = vst.msk [vmem:[#allocation0 + $0xe9] sm:$0x2] %vm11_vm0, %v660_v42   ;;  %v850_v43 = vld [vmem:[#allocation0 + $0x60] sm:$0xf] }
 0x100   :  { %667 = vst.msk [vmem:[#allocation0 + $0x168] sm:$0x4] %vm11_vm0, %v660_v42   ;;  %669 = vst.msk [vmem:[#allocation0 + $0x1e7] sm:$0x8] %vm11_vm0, %v660_v42   ;;  %v946_v44 = vld [vmem:[#allocation0 + $0xe0] sm:$0xf] }
 0x101   :  { %v1042_v45 = vld [vmem:[#allocation0 + $0x160] sm:$0xf]  ;;  %1235 = vst [vmem:[%s1943_s1 + $0x30] sm:$0xf] %v850_v43  ;;  %1251 = vst [vmem:[%s1943_s1 + $0x70] sm:$0xf] %v946_v44 }
 0x102   :  { %v1138_v48 = vld [vmem:[#allocation0 + $0x1e0] sm:$0xf]  ;;  %1267 = vst [vmem:[%s1943_s1 + $0xb0] sm:$0xf] %v1042_v45  ;;  %675 = vst.msk [vmem:[#allocation0 + $0x6b] sm:$0x1] %vm11_vm0, %v672_v46  }
 0x103   :  { %677 = vst.msk [vmem:[#allocation0 + $0xea] sm:$0x2] %vm11_vm0, %v672_v46   ;;  %679 = vst.msk [vmem:[#allocation0 + $0x169] sm:$0x4] %vm11_vm0, %v672_v46  }
 0x104   :  { %681 = vst.msk [vmem:[#allocation0 + $0x1e8] sm:$0x8] %vm11_vm0, %v672_v46   ;;  %687 = vst.msk [vmem:[#allocation0 + $0x70] sm:$0x1] %vm11_vm0, %v684_v47  }
 0x105   :  { %689 = vst.msk [vmem:[#allocation0 + $0xef] sm:$0x2] %vm11_vm0, %v684_v47   ;;  %691 = vst.msk [vmem:[#allocation0 + $0x16e] sm:$0x4] %vm11_vm0, %v684_v47  }
 0x106   :  { %693 = vst.msk [vmem:[#allocation0 + $0x1ed] sm:$0x8] %vm11_vm0, %v684_v47   ;;  %1283 = vst [vmem:[%s1943_s1 + $0xf0] sm:$0xf] %v1138_v48 }
 0x107   :  { %699 = vst.msk [vmem:[#allocation0 + $0x71] sm:$0x1] %vm11_vm0, %v696_v49   ;;  %701 = vst.msk [vmem:[#allocation0 + $0xf0] sm:$0x2] %vm11_vm0, %v696_v49  }
 0x108   :  { %703 = vst.msk [vmem:[#allocation0 + $0x16f] sm:$0x4] %vm11_vm0, %v696_v49   ;;  %705 = vst.msk [vmem:[#allocation0 + $0x1ee] sm:$0x8] %vm11_vm0, %v696_v49  }
 0x109   :  { %711 = vst.msk [vmem:[#allocation0 + $0x72] sm:$0x1] %vm11_vm0, %v708_v50   ;;  %713 = vst.msk [vmem:[#allocation0 + $0xf1] sm:$0x2] %vm11_vm0, %v708_v50   ;;  %v856_v51 = vld [vmem:[#allocation0 + $0x68] sm:$0xf] }
 0x10a   :  { %715 = vst.msk [vmem:[#allocation0 + $0x170] sm:$0x4] %vm11_vm0, %v708_v50   ;;  %717 = vst.msk [vmem:[#allocation0 + $0x1ef] sm:$0x8] %vm11_vm0, %v708_v50   ;;  %v952_v52 = vld [vmem:[#allocation0 + $0xe8] sm:$0xf] }
 0x10b   :  { %v1144_v53 = vld [vmem:[#allocation0 + $0x1e8] sm:$0xf]  ;;  %1236 = vst [vmem:[%s1943_s1 + $0x34] sm:$0xf] %v856_v51  ;;  %1252 = vst [vmem:[%s1943_s1 + $0x74] sm:$0xf] %v952_v52 }
 0x10c   :  { %1284 = vst [vmem:[%s1943_s1 + $0xf4] sm:$0xf] %v1144_v53  ;;  %v1048_v56 = vld [vmem:[#allocation0 + $0x168] sm:$0xf]  ;;  %723 = vst.msk [vmem:[#allocation0 + $0x73] sm:$0x1] %vm11_vm0, %v720_v54  }
 0x10d   :  { %725 = vst.msk [vmem:[#allocation0 + $0xf2] sm:$0x2] %vm11_vm0, %v720_v54   ;;  %727 = vst.msk [vmem:[#allocation0 + $0x171] sm:$0x4] %vm11_vm0, %v720_v54  }
 0x10e   :  { %729 = vst.msk [vmem:[#allocation0 + $0x1f0] sm:$0x8] %vm11_vm0, %v720_v54   ;;  %735 = vst.msk [vmem:[#allocation0 + $0x78] sm:$0x1] %vm11_vm0, %v732_v55  }
 0x10f   :  { %737 = vst.msk [vmem:[#allocation0 + $0xf7] sm:$0x2] %vm11_vm0, %v732_v55   ;;  %739 = vst.msk [vmem:[#allocation0 + $0x176] sm:$0x4] %vm11_vm0, %v732_v55  }
 0x110   :  { %741 = vst.msk [vmem:[#allocation0 + $0x1f5] sm:$0x8] %vm11_vm0, %v732_v55   ;;  %1268 = vst [vmem:[%s1943_s1 + $0xb4] sm:$0xf] %v1048_v56 }
 0x111   :  { %747 = vst.msk [vmem:[#allocation0 + $0x79] sm:$0x1] %vm11_vm0, %v744_v57   ;;  %749 = vst.msk [vmem:[#allocation0 + $0xf8] sm:$0x2] %vm11_vm0, %v744_v57  }
 0x112   :  { %751 = vst.msk [vmem:[#allocation0 + $0x177] sm:$0x4] %vm11_vm0, %v744_v57   ;;  %753 = vst.msk [vmem:[#allocation0 + $0x1f6] sm:$0x8] %vm11_vm0, %v744_v57  }
 0x113   :  { %759 = vst.msk [vmem:[#allocation0 + $0x7a] sm:$0x1] %vm11_vm0, %v756_v58   ;;  %761 = vst.msk [vmem:[#allocation0 + $0xf9] sm:$0x2] %vm11_vm0, %v756_v58   ;;  %v862_v60 = vld [vmem:[#allocation0 + $0x70] sm:$0xf] }
 0x114   :  { %763 = vst.msk [vmem:[#allocation0 + $0x178] sm:$0x4] %vm11_vm0, %v756_v58   ;;  %765 = vst.msk [vmem:[#allocation0 + $0x1f7] sm:$0x8] %vm11_vm0, %v756_v58   ;;  %v958_v59 = vld [vmem:[#allocation0 + $0xf0] sm:$0xf] }
 0x115   :  { %v1054_v61 = vld [vmem:[#allocation0 + $0x170] sm:$0xf]  ;;  %1253 = vst [vmem:[%s1943_s1 + $0x78] sm:$0xf] %v958_v59  ;;  %1237 = vst [vmem:[%s1943_s1 + $0x38] sm:$0xf] %v862_v60 }
 0x116   :  { %v1150_v63 = vld [vmem:[#allocation0 + $0x1f0] sm:$0xf]  ;;  %1269 = vst [vmem:[%s1943_s1 + $0xb8] sm:$0xf] %v1054_v61  ;;  %771 = vst.msk [vmem:[#allocation0 + $0x7b] sm:$0x1] %vm11_vm0, %v768_v62  }
 0x117   :  { %773 = vst.msk [vmem:[#allocation0 + $0xfa] sm:$0x2] %vm11_vm0, %v768_v62   ;;  %775 = vst.msk [vmem:[#allocation0 + $0x179] sm:$0x4] %vm11_vm0, %v768_v62  }
 0x118   :  { %777 = vst.msk [vmem:[#allocation0 + $0x1f8] sm:$0x8] %vm11_vm0, %v768_v62   ;;  %1285 = vst [vmem:[%s1943_s1 + $0xf8] sm:$0xf] %v1150_v63 }
 0x11d   :  { %v868_v0 = vld [vmem:[#allocation0 + $0x78] sm:$0xf] }
 0x11e   :  { %v964_v1 = vld [vmem:[#allocation0 + $0xf8] sm:$0xf]  ;;  %1238 = vst [vmem:[%s1943_s1 + $0x3c] sm:$0xf] %v868_v0 }
 0x11f   :  { %v1060_v2 = vld [vmem:[#allocation0 + $0x178] sm:$0xf]  ;;  %1254 = vst [vmem:[%s1943_s1 + $0x7c] sm:$0xf] %v964_v1 }
 0x120   :  { %1270 = vst [vmem:[%s1943_s1 + $0xbc] sm:$0xf] %v1060_v2  ;;  %v1156_v3 = vld [vmem:[#allocation0 + $0x1f8] sm:$0xf] }
 0x121   :  { %1286 = vst [vmem:[%s1943_s1 + $0xfc] sm:$0xf] %v1156_v3 }

// kernel: _lambda_.3
= control target key start
LH: loop header
LB: loop body
LE: loop exit
PB: predicated region body
PF: predicated region fallthrough
CT: control target
= control target key end

     0   :  { %s713_s15 = smov 0   ;;  %s797_s0 = inlined_call_operand.vmem [shape: f32[2,256], index: 0, kind: input, shape index: {}]   ;;  %s798_s1 = inlined_call_operand.vmem [shape: bf16[2,256], index: 1, kind: input, shape index: {}]   ;;  %s799_s2 = inlined_call_operand.vmem [shape: bf16[2,256,256], index: 2, kind: input, shape index: {}]   ;;  %s800_s3 = inlined_call_operand.vmem [shape: f32[2,1,256], index: 3, kind: input, shape index: {}]   ;;  %s801_s4 = inlined_call_operand.vmem [shape: f32[2,512], index: 4, kind: output, shape index: {}]  }
   0x1 LB: > { %s719_s16 = sadd.s32 4294967295, %s685_s15   ;;  %p574_p0 = scmp.ge.s32.totalorder %s685_s15, 1  ;;  %s685_s15 = sphi %s713_s15, %s14_s15  }
   0x2   : > { %p171_p1 = scmp.lt.s32.totalorder %s685_s15, 3 }
   0x4   : > { %p172_p2 = pnand %p574_p0, %p171_p1 }
   0x5   : > { %p201_p3 = scmp.lt.s32.totalorder (!%p172_p2), %s719_s16, 1  ;;  %v252_v0 = vlaneseq (!%p172_p2)  ;;  %v727_v1 = vld.sshfl [vmem:[%s798_s1] sm:$0x11 pattern:$0x75316420] (!%p172_p2)  ;;  %s580_s28 = sshll.u32 (!%p172_p2), %s719_s16, 7 }
   0x6   : > { %175 = sbr.rel (%p172_p2) target bundleno = 325 (0x145), region = 36  ;;  %v687_v3 = vmov (!%p172_p2), 1966171168   ;;  %v270_v5 = vcombine.high (!%p172_p2), %v727_v1, %v727_v1  ;;  %s578_s29 = sshll.u32 (!%p172_p2), %s719_s16, 1 }
   0x7   : > { %v732_v2 = vshrl.u32 (!%p172_p2), %v252_v0, 7  ;;  %v272_v4 = vunpack.c.l.s4 (!%p172_p2), %v687_v3  ;;  %s489_s30 = sshra.s32 (!%p172_p2), %s580_s28, 7  ;;  %p211_p4 = scmp.lt.s32.totalorder (!%p172_p2), %s578_s29, 3 }
   0x8   : > { %s614_s5 = sshll.u32 (!%p172_p2), %s489_s30, 1 }
   0x9   : > { %v273_v6 = vunpack.c.0.s8 (!%p172_p2), %v272_v4  ;;  %v254_v42 = vsub.s32 (!%p172_p2), 0, %v732_v2  ;;  %v258_v44 = vsub.s32 (!%p172_p2), 1, %v732_v2  ;;  %s492_s8 = scalar_lea.vmem (!%p172_p2), %s797_s0, %s614_s5 }
   0xa   : > { %v493_v55 = vld [vmem:[%s492_s8] sm:$0x3] (!%p172_p2) }
   0xb   : > { %v744_v8 = vsub.s32 (!%p172_p2), %v273_v6, %v732_v2 }
   0xd   : > { %s730_s19 = scalar_select %p201_p3, %s719_s16, 1  ;;  %v284_v11 = vrot.slane %v270_v5, %v744_v8  ;;  %v277_v41 = vrot.slane %v727_v1, %v744_v8 }
   0xe   : > { %s803_s29 = smov (!%p211_p4, %s578_s29), 3 }
   0xf   : > { %s617_s20 = sshll.u32 %s730_s19, 8  ;;  %479 = vmatprep.mubr.bf16.mxu0 %v284_v11  ;;  %s577_s24 = sshll.u32 %s730_s19, 1 }
  0x10   : > { %s740_s23 = scalar_lea.vmem %s799_s2, %s617_s20  ;;  %s209_s27 = scalar_lea.vmem %s800_s3, %s577_s24 }
  0x11   : > { %v627_v7 = vld [vmem:[%s740_s23 + $0x4] ss:$8 sps:$4 sm:$0xff]   ;;  %v629_v9 = vld [vmem:[%s740_s23] ss:$8 sps:$4 sm:$0xff]   ;;  %v630_v10 = vld [vmem:[%s740_s23 + $0x14] ss:$8 sps:$4 sm:$0xff]  }
  0x12   : > { %447 = vmatprep.subr.bf16.mxu0 %v627_v7  ;;  %v632_v12 = vld [vmem:[%s740_s23 + $0x10] ss:$8 sps:$4 sm:$0xff]   ;;  %v633_v13 = vld [vmem:[%s740_s23 + $0x24] ss:$8 sps:$4 sm:$0xff]   ;;  %v635_v14 = vld [vmem:[%s740_s23 + $0x20] ss:$8 sps:$4 sm:$0xff]  }
  0x13   : > { %448 = vmatpush1.bf16.msra.mxu0 %v629_v9  ;;  %v636_v15 = vld [vmem:[%s740_s23 + $0x34] ss:$8 sps:$4 sm:$0xff]   ;;  %v638_v16 = vld [vmem:[%s740_s23 + $0x30] ss:$8 sps:$4 sm:$0xff]   ;;  %v639_v17 = vld [vmem:[%s740_s23 + $0x44] ss:$8 sps:$4 sm:$0xff]  }
  0x14   : > { %449 = vmatprep.subr.bf16.mxu0 %v630_v10  ;;  %v641_v18 = vld [vmem:[%s740_s23 + $0x40] ss:$8 sps:$4 sm:$0xff]   ;;  %v642_v19 = vld [vmem:[%s740_s23 + $0x54] ss:$8 sps:$4 sm:$0xff]   ;;  %v644_v20 = vld [vmem:[%s740_s23 + $0x50] ss:$8 sps:$4 sm:$0xff]  }
  0x15   : > { %v645_v21 = vld [vmem:[%s740_s23 + $0x64] ss:$8 sps:$4 sm:$0xff]   ;;  %v647_v22 = vld [vmem:[%s740_s23 + $0x60] ss:$8 sps:$4 sm:$0xff]   ;;  %v648_v23 = vld [vmem:[%s740_s23 + $0x74] ss:$8 sps:$4 sm:$0xff]  }
  0x16   : > { %v650_v24 = vld [vmem:[%s740_s23 + $0x70] ss:$8 sps:$4 sm:$0xff]   ;;  %v651_v25 = vld [vmem:[%s740_s23 + $0x84] ss:$8 sps:$4 sm:$0xff]   ;;  %v653_v26 = vld [vmem:[%s740_s23 + $0x80] ss:$8 sps:$4 sm:$0xff]  }
  0x17   : > { %450 = vmatpush1.bf16.msra.mxu0 %v632_v12  ;;  %v654_v27 = vld [vmem:[%s740_s23 + $0x94] ss:$8 sps:$4 sm:$0xff]   ;;  %v656_v28 = vld [vmem:[%s740_s23 + $0x90] ss:$8 sps:$4 sm:$0xff]   ;;  %v657_v29 = vld [vmem:[%s740_s23 + $0xa4] ss:$8 sps:$4 sm:$0xff]  }
  0x18   : > { %451 = vmatprep.subr.bf16.mxu0 %v633_v13  ;;  %v659_v30 = vld [vmem:[%s740_s23 + $0xa0] ss:$8 sps:$4 sm:$0xff]   ;;  %v660_v31 = vld [vmem:[%s740_s23 + $0xb4] ss:$8 sps:$4 sm:$0xff]   ;;  %v662_v32 = vld [vmem:[%s740_s23 + $0xb0] ss:$8 sps:$4 sm:$0xff]  }
  0x19   : > { %v663_v33 = vld [vmem:[%s740_s23 + $0xc4] ss:$8 sps:$4 sm:$0xff]   ;;  %v665_v34 = vld [vmem:[%s740_s23 + $0xc0] ss:$8 sps:$4 sm:$0xff]   ;;  %v666_v35 = vld [vmem:[%s740_s23 + $0xd4] ss:$8 sps:$4 sm:$0xff]  }
  0x1a   : > { %v668_v36 = vld [vmem:[%s740_s23 + $0xd0] ss:$8 sps:$4 sm:$0xff]   ;;  %v669_v37 = vld [vmem:[%s740_s23 + $0xe4] ss:$8 sps:$4 sm:$0xff]   ;;  %v671_v38 = vld [vmem:[%s740_s23 + $0xe0] ss:$8 sps:$4 sm:$0xff]  }
  0x1b   : > { %452 = vmatpush1.bf16.msra.mxu0 %v635_v14  ;;  %v672_v39 = vld [vmem:[%s740_s23 + $0xf4] ss:$8 sps:$4 sm:$0xff]   ;;  %v674_v40 = vld [vmem:[%s740_s23 + $0xf0] ss:$8 sps:$4 sm:$0xff]   ;;  %v250_v43 = vld [vmem:[%s209_s27] sm:$0x3] }
  0x1c   : > { %453 = vmatprep.subr.bf16.mxu0 %v636_v15  ;;  %v255_v45 = vrot.slane %v250_v43, %v254_v42  ;;  %v259_v46 = vrot.slane %v250_v43, %v258_v44  ;;  %s579_s9 = sshll.u32 %s803_s29, 1 }
  0x1d   : > { %s214_s12 = scalar_lea.vmem %s801_s4, %s579_s9 }
  0x1f   : > { %454 = vmatpush1.bf16.msra.mxu0 %v638_v16 }
  0x20   : > { %455 = vmatprep.subr.bf16.mxu0 %v639_v17 }
  0x23   : > { %456 = vmatpush1.bf16.msra.mxu0 %v641_v18 }
  0x24   : > { %457 = vmatprep.subr.bf16.mxu0 %v642_v19 }
  0x27   : > { %458 = vmatpush1.bf16.msra.mxu0 %v644_v20 }
  0x28   : > { %459 = vmatprep.subr.bf16.mxu0 %v645_v21 }
  0x2b   : > { %460 = vmatpush1.bf16.msra.mxu0 %v647_v22 }
  0x2c   : > { %461 = vmatprep.subr.bf16.mxu0 %v648_v23 }
  0x2f   : > { %462 = vmatpush1.bf16.msra.mxu0 %v650_v24 }
  0x30   : > { %463 = vmatprep.subr.bf16.mxu0 %v651_v25 }
  0x33   : > { %464 = vmatpush1.bf16.msra.mxu0 %v653_v26 }
  0x34   : > { %465 = vmatprep.subr.bf16.mxu0 %v654_v27 }
  0x37   : > { %466 = vmatpush1.bf16.msra.mxu0 %v656_v28 }
  0x38   : > { %467 = vmatprep.subr.bf16.mxu0 %v657_v29 }
  0x3b   : > { %468 = vmatpush1.bf16.msra.mxu0 %v659_v30 }
  0x3c   : > { %469 = vmatprep.subr.bf16.mxu0 %v660_v31 }
  0x3f   : > { %470 = vmatpush1.bf16.msra.mxu0 %v662_v32 }
  0x40   : > { %471 = vmatprep.subr.bf16.mxu0 %v663_v33 }
  0x43   : > { %472 = vmatpush1.bf16.msra.mxu0 %v665_v34 }
  0x44   : > { %473 = vmatprep.subr.bf16.mxu0 %v666_v35 }
  0x47   : > { %474 = vmatpush1.bf16.msra.mxu0 %v668_v36 }
  0x48   : > { %475 = vmatprep.subr.bf16.mxu0 %v669_v37 }
  0x4b   : > { %476 = vmatpush1.bf16.msra.mxu0 %v671_v38 }
  0x4c   : > { %477 = vmatprep.subr.bf16.mxu0 %v672_v39 }
  0x4f   : > { %478 = vmatpush1.bf16.msra.mxu0 %v674_v40 }
  0x52   : > { %480 = vmatmul.mubr.bf16.vlgmr.msra.gmra.mrb[0].mxu0 %v277_v41 }
 0x125   : > { %v481_v47 = vpop.f32.mrb[0].mxu0 }
 0x126   : > { %v482_v48 = vadd.f32 %v481_v47, %v255_v45  ;;  %v483_v49 = vpop.f32.mrb[1].mxu0 }
 0x127   : > { %v484_v50 = vadd.f32 %v483_v49, %v259_v46  ;;  %v485_v51 = vpop.f32.mrb[2].mxu0 }
 0x128   : > { %675 = vtanh.f32 %v482_v48  ;;  %v486_v52 = vpop.f32.mrb[3].mxu0 }
 0x132   : > { %v676_v53 = vpop.eup %675 }
 0x133   : > { %v494_v54 = vmul.f32 1.442695, %v676_v53  ;;  %499 = vst [vmem:[%s214_s12 + $0x2] sm:$0x3] %v676_v53 }
 0x135   : > { %677 = vpow2.f32 %v494_v54 }
 0x13f   : > { %v678_v56 = vpop.eup %677 }
 0x140   : > { %v496_v57 = vmul.f32 %v678_v56, %v493_v55 }
 0x142   : > { %v497_v58 = vadd.f32 %v496_v57, %v484_v50 }
 0x144   : > { %498 = vst [vmem:[%s214_s12] sm:$0x3] %v497_v58 }
 0x145 PF: > { %s14_s15 = sadd.s32 1, %s685_s15  }
 0x146   : > { %p11_p5 = scmp.ge.s32.totalorder %s14_s15, 4  }
 0x148   :  { %13 = sbr.rel (!%p11_p5) target bundleno = 1 (0x1), region = 70 }

// kernel: squeeze.11
= control target key start
LH: loop header
LB: loop body
LE: loop exit
PB: predicated region body
PF: predicated region fallthrough
CT: control target
= control target key end

     0   :  { %s29_s10 = smov 3  ;;  %s10_s11 = smov 3  ;;  %vm12_vm0 = vcmask 31744   ;;  %vm19_vm1 = vcmask 130144   ;;  %vm26_vm2 = vcmask 97344   ;;  %vm33_vm3 = vcmask 64544   ;;  %s67_s0 = inlined_call_operand.vmem [shape: f32[2,4,4], index: 0, kind: input, shape index: {}]   ;;  %s68_s1 = inlined_call_operand.vmem [shape: f32[2,16], index: 1, kind: output, shape index: {}]  }
   0x1   :  { %v41_v0 = vld [vmem:[%s67_s0 + $0x4] sm:$0xf]  ;;  %v8_v1 = vld [vmem:[%s67_s0] sm:$0xf]  ;;  %s15_s0 = smov 3  ;;  %s22_s12 = smov 3 }
   0x2   :  { %7 = vst [vmem:[#allocation1 + $0x8] sm:$0xf] %v41_v0  ;;  %9 = vst [vmem:[#allocation1] sm:$0xf] %v8_v1  ;;  %s45_s13 = smov 12   ;;  %s46_s14 = smov 4  }
   0x3   :  { %s47_s15 = smov 8  }
   0x9   :  { %v16_v2 = vld [vmem:[#allocation1 + $0x3] ss:$8 sm:%s15_s0]   ;;  %v30_v3 = vld [vmem:[#allocation1 + $0x1] ss:$8 sm:%s29_s10]   ;;  %v11_v4 = vld [vmem:[#allocation1] ss:$8 sm:%s10_s11]  }
   0xa   :  { %17 = vrot.lane.b32.xlu0 %v16_v2, %s45_s13  ;;  %31 = vrot.lane.b32.xlu1 %v30_v3, %s46_s14  ;;  %v23_v5 = vld [vmem:[#allocation1 + $0x2] ss:$8 sm:%s22_s12]   ;;  %13 = vst.msk [vmem:[#allocation0] sm:$0x3] %vm12_vm0, %v11_v4  }
   0xe   :  { %24 = vrot.lane.b32.xlu0 %v23_v5, %s47_s15 }
  0x7c   :  { %v18_v6 = vpop.permute.xlu0 %17   ;;  %v32_v7 = vpop.permute.xlu1 %31  }
  0x7d   :  { %20 = vst.msk [vmem:[#allocation0] sm:$0x3] %vm19_vm1, %v18_v6  }
  0x80   :  { %v25_v8 = vpop.permute.xlu0 %24  }
  0x81   :  { %27 = vst.msk [vmem:[#allocation0] sm:$0x3] %vm26_vm2, %v25_v8  }
  0x82   :  { %34 = vst.msk [vmem:[#allocation0] sm:$0x3] %vm33_vm3, %v32_v7  }
  0x89   :  { %v38_v9 = vld [vmem:[#allocation0] sm:$0x3] }
  0x8a   :  { %40 = vst [vmem:[%s68_s1] sm:$0x3] %v38_v9 }

// kernel: _lambda_.2
= control target key start
LH: loop header
LB: loop body
LE: loop exit
PB: predicated region body
PF: predicated region fallthrough
CT: control target
= control target key end

     0   :  { %9 = vsyncpa [#allocation3], 0  ;;  %s5839_s0 = inlined_call_operand.vmem [shape: f32[2,1024], index: 0, kind: input, shape index: {}]   ;;  %s5840_s1 = inlined_call_operand.vmem [shape: bf16[2,1024], index: 1, kind: input, shape index: {}]   ;;  %s5841_s2 = inlined_call_operand.hbm [shape: bf16[2,1024,1024], index: 2, kind: input, shape index: {}]   ;;  %s5842_s3 = inlined_call_operand.hbm [shape: f32[2,1,1024], index: 3, kind: input, shape index: {}]   ;;  %s5843_s4 = inlined_call_operand.vmem [shape: f32[2,2048], index: 4, kind: output, shape index: {}]  }
   0x1   :  { %11 = vsyncpa [#allocation3 + $0x1], 0 }
   0x2   :  { %12 = vsyncpa [#allocation5], 0 }
   0x3   :  { %14 = vsyncpa [#allocation5 + $0x1], 0  ;;  %s5051_s15 = smov 0   ;;  %s5053_s16 = smov 0  }
   0x4   :  { %s5055_s17 = smov 0   ;;  %s5057_s18 = smov 0  }
   0x5 LB: > { %s5070_s19 = sadd.s32 4294967295, %s5018_s18   ;;  %s5073_s20 = sadd.s32 1, %s5018_s18   ;;  %s5018_s18 = sphi %s5057_s18, %s5855_s18   ;;  %s5014_s17 = sphi %s5055_s17, %s5854_s17   ;;  %s5010_s16 = sphi %s5053_s16, %s5853_s16   ;;  %s5006_s15 = sphi %s5051_s15, %s5852_s15  }
   0x6   : > { %s66_s21 = ssub.s32 %s5018_s18, %s5073_s20  ;;  %s69_s22 = sadd.s32 1, %s5014_s17 }
   0x7   : > { %p67_p0 = scmp.eq.s32.totalorder %s66_s21, 0  ;;  %p76_p1 = scmp.ne.s32.totalorder %s5014_s17, %s5010_s16 }
   0x8   : > { %p77_p2 = scmp.eq.s32.totalorder %s5018_s18, 0  ;;  %p82_p3 = scmp.ne.s32.totalorder %s5010_s16, %s5006_s15 }
   0x9   : > { %s5083_s23 = scalar_select %p67_p0, %s5014_s17, %s69_s22  }
   0xa   : > { %p78_p4 = por %p77_p2, %p76_p1  ;;  %p83_p5 = scmp.eq.s32.totalorder %s5070_s19, 0 }
   0xb   : > { %p4866_p6 = scmp.lt.s32.totalorder %s5018_s18, 2  ;;  %s5092_s25 = sand.u32 1, %s5014_s17  }
   0xc   : > { %p5087_p7 = por %p83_p5, %p82_p3  ;;  %s4270_s26 = sshll.u32 %s5092_s25, 12 }
   0xd   : > { %s4797_s27 = sshll.u32 %s5018_s18, 16  ;;  %s168_s5 = scalar_lea.vmem [#allocation2], %s4270_s26 }
   0xe   : > { %s5845_s24 = scalar_select %p5087_p7, 1, 0 }
   0xf   : > { %s5099_s30 = scalar_lea.hbm %s5841_s2, %s4797_s27  ;;  %s175_s6 = sshll.u32 %s168_s5, 4  ;;  %s5101_s6 = int_to_ptr.vmem [resolvable:$true] %s175_s6 }
  0x10   : > { %p5103_p8 = pnand %p4866_p6, %p78_p4  ;;  %s165_s8 = scalar_lea.sflag [#allocation3], %s5092_s25 }
  0x11   : > { %s4920_s9 = scalar_lea.hbm %s5099_s30, 65536  ;;  %s4925_s12 = scalar_lea.hbm %s5841_s2, 131072 }
  0x12   : > { %p4921_p10 = scmp.ne.s32.totalorder %s5099_s30, %s4920_s9  ;;  %p4922_p11 = pneg %p5103_p8 }
  0x13   : > { %p4926_p0 = scmp.lt.u32.totalorder %s5099_s30, %s5841_s2  ;;  %p4927_p1 = scmp.lt.u32.totalorder %s4925_s12, %s4920_s9 }
  0x14   : > { %p4923_p12 = pnand %p4922_p11, %p4921_p10  ;;  %p4929_p3 = scmp.lt.u32.totalorder %s4920_s9, %s5099_s30 }
  0x15   : > { %p4928_p2 = por %p4927_p1, %p4926_p0 }
  0x16   : > { %p4924_p13 = pneg %p4923_p12 }
  0x17   : > { %p4930_p4 = por %p4929_p3, %p4928_p2 }
  0x19   : > { %p4931_p5 = pnand %p4930_p4, %p4924_p13 }
  0x1b   : > { %4934 = shalt.err (!%p4931_p5)
}
  0x1c   : > { %s4935_s15 = scalar_lea.vmem %s5101_s6, 65536  ;;  %s5020_s21 = smov [#allocation2]  }
  0x1d   : > { %p4936_p6 = scmp.ne.s32.totalorder %s5101_s6, %s4935_s15  ;;  %s4940_s22 = sshll.u32 %s5020_s21, 4  ;;  %s4941_s22 = int_to_ptr.vmem [resolvable:$false] %s4940_s22 }
  0x1e   : > { %s4942_s26 = scalar_lea.vmem %s4941_s22, 131072  ;;  %p4943_p9 = scmp.lt.s32.totalorder %s5101_s6, %s4941_s22 }
  0x1f   : > { %p4938_p10 = pnand %p4936_p6, %p4922_p11  ;;  %p4944_p0 = scmp.lt.s32.totalorder %s4942_s26, %s4935_s15 }
  0x21   : > { %p4939_p12 = pneg %p4938_p10  ;;  %p4945_p1 = por %p4944_p0, %p4943_p9 }
  0x23   : > { %p4946_p2 = pnand %p4945_p1, %p4939_p12 }
  0x25   : > { %4949 = shalt.err (!%p4946_p2)
}
  0x26   : > { %s5021_s27 = smov 512   ;;  %s5022_s28 = smov 32  }
  0x27   : > { %4862 = dma.hbm_to_vmem [thread:$0]  (!%p5103_p8), %s5099_s30, 65536, %s5101_s6, %s165_s8, %s5021_s27, %s5021_s27, %s5022_s28  }
  0x28   : > { %p202_p13 = scmp.lt.s32.totalorder %s5018_s18, 3  ;;  %s4273_s29 = sshll.u32 %s5092_s25, 3 }
  0x29   : > { %s4798_s5 = sshll.u32 %s5018_s18, 7  ;;  %p5847_p9 = scmp.ge.s32.totalorder %s5018_s18, 1 }
  0x2a   : > { %s5148_s12 = scalar_lea.hbm %s5842_s3, %s4798_s5  ;;  %s189_s13 = scalar_lea.vmem [#allocation4], %s4273_s29 }
  0x2b   : > { %p5141_p3 = pnand %p5847_p9, %p202_p13  ;;  %s197_s14 = sshll.u32 %s189_s13, 4  ;;  %s198_s14 = int_to_ptr.vmem [resolvable:$true] %s197_s14 }
  0x2c   : > { %s186_s30 = scalar_lea.sflag [#allocation5], %s5092_s25  ;;  %s4950_s6 = scalar_lea.hbm %s5148_s12, 128 }
  0x2d   : > { %s5848_s9 = scalar_select %p5141_p3, 1, 0 }
  0x2e   : > { %p4951_p4 = scmp.ne.s32.totalorder %s5148_s12, %s4950_s6  ;;  %s4955_s15 = scalar_lea.hbm %s5842_s3, 256 }
  0x2f   : > { %p4956_p10 = scmp.lt.u32.totalorder %s5148_s12, %s5842_s3  ;;  %p4957_p12 = scmp.lt.u32.totalorder %s4955_s15, %s4950_s6 }
  0x30   : > { %p4953_p5 = pnand %p4951_p4, %p4922_p11  ;;  %p4959_p1 = scmp.lt.u32.totalorder %s4950_s6, %s5148_s12 }
  0x31   : > { %p4958_p0 = por %p4957_p12, %p4956_p10 }
  0x32   : > { %p4954_p6 = pneg %p4953_p5 }
  0x33   : > { %p4960_p2 = por %p4959_p1, %p4958_p0 }
  0x35   : > { %p4961_p13 = pnand %p4960_p2, %p4954_p6 }
  0x37   : > { %4964 = shalt.err (!%p4961_p13)
}
  0x38   : > { %s4965_s25 = scalar_lea.vmem %s198_s14, 128  ;;  %s5023_s26 = smov [#allocation4]  }
  0x39   : > { %p4966_p9 = scmp.ne.s32.totalorder %s198_s14, %s4965_s25  ;;  %s4970_s27 = sshll.u32 %s5023_s26, 4  ;;  %s4971_s27 = int_to_ptr.vmem [resolvable:$false] %s4970_s27 }
  0x3a   : > { %s4972_s28 = scalar_lea.vmem %s4971_s27, 256  ;;  %p4973_p7 = scmp.lt.s32.totalorder %s198_s14, %s4971_s27 }
  0x3b   : > { %p4968_p4 = pnand %p4966_p9, %p4922_p11  ;;  %p4974_p3 = scmp.lt.s32.totalorder %s4972_s28, %s4965_s25 }
  0x3d   : > { %p4969_p5 = pneg %p4968_p4  ;;  %p4975_p10 = por %p4974_p3, %p4973_p7 }
  0x3f   : > { %p4976_p12 = pnand %p4975_p10, %p4969_p5 }
  0x41   : > { %4979 = shalt.err (!%p4976_p12)
}
  0x42   : > { %4865 = dma.hbm_to_vmem [thread:$0]  (!%p5103_p8), %s5148_s12, 128, %s198_s14, %s186_s30  }
  0x43   : > { %p5849_p6 = scmp.ne.s32.totalorder %s5848_s9, 0 }
  0x44   : > { %s208_s29 = sand.u32 (!%p5849_p6), 1, %s5010_s16   ;;  %p5850_p11 = scmp.ne.s32.totalorder (!%p5849_p6), %s5845_s24, 0 }
  0x45   : > { %206 = sbr.rel (%p5849_p6) target bundleno = 820 (0x334), region = 36  ;;  %s4277_s5 = sshll.u32 (!%p5849_p6), %s208_s29, 12 }
  0x46   : > { %s209_s10 = scalar_lea.sflag (!%p5849_p6), [#allocation3], %s208_s29  ;;  %s5173_s11 = scalar_lea.vmem (!%p5849_p6), [#allocation2], %s4277_s5 }
  0x4c   : > { %4997 = dma.done.wait (%p5850_p11), %s209_s10, 65536  }
  0x4d   : > { %4999 = vsyncadd (%p5850_p11), %s209_s10, 4294901760  ;;  %s4278_s13 = sshll.u32 %s208_s29, 3  ;;  %s218_s7 = scalar_lea.sflag [#allocation5], %s208_s29 }
  0x4e   : > { %s5179_s6 = scalar_lea.vmem [#allocation4], %s4278_s13 }
  0x4f   : > { %5001 = dma.done.wait (%p5850_p11), %s218_s7, 128  }
  0x50   : > { %5003 = vsyncadd (%p5850_p11), %s218_s7, 4294967168  ;;  %v259_v0 = vld [vmem:[%s5173_s11] sm:$0xff]  ;;  %v260_v2 = vld [vmem:[%s5173_s11 + $0x8] sm:$0xff]  ;;  %v773_v32 = vlaneseq  ;;  %v5024_v33 = vmov 1966171168   ;;  %s4279_s12 = sshll.u32 %s5070_s19, 3 }
  0x51   : > { %v263_v1 = vld [vmem:[%s5173_s11 + $0x20] sm:$0xff]  ;;  %v264_v4 = vld [vmem:[%s5173_s11 + $0x28] sm:$0xff]  ;;  %v816_v34 = vunpack.c.l.s4 %v5024_v33  ;;  %p5763_p7 = scmp.lt.s32.totalorder %s4279_s12, 15  ;;  %s4281_s21 = sshll.u32 %s5070_s19, 9 }
  0x52   : > { %v4283_v3 = vcombine.high %v259_v0, %v263_v1  ;;  %v4282_v5 = vcombine.low %v259_v0, %v263_v1  ;;  %v267_v6 = vld [vmem:[%s5173_s11 + $0x40] sm:$0xff]  ;;  %v4285_v8 = vcombine.high %v260_v2, %v264_v4  ;;  %v4284_v9 = vcombine.low %v260_v2, %v264_v4  ;;  %v268_v11 = vld [vmem:[%s5173_s11 + $0x48] sm:$0xff]  ;;  %s4091_s22 = sshra.s32 %s4281_s21, 7 }
  0x53   : > { %v271_v7 = vld [vmem:[%s5173_s11 + $0x60] sm:$0xff]  ;;  %v272_v12 = vld [vmem:[%s5173_s11 + $0x68] sm:$0xff]  ;;  %v5207_v43 = vshrl.u32 %v773_v32, 7  ;;  %v817_v44 = vunpack.c.0.s8 %v816_v34  ;;  %s5857_s12 = smov (!%p5763_p7, %s4279_s12), 15  ;;  %s4794_s25 = sshll.u32 %s4091_s22, 1 }
  0x54   : > { %v4291_v10 = vcombine.high %v267_v6, %v271_v7  ;;  %v275_v13 = vld [vmem:[%s5173_s11 + $0x80] sm:$0xff]  ;;  %3431 = vmatprep.subr.bf16.mxu0 %v4283_v3  ;;  %v4293_v14 = vcombine.high %v268_v11, %v272_v12  ;;  %v276_v16 = vld [vmem:[%s5173_s11 + $0x88] sm:$0xff]  ;;  %3595 = vmatprep.subr.bf16.mxu1 %v4285_v8  ;;  %v4290_v18 = vcombine.low %v267_v6, %v271_v7  ;;  %s4280_s30 = sshll.u32 %s5857_s12, 1  ;;  %s4094_s27 = scalar_lea.vmem %s5839_s0, %s4794_s25 }
  0x55   : > { %v279_v15 = vld [vmem:[%s5173_s11 + $0xa0] sm:$0xff]  ;;  %v280_v17 = vld [vmem:[%s5173_s11 + $0xa8] sm:$0xff]  ;;  %3432 = vmatpush1.bf16.msra.mxu0 %v4282_v5  ;;  %3596 = vmatpush1.bf16.msra.mxu1 %v4284_v9  ;;  %v4292_v19 = vcombine.low %v268_v11, %v272_v12  ;;  %v5214_v53 = vsub.s32 %v817_v44, %v5207_v43  ;;  %s5790_s15 = scalar_lea.vmem %s5843_s4, %s4280_s30 }
  0x56   : > { %3433 = vmatprep.subr.bf16.mxu0 %v4291_v10  ;;  %v4299_v20 = vcombine.high %v275_v13, %v279_v15  ;;  %3597 = vmatprep.subr.bf16.mxu1 %v4293_v14  ;;  %v4301_v21 = vcombine.high %v276_v16, %v280_v17  ;;  %v283_v22 = vld [vmem:[%s5173_s11 + $0xc0] sm:$0xff]  ;;  %v284_v24 = vld [vmem:[%s5173_s11 + $0xc8] sm:$0xff]  ;;  %v4298_v26 = vcombine.low %v275_v13, %v279_v15 }
  0x57   : > { %v287_v23 = vld [vmem:[%s5173_s11 + $0xe0] sm:$0xff]  ;;  %v288_v25 = vld [vmem:[%s5173_s11 + $0xe8] sm:$0xff]  ;;  %v4300_v27 = vcombine.low %v276_v16, %v280_v17 }
  0x58   : > { %v4307_v28 = vcombine.high %v283_v22, %v287_v23  ;;  %v4309_v29 = vcombine.high %v284_v24, %v288_v25  ;;  %v291_v30 = vld [vmem:[%s5173_s11 + $0x100] sm:$0xff]  ;;  %v292_v35 = vld [vmem:[%s5173_s11 + $0x108] sm:$0xff]  ;;  %v4306_v37 = vcombine.low %v283_v22, %v287_v23  ;;  %v4308_v38 = vcombine.low %v284_v24, %v288_v25 }
  0x59   : > { %3434 = vmatpush1.bf16.msra.mxu0 %v4290_v18  ;;  %3598 = vmatpush1.bf16.msra.mxu1 %v4292_v19  ;;  %v295_v31 = vld [vmem:[%s5173_s11 + $0x120] sm:$0xff]  ;;  %v296_v36 = vld [vmem:[%s5173_s11 + $0x128] sm:$0xff] }
  0x5a   : > { %3435 = vmatprep.subr.bf16.mxu0 %v4299_v20  ;;  %3599 = vmatprep.subr.bf16.mxu1 %v4301_v21  ;;  %v4315_v39 = vcombine.high %v291_v30, %v295_v31  ;;  %v4317_v40 = vcombine.high %v292_v35, %v296_v36  ;;  %v299_v41 = vld [vmem:[%s5173_s11 + $0x140] sm:$0xff]  ;;  %v300_v45 = vld [vmem:[%s5173_s11 + $0x148] sm:$0xff]  ;;  %v4314_v47 = vcombine.low %v291_v30, %v295_v31 }
  0x5b   : > { %v303_v42 = vld [vmem:[%s5173_s11 + $0x160] sm:$0xff]  ;;  %v304_v46 = vld [vmem:[%s5173_s11 + $0x168] sm:$0xff]  ;;  %v4316_v48 = vcombine.low %v292_v35, %v296_v36 }
  0x5c   : > { %v4323_v49 = vcombine.high %v299_v41, %v303_v42  ;;  %v4325_v50 = vcombine.high %v300_v45, %v304_v46  ;;  %v307_v51 = vld [vmem:[%s5173_s11 + $0x180] sm:$0xff]  ;;  %v308_v54 = vld [vmem:[%s5173_s11 + $0x188] sm:$0xff]  ;;  %v4322_v56 = vcombine.low %v299_v41, %v303_v42  ;;  %v4324_v57 = vcombine.low %v300_v45, %v304_v46 }
  0x5d   : > { %3436 = vmatpush1.bf16.msra.mxu0 %v4298_v26  ;;  %3600 = vmatpush1.bf16.msra.mxu1 %v4300_v27  ;;  %v311_v52 = vld [vmem:[%s5173_s11 + $0x1a0] sm:$0xff]  ;;  %v312_v55 = vld [vmem:[%s5173_s11 + $0x1a8] sm:$0xff] }
  0x5e   : > { %3437 = vmatprep.subr.bf16.mxu0 %v4307_v28  ;;  %3601 = vmatprep.subr.bf16.mxu1 %v4309_v29  ;;  %v4331_v58 = vcombine.high %v307_v51, %v311_v52  ;;  %v5221_v59 = vld [vmem:[%s5840_s1] sm:$0xff]  ;;  %v4333_v60 = vcombine.high %v308_v54, %v312_v55  ;;  %v316_v0 = vld [vmem:[%s5173_s11 + $0x1c8] sm:$0xff]  ;;  %v4330_v2 = vcombine.low %v307_v51, %v311_v52 }
  0x5f   : > { %v315_v61 = vld [vmem:[%s5173_s11 + $0x1c0] sm:$0xff]  ;;  %v5227_v63 = vrot.slane %v5221_v59, %v5214_v53  ;;  %v320_v1 = vld [vmem:[%s5173_s11 + $0x1e8] sm:$0xff]  ;;  %v4332_v4 = vcombine.low %v308_v54, %v312_v55 }
  0x60   : > { %v319_v62 = vld [vmem:[%s5173_s11 + $0x1e0] sm:$0xff]  ;;  %v4341_v6 = vcombine.high %v316_v0, %v320_v1  ;;  %v324_v10 = vld [vmem:[%s5173_s11 + $0x208] sm:$0xff]  ;;  %v4340_v13 = vcombine.low %v316_v0, %v320_v1 }
  0x61   : > { %3438 = vmatpush1.bf16.msra.mxu0 %v4306_v37  ;;  %3602 = vmatpush1.bf16.msra.mxu1 %v4308_v38  ;;  %v829_v3 = vcombine.high %v5227_v63, %v5227_v63  ;;  %v4339_v5 = vcombine.high %v315_v61, %v319_v62  ;;  %v323_v7 = vld [vmem:[%s5173_s11 + $0x200] sm:$0xff]  ;;  %v328_v11 = vld [vmem:[%s5173_s11 + $0x228] sm:$0xff]  ;;  %v4338_v12 = vcombine.low %v315_v61, %v319_v62 }
  0x62   : > { %3439 = vmatprep.subr.bf16.mxu0 %v4315_v39  ;;  %3603 = vmatprep.subr.bf16.mxu1 %v4317_v40  ;;  %v327_v8 = vld [vmem:[%s5173_s11 + $0x220] sm:$0xff]  ;;  %v4349_v15 = vcombine.high %v324_v10, %v328_v11  ;;  %v332_v18 = vld [vmem:[%s5173_s11 + $0x248] sm:$0xff]  ;;  %v4348_v21 = vcombine.low %v324_v10, %v328_v11 }
  0x63   : > { %v5236_v9 = vrot.slane %v829_v3, %v5214_v53  ;;  %v4347_v14 = vcombine.high %v323_v7, %v327_v8  ;;  %v331_v16 = vld [vmem:[%s5173_s11 + $0x240] sm:$0xff]  ;;  %v336_v19 = vld [vmem:[%s5173_s11 + $0x268] sm:$0xff]  ;;  %v4346_v20 = vcombine.low %v323_v7, %v327_v8 }
  0x64   : > { %v335_v17 = vld [vmem:[%s5173_s11 + $0x260] sm:$0xff]  ;;  %v4357_v23 = vcombine.high %v332_v18, %v336_v19  ;;  %v340_v26 = vld [vmem:[%s5173_s11 + $0x288] sm:$0xff]  ;;  %v4356_v29 = vcombine.low %v332_v18, %v336_v19  ;;  %v814_v18 = vcombine.high %v5221_v59, %v5221_v59 }
  0x65   : > { %3440 = vmatpush1.bf16.msra.mxu0 %v4314_v47  ;;  %3604 = vmatpush1.bf16.msra.mxu1 %v4316_v48  ;;  %v4355_v22 = vcombine.high %v331_v16, %v335_v17  ;;  %v339_v24 = vld [vmem:[%s5173_s11 + $0x280] sm:$0xff]  ;;  %v344_v27 = vld [vmem:[%s5173_s11 + $0x2a8] sm:$0xff]  ;;  %v4354_v28 = vcombine.low %v331_v16, %v335_v17 }
  0x66   : > { %3441 = vmatprep.subr.bf16.mxu0 %v4323_v49  ;;  %3605 = vmatprep.subr.bf16.mxu1 %v4325_v50  ;;  %v343_v25 = vld [vmem:[%s5173_s11 + $0x2a0] sm:$0xff]  ;;  %v4365_v31 = vcombine.high %v340_v26, %v344_v27  ;;  %v348_v34 = vld [vmem:[%s5173_s11 + $0x2c8] sm:$0xff]  ;;  %v4364_v37 = vcombine.low %v340_v26, %v344_v27 }
  0x67   : > { %3463 = vmatprep.mubr.bf16.mxu0 %v5236_v9  ;;  %3627 = vmatprep.mubr.bf16.mxu1 %v5236_v9  ;;  %v4363_v30 = vcombine.high %v339_v24, %v343_v25  ;;  %v347_v32 = vld [vmem:[%s5173_s11 + $0x2c0] sm:$0xff]  ;;  %v352_v35 = vld [vmem:[%s5173_s11 + $0x2e8] sm:$0xff]  ;;  %v4362_v36 = vcombine.low %v339_v24, %v343_v25  ;;  %v828_v24 = vrot.slane %v814_v18, %v5214_v53 }
  0x68   : > { %v351_v33 = vld [vmem:[%s5173_s11 + $0x2e0] sm:$0xff]  ;;  %v4373_v39 = vcombine.high %v348_v34, %v352_v35  ;;  %v356_v42 = vld [vmem:[%s5173_s11 + $0x308] sm:$0xff]  ;;  %v4372_v46 = vcombine.low %v348_v34, %v352_v35  ;;  %v5281_v25 = vrot.slane %v5227_v63, %v5214_v53  ;;  %v5289_v63 = vcombine.high %v5236_v9, %v5236_v9 }
  0x69   : > { %3442 = vmatpush1.bf16.msra.mxu0 %v4322_v56  ;;  %3606 = vmatpush1.bf16.msra.mxu1 %v4324_v57  ;;  %v4371_v38 = vcombine.high %v347_v32, %v351_v33  ;;  %v355_v40 = vld [vmem:[%s5173_s11 + $0x300] sm:$0xff]  ;;  %v360_v44 = vld [vmem:[%s5173_s11 + $0x328] sm:$0xff]  ;;  %v4370_v45 = vcombine.low %v347_v32, %v351_v33  ;;  %v5295_v35 = vrot.slane %v828_v24, %v5214_v53 }
  0x6a   : > { %3443 = vmatprep.subr.bf16.mxu0 %v4331_v58  ;;  %3607 = vmatprep.subr.bf16.mxu1 %v4333_v60  ;;  %v359_v41 = vld [vmem:[%s5173_s11 + $0x320] sm:$0xff]  ;;  %v4381_v48 = vcombine.high %v356_v42, %v360_v44  ;;  %v364_v51 = vld [vmem:[%s5173_s11 + $0x348] sm:$0xff]  ;;  %v4380_v55 = vcombine.low %v356_v42, %v360_v44 }
  0x6b   : > { %v4379_v47 = vcombine.high %v355_v40, %v359_v41  ;;  %v363_v49 = vld [vmem:[%s5173_s11 + $0x340] sm:$0xff]  ;;  %v368_v52 = vld [vmem:[%s5173_s11 + $0x368] sm:$0xff]  ;;  %v4378_v54 = vcombine.low %v355_v40, %v359_v41 }
  0x6c   : > { %v367_v50 = vld [vmem:[%s5173_s11 + $0x360] sm:$0xff]  ;;  %v4389_v57 = vcombine.high %v364_v51, %v368_v52  ;;  %v372_v61 = vld [vmem:[%s5173_s11 + $0x388] sm:$0xff]  ;;  %v4388_v1 = vcombine.low %v364_v51, %v368_v52 }
  0x6d   : > { %3444 = vmatpush1.bf16.msra.mxu0 %v4330_v2  ;;  %3608 = vmatpush1.bf16.msra.mxu1 %v4332_v4  ;;  %v4387_v56 = vcombine.high %v363_v49, %v367_v50  ;;  %v371_v58 = vld [vmem:[%s5173_s11 + $0x380] sm:$0xff]  ;;  %v376_v62 = vld [vmem:[%s5173_s11 + $0x3a8] sm:$0xff]  ;;  %v4386_v0 = vcombine.low %v363_v49, %v367_v50 }
  0x6e   : > { %3445 = vmatprep.subr.bf16.mxu0 %v4339_v5  ;;  %3609 = vmatprep.subr.bf16.mxu1 %v4341_v6  ;;  %v375_v60 = vld [vmem:[%s5173_s11 + $0x3a0] sm:$0xff]  ;;  %v4397_v3 = vcombine.high %v372_v61, %v376_v62  ;;  %v380_v6 = vld [vmem:[%s5173_s11 + $0x3c8] sm:$0xff]  ;;  %v4396_v10 = vcombine.low %v372_v61, %v376_v62 }
  0x6f   : > { %v4395_v2 = vcombine.high %v371_v58, %v375_v60  ;;  %v379_v4 = vld [vmem:[%s5173_s11 + $0x3c0] sm:$0xff]  ;;  %v384_v7 = vld [vmem:[%s5173_s11 + $0x3e8] sm:$0xff]  ;;  %v4394_v8 = vcombine.low %v371_v58, %v375_v60 }
  0x70   : > { %v383_v5 = vld [vmem:[%s5173_s11 + $0x3e0] sm:$0xff]  ;;  %v392_v16 = vld [vmem:[%s5173_s11 + $0x428] sm:$0xff]  ;;  %v4404_v19 = vcombine.low %v380_v6, %v384_v7 }
  0x71   : > { %3446 = vmatpush1.bf16.msra.mxu0 %v4338_v12  ;;  %3610 = vmatpush1.bf16.msra.mxu1 %v4340_v13  ;;  %v4403_v11 = vcombine.high %v379_v4, %v383_v5  ;;  %v4405_v12 = vcombine.high %v380_v6, %v384_v7  ;;  %v387_v13 = vld [vmem:[%s5173_s11 + $0x400] sm:$0xff]  ;;  %v4402_v17 = vcombine.low %v379_v4, %v383_v5  ;;  %v396_v26 = vld [vmem:[%s5173_s11 + $0x448] sm:$0xff] }
  0x72   : > { %3447 = vmatprep.subr.bf16.mxu0 %v4347_v14  ;;  %3611 = vmatprep.subr.bf16.mxu1 %v4349_v15  ;;  %v391_v14 = vld [vmem:[%s5173_s11 + $0x420] sm:$0xff]  ;;  %v388_v15 = vld [vmem:[%s5173_s11 + $0x408] sm:$0xff] }
  0x73   : > { %v400_v27 = vld [vmem:[%s5173_s11 + $0x468] sm:$0xff]  ;;  %v4410_v59 = vcombine.low %v387_v13, %v391_v14  ;;  %v403_v32 = vld [vmem:[%s5173_s11 + $0x480] sm:$0xff] }
  0x74   : > { %v407_v33 = vld [vmem:[%s5173_s11 + $0x4a0] sm:$0xff]  ;;  %v412_v44 = vld [vmem:[%s5173_s11 + $0x4c8] sm:$0xff] }
  0x75   : > { %3448 = vmatpush1.bf16.msra.mxu0 %v4346_v20  ;;  %3612 = vmatpush1.bf16.msra.mxu1 %v4348_v21  ;;  %v4411_v20 = vcombine.high %v387_v13, %v391_v14  ;;  %v4413_v21 = vcombine.high %v388_v15, %v392_v16  ;;  %v4427_v40 = vcombine.high %v403_v32, %v407_v33  ;;  %v415_v42 = vld [vmem:[%s5173_s11 + $0x4e0] sm:$0xff]  ;;  %v420_v52 = vld [vmem:[%s5173_s11 + $0x508] sm:$0xff] }
  0x76   : > { %3449 = vmatprep.subr.bf16.mxu0 %v4355_v22  ;;  %3613 = vmatprep.subr.bf16.mxu1 %v4357_v23  ;;  %v395_v22 = vld [vmem:[%s5173_s11 + $0x440] sm:$0xff]  ;;  %v428_v62 = vld [vmem:[%s5173_s11 + $0x548] sm:$0xff] }
  0x77   : > { %v399_v23 = vld [vmem:[%s5173_s11 + $0x460] sm:$0xff]  ;;  %v436_v7 = vld [vmem:[%s5173_s11 + $0x588] sm:$0xff] }
  0x78   : > { %v419_v50 = vld [vmem:[%s5173_s11 + $0x500] sm:$0xff] }
  0x79   : > { %3450 = vmatpush1.bf16.msra.mxu0 %v4354_v28  ;;  %3614 = vmatpush1.bf16.msra.mxu1 %v4356_v29  ;;  %v830_v28 = vcombine.high %v828_v24, %v828_v24  ;;  %v4412_v29 = vcombine.low %v388_v15, %v392_v16  ;;  %v423_v51 = vld [vmem:[%s5173_s11 + $0x520] sm:$0xff]  ;;  %v444_v16 = vld [vmem:[%s5173_s11 + $0x5c8] sm:$0xff] }
  0x7a   : > { %3451 = vmatprep.subr.bf16.mxu0 %v4363_v30  ;;  %3615 = vmatprep.subr.bf16.mxu1 %v4365_v31  ;;  %v4419_v30 = vcombine.high %v395_v22, %v399_v23  ;;  %v4421_v31 = vcombine.high %v396_v26, %v400_v27  ;;  %v427_v60 = vld [vmem:[%s5173_s11 + $0x540] sm:$0xff]  ;;  %v452_v24 = vld [vmem:[%s5173_s11 + $0x608] sm:$0xff] }
  0x7b   : > { %v5292_v34 = vrot.slane %v830_v28, %v5214_v53  ;;  %v411_v53 = vld [vmem:[%s5173_s11 + $0x4c0] sm:$0xff] }
  0x7c   : > { %v431_v61 = vld [vmem:[%s5173_s11 + $0x560] sm:$0xff] }
  0x7d   : > { %3452 = vmatpush1.bf16.msra.mxu0 %v4362_v36  ;;  %3616 = vmatpush1.bf16.msra.mxu1 %v4364_v37  ;;  %v404_v36 = vld [vmem:[%s5173_s11 + $0x488] sm:$0xff]  ;;  %v435_v5 = vld [vmem:[%s5173_s11 + $0x580] sm:$0xff] }
  0x7e   : > { %3453 = vmatprep.subr.bf16.mxu0 %v4371_v38  ;;  %3617 = vmatprep.subr.bf16.mxu1 %v4373_v39  ;;  %v408_v37 = vld [vmem:[%s5173_s11 + $0x4a8] sm:$0xff]  ;;  %v4418_v38 = vcombine.low %v395_v22, %v399_v23  ;;  %v4420_v39 = vcombine.low %v396_v26, %v400_v27  ;;  %v439_v6 = vld [vmem:[%s5173_s11 + $0x5a0] sm:$0xff] }
  0x7f   : > { %v4429_v41 = vcombine.high %v404_v36, %v408_v37  ;;  %v443_v14 = vld [vmem:[%s5173_s11 + $0x5c0] sm:$0xff]  ;;  %v4458_v18 = vcombine.low %v435_v5, %v439_v6  ;;  %v456_v26 = vld [vmem:[%s5173_s11 + $0x628] sm:$0xff] }
  0x80   : > { %v447_v15 = vld [vmem:[%s5173_s11 + $0x5e0] sm:$0xff] }
  0x81   : > { %3454 = vmatpush1.bf16.msra.mxu0 %v4370_v45  ;;  %3618 = vmatpush1.bf16.msra.mxu1 %v4372_v46  ;;  %v416_v45 = vld [vmem:[%s5173_s11 + $0x4e8] sm:$0xff]  ;;  %v4426_v46 = vcombine.low %v403_v32, %v407_v33  ;;  %v451_v22 = vld [vmem:[%s5173_s11 + $0x600] sm:$0xff]  ;;  %v4466_v27 = vcombine.low %v443_v14, %v447_v15 }
  0x82   : > { %3455 = vmatprep.subr.bf16.mxu0 %v4379_v47  ;;  %3619 = vmatprep.subr.bf16.mxu1 %v4381_v48  ;;  %v4428_v47 = vcombine.low %v404_v36, %v408_v37  ;;  %v4435_v48 = vcombine.high %v411_v53, %v415_v42  ;;  %v4437_v49 = vcombine.high %v412_v44, %v416_v45  ;;  %v455_v23 = vld [vmem:[%s5173_s11 + $0x620] sm:$0xff]  ;;  %v460_v32 = vld [vmem:[%s5173_s11 + $0x648] sm:$0xff] }
  0x83   : > { %v4475_v28 = vcombine.high %v451_v22, %v455_v23  ;;  %v464_v33 = vld [vmem:[%s5173_s11 + $0x668] sm:$0xff]  ;;  %v4474_v36 = vcombine.low %v451_v22, %v455_v23  ;;  %v4476_v37 = vcombine.low %v452_v24, %v456_v26 }
  0x84   : > { %v508_v22 = vld [vmem:[%s5173_s11 + $0x7c8] sm:$0xff] }
  0x85   : > { %3456 = vmatpush1.bf16.msra.mxu0 %v4378_v54  ;;  %3620 = vmatpush1.bf16.msra.mxu1 %v4380_v55  ;;  %v424_v54 = vld [vmem:[%s5173_s11 + $0x528] sm:$0xff]  ;;  %v4434_v55 = vcombine.low %v411_v53, %v415_v42 }
  0x86   : > { %3457 = vmatprep.subr.bf16.mxu0 %v4387_v56  ;;  %3621 = vmatprep.subr.bf16.mxu1 %v4389_v57  ;;  %v4436_v56 = vcombine.low %v412_v44, %v416_v45  ;;  %v4443_v57 = vcombine.high %v419_v50, %v423_v51  ;;  %v4445_v58 = vcombine.high %v420_v52, %v424_v54  ;;  %v468_v53 = vld [vmem:[%s5173_s11 + $0x688] sm:$0xff] }
  0x87   : > { %v472_v42 = vld [vmem:[%s5173_s11 + $0x6a8] sm:$0xff]  ;;  %v4484_v45 = vcombine.low %v460_v32, %v464_v33 }
  0x88   : > { %v512_v23 = vld [vmem:[%s5173_s11 + $0x7e8] sm:$0xff] }
  0x89   : > { %3458 = vmatpush1.bf16.msra.mxu0 %v4386_v0  ;;  %3622 = vmatpush1.bf16.msra.mxu1 %v4388_v1  ;;  %v432_v0 = vld [vmem:[%s5173_s11 + $0x568] sm:$0xff]  ;;  %v4442_v1 = vcombine.low %v419_v50, %v423_v51 }
  0x8a   : > { %3459 = vmatprep.subr.bf16.mxu0 %v4395_v2  ;;  %3623 = vmatprep.subr.bf16.mxu1 %v4397_v3  ;;  %v4444_v2 = vcombine.low %v420_v52, %v424_v54  ;;  %v4451_v3 = vcombine.high %v427_v60, %v431_v61  ;;  %v4453_v4 = vcombine.high %v428_v62, %v432_v0  ;;  %v476_v50 = vld [vmem:[%s5173_s11 + $0x6c8] sm:$0xff] }
  0x8b   : > { %v480_v51 = vld [vmem:[%s5173_s11 + $0x6e8] sm:$0xff]  ;;  %v4492_v54 = vcombine.low %v468_v53, %v472_v42 }
  0x8d   : > { %3460 = vmatpush1.bf16.msra.mxu0 %v4394_v8  ;;  %3624 = vmatpush1.bf16.msra.mxu1 %v4396_v10  ;;  %v440_v8 = vld [vmem:[%s5173_s11 + $0x5a8] sm:$0xff]  ;;  %v4450_v10 = vcombine.low %v427_v60, %v431_v61 }
  0x8e   : > { %3461 = vmatprep.subr.bf16.mxu0 %v4403_v11  ;;  %3625 = vmatprep.subr.bf16.mxu1 %v4405_v12  ;;  %v4452_v11 = vcombine.low %v428_v62, %v432_v0  ;;  %v4459_v12 = vcombine.high %v435_v5, %v439_v6  ;;  %v4461_v13 = vcombine.high %v436_v7, %v440_v8  ;;  %v484_v60 = vld [vmem:[%s5173_s11 + $0x708] sm:$0xff] }
  0x8f   : > { %v488_v61 = vld [vmem:[%s5173_s11 + $0x728] sm:$0xff]  ;;  %v4500_v0 = vcombine.low %v476_v50, %v480_v51 }
  0x90   : > { %v492_v5 = vld [vmem:[%s5173_s11 + $0x748] sm:$0xff] }
  0x91   : > { %3462 = vmatpush1.bf16.msra.mxu0 %v4402_v17  ;;  %3626 = vmatpush1.bf16.msra.mxu1 %v4404_v19  ;;  %v448_v17 = vld [vmem:[%s5173_s11 + $0x5e8] sm:$0xff]  ;;  %v4460_v19 = vcombine.low %v436_v7, %v440_v8  ;;  %v4508_v8 = vcombine.low %v484_v60, %v488_v61 }
  0x92   : > { %3472 = vmatprep.subr.bf16.mxu0 %v4411_v20  ;;  %3636 = vmatprep.subr.bf16.mxu1 %v4413_v21  ;;  %v4467_v20 = vcombine.high %v443_v14, %v447_v15  ;;  %v4469_v21 = vcombine.high %v444_v16, %v448_v17  ;;  %v496_v6 = vld [vmem:[%s5173_s11 + $0x768] sm:$0xff] }
  0x93   : > { %v500_v14 = vld [vmem:[%s5173_s11 + $0x788] sm:$0xff] }
  0x94   : > { %3464 = vmatmul.mubr.bf16.vlgmr.msra.gmra.mrb[0].mxu0 %v5281_v25  ;;  %3628 = vmatmul.mubr.bf16.vlgmr.msra.gmra.mrb[0].mxu1 %v5281_v25  ;;  %v504_v15 = vld [vmem:[%s5173_s11 + $0x7a8] sm:$0xff] }
  0x95   : > { %3473 = vmatpush1.bf16.msra.mxu0 %v4410_v59  ;;  %3637 = vmatpush1.bf16.msra.mxu1 %v4412_v29  ;;  %v4468_v59 = vcombine.low %v444_v16, %v448_v17  ;;  %v4477_v29 = vcombine.high %v452_v24, %v456_v26  ;;  %v4516_v17 = vcombine.low %v492_v5, %v496_v6 }
  0x96   : > { %3474 = vmatprep.subr.bf16.mxu0 %v4419_v30  ;;  %3638 = vmatprep.subr.bf16.mxu1 %v4421_v31  ;;  %v459_v30 = vld [vmem:[%s5173_s11 + $0x640] sm:$0xff]  ;;  %v4524_v26 = vcombine.low %v500_v14, %v504_v15 }
  0x97   : > { %3504 = vmatprep.mubr.bf16.mxu0 %v5289_v63  ;;  %3668 = vmatprep.mubr.bf16.mxu1 %v5289_v63  ;;  %v463_v31 = vld [vmem:[%s5173_s11 + $0x660] sm:$0xff] }
  0x98   : > { %v4482_v44 = vcombine.low %v459_v30, %v463_v31 }
  0x99   : > { %3475 = vmatpush1.bf16.msra.mxu0 %v4418_v38  ;;  %3639 = vmatpush1.bf16.msra.mxu1 %v4420_v39  ;;  %v4483_v38 = vcombine.high %v459_v30, %v463_v31  ;;  %v4485_v39 = vcombine.high %v460_v32, %v464_v33  ;;  %v516_v30 = vld [vmem:[%s5173_s11 + $0x808] sm:$0xff]  ;;  %v4532_v33 = vcombine.low %v508_v22, %v512_v23 }
  0x9a   : > { %3476 = vmatprep.subr.bf16.mxu0 %v4427_v40  ;;  %3640 = vmatprep.subr.bf16.mxu1 %v4429_v41  ;;  %v467_v40 = vld [vmem:[%s5173_s11 + $0x680] sm:$0xff]  ;;  %v520_v31 = vld [vmem:[%s5173_s11 + $0x828] sm:$0xff] }
  0x9b   : > { %v471_v41 = vld [vmem:[%s5173_s11 + $0x6a0] sm:$0xff] }
  0x9c   : > { %v4490_v52 = vcombine.low %v467_v40, %v471_v41 }
  0x9d   : > { %3477 = vmatpush1.bf16.msra.mxu0 %v4426_v46  ;;  %3641 = vmatpush1.bf16.msra.mxu1 %v4428_v47  ;;  %v4491_v46 = vcombine.high %v467_v40, %v471_v41  ;;  %v4493_v47 = vcombine.high %v468_v53, %v472_v42  ;;  %v5363_v40 = vcombine.high %v5281_v25, %v5281_v25  ;;  %v524_v41 = vld [vmem:[%s5173_s11 + $0x848] sm:$0xff] }
  0x9e   : > { %3478 = vmatprep.subr.bf16.mxu0 %v4435_v48  ;;  %3642 = vmatprep.subr.bf16.mxu1 %v4437_v49  ;;  %v475_v48 = vld [vmem:[%s5173_s11 + $0x6c0] sm:$0xff]  ;;  %v528_v53 = vld [vmem:[%s5173_s11 + $0x868] sm:$0xff] }
  0x9f   : > { %v479_v49 = vld [vmem:[%s5173_s11 + $0x6e0] sm:$0xff] }
  0xa0   : > { %v4498_v62 = vcombine.low %v475_v48, %v479_v49 }
  0xa1   : > { %3479 = vmatpush1.bf16.msra.mxu0 %v4434_v55  ;;  %3643 = vmatpush1.bf16.msra.mxu1 %v4436_v56  ;;  %v4499_v55 = vcombine.high %v475_v48, %v479_v49  ;;  %v4501_v56 = vcombine.high %v476_v50, %v480_v51  ;;  %v535_v48 = vld [vmem:[%s5173_s11 + $0x8a0] sm:$0xff]  ;;  %v532_v49 = vld [vmem:[%s5173_s11 + $0x888] sm:$0xff] }
  0xa2   : > { %3480 = vmatprep.subr.bf16.mxu0 %v4443_v57  ;;  %3644 = vmatprep.subr.bf16.mxu1 %v4445_v58  ;;  %v483_v57 = vld [vmem:[%s5173_s11 + $0x700] sm:$0xff]  ;;  %v536_v50 = vld [vmem:[%s5173_s11 + $0x8a8] sm:$0xff] }
  0xa3   : > { %v487_v58 = vld [vmem:[%s5173_s11 + $0x720] sm:$0xff] }
  0xa4   : > { %v4506_v7 = vcombine.low %v483_v57, %v487_v58 }
  0xa5   : > { %3481 = vmatpush1.bf16.msra.mxu0 %v4442_v1  ;;  %3645 = vmatpush1.bf16.msra.mxu1 %v4444_v2  ;;  %v4507_v1 = vcombine.high %v483_v57, %v487_v58  ;;  %v4509_v2 = vcombine.high %v484_v60, %v488_v61  ;;  %v543_v57 = vld [vmem:[%s5173_s11 + $0x8e0] sm:$0xff]  ;;  %v540_v58 = vld [vmem:[%s5173_s11 + $0x8c8] sm:$0xff] }
  0xa6   : > { %3482 = vmatprep.subr.bf16.mxu0 %v4451_v3  ;;  %3646 = vmatprep.subr.bf16.mxu1 %v4453_v4  ;;  %v491_v3 = vld [vmem:[%s5173_s11 + $0x740] sm:$0xff]  ;;  %v544_v60 = vld [vmem:[%s5173_s11 + $0x8e8] sm:$0xff] }
  0xa7   : > { %v495_v4 = vld [vmem:[%s5173_s11 + $0x760] sm:$0xff] }
  0xa8   : > { %v4514_v16 = vcombine.low %v491_v3, %v495_v4 }
  0xa9   : > { %3483 = vmatpush1.bf16.msra.mxu0 %v4450_v10  ;;  %3647 = vmatpush1.bf16.msra.mxu1 %v4452_v11  ;;  %v4515_v10 = vcombine.high %v491_v3, %v495_v4  ;;  %v4517_v11 = vcombine.high %v492_v5, %v496_v6  ;;  %v551_v3 = vld [vmem:[%s5173_s11 + $0x920] sm:$0xff]  ;;  %v548_v4 = vld [vmem:[%s5173_s11 + $0x908] sm:$0xff] }
  0xaa   : > { %3484 = vmatprep.subr.bf16.mxu0 %v4459_v12  ;;  %3648 = vmatprep.subr.bf16.mxu1 %v4461_v13  ;;  %v499_v12 = vld [vmem:[%s5173_s11 + $0x780] sm:$0xff]  ;;  %v552_v5 = vld [vmem:[%s5173_s11 + $0x928] sm:$0xff] }
  0xab   : > { %v503_v13 = vld [vmem:[%s5173_s11 + $0x7a0] sm:$0xff] }
  0xac   : > { %v4522_v24 = vcombine.low %v499_v12, %v503_v13 }
  0xad   : > { %3485 = vmatpush1.bf16.msra.mxu0 %v4458_v18  ;;  %3649 = vmatpush1.bf16.msra.mxu1 %v4460_v19  ;;  %v4523_v18 = vcombine.high %v499_v12, %v503_v13  ;;  %v4525_v19 = vcombine.high %v500_v14, %v504_v15  ;;  %v559_v12 = vld [vmem:[%s5173_s11 + $0x960] sm:$0xff]  ;;  %v556_v13 = vld [vmem:[%s5173_s11 + $0x948] sm:$0xff] }
  0xae   : > { %3486 = vmatprep.subr.bf16.mxu0 %v4467_v20  ;;  %3650 = vmatprep.subr.bf16.mxu1 %v4469_v21  ;;  %v507_v20 = vld [vmem:[%s5173_s11 + $0x7c0] sm:$0xff]  ;;  %v560_v14 = vld [vmem:[%s5173_s11 + $0x968] sm:$0xff] }
  0xaf   : > { %v511_v21 = vld [vmem:[%s5173_s11 + $0x7e0] sm:$0xff] }
  0xb0   : > { %v4530_v32 = vcombine.low %v507_v20, %v511_v21 }
  0xb1   : > { %3487 = vmatpush1.bf16.msra.mxu0 %v4466_v27  ;;  %3651 = vmatpush1.bf16.msra.mxu1 %v4468_v59  ;;  %v4531_v27 = vcombine.high %v507_v20, %v511_v21  ;;  %v4533_v59 = vcombine.high %v508_v22, %v512_v23  ;;  %v567_v20 = vld [vmem:[%s5173_s11 + $0x9a0] sm:$0xff]  ;;  %v564_v21 = vld [vmem:[%s5173_s11 + $0x988] sm:$0xff] }
  0xb2   : > { %3488 = vmatprep.subr.bf16.mxu0 %v4475_v28  ;;  %3652 = vmatprep.subr.bf16.mxu1 %v4477_v29  ;;  %v515_v28 = vld [vmem:[%s5173_s11 + $0x800] sm:$0xff]  ;;  %v568_v22 = vld [vmem:[%s5173_s11 + $0x9a8] sm:$0xff] }
  0xb3   : > { %v519_v29 = vld [vmem:[%s5173_s11 + $0x820] sm:$0xff] }
  0xb4   : > { %v4538_v42 = vcombine.low %v515_v28, %v519_v29 }
  0xb5   : > { %3489 = vmatpush1.bf16.msra.mxu0 %v4474_v36  ;;  %3653 = vmatpush1.bf16.msra.mxu1 %v4476_v37  ;;  %v4539_v36 = vcombine.high %v515_v28, %v519_v29  ;;  %v4541_v37 = vcombine.high %v516_v30, %v520_v31  ;;  %v575_v28 = vld [vmem:[%s5173_s11 + $0x9e0] sm:$0xff]  ;;  %v572_v29 = vld [vmem:[%s5173_s11 + $0x9c8] sm:$0xff] }
  0xb6   : > { %3490 = vmatprep.subr.bf16.mxu0 %v4483_v38  ;;  %3654 = vmatprep.subr.bf16.mxu1 %v4485_v39  ;;  %v523_v38 = vld [vmem:[%s5173_s11 + $0x840] sm:$0xff] }
  0xb7   : > { %v527_v39 = vld [vmem:[%s5173_s11 + $0x860] sm:$0xff] }
  0xb8   : > { %v4546_v51 = vcombine.low %v523_v38, %v527_v39 }
  0xb9   : > { %3491 = vmatpush1.bf16.msra.mxu0 %v4482_v44  ;;  %3655 = vmatpush1.bf16.msra.mxu1 %v4484_v45  ;;  %v4540_v44 = vcombine.low %v516_v30, %v520_v31  ;;  %v4547_v45 = vcombine.high %v523_v38, %v527_v39  ;;  %v576_v30 = vld [vmem:[%s5173_s11 + $0x9e8] sm:$0xff]  ;;  %v583_v38 = vld [vmem:[%s5173_s11 + $0xa20] sm:$0xff] }
  0xba   : > { %3492 = vmatprep.subr.bf16.mxu0 %v4491_v46  ;;  %3656 = vmatprep.subr.bf16.mxu1 %v4493_v47  ;;  %v4549_v46 = vcombine.high %v524_v41, %v528_v53  ;;  %v531_v47 = vld [vmem:[%s5173_s11 + $0x880] sm:$0xff]  ;;  %v580_v39 = vld [vmem:[%s5173_s11 + $0xa08] sm:$0xff] }
  0xbb   : > { %v4554_v61 = vcombine.low %v531_v47, %v535_v48 }
  0xbd   : > { %3493 = vmatpush1.bf16.msra.mxu0 %v4490_v52  ;;  %3657 = vmatpush1.bf16.msra.mxu1 %v4492_v54  ;;  %v4548_v52 = vcombine.low %v524_v41, %v528_v53  ;;  %v4555_v54 = vcombine.high %v531_v47, %v535_v48  ;;  %v584_v41 = vld [vmem:[%s5173_s11 + $0xa28] sm:$0xff]  ;;  %v591_v47 = vld [vmem:[%s5173_s11 + $0xa60] sm:$0xff] }
  0xbe   : > { %3494 = vmatprep.subr.bf16.mxu0 %v4499_v55  ;;  %3658 = vmatprep.subr.bf16.mxu1 %v4501_v56  ;;  %v4557_v55 = vcombine.high %v532_v49, %v536_v50  ;;  %v539_v56 = vld [vmem:[%s5173_s11 + $0x8c0] sm:$0xff]  ;;  %v588_v48 = vld [vmem:[%s5173_s11 + $0xa48] sm:$0xff] }
  0xbf   : > { %v4562_v6 = vcombine.low %v539_v56, %v543_v57 }
  0xc1   : > { %3495 = vmatpush1.bf16.msra.mxu0 %v4498_v62  ;;  %3659 = vmatpush1.bf16.msra.mxu1 %v4500_v0  ;;  %v4556_v62 = vcombine.low %v532_v49, %v536_v50  ;;  %v4563_v0 = vcombine.high %v539_v56, %v543_v57  ;;  %v592_v49 = vld [vmem:[%s5173_s11 + $0xa68] sm:$0xff]  ;;  %v599_v56 = vld [vmem:[%s5173_s11 + $0xaa0] sm:$0xff] }
  0xc2   : > { %3496 = vmatprep.subr.bf16.mxu0 %v4507_v1  ;;  %3660 = vmatprep.subr.bf16.mxu1 %v4509_v2  ;;  %v4565_v1 = vcombine.high %v540_v58, %v544_v60  ;;  %v547_v2 = vld [vmem:[%s5173_s11 + $0x900] sm:$0xff]  ;;  %v596_v57 = vld [vmem:[%s5173_s11 + $0xa88] sm:$0xff] }
  0xc3   : > { %v4570_v15 = vcombine.low %v547_v2, %v551_v3 }
  0xc5   : > { %3497 = vmatpush1.bf16.msra.mxu0 %v4506_v7  ;;  %3661 = vmatpush1.bf16.msra.mxu1 %v4508_v8  ;;  %v4564_v7 = vcombine.low %v540_v58, %v544_v60  ;;  %v4571_v8 = vcombine.high %v547_v2, %v551_v3  ;;  %v600_v58 = vld [vmem:[%s5173_s11 + $0xaa8] sm:$0xff]  ;;  %v607_v2 = vld [vmem:[%s5173_s11 + $0xae0] sm:$0xff] }
  0xc6   : > { %3498 = vmatprep.subr.bf16.mxu0 %v4515_v10  ;;  %3662 = vmatprep.subr.bf16.mxu1 %v4517_v11  ;;  %v4573_v10 = vcombine.high %v548_v4, %v552_v5  ;;  %v555_v11 = vld [vmem:[%s5173_s11 + $0x940] sm:$0xff]  ;;  %v604_v3 = vld [vmem:[%s5173_s11 + $0xac8] sm:$0xff] }
  0xc7   : > { %v4578_v23 = vcombine.low %v555_v11, %v559_v12 }
  0xc9   : > { %3499 = vmatpush1.bf16.msra.mxu0 %v4514_v16  ;;  %3663 = vmatpush1.bf16.msra.mxu1 %v4516_v17  ;;  %v4572_v16 = vcombine.low %v548_v4, %v552_v5  ;;  %v4579_v17 = vcombine.high %v555_v11, %v559_v12  ;;  %v608_v4 = vld [vmem:[%s5173_s11 + $0xae8] sm:$0xff]  ;;  %v615_v11 = vld [vmem:[%s5173_s11 + $0xb20] sm:$0xff] }
  0xca   : > { %3500 = vmatprep.subr.bf16.mxu0 %v4523_v18  ;;  %3664 = vmatprep.subr.bf16.mxu1 %v4525_v19  ;;  %v4581_v18 = vcombine.high %v556_v13, %v560_v14  ;;  %v563_v19 = vld [vmem:[%s5173_s11 + $0x980] sm:$0xff]  ;;  %v612_v12 = vld [vmem:[%s5173_s11 + $0xb08] sm:$0xff] }
  0xcb   : > { %v4586_v31 = vcombine.low %v563_v19, %v567_v20 }
  0xcd   : > { %3501 = vmatpush1.bf16.msra.mxu0 %v4522_v24  ;;  %3665 = vmatpush1.bf16.msra.mxu1 %v4524_v26  ;;  %v4580_v24 = vcombine.low %v556_v13, %v560_v14  ;;  %v4587_v26 = vcombine.high %v563_v19, %v567_v20  ;;  %v616_v13 = vld [vmem:[%s5173_s11 + $0xb28] sm:$0xff]  ;;  %v623_v19 = vld [vmem:[%s5173_s11 + $0xb60] sm:$0xff] }
  0xce   : > { %3502 = vmatprep.subr.bf16.mxu0 %v4531_v27  ;;  %3666 = vmatprep.subr.bf16.mxu1 %v4533_v59  ;;  %v4589_v27 = vcombine.high %v564_v21, %v568_v22  ;;  %v571_v59 = vld [vmem:[%s5173_s11 + $0x9c0] sm:$0xff]  ;;  %v620_v20 = vld [vmem:[%s5173_s11 + $0xb48] sm:$0xff] }
  0xcf   : > { %v4594_v53 = vcombine.low %v571_v59, %v575_v28 }
  0xd1   : > { %3503 = vmatpush1.bf16.msra.mxu0 %v4530_v32  ;;  %3667 = vmatpush1.bf16.msra.mxu1 %v4532_v33  ;;  %v4588_v32 = vcombine.low %v564_v21, %v568_v22  ;;  %v4595_v33 = vcombine.high %v571_v59, %v575_v28  ;;  %v624_v21 = vld [vmem:[%s5173_s11 + $0xb68] sm:$0xff]  ;;  %v631_v59 = vld [vmem:[%s5173_s11 + $0xba0] sm:$0xff] }
  0xd2   : > { %3513 = vmatprep.subr.bf16.mxu0 %v4539_v36  ;;  %3677 = vmatprep.subr.bf16.mxu1 %v4541_v37  ;;  %v4597_v36 = vcombine.high %v572_v29, %v576_v30  ;;  %v579_v37 = vld [vmem:[%s5173_s11 + $0xa00] sm:$0xff]  ;;  %v628_v28 = vld [vmem:[%s5173_s11 + $0xb88] sm:$0xff] }
  0xd3   : > { %v4602_v50 = vcombine.low %v579_v37, %v583_v38 }
  0xd4   : > { %3505 = vmatmul.mubr.bf16.vlgmr.msra.gmra.mrb[0].mxu0 %v5363_v40  ;;  %3669 = vmatmul.mubr.bf16.vlgmr.msra.gmra.mrb[0].mxu1 %v5363_v40 }
  0xd5   : > { %3514 = vmatpush1.bf16.msra.mxu0 %v4538_v42  ;;  %3678 = vmatpush1.bf16.msra.mxu1 %v4540_v44  ;;  %v4596_v42 = vcombine.low %v572_v29, %v576_v30  ;;  %v4603_v44 = vcombine.high %v579_v37, %v583_v38  ;;  %v632_v29 = vld [vmem:[%s5173_s11 + $0xba8] sm:$0xff]  ;;  %v639_v37 = vld [vmem:[%s5173_s11 + $0xbe0] sm:$0xff] }
  0xd6   : > { %3515 = vmatprep.subr.bf16.mxu0 %v4547_v45  ;;  %3679 = vmatprep.subr.bf16.mxu1 %v4549_v46  ;;  %v4605_v45 = vcombine.high %v580_v39, %v584_v41  ;;  %v587_v46 = vld [vmem:[%s5173_s11 + $0xa40] sm:$0xff]  ;;  %v636_v38 = vld [vmem:[%s5173_s11 + $0xbc8] sm:$0xff] }
  0xd7   : > { %3545 = vmatprep.mubr.bf16.mxu0 %v5292_v34  ;;  %3709 = vmatprep.mubr.bf16.mxu1 %v5292_v34  ;;  %v4610_v60 = vcombine.low %v587_v46, %v591_v47 }
  0xd9   : > { %3516 = vmatpush1.bf16.msra.mxu0 %v4546_v51  ;;  %3680 = vmatpush1.bf16.msra.mxu1 %v4548_v52  ;;  %v4604_v51 = vcombine.low %v580_v39, %v584_v41  ;;  %v4611_v52 = vcombine.high %v587_v46, %v591_v47  ;;  %v640_v39 = vld [vmem:[%s5173_s11 + $0xbe8] sm:$0xff]  ;;  %v647_v46 = vld [vmem:[%s5173_s11 + $0xc20] sm:$0xff] }
  0xda   : > { %3517 = vmatprep.subr.bf16.mxu0 %v4555_v54  ;;  %3681 = vmatprep.subr.bf16.mxu1 %v4557_v55  ;;  %v4613_v54 = vcombine.high %v588_v48, %v592_v49  ;;  %v595_v55 = vld [vmem:[%s5173_s11 + $0xa80] sm:$0xff]  ;;  %v644_v47 = vld [vmem:[%s5173_s11 + $0xc08] sm:$0xff] }
  0xdb   : > { %v4618_v5 = vcombine.low %v595_v55, %v599_v56 }
  0xdd   : > { %3518 = vmatpush1.bf16.msra.mxu0 %v4554_v61  ;;  %3682 = vmatpush1.bf16.msra.mxu1 %v4556_v62  ;;  %v4612_v61 = vcombine.low %v588_v48, %v592_v49  ;;  %v4619_v62 = vcombine.high %v595_v55, %v599_v56  ;;  %v648_v48 = vld [vmem:[%s5173_s11 + $0xc28] sm:$0xff]  ;;  %v655_v55 = vld [vmem:[%s5173_s11 + $0xc60] sm:$0xff] }
  0xde   : > { %3519 = vmatprep.subr.bf16.mxu0 %v4563_v0  ;;  %3683 = vmatprep.subr.bf16.mxu1 %v4565_v1  ;;  %v4621_v0 = vcombine.high %v596_v57, %v600_v58  ;;  %v603_v1 = vld [vmem:[%s5173_s11 + $0xac0] sm:$0xff]  ;;  %v652_v56 = vld [vmem:[%s5173_s11 + $0xc48] sm:$0xff] }
  0xdf   : > { %v4626_v14 = vcombine.low %v603_v1, %v607_v2 }
  0xe1   : > { %3520 = vmatpush1.bf16.msra.mxu0 %v4562_v6  ;;  %3684 = vmatpush1.bf16.msra.mxu1 %v4564_v7  ;;  %v4620_v6 = vcombine.low %v596_v57, %v600_v58  ;;  %v4627_v7 = vcombine.high %v603_v1, %v607_v2  ;;  %v656_v57 = vld [vmem:[%s5173_s11 + $0xc68] sm:$0xff]  ;;  %v663_v1 = vld [vmem:[%s5173_s11 + $0xca0] sm:$0xff]  ;;  %v5439_v2 = vcombine.high %v5292_v34, %v5292_v34 }
  0xe2   : > { %3521 = vmatprep.subr.bf16.mxu0 %v4571_v8  ;;  %3685 = vmatprep.subr.bf16.mxu1 %v4573_v10  ;;  %v4629_v8 = vcombine.high %v604_v3, %v608_v4  ;;  %v611_v10 = vld [vmem:[%s5173_s11 + $0xb00] sm:$0xff] }
  0xe3   : > { %v4634_v22 = vcombine.low %v611_v10, %v615_v11 }
  0xe5   : > { %3522 = vmatpush1.bf16.msra.mxu0 %v4570_v15  ;;  %3686 = vmatpush1.bf16.msra.mxu1 %v4572_v16  ;;  %v4628_v15 = vcombine.low %v604_v3, %v608_v4  ;;  %v4635_v16 = vcombine.high %v611_v10, %v615_v11  ;;  %v660_v3 = vld [vmem:[%s5173_s11 + $0xc88] sm:$0xff]  ;;  %v667_v10 = vld [vmem:[%s5173_s11 + $0xcc0] sm:$0xff] }
  0xe6   : > { %3523 = vmatprep.subr.bf16.mxu0 %v4579_v17  ;;  %3687 = vmatprep.subr.bf16.mxu1 %v4581_v18  ;;  %v4637_v17 = vcombine.high %v612_v12, %v616_v13  ;;  %v619_v18 = vld [vmem:[%s5173_s11 + $0xb40] sm:$0xff]  ;;  %v664_v4 = vld [vmem:[%s5173_s11 + $0xca8] sm:$0xff] }
  0xe7   : > { %v4642_v30 = vcombine.low %v619_v18, %v623_v19  ;;  %v671_v11 = vld [vmem:[%s5173_s11 + $0xce0] sm:$0xff] }
  0xe9   : > { %3524 = vmatpush1.bf16.msra.mxu0 %v4578_v23  ;;  %3688 = vmatpush1.bf16.msra.mxu1 %v4580_v24  ;;  %v4636_v23 = vcombine.low %v612_v12, %v616_v13  ;;  %v4643_v24 = vcombine.high %v619_v18, %v623_v19  ;;  %v668_v12 = vld [vmem:[%s5173_s11 + $0xcc8] sm:$0xff]  ;;  %v675_v18 = vld [vmem:[%s5173_s11 + $0xd00] sm:$0xff] }
  0xea   : > { %3525 = vmatprep.subr.bf16.mxu0 %v4587_v26  ;;  %3689 = vmatprep.subr.bf16.mxu1 %v4589_v27  ;;  %v4645_v26 = vcombine.high %v620_v20, %v624_v21  ;;  %v627_v27 = vld [vmem:[%s5173_s11 + $0xb80] sm:$0xff]  ;;  %v672_v13 = vld [vmem:[%s5173_s11 + $0xce8] sm:$0xff] }
  0xeb   : > { %v4650_v41 = vcombine.low %v627_v27, %v631_v59  ;;  %v679_v19 = vld [vmem:[%s5173_s11 + $0xd20] sm:$0xff] }
  0xed   : > { %3526 = vmatpush1.bf16.msra.mxu0 %v4586_v31  ;;  %3690 = vmatpush1.bf16.msra.mxu1 %v4588_v32  ;;  %v4644_v31 = vcombine.low %v620_v20, %v624_v21  ;;  %v4651_v32 = vcombine.high %v627_v27, %v631_v59  ;;  %v676_v20 = vld [vmem:[%s5173_s11 + $0xd08] sm:$0xff]  ;;  %v683_v27 = vld [vmem:[%s5173_s11 + $0xd40] sm:$0xff] }
  0xee   : > { %3527 = vmatprep.subr.bf16.mxu0 %v4595_v33  ;;  %3691 = vmatprep.subr.bf16.mxu1 %v4597_v36  ;;  %v4653_v33 = vcombine.high %v628_v28, %v632_v29  ;;  %v635_v36 = vld [vmem:[%s5173_s11 + $0xbc0] sm:$0xff]  ;;  %v680_v21 = vld [vmem:[%s5173_s11 + $0xd28] sm:$0xff] }
  0xef   : > { %v4658_v49 = vcombine.low %v635_v36, %v639_v37  ;;  %v687_v59 = vld [vmem:[%s5173_s11 + $0xd60] sm:$0xff] }
  0xf1   : > { %3528 = vmatpush1.bf16.msra.mxu0 %v4594_v53  ;;  %3692 = vmatpush1.bf16.msra.mxu1 %v4596_v42  ;;  %v4652_v53 = vcombine.low %v628_v28, %v632_v29  ;;  %v4659_v42 = vcombine.high %v635_v36, %v639_v37  ;;  %v684_v28 = vld [vmem:[%s5173_s11 + $0xd48] sm:$0xff]  ;;  %v691_v36 = vld [vmem:[%s5173_s11 + $0xd80] sm:$0xff] }
  0xf2   : > { %3529 = vmatprep.subr.bf16.mxu0 %v4603_v44  ;;  %3693 = vmatprep.subr.bf16.mxu1 %v4605_v45  ;;  %v4661_v44 = vcombine.high %v636_v38, %v640_v39  ;;  %v643_v45 = vld [vmem:[%s5173_s11 + $0xc00] sm:$0xff]  ;;  %v688_v29 = vld [vmem:[%s5173_s11 + $0xd68] sm:$0xff] }
  0xf3   : > { %v4666_v58 = vcombine.low %v643_v45, %v647_v46  ;;  %v695_v37 = vld [vmem:[%s5173_s11 + $0xda0] sm:$0xff] }
  0xf5   : > { %3530 = vmatpush1.bf16.msra.mxu0 %v4602_v50  ;;  %3694 = vmatpush1.bf16.msra.mxu1 %v4604_v51  ;;  %v4660_v50 = vcombine.low %v636_v38, %v640_v39  ;;  %v4667_v51 = vcombine.high %v643_v45, %v647_v46  ;;  %v692_v38 = vld [vmem:[%s5173_s11 + $0xd88] sm:$0xff]  ;;  %v699_v45 = vld [vmem:[%s5173_s11 + $0xdc0] sm:$0xff] }
  0xf6   : > { %3531 = vmatprep.subr.bf16.mxu0 %v4611_v52  ;;  %3695 = vmatprep.subr.bf16.mxu1 %v4613_v54  ;;  %v4669_v52 = vcombine.high %v644_v47, %v648_v48  ;;  %v651_v54 = vld [vmem:[%s5173_s11 + $0xc40] sm:$0xff]  ;;  %v696_v39 = vld [vmem:[%s5173_s11 + $0xda8] sm:$0xff] }
  0xf7   : > { %v703_v46 = vld [vmem:[%s5173_s11 + $0xde0] sm:$0xff] }
  0xf9   : > { %3532 = vmatpush1.bf16.msra.mxu0 %v4610_v60  ;;  %3696 = vmatpush1.bf16.msra.mxu1 %v4612_v61  ;;  %v4668_v60 = vcombine.low %v644_v47, %v648_v48  ;;  %v4675_v61 = vcombine.high %v651_v54, %v655_v55  ;;  %v700_v47 = vld [vmem:[%s5173_s11 + $0xdc8] sm:$0xff] }
  0xfa   : > { %3533 = vmatprep.subr.bf16.mxu0 %v4619_v62  ;;  %3697 = vmatprep.subr.bf16.mxu1 %v4621_v0  ;;  %v4677_v62 = vcombine.high %v652_v56, %v656_v57  ;;  %v659_v0 = vld [vmem:[%s5173_s11 + $0xc80] sm:$0xff]  ;;  %v704_v48 = vld [vmem:[%s5173_s11 + $0xde8] sm:$0xff] }
  0xfd   : > { %3534 = vmatpush1.bf16.msra.mxu0 %v4618_v5  ;;  %3698 = vmatpush1.bf16.msra.mxu1 %v4620_v6  ;;  %v4674_v5 = vcombine.low %v651_v54, %v655_v55  ;;  %v4676_v6 = vcombine.low %v652_v56, %v656_v57  ;;  %v707_v54 = vld [vmem:[%s5173_s11 + $0xe00] sm:$0xff]  ;;  %v708_v56 = vld [vmem:[%s5173_s11 + $0xe08] sm:$0xff] }
  0xfe   : > { %3535 = vmatprep.subr.bf16.mxu0 %v4627_v7  ;;  %3699 = vmatprep.subr.bf16.mxu1 %v4629_v8  ;;  %v4683_v7 = vcombine.high %v659_v0, %v663_v1  ;;  %v4685_v8 = vcombine.high %v660_v3, %v664_v4  ;;  %v711_v55 = vld [vmem:[%s5173_s11 + $0xe20] sm:$0xff]  ;;  %v712_v57 = vld [vmem:[%s5173_s11 + $0xe28] sm:$0xff] }
 0x101   : > { %3536 = vmatpush1.bf16.msra.mxu0 %v4626_v14  ;;  %3700 = vmatpush1.bf16.msra.mxu1 %v4628_v15  ;;  %v4682_v14 = vcombine.low %v659_v0, %v663_v1  ;;  %v4684_v15 = vcombine.low %v660_v3, %v664_v4  ;;  %v715_v0 = vld [vmem:[%s5173_s11 + $0xe40] sm:$0xff]  ;;  %v716_v3 = vld [vmem:[%s5173_s11 + $0xe48] sm:$0xff] }
 0x102   : > { %3537 = vmatprep.subr.bf16.mxu0 %v4635_v16  ;;  %3701 = vmatprep.subr.bf16.mxu1 %v4637_v17  ;;  %v4691_v16 = vcombine.high %v667_v10, %v671_v11  ;;  %v4693_v17 = vcombine.high %v668_v12, %v672_v13  ;;  %v719_v1 = vld [vmem:[%s5173_s11 + $0xe60] sm:$0xff]  ;;  %v720_v4 = vld [vmem:[%s5173_s11 + $0xe68] sm:$0xff] }
 0x105   : > { %3538 = vmatpush1.bf16.msra.mxu0 %v4634_v22  ;;  %3702 = vmatpush1.bf16.msra.mxu1 %v4636_v23  ;;  %v4690_v22 = vcombine.low %v667_v10, %v671_v11  ;;  %v4692_v23 = vcombine.low %v668_v12, %v672_v13  ;;  %v723_v10 = vld [vmem:[%s5173_s11 + $0xe80] sm:$0xff]  ;;  %v724_v12 = vld [vmem:[%s5173_s11 + $0xe88] sm:$0xff] }
 0x106   : > { %3539 = vmatprep.subr.bf16.mxu0 %v4643_v24  ;;  %3703 = vmatprep.subr.bf16.mxu1 %v4645_v26  ;;  %v4699_v24 = vcombine.high %v675_v18, %v679_v19  ;;  %v4701_v26 = vcombine.high %v676_v20, %v680_v21  ;;  %v727_v11 = vld [vmem:[%s5173_s11 + $0xea0] sm:$0xff]  ;;  %v728_v13 = vld [vmem:[%s5173_s11 + $0xea8] sm:$0xff] }
 0x109   : > { %3540 = vmatpush1.bf16.msra.mxu0 %v4642_v30  ;;  %3704 = vmatpush1.bf16.msra.mxu1 %v4644_v31  ;;  %v4698_v30 = vcombine.low %v675_v18, %v679_v19  ;;  %v4700_v31 = vcombine.low %v676_v20, %v680_v21  ;;  %v731_v18 = vld [vmem:[%s5173_s11 + $0xec0] sm:$0xff]  ;;  %v732_v20 = vld [vmem:[%s5173_s11 + $0xec8] sm:$0xff] }
 0x10a   : > { %3541 = vmatprep.subr.bf16.mxu0 %v4651_v32  ;;  %3705 = vmatprep.subr.bf16.mxu1 %v4653_v33  ;;  %v4707_v32 = vcombine.high %v683_v27, %v687_v59  ;;  %v4709_v33 = vcombine.high %v684_v28, %v688_v29  ;;  %v735_v19 = vld [vmem:[%s5173_s11 + $0xee0] sm:$0xff]  ;;  %v736_v21 = vld [vmem:[%s5173_s11 + $0xee8] sm:$0xff] }
 0x10d   : > { %3542 = vmatpush1.bf16.msra.mxu0 %v4650_v41  ;;  %3706 = vmatpush1.bf16.msra.mxu1 %v4652_v53  ;;  %v4706_v41 = vcombine.low %v683_v27, %v687_v59  ;;  %v4708_v53 = vcombine.low %v684_v28, %v688_v29  ;;  %v739_v27 = vld [vmem:[%s5173_s11 + $0xf00] sm:$0xff]  ;;  %v740_v28 = vld [vmem:[%s5173_s11 + $0xf08] sm:$0xff] }
 0x10e   : > { %3543 = vmatprep.subr.bf16.mxu0 %v4659_v42  ;;  %3707 = vmatprep.subr.bf16.mxu1 %v4661_v44  ;;  %v4715_v42 = vcombine.high %v691_v36, %v695_v37  ;;  %v4717_v44 = vcombine.high %v692_v38, %v696_v39  ;;  %v743_v59 = vld [vmem:[%s5173_s11 + $0xf20] sm:$0xff]  ;;  %v744_v29 = vld [vmem:[%s5173_s11 + $0xf28] sm:$0xff] }
 0x111   : > { %3544 = vmatpush1.bf16.msra.mxu0 %v4658_v49  ;;  %3708 = vmatpush1.bf16.msra.mxu1 %v4660_v50  ;;  %v4714_v49 = vcombine.low %v691_v36, %v695_v37  ;;  %v4716_v50 = vcombine.low %v692_v38, %v696_v39  ;;  %v747_v36 = vld [vmem:[%s5173_s11 + $0xf40] sm:$0xff]  ;;  %v748_v38 = vld [vmem:[%s5173_s11 + $0xf48] sm:$0xff] }
 0x112   : > { %3554 = vmatprep.subr.bf16.mxu0 %v4667_v51  ;;  %3718 = vmatprep.subr.bf16.mxu1 %v4669_v52  ;;  %v4723_v51 = vcombine.high %v699_v45, %v703_v46  ;;  %v4725_v52 = vcombine.high %v700_v47, %v704_v48  ;;  %v751_v37 = vld [vmem:[%s5173_s11 + $0xf60] sm:$0xff]  ;;  %v752_v39 = vld [vmem:[%s5173_s11 + $0xf68] sm:$0xff] }
 0x114   : > { %3546 = vmatmul.mubr.bf16.vlgmr.msra.gmra.mrb[0].mxu0 %v5295_v35  ;;  %3710 = vmatmul.mubr.bf16.vlgmr.msra.gmra.mrb[0].mxu1 %v5295_v35 }
 0x115   : > { %3555 = vmatpush1.bf16.msra.mxu0 %v4666_v58  ;;  %3719 = vmatpush1.bf16.msra.mxu1 %v4668_v60  ;;  %v4722_v58 = vcombine.low %v699_v45, %v703_v46  ;;  %v4724_v60 = vcombine.low %v700_v47, %v704_v48  ;;  %v755_v45 = vld [vmem:[%s5173_s11 + $0xf80] sm:$0xff]  ;;  %v756_v47 = vld [vmem:[%s5173_s11 + $0xf88] sm:$0xff] }
 0x116   : > { %3556 = vmatprep.subr.bf16.mxu0 %v4675_v61  ;;  %3720 = vmatprep.subr.bf16.mxu1 %v4677_v62  ;;  %v4731_v61 = vcombine.high %v707_v54, %v711_v55  ;;  %v4733_v62 = vcombine.high %v708_v56, %v712_v57  ;;  %v759_v46 = vld [vmem:[%s5173_s11 + $0xfa0] sm:$0xff]  ;;  %v760_v48 = vld [vmem:[%s5173_s11 + $0xfa8] sm:$0xff] }
 0x117   : > { %3586 = vmatprep.mubr.bf16.mxu0 %v5439_v2  ;;  %3750 = vmatprep.mubr.bf16.mxu1 %v5439_v2 }
 0x119   : > { %3557 = vmatpush1.bf16.msra.mxu0 %v4674_v5  ;;  %3721 = vmatpush1.bf16.msra.mxu1 %v4676_v6  ;;  %v4730_v5 = vcombine.low %v707_v54, %v711_v55  ;;  %v4732_v6 = vcombine.low %v708_v56, %v712_v57  ;;  %v763_v54 = vld [vmem:[%s5173_s11 + $0xfc0] sm:$0xff]  ;;  %v764_v56 = vld [vmem:[%s5173_s11 + $0xfc8] sm:$0xff] }
 0x11a   : > { %3558 = vmatprep.subr.bf16.mxu0 %v4683_v7  ;;  %3722 = vmatprep.subr.bf16.mxu1 %v4685_v8  ;;  %v4739_v7 = vcombine.high %v715_v0, %v719_v1  ;;  %v4741_v8 = vcombine.high %v716_v3, %v720_v4  ;;  %v767_v55 = vld [vmem:[%s5173_s11 + $0xfe0] sm:$0xff]  ;;  %v768_v57 = vld [vmem:[%s5173_s11 + $0xfe8] sm:$0xff] }
 0x11d   : > { %3559 = vmatpush1.bf16.msra.mxu0 %v4682_v14  ;;  %3723 = vmatpush1.bf16.msra.mxu1 %v4684_v15  ;;  %v4738_v14 = vcombine.low %v715_v0, %v719_v1  ;;  %v4740_v15 = vcombine.low %v716_v3, %v720_v4  ;;  %v261_v0 = vld [vmem:[%s5173_s11 + $0x10] sm:$0xff]  ;;  %v262_v3 = vld [vmem:[%s5173_s11 + $0x18] sm:$0xff] }
 0x11e   : > { %3560 = vmatprep.subr.bf16.mxu0 %v4691_v16  ;;  %3724 = vmatprep.subr.bf16.mxu1 %v4693_v17  ;;  %v4747_v16 = vcombine.high %v723_v10, %v727_v11  ;;  %v4749_v17 = vcombine.high %v724_v12, %v728_v13  ;;  %v265_v1 = vld [vmem:[%s5173_s11 + $0x30] sm:$0xff]  ;;  %v266_v4 = vld [vmem:[%s5173_s11 + $0x38] sm:$0xff] }
 0x121   : > { %3561 = vmatpush1.bf16.msra.mxu0 %v4690_v22  ;;  %3725 = vmatpush1.bf16.msra.mxu1 %v4692_v23  ;;  %v4746_v22 = vcombine.low %v723_v10, %v727_v11  ;;  %v4748_v23 = vcombine.low %v724_v12, %v728_v13  ;;  %v269_v10 = vld [vmem:[%s5173_s11 + $0x50] sm:$0xff]  ;;  %v5507_v12 = vcombine.high %v5295_v35, %v5295_v35  ;;  %v270_v13 = vld [vmem:[%s5173_s11 + $0x58] sm:$0xff] }
 0x122   : > { %3562 = vmatprep.subr.bf16.mxu0 %v4699_v24  ;;  %3726 = vmatprep.subr.bf16.mxu1 %v4701_v26  ;;  %v4755_v24 = vcombine.high %v731_v18, %v735_v19  ;;  %v4757_v26 = vcombine.high %v732_v20, %v736_v21  ;;  %v273_v11 = vld [vmem:[%s5173_s11 + $0x70] sm:$0xff] }
 0x125   : > { %3563 = vmatpush1.bf16.msra.mxu0 %v4698_v30  ;;  %3727 = vmatpush1.bf16.msra.mxu1 %v4700_v31  ;;  %v4754_v30 = vcombine.low %v731_v18, %v735_v19  ;;  %v4756_v31 = vcombine.low %v732_v20, %v736_v21  ;;  %v277_v19 = vld [vmem:[%s5173_s11 + $0x90] sm:$0xff]  ;;  %v278_v21 = vld [vmem:[%s5173_s11 + $0x98] sm:$0xff] }
 0x126   : > { %3564 = vmatprep.subr.bf16.mxu0 %v4707_v32  ;;  %3728 = vmatprep.subr.bf16.mxu1 %v4709_v33  ;;  %v4763_v32 = vcombine.high %v739_v27, %v743_v59  ;;  %v4765_v33 = vcombine.high %v740_v28, %v744_v29  ;;  %v281_v20 = vld [vmem:[%s5173_s11 + $0xb0] sm:$0xff] }
 0x129   : > { %3565 = vmatpush1.bf16.msra.mxu0 %v4706_v41  ;;  %3729 = vmatpush1.bf16.msra.mxu1 %v4708_v53  ;;  %v4762_v41 = vcombine.low %v739_v27, %v743_v59  ;;  %v4764_v53 = vcombine.low %v740_v28, %v744_v29  ;;  %v285_v59 = vld [vmem:[%s5173_s11 + $0xd0] sm:$0xff]  ;;  %v286_v29 = vld [vmem:[%s5173_s11 + $0xd8] sm:$0xff] }
 0x12a   : > { %3566 = vmatprep.subr.bf16.mxu0 %v4715_v42  ;;  %3730 = vmatprep.subr.bf16.mxu1 %v4717_v44  ;;  %v4771_v42 = vcombine.high %v747_v36, %v751_v37  ;;  %v4773_v44 = vcombine.high %v748_v38, %v752_v39  ;;  %v289_v28 = vld [vmem:[%s5173_s11 + $0xf0] sm:$0xff] }
 0x12d   : > { %3567 = vmatpush1.bf16.msra.mxu0 %v4714_v49  ;;  %3731 = vmatpush1.bf16.msra.mxu1 %v4716_v50  ;;  %v4770_v49 = vcombine.low %v747_v36, %v751_v37  ;;  %v4772_v50 = vcombine.low %v748_v38, %v752_v39  ;;  %v293_v37 = vld [vmem:[%s5173_s11 + $0x110] sm:$0xff]  ;;  %v294_v39 = vld [vmem:[%s5173_s11 + $0x118] sm:$0xff] }
 0x12e   : > { %3568 = vmatprep.subr.bf16.mxu0 %v4723_v51  ;;  %3732 = vmatprep.subr.bf16.mxu1 %v4725_v52  ;;  %v4779_v51 = vcombine.high %v755_v45, %v759_v46  ;;  %v4781_v52 = vcombine.high %v756_v47, %v760_v48  ;;  %v297_v38 = vld [vmem:[%s5173_s11 + $0x130] sm:$0xff] }
 0x131   : > { %3569 = vmatpush1.bf16.msra.mxu0 %v4722_v58  ;;  %3733 = vmatpush1.bf16.msra.mxu1 %v4724_v60  ;;  %v4778_v58 = vcombine.low %v755_v45, %v759_v46  ;;  %v4780_v60 = vcombine.low %v756_v47, %v760_v48  ;;  %v301_v45 = vld [vmem:[%s5173_s11 + $0x150] sm:$0xff]  ;;  %v302_v47 = vld [vmem:[%s5173_s11 + $0x158] sm:$0xff] }
 0x132   : > { %3570 = vmatprep.subr.bf16.mxu0 %v4731_v61  ;;  %3734 = vmatprep.subr.bf16.mxu1 %v4733_v62  ;;  %v4787_v61 = vcombine.high %v763_v54, %v767_v55  ;;  %v4789_v62 = vcombine.high %v764_v56, %v768_v57  ;;  %v305_v46 = vld [vmem:[%s5173_s11 + $0x170] sm:$0xff]  ;;  %v306_v48 = vld [vmem:[%s5173_s11 + $0x178] sm:$0xff] }
 0x135   : > { %3571 = vmatpush1.bf16.msra.mxu0 %v4730_v5  ;;  %3735 = vmatpush1.bf16.msra.mxu1 %v4732_v6  ;;  %v4786_v5 = vcombine.low %v763_v54, %v767_v55  ;;  %v4788_v6 = vcombine.low %v764_v56, %v768_v57  ;;  %v309_v54 = vld [vmem:[%s5173_s11 + $0x190] sm:$0xff]  ;;  %v310_v56 = vld [vmem:[%s5173_s11 + $0x198] sm:$0xff] }
 0x136   : > { %3572 = vmatprep.subr.bf16.mxu0 %v4739_v7  ;;  %3736 = vmatprep.subr.bf16.mxu1 %v4741_v8  ;;  %v4287_v7 = vcombine.high %v261_v0, %v265_v1  ;;  %v4289_v8 = vcombine.high %v262_v3, %v266_v4  ;;  %v313_v55 = vld [vmem:[%s5173_s11 + $0x1b0] sm:$0xff]  ;;  %v314_v57 = vld [vmem:[%s5173_s11 + $0x1b8] sm:$0xff] }
 0x139   : > { %3573 = vmatpush1.bf16.msra.mxu0 %v4738_v14  ;;  %3737 = vmatpush1.bf16.msra.mxu1 %v4740_v15  ;;  %v274_v14 = vld [vmem:[%s5173_s11 + $0x78] sm:$0xff]  ;;  %v4286_v15 = vcombine.low %v261_v0, %v265_v1  ;;  %v317_v0 = vld [vmem:[%s5173_s11 + $0x1d0] sm:$0xff] }
 0x13a   : > { %3574 = vmatprep.subr.bf16.mxu0 %v4747_v16  ;;  %3738 = vmatprep.subr.bf16.mxu1 %v4749_v17  ;;  %v4288_v16 = vcombine.low %v262_v3, %v266_v4  ;;  %v4295_v17 = vcombine.high %v269_v10, %v273_v11  ;;  %v4297_v18 = vcombine.high %v270_v13, %v274_v14  ;;  %v321_v1 = vld [vmem:[%s5173_s11 + $0x1f0] sm:$0xff]  ;;  %v318_v3 = vld [vmem:[%s5173_s11 + $0x1d8] sm:$0xff] }
 0x13b   : > { %v322_v4 = vld [vmem:[%s5173_s11 + $0x1f8] sm:$0xff] }
 0x13d   : > { %3575 = vmatpush1.bf16.msra.mxu0 %v4746_v22  ;;  %3739 = vmatpush1.bf16.msra.mxu1 %v4748_v23  ;;  %v282_v22 = vld [vmem:[%s5173_s11 + $0xb8] sm:$0xff]  ;;  %v4294_v23 = vcombine.low %v269_v10, %v273_v11  ;;  %v325_v10 = vld [vmem:[%s5173_s11 + $0x210] sm:$0xff] }
 0x13e   : > { %3576 = vmatprep.subr.bf16.mxu0 %v4755_v24  ;;  %3740 = vmatprep.subr.bf16.mxu1 %v4757_v26  ;;  %v4296_v24 = vcombine.low %v270_v13, %v274_v14  ;;  %v4303_v26 = vcombine.high %v277_v19, %v281_v20  ;;  %v4305_v27 = vcombine.high %v278_v21, %v282_v22  ;;  %v329_v11 = vld [vmem:[%s5173_s11 + $0x230] sm:$0xff]  ;;  %v326_v13 = vld [vmem:[%s5173_s11 + $0x218] sm:$0xff] }
 0x13f   : > { %v330_v14 = vld [vmem:[%s5173_s11 + $0x238] sm:$0xff] }
 0x141   : > { %3577 = vmatpush1.bf16.msra.mxu0 %v4754_v30  ;;  %3741 = vmatpush1.bf16.msra.mxu1 %v4756_v31  ;;  %v290_v30 = vld [vmem:[%s5173_s11 + $0xf8] sm:$0xff]  ;;  %v4302_v31 = vcombine.low %v277_v19, %v281_v20  ;;  %v333_v19 = vld [vmem:[%s5173_s11 + $0x250] sm:$0xff] }
 0x142   : > { %3578 = vmatprep.subr.bf16.mxu0 %v4763_v32  ;;  %3742 = vmatprep.subr.bf16.mxu1 %v4765_v33  ;;  %v4304_v32 = vcombine.low %v278_v21, %v282_v22  ;;  %v4311_v33 = vcombine.high %v285_v59, %v289_v28  ;;  %v4313_v36 = vcombine.high %v286_v29, %v290_v30  ;;  %v337_v20 = vld [vmem:[%s5173_s11 + $0x270] sm:$0xff]  ;;  %v334_v21 = vld [vmem:[%s5173_s11 + $0x258] sm:$0xff] }
 0x143   : > { %v338_v22 = vld [vmem:[%s5173_s11 + $0x278] sm:$0xff] }
 0x145   : > { %3579 = vmatpush1.bf16.msra.mxu0 %v4762_v41  ;;  %3743 = vmatpush1.bf16.msra.mxu1 %v4764_v53  ;;  %v298_v41 = vld [vmem:[%s5173_s11 + $0x138] sm:$0xff]  ;;  %v4310_v53 = vcombine.low %v285_v59, %v289_v28  ;;  %v341_v59 = vld [vmem:[%s5173_s11 + $0x290] sm:$0xff] }
 0x146   : > { %3580 = vmatprep.subr.bf16.mxu0 %v4771_v42  ;;  %3744 = vmatprep.subr.bf16.mxu1 %v4773_v44  ;;  %v4319_v42 = vcombine.high %v293_v37, %v297_v38  ;;  %v4321_v44 = vcombine.high %v294_v39, %v298_v41  ;;  %v345_v28 = vld [vmem:[%s5173_s11 + $0x2b0] sm:$0xff] }
 0x149   : > { %3581 = vmatpush1.bf16.msra.mxu0 %v4770_v49  ;;  %3745 = vmatpush1.bf16.msra.mxu1 %v4772_v50  ;;  %v4318_v49 = vcombine.low %v293_v37, %v297_v38  ;;  %v4320_v50 = vcombine.low %v294_v39, %v298_v41  ;;  %v349_v37 = vld [vmem:[%s5173_s11 + $0x2d0] sm:$0xff]  ;;  %v350_v39 = vld [vmem:[%s5173_s11 + $0x2d8] sm:$0xff] }
 0x14a   : > { %3582 = vmatprep.subr.bf16.mxu0 %v4779_v51  ;;  %3746 = vmatprep.subr.bf16.mxu1 %v4781_v52  ;;  %v4327_v51 = vcombine.high %v301_v45, %v305_v46  ;;  %v4329_v52 = vcombine.high %v302_v47, %v306_v48  ;;  %v353_v38 = vld [vmem:[%s5173_s11 + $0x2f0] sm:$0xff]  ;;  %v354_v41 = vld [vmem:[%s5173_s11 + $0x2f8] sm:$0xff] }
 0x14d   : > { %3583 = vmatpush1.bf16.msra.mxu0 %v4778_v58  ;;  %3747 = vmatpush1.bf16.msra.mxu1 %v4780_v60  ;;  %v4326_v58 = vcombine.low %v301_v45, %v305_v46  ;;  %v4328_v60 = vcombine.low %v302_v47, %v306_v48  ;;  %v357_v45 = vld [vmem:[%s5173_s11 + $0x310] sm:$0xff]  ;;  %v358_v47 = vld [vmem:[%s5173_s11 + $0x318] sm:$0xff] }
 0x14e   : > { %3584 = vmatprep.subr.bf16.mxu0 %v4787_v61  ;;  %3748 = vmatprep.subr.bf16.mxu1 %v4789_v62  ;;  %v4335_v61 = vcombine.high %v309_v54, %v313_v55  ;;  %v4337_v62 = vcombine.high %v310_v56, %v314_v57  ;;  %v361_v46 = vld [vmem:[%s5173_s11 + $0x330] sm:$0xff]  ;;  %v362_v48 = vld [vmem:[%s5173_s11 + $0x338] sm:$0xff] }
 0x151   : > { %3585 = vmatpush1.bf16.msra.mxu0 %v4786_v5  ;;  %3749 = vmatpush1.bf16.msra.mxu1 %v4788_v6  ;;  %v4334_v5 = vcombine.low %v309_v54, %v313_v55  ;;  %v4336_v6 = vcombine.low %v310_v56, %v314_v57  ;;  %v365_v54 = vld [vmem:[%s5173_s11 + $0x350] sm:$0xff]  ;;  %v366_v56 = vld [vmem:[%s5173_s11 + $0x358] sm:$0xff] }
 0x152   : > { %3759 = vmatprep.subr.bf16.mxu0 %v4287_v7  ;;  %3923 = vmatprep.subr.bf16.mxu1 %v4289_v8  ;;  %v4343_v7 = vcombine.high %v317_v0, %v321_v1  ;;  %v4345_v8 = vcombine.high %v318_v3, %v322_v4  ;;  %v369_v55 = vld [vmem:[%s5173_s11 + $0x370] sm:$0xff]  ;;  %v370_v57 = vld [vmem:[%s5173_s11 + $0x378] sm:$0xff] }
 0x154   : > { %3587 = vmatmul.mubr.bf16.vlgmr.msra.gmra.mrb[0].mxu0 %v5507_v12  ;;  %3751 = vmatmul.mubr.bf16.vlgmr.msra.gmra.mrb[0].mxu1 %v5507_v12 }
 0x155   : > { %3760 = vmatpush1.bf16.msra.mxu0 %v4286_v15  ;;  %3924 = vmatpush1.bf16.msra.mxu1 %v4288_v16  ;;  %v4342_v15 = vcombine.low %v317_v0, %v321_v1  ;;  %v4344_v16 = vcombine.low %v318_v3, %v322_v4  ;;  %v373_v0 = vld [vmem:[%s5173_s11 + $0x390] sm:$0xff]  ;;  %v374_v3 = vld [vmem:[%s5173_s11 + $0x398] sm:$0xff] }
 0x156   : > { %3761 = vmatprep.subr.bf16.mxu0 %v4295_v17  ;;  %3925 = vmatprep.subr.bf16.mxu1 %v4297_v18  ;;  %v4351_v17 = vcombine.high %v325_v10, %v329_v11  ;;  %v4353_v18 = vcombine.high %v326_v13, %v330_v14  ;;  %v377_v1 = vld [vmem:[%s5173_s11 + $0x3b0] sm:$0xff]  ;;  %v378_v4 = vld [vmem:[%s5173_s11 + $0x3b8] sm:$0xff] }
 0x157   : > { %3791 = vmatprep.mubr.bf16.mxu0 %v5236_v9  ;;  %3955 = vmatprep.mubr.bf16.mxu1 %v5236_v9  ;;  %v4312_v9 = vcombine.low %v286_v29, %v290_v30  ;;  %v342_v29 = vld [vmem:[%s5173_s11 + $0x298] sm:$0xff] }
 0x158   : > { %v346_v30 = vld [vmem:[%s5173_s11 + $0x2b8] sm:$0xff] }
 0x159   : > { %3762 = vmatpush1.bf16.msra.mxu0 %v4294_v23  ;;  %3926 = vmatpush1.bf16.msra.mxu1 %v4296_v24  ;;  %v4350_v23 = vcombine.low %v325_v10, %v329_v11  ;;  %v4352_v24 = vcombine.low %v326_v13, %v330_v14  ;;  %v381_v10 = vld [vmem:[%s5173_s11 + $0x3d0] sm:$0xff]  ;;  %v382_v13 = vld [vmem:[%s5173_s11 + $0x3d8] sm:$0xff] }
 0x15a   : > { %3763 = vmatprep.subr.bf16.mxu0 %v4303_v26  ;;  %3927 = vmatprep.subr.bf16.mxu1 %v4305_v27  ;;  %v4359_v26 = vcombine.high %v333_v19, %v337_v20  ;;  %v4361_v27 = vcombine.high %v334_v21, %v338_v22  ;;  %v385_v11 = vld [vmem:[%s5173_s11 + $0x3f0] sm:$0xff]  ;;  %v386_v14 = vld [vmem:[%s5173_s11 + $0x3f8] sm:$0xff] }
 0x15d   : > { %3764 = vmatpush1.bf16.msra.mxu0 %v4302_v31  ;;  %3928 = vmatpush1.bf16.msra.mxu1 %v4304_v32  ;;  %v4358_v31 = vcombine.low %v333_v19, %v337_v20  ;;  %v4360_v32 = vcombine.low %v334_v21, %v338_v22  ;;  %v389_v19 = vld [vmem:[%s5173_s11 + $0x410] sm:$0xff]  ;;  %v390_v21 = vld [vmem:[%s5173_s11 + $0x418] sm:$0xff] }
 0x15e   : > { %3765 = vmatprep.subr.bf16.mxu0 %v4311_v33  ;;  %3929 = vmatprep.subr.bf16.mxu1 %v4313_v36  ;;  %v4367_v33 = vcombine.high %v341_v59, %v345_v28  ;;  %v4369_v36 = vcombine.high %v342_v29, %v346_v30  ;;  %v393_v20 = vld [vmem:[%s5173_s11 + $0x430] sm:$0xff]  ;;  %v394_v22 = vld [vmem:[%s5173_s11 + $0x438] sm:$0xff] }
 0x161   : > { %3766 = vmatpush1.bf16.msra.mxu0 %v4310_v53  ;;  %3930 = vmatpush1.bf16.msra.mxu1 %v4312_v9  ;;  %v4366_v53 = vcombine.low %v341_v59, %v345_v28  ;;  %v4368_v9 = vcombine.low %v342_v29, %v346_v30  ;;  %v397_v59 = vld [vmem:[%s5173_s11 + $0x450] sm:$0xff]  ;;  %v398_v29 = vld [vmem:[%s5173_s11 + $0x458] sm:$0xff] }
 0x162   : > { %3767 = vmatprep.subr.bf16.mxu0 %v4319_v42  ;;  %3931 = vmatprep.subr.bf16.mxu1 %v4321_v44  ;;  %v4375_v42 = vcombine.high %v349_v37, %v353_v38  ;;  %v4377_v44 = vcombine.high %v350_v39, %v354_v41  ;;  %v401_v28 = vld [vmem:[%s5173_s11 + $0x470] sm:$0xff]  ;;  %v402_v30 = vld [vmem:[%s5173_s11 + $0x478] sm:$0xff] }
 0x165   : > { %3768 = vmatpush1.bf16.msra.mxu0 %v4318_v49  ;;  %3932 = vmatpush1.bf16.msra.mxu1 %v4320_v50  ;;  %v4374_v49 = vcombine.low %v349_v37, %v353_v38  ;;  %v4376_v50 = vcombine.low %v350_v39, %v354_v41  ;;  %v405_v37 = vld [vmem:[%s5173_s11 + $0x490] sm:$0xff]  ;;  %v406_v39 = vld [vmem:[%s5173_s11 + $0x498] sm:$0xff] }
 0x166   : > { %3769 = vmatprep.subr.bf16.mxu0 %v4327_v51  ;;  %3933 = vmatprep.subr.bf16.mxu1 %v4329_v52  ;;  %v4383_v51 = vcombine.high %v357_v45, %v361_v46  ;;  %v4385_v52 = vcombine.high %v358_v47, %v362_v48  ;;  %v409_v38 = vld [vmem:[%s5173_s11 + $0x4b0] sm:$0xff]  ;;  %v410_v41 = vld [vmem:[%s5173_s11 + $0x4b8] sm:$0xff] }
 0x169   : > { %3770 = vmatpush1.bf16.msra.mxu0 %v4326_v58  ;;  %3934 = vmatpush1.bf16.msra.mxu1 %v4328_v60  ;;  %v4382_v58 = vcombine.low %v357_v45, %v361_v46  ;;  %v4384_v60 = vcombine.low %v358_v47, %v362_v48  ;;  %v413_v45 = vld [vmem:[%s5173_s11 + $0x4d0] sm:$0xff]  ;;  %v414_v47 = vld [vmem:[%s5173_s11 + $0x4d8] sm:$0xff] }
 0x16a   : > { %3771 = vmatprep.subr.bf16.mxu0 %v4335_v61  ;;  %3935 = vmatprep.subr.bf16.mxu1 %v4337_v62  ;;  %v4391_v61 = vcombine.high %v365_v54, %v369_v55  ;;  %v4393_v62 = vcombine.high %v366_v56, %v370_v57  ;;  %v417_v46 = vld [vmem:[%s5173_s11 + $0x4f0] sm:$0xff]  ;;  %v418_v48 = vld [vmem:[%s5173_s11 + $0x4f8] sm:$0xff] }
 0x16d   : > { %3772 = vmatpush1.bf16.msra.mxu0 %v4334_v5  ;;  %3936 = vmatpush1.bf16.msra.mxu1 %v4336_v6  ;;  %v4390_v5 = vcombine.low %v365_v54, %v369_v55  ;;  %v4392_v6 = vcombine.low %v366_v56, %v370_v57  ;;  %v425_v54 = vld [vmem:[%s5173_s11 + $0x530] sm:$0xff]  ;;  %v422_v55 = vld [vmem:[%s5173_s11 + $0x518] sm:$0xff]  ;;  %v4438_v57 = vcombine.low %v413_v45, %v417_v46 }
 0x16e   : > { %3773 = vmatprep.subr.bf16.mxu0 %v4343_v7  ;;  %3937 = vmatprep.subr.bf16.mxu1 %v4345_v8  ;;  %v4399_v7 = vcombine.high %v373_v0, %v377_v1  ;;  %v4401_v8 = vcombine.high %v374_v3, %v378_v4  ;;  %v426_v56 = vld [vmem:[%s5173_s11 + $0x538] sm:$0xff] }
 0x171   : > { %3774 = vmatpush1.bf16.msra.mxu0 %v4342_v15  ;;  %3938 = vmatpush1.bf16.msra.mxu1 %v4344_v16  ;;  %v4398_v15 = vcombine.low %v373_v0, %v377_v1  ;;  %v4400_v16 = vcombine.low %v374_v3, %v378_v4  ;;  %v430_v0 = vld [vmem:[%s5173_s11 + $0x558] sm:$0xff]  ;;  %v4448_v4 = vcombine.low %v422_v55, %v426_v56 }
 0x172   : > { %3775 = vmatprep.subr.bf16.mxu0 %v4351_v17  ;;  %3939 = vmatprep.subr.bf16.mxu1 %v4353_v18  ;;  %v4407_v17 = vcombine.high %v381_v10, %v385_v11  ;;  %v4409_v18 = vcombine.high %v382_v13, %v386_v14  ;;  %v434_v1 = vld [vmem:[%s5173_s11 + $0x578] sm:$0xff] }
 0x175   : > { %3776 = vmatpush1.bf16.msra.mxu0 %v4350_v23  ;;  %3940 = vmatpush1.bf16.msra.mxu1 %v4352_v24  ;;  %v4406_v23 = vcombine.low %v381_v10, %v385_v11  ;;  %v4408_v24 = vcombine.low %v382_v13, %v386_v14  ;;  %v438_v10 = vld [vmem:[%s5173_s11 + $0x598] sm:$0xff]  ;;  %v4456_v14 = vcombine.low %v430_v0, %v434_v1 }
 0x176   : > { %3777 = vmatprep.subr.bf16.mxu0 %v4359_v26  ;;  %3941 = vmatprep.subr.bf16.mxu1 %v4361_v27  ;;  %v4415_v26 = vcombine.high %v389_v19, %v393_v20  ;;  %v4417_v27 = vcombine.high %v390_v21, %v394_v22  ;;  %v442_v11 = vld [vmem:[%s5173_s11 + $0x5b8] sm:$0xff] }
 0x179   : > { %3778 = vmatpush1.bf16.msra.mxu0 %v4358_v31  ;;  %3942 = vmatpush1.bf16.msra.mxu1 %v4360_v32  ;;  %v4414_v31 = vcombine.low %v389_v19, %v393_v20  ;;  %v4416_v32 = vcombine.low %v390_v21, %v394_v22  ;;  %v446_v19 = vld [vmem:[%s5173_s11 + $0x5d8] sm:$0xff]  ;;  %v4464_v22 = vcombine.low %v438_v10, %v442_v11 }
 0x17a   : > { %3779 = vmatprep.subr.bf16.mxu0 %v4367_v33  ;;  %3943 = vmatprep.subr.bf16.mxu1 %v4369_v36  ;;  %v4423_v33 = vcombine.high %v397_v59, %v401_v28  ;;  %v4425_v36 = vcombine.high %v398_v29, %v402_v30  ;;  %v450_v20 = vld [vmem:[%s5173_s11 + $0x5f8] sm:$0xff] }
 0x17d   : > { %3780 = vmatpush1.bf16.msra.mxu0 %v4366_v53  ;;  %3944 = vmatpush1.bf16.msra.mxu1 %v4368_v9  ;;  %v4422_v53 = vcombine.low %v397_v59, %v401_v28  ;;  %v4424_v9 = vcombine.low %v398_v29, %v402_v30  ;;  %v454_v59 = vld [vmem:[%s5173_s11 + $0x618] sm:$0xff]  ;;  %v4472_v30 = vcombine.low %v446_v19, %v450_v20 }
 0x17e   : > { %3781 = vmatprep.subr.bf16.mxu0 %v4375_v42  ;;  %3945 = vmatprep.subr.bf16.mxu1 %v4377_v44  ;;  %v4431_v42 = vcombine.high %v405_v37, %v409_v38  ;;  %v4433_v44 = vcombine.high %v406_v39, %v410_v41  ;;  %v458_v28 = vld [vmem:[%s5173_s11 + $0x638] sm:$0xff] }
 0x181   : > { %3782 = vmatpush1.bf16.msra.mxu0 %v4374_v49  ;;  %3946 = vmatpush1.bf16.msra.mxu1 %v4376_v50  ;;  %v4432_v49 = vcombine.low %v406_v39, %v410_v41  ;;  %v4439_v50 = vcombine.high %v413_v45, %v417_v46  ;;  %v4480_v41 = vcombine.low %v454_v59, %v458_v28  ;;  %v470_v45 = vld [vmem:[%s5173_s11 + $0x698] sm:$0xff] }
 0x182   : > { %3783 = vmatprep.subr.bf16.mxu0 %v4383_v51  ;;  %3947 = vmatprep.subr.bf16.mxu1 %v4385_v52  ;;  %v4441_v51 = vcombine.high %v414_v47, %v418_v48  ;;  %v421_v52 = vld [vmem:[%s5173_s11 + $0x510] sm:$0xff]  ;;  %v474_v46 = vld [vmem:[%s5173_s11 + $0x6b8] sm:$0xff] }
 0x183   : > { %v4446_v3 = vcombine.low %v421_v52, %v425_v54 }
 0x185   : > { %3784 = vmatpush1.bf16.msra.mxu0 %v4382_v58  ;;  %3948 = vmatpush1.bf16.msra.mxu1 %v4384_v60  ;;  %v4447_v58 = vcombine.high %v421_v52, %v425_v54  ;;  %v4449_v60 = vcombine.high %v422_v55, %v426_v56  ;;  %v478_v52 = vld [vmem:[%s5173_s11 + $0x6d8] sm:$0xff]  ;;  %v4496_v56 = vcombine.low %v470_v45, %v474_v46 }
 0x186   : > { %3785 = vmatprep.subr.bf16.mxu0 %v4391_v61  ;;  %3949 = vmatprep.subr.bf16.mxu1 %v4393_v62  ;;  %v429_v61 = vld [vmem:[%s5173_s11 + $0x550] sm:$0xff]  ;;  %v482_v54 = vld [vmem:[%s5173_s11 + $0x6f8] sm:$0xff] }
 0x187   : > { %v433_v62 = vld [vmem:[%s5173_s11 + $0x570] sm:$0xff] }
 0x188   : > { %v4454_v13 = vcombine.low %v429_v61, %v433_v62 }
 0x189   : > { %3786 = vmatpush1.bf16.msra.mxu0 %v4390_v5  ;;  %3950 = vmatpush1.bf16.msra.mxu1 %v4392_v6  ;;  %v4455_v5 = vcombine.high %v429_v61, %v433_v62  ;;  %v4457_v6 = vcombine.high %v430_v0, %v434_v1  ;;  %v486_v61 = vld [vmem:[%s5173_s11 + $0x718] sm:$0xff]  ;;  %v4504_v1 = vcombine.low %v478_v52, %v482_v54 }
 0x18a   : > { %3787 = vmatprep.subr.bf16.mxu0 %v4399_v7  ;;  %3951 = vmatprep.subr.bf16.mxu1 %v4401_v8  ;;  %v437_v7 = vld [vmem:[%s5173_s11 + $0x590] sm:$0xff]  ;;  %v490_v62 = vld [vmem:[%s5173_s11 + $0x738] sm:$0xff] }
 0x18b   : > { %v441_v8 = vld [vmem:[%s5173_s11 + $0x5b0] sm:$0xff] }
 0x18c   : > { %v4462_v21 = vcombine.low %v437_v7, %v441_v8 }
 0x18d   : > { %3788 = vmatpush1.bf16.msra.mxu0 %v4398_v15  ;;  %3952 = vmatpush1.bf16.msra.mxu1 %v4400_v16  ;;  %v4463_v15 = vcombine.high %v437_v7, %v441_v8  ;;  %v4465_v16 = vcombine.high %v438_v10, %v442_v11  ;;  %v494_v7 = vld [vmem:[%s5173_s11 + $0x758] sm:$0xff]  ;;  %v4512_v11 = vcombine.low %v486_v61, %v490_v62 }
 0x18e   : > { %3789 = vmatprep.subr.bf16.mxu0 %v4407_v17  ;;  %3953 = vmatprep.subr.bf16.mxu1 %v4409_v18  ;;  %v445_v17 = vld [vmem:[%s5173_s11 + $0x5d0] sm:$0xff]  ;;  %v498_v8 = vld [vmem:[%s5173_s11 + $0x778] sm:$0xff] }
 0x18f   : > { %v449_v18 = vld [vmem:[%s5173_s11 + $0x5f0] sm:$0xff] }
 0x190   : > { %v4470_v29 = vcombine.low %v445_v17, %v449_v18 }
 0x191   : > { %3790 = vmatpush1.bf16.msra.mxu0 %v4406_v23  ;;  %3954 = vmatpush1.bf16.msra.mxu1 %v4408_v24  ;;  %v4471_v23 = vcombine.high %v445_v17, %v449_v18  ;;  %v4473_v24 = vcombine.high %v446_v19, %v450_v20  ;;  %v502_v17 = vld [vmem:[%s5173_s11 + $0x798] sm:$0xff]  ;;  %v4520_v20 = vcombine.low %v494_v7, %v498_v8 }
 0x192   : > { %3800 = vmatprep.subr.bf16.mxu0 %v4415_v26  ;;  %3964 = vmatprep.subr.bf16.mxu1 %v4417_v27  ;;  %v453_v26 = vld [vmem:[%s5173_s11 + $0x610] sm:$0xff]  ;;  %v506_v18 = vld [vmem:[%s5173_s11 + $0x7b8] sm:$0xff] }
 0x193   : > { %v457_v27 = vld [vmem:[%s5173_s11 + $0x630] sm:$0xff] }
 0x194   : > { %3792 = vmatmul.mubr.bf16.vlgmr.msra.gmra.mrb[4].mxu0 %v5281_v25  ;;  %3956 = vmatmul.mubr.bf16.vlgmr.msra.gmra.mrb[4].mxu1 %v5281_v25  ;;  %v4430_v25 = vcombine.low %v405_v37, %v409_v38  ;;  %v462_v37 = vld [vmem:[%s5173_s11 + $0x658] sm:$0xff]  ;;  %v4478_v39 = vcombine.low %v453_v26, %v457_v27 }
 0x195   : > { %3801 = vmatpush1.bf16.msra.mxu0 %v4414_v31  ;;  %3965 = vmatpush1.bf16.msra.mxu1 %v4416_v32  ;;  %v4479_v31 = vcombine.high %v453_v26, %v457_v27  ;;  %v4481_v32 = vcombine.high %v454_v59, %v458_v28  ;;  %v466_v38 = vld [vmem:[%s5173_s11 + $0x678] sm:$0xff]  ;;  %v4528_v28 = vcombine.low %v502_v17, %v506_v18 }
 0x196   : > { %3802 = vmatprep.subr.bf16.mxu0 %v4423_v33  ;;  %3966 = vmatprep.subr.bf16.mxu1 %v4425_v36  ;;  %v461_v33 = vld [vmem:[%s5173_s11 + $0x650] sm:$0xff]  ;;  %v510_v26 = vld [vmem:[%s5173_s11 + $0x7d8] sm:$0xff] }
 0x197   : > { %3832 = vmatprep.mubr.bf16.mxu0 %v5289_v63  ;;  %3996 = vmatprep.mubr.bf16.mxu1 %v5289_v63  ;;  %v4440_v63 = vcombine.low %v414_v47, %v418_v48  ;;  %v465_v36 = vld [vmem:[%s5173_s11 + $0x670] sm:$0xff]  ;;  %v4488_v48 = vcombine.low %v462_v37, %v466_v38  ;;  %v514_v27 = vld [vmem:[%s5173_s11 + $0x7f8] sm:$0xff] }
 0x198   : > { %v4486_v47 = vcombine.low %v461_v33, %v465_v36 }
 0x199   : > { %3803 = vmatpush1.bf16.msra.mxu0 %v4422_v53  ;;  %3967 = vmatpush1.bf16.msra.mxu1 %v4424_v9  ;;  %v4487_v53 = vcombine.high %v461_v33, %v465_v36  ;;  %v4489_v9 = vcombine.high %v462_v37, %v466_v38  ;;  %v518_v33 = vld [vmem:[%s5173_s11 + $0x818] sm:$0xff]  ;;  %v4536_v38 = vcombine.low %v510_v26, %v514_v27 }
 0x19a   : > { %3804 = vmatprep.subr.bf16.mxu0 %v4431_v42  ;;  %3968 = vmatprep.subr.bf16.mxu1 %v4433_v44  ;;  %v469_v42 = vld [vmem:[%s5173_s11 + $0x690] sm:$0xff]  ;;  %v522_v36 = vld [vmem:[%s5173_s11 + $0x838] sm:$0xff] }
 0x19b   : > { %v473_v44 = vld [vmem:[%s5173_s11 + $0x6b0] sm:$0xff] }
 0x19c   : > { %v4494_v55 = vcombine.low %v469_v42, %v473_v44 }
 0x19d   : > { %3805 = vmatpush1.bf16.msra.mxu0 %v4430_v25  ;;  %3969 = vmatpush1.bf16.msra.mxu1 %v4432_v49  ;;  %v4495_v25 = vcombine.high %v469_v42, %v473_v44  ;;  %v4497_v49 = vcombine.high %v470_v45, %v474_v46  ;;  %v526_v42 = vld [vmem:[%s5173_s11 + $0x858] sm:$0xff]  ;;  %v4544_v46 = vcombine.low %v518_v33, %v522_v36 }
 0x19e   : > { %3806 = vmatprep.subr.bf16.mxu0 %v4439_v50  ;;  %3970 = vmatprep.subr.bf16.mxu1 %v4441_v51  ;;  %v477_v50 = vld [vmem:[%s5173_s11 + $0x6d0] sm:$0xff]  ;;  %v530_v44 = vld [vmem:[%s5173_s11 + $0x878] sm:$0xff] }
 0x19f   : > { %v481_v51 = vld [vmem:[%s5173_s11 + $0x6f0] sm:$0xff] }
 0x1a0   : > { %v4502_v0 = vcombine.low %v477_v50, %v481_v51 }
 0x1a1   : > { %3807 = vmatpush1.bf16.msra.mxu0 %v4438_v57  ;;  %3971 = vmatpush1.bf16.msra.mxu1 %v4440_v63  ;;  %v4503_v57 = vcombine.high %v477_v50, %v481_v51  ;;  %v4505_v63 = vcombine.high %v478_v52, %v482_v54  ;;  %v534_v50 = vld [vmem:[%s5173_s11 + $0x898] sm:$0xff]  ;;  %v4552_v54 = vcombine.low %v526_v42, %v530_v44 }
 0x1a2   : > { %3808 = vmatprep.subr.bf16.mxu0 %v4447_v58  ;;  %3972 = vmatprep.subr.bf16.mxu1 %v4449_v60  ;;  %v485_v58 = vld [vmem:[%s5173_s11 + $0x710] sm:$0xff]  ;;  %v538_v51 = vld [vmem:[%s5173_s11 + $0x8b8] sm:$0xff] }
 0x1a3   : > { %v489_v60 = vld [vmem:[%s5173_s11 + $0x730] sm:$0xff] }
 0x1a4   : > { %v4510_v10 = vcombine.low %v485_v58, %v489_v60 }
 0x1a5   : > { %3809 = vmatpush1.bf16.msra.mxu0 %v4446_v3  ;;  %3973 = vmatpush1.bf16.msra.mxu1 %v4448_v4  ;;  %v4511_v3 = vcombine.high %v485_v58, %v489_v60  ;;  %v4513_v4 = vcombine.high %v486_v61, %v490_v62  ;;  %v542_v58 = vld [vmem:[%s5173_s11 + $0x8d8] sm:$0xff]  ;;  %v4560_v61 = vcombine.low %v534_v50, %v538_v51 }
 0x1a6   : > { %3810 = vmatprep.subr.bf16.mxu0 %v4455_v5  ;;  %3974 = vmatprep.subr.bf16.mxu1 %v4457_v6  ;;  %v493_v5 = vld [vmem:[%s5173_s11 + $0x750] sm:$0xff]  ;;  %v546_v60 = vld [vmem:[%s5173_s11 + $0x8f8] sm:$0xff] }
 0x1a7   : > { %v497_v6 = vld [vmem:[%s5173_s11 + $0x770] sm:$0xff] }
 0x1a8   : > { %v4518_v19 = vcombine.low %v493_v5, %v497_v6 }
 0x1a9   : > { %3811 = vmatpush1.bf16.msra.mxu0 %v4454_v13  ;;  %3975 = vmatpush1.bf16.msra.mxu1 %v4456_v14  ;;  %v4519_v13 = vcombine.high %v493_v5, %v497_v6  ;;  %v4521_v14 = vcombine.high %v494_v7, %v498_v8  ;;  %v554_v5 = vld [vmem:[%s5173_s11 + $0x938] sm:$0xff] }
 0x1aa   : > { %3812 = vmatprep.subr.bf16.mxu0 %v4463_v15  ;;  %3976 = vmatprep.subr.bf16.mxu1 %v4465_v16  ;;  %v501_v15 = vld [vmem:[%s5173_s11 + $0x790] sm:$0xff] }
 0x1ab   : > { %v505_v16 = vld [vmem:[%s5173_s11 + $0x7b0] sm:$0xff] }
 0x1ac   : > { %v4526_v59 = vcombine.low %v501_v15, %v505_v16 }
 0x1ad   : > { %3813 = vmatpush1.bf16.msra.mxu0 %v4462_v21  ;;  %3977 = vmatpush1.bf16.msra.mxu1 %v4464_v22  ;;  %v4527_v21 = vcombine.high %v501_v15, %v505_v16  ;;  %v4529_v22 = vcombine.high %v502_v17, %v506_v18 }
 0x1ae   : > { %3814 = vmatprep.subr.bf16.mxu0 %v4471_v23  ;;  %3978 = vmatprep.subr.bf16.mxu1 %v4473_v24  ;;  %v509_v23 = vld [vmem:[%s5173_s11 + $0x7d0] sm:$0xff] }
 0x1af   : > { %v513_v24 = vld [vmem:[%s5173_s11 + $0x7f0] sm:$0xff] }
 0x1b0   : > { %v4534_v37 = vcombine.low %v509_v23, %v513_v24 }
 0x1b1   : > { %3815 = vmatpush1.bf16.msra.mxu0 %v4470_v29  ;;  %3979 = vmatpush1.bf16.msra.mxu1 %v4472_v30  ;;  %v4535_v29 = vcombine.high %v509_v23, %v513_v24  ;;  %v4537_v30 = vcombine.high %v510_v26, %v514_v27 }
 0x1b2   : > { %3816 = vmatprep.subr.bf16.mxu0 %v4479_v31  ;;  %3980 = vmatprep.subr.bf16.mxu1 %v4481_v32  ;;  %v517_v31 = vld [vmem:[%s5173_s11 + $0x810] sm:$0xff] }
 0x1b3   : > { %v521_v32 = vld [vmem:[%s5173_s11 + $0x830] sm:$0xff] }
 0x1b4   : > { %v4542_v45 = vcombine.low %v517_v31, %v521_v32 }
 0x1b5   : > { %3817 = vmatpush1.bf16.msra.mxu0 %v4478_v39  ;;  %3981 = vmatpush1.bf16.msra.mxu1 %v4480_v41  ;;  %v4543_v39 = vcombine.high %v517_v31, %v521_v32  ;;  %v4545_v41 = vcombine.high %v518_v33, %v522_v36 }
 0x1b6   : > { %3818 = vmatprep.subr.bf16.mxu0 %v4487_v53  ;;  %3982 = vmatprep.subr.bf16.mxu1 %v4489_v9  ;;  %v525_v53 = vld [vmem:[%s5173_s11 + $0x850] sm:$0xff] }
 0x1b7   : > { %v529_v9 = vld [vmem:[%s5173_s11 + $0x870] sm:$0xff] }
 0x1b8   : > { %v4550_v52 = vcombine.low %v525_v53, %v529_v9 }
 0x1b9   : > { %3819 = vmatpush1.bf16.msra.mxu0 %v4486_v47  ;;  %3983 = vmatpush1.bf16.msra.mxu1 %v4488_v48  ;;  %v4551_v47 = vcombine.high %v525_v53, %v529_v9  ;;  %v4553_v48 = vcombine.high %v526_v42, %v530_v44 }
 0x1ba   : > { %3820 = vmatprep.subr.bf16.mxu0 %v4495_v25  ;;  %3984 = vmatprep.subr.bf16.mxu1 %v4497_v49  ;;  %v533_v25 = vld [vmem:[%s5173_s11 + $0x890] sm:$0xff] }
 0x1bb   : > { %v537_v49 = vld [vmem:[%s5173_s11 + $0x8b0] sm:$0xff] }
 0x1bd   : > { %3821 = vmatpush1.bf16.msra.mxu0 %v4494_v55  ;;  %3985 = vmatpush1.bf16.msra.mxu1 %v4496_v56  ;;  %v4559_v55 = vcombine.high %v533_v25, %v537_v49  ;;  %v4561_v56 = vcombine.high %v534_v50, %v538_v51 }
 0x1be   : > { %3822 = vmatprep.subr.bf16.mxu0 %v4503_v57  ;;  %3986 = vmatprep.subr.bf16.mxu1 %v4505_v63  ;;  %v541_v57 = vld [vmem:[%s5173_s11 + $0x8d0] sm:$0xff] }
 0x1bf   : > { %v545_v63 = vld [vmem:[%s5173_s11 + $0x8f0] sm:$0xff] }
 0x1c0   : > { %v4567_v62 = vcombine.high %v541_v57, %v545_v63  ;;  %v4566_v6 = vcombine.low %v541_v57, %v545_v63 }
 0x1c1   : > { %3823 = vmatpush1.bf16.msra.mxu0 %v4502_v0  ;;  %3987 = vmatpush1.bf16.msra.mxu1 %v4504_v1  ;;  %v4569_v0 = vcombine.high %v542_v58, %v546_v60  ;;  %v549_v1 = vld [vmem:[%s5173_s11 + $0x910] sm:$0xff] }
 0x1c2   : > { %3824 = vmatprep.subr.bf16.mxu0 %v4511_v3  ;;  %3988 = vmatprep.subr.bf16.mxu1 %v4513_v4  ;;  %v553_v3 = vld [vmem:[%s5173_s11 + $0x930] sm:$0xff]  ;;  %v550_v4 = vld [vmem:[%s5173_s11 + $0x918] sm:$0xff] }
 0x1c3   : > { %v4575_v7 = vcombine.high %v549_v1, %v553_v3  ;;  %v4577_v8 = vcombine.high %v550_v4, %v554_v5  ;;  %v4574_v15 = vcombine.low %v549_v1, %v553_v3  ;;  %v4576_v16 = vcombine.low %v550_v4, %v554_v5 }
 0x1c5   : > { %3825 = vmatpush1.bf16.msra.mxu0 %v4510_v10  ;;  %3989 = vmatpush1.bf16.msra.mxu1 %v4512_v11  ;;  %v557_v10 = vld [vmem:[%s5173_s11 + $0x950] sm:$0xff] }
 0x1c6   : > { %3826 = vmatprep.subr.bf16.mxu0 %v4519_v13  ;;  %3990 = vmatprep.subr.bf16.mxu1 %v4521_v14  ;;  %v561_v11 = vld [vmem:[%s5173_s11 + $0x970] sm:$0xff]  ;;  %v558_v13 = vld [vmem:[%s5173_s11 + $0x958] sm:$0xff] }
 0x1c7   : > { %v562_v14 = vld [vmem:[%s5173_s11 + $0x978] sm:$0xff]  ;;  %v4583_v17 = vcombine.high %v557_v10, %v561_v11  ;;  %v4582_v23 = vcombine.low %v557_v10, %v561_v11 }
 0x1c8   : > { %v4585_v18 = vcombine.high %v558_v13, %v562_v14  ;;  %v4584_v24 = vcombine.low %v558_v13, %v562_v14 }
 0x1c9   : > { %3827 = vmatpush1.bf16.msra.mxu0 %v4518_v19  ;;  %3991 = vmatpush1.bf16.msra.mxu1 %v4520_v20  ;;  %v565_v19 = vld [vmem:[%s5173_s11 + $0x990] sm:$0xff] }
 0x1ca   : > { %3828 = vmatprep.subr.bf16.mxu0 %v4527_v21  ;;  %3992 = vmatprep.subr.bf16.mxu1 %v4529_v22  ;;  %v569_v20 = vld [vmem:[%s5173_s11 + $0x9b0] sm:$0xff]  ;;  %v566_v21 = vld [vmem:[%s5173_s11 + $0x998] sm:$0xff] }
 0x1cb   : > { %v570_v22 = vld [vmem:[%s5173_s11 + $0x9b8] sm:$0xff]  ;;  %v4591_v26 = vcombine.high %v565_v19, %v569_v20  ;;  %v4590_v31 = vcombine.low %v565_v19, %v569_v20 }
 0x1cc   : > { %v4593_v27 = vcombine.high %v566_v21, %v570_v22  ;;  %v4592_v32 = vcombine.low %v566_v21, %v570_v22 }
 0x1cd   : > { %3829 = vmatpush1.bf16.msra.mxu0 %v4526_v59  ;;  %3993 = vmatpush1.bf16.msra.mxu1 %v4528_v28  ;;  %v573_v59 = vld [vmem:[%s5173_s11 + $0x9d0] sm:$0xff] }
 0x1ce   : > { %3830 = vmatprep.subr.bf16.mxu0 %v4535_v29  ;;  %3994 = vmatprep.subr.bf16.mxu1 %v4537_v30  ;;  %v577_v28 = vld [vmem:[%s5173_s11 + $0x9f0] sm:$0xff]  ;;  %v574_v29 = vld [vmem:[%s5173_s11 + $0x9d8] sm:$0xff] }
 0x1cf   : > { %v578_v30 = vld [vmem:[%s5173_s11 + $0x9f8] sm:$0xff]  ;;  %v4599_v33 = vcombine.high %v573_v59, %v577_v28  ;;  %v4598_v53 = vcombine.low %v573_v59, %v577_v28 }
 0x1d0   : > { %v4601_v36 = vcombine.high %v574_v29, %v578_v30  ;;  %v4600_v9 = vcombine.low %v574_v29, %v578_v30 }
 0x1d1   : > { %3831 = vmatpush1.bf16.msra.mxu0 %v4534_v37  ;;  %3995 = vmatpush1.bf16.msra.mxu1 %v4536_v38  ;;  %v581_v37 = vld [vmem:[%s5173_s11 + $0xa10] sm:$0xff] }
 0x1d2   : > { %3841 = vmatprep.subr.bf16.mxu0 %v4543_v39  ;;  %4005 = vmatprep.subr.bf16.mxu1 %v4545_v41  ;;  %v585_v38 = vld [vmem:[%s5173_s11 + $0xa30] sm:$0xff]  ;;  %v582_v39 = vld [vmem:[%s5173_s11 + $0xa18] sm:$0xff] }
 0x1d3   : > { %v586_v41 = vld [vmem:[%s5173_s11 + $0xa38] sm:$0xff]  ;;  %v4607_v42 = vcombine.high %v581_v37, %v585_v38 }
 0x1d4   : > { %3833 = vmatmul.mubr.bf16.vlgmr.msra.gmra.mrb[4].mxu0 %v5363_v40  ;;  %3997 = vmatmul.mubr.bf16.vlgmr.msra.gmra.mrb[4].mxu1 %v5363_v40  ;;  %v4558_v40 = vcombine.low %v533_v25, %v537_v49  ;;  %v4609_v44 = vcombine.high %v582_v39, %v586_v41  ;;  %v4606_v25 = vcombine.low %v581_v37, %v585_v38 }
 0x1d5   : > { %3842 = vmatpush1.bf16.msra.mxu0 %v4542_v45  ;;  %4006 = vmatpush1.bf16.msra.mxu1 %v4544_v46  ;;  %v589_v45 = vld [vmem:[%s5173_s11 + $0xa50] sm:$0xff]  ;;  %v4608_v49 = vcombine.low %v582_v39, %v586_v41 }
 0x1d6   : > { %3843 = vmatprep.subr.bf16.mxu0 %v4551_v47  ;;  %4007 = vmatprep.subr.bf16.mxu1 %v4553_v48  ;;  %v593_v46 = vld [vmem:[%s5173_s11 + $0xa70] sm:$0xff]  ;;  %v590_v47 = vld [vmem:[%s5173_s11 + $0xa58] sm:$0xff] }
 0x1d7   : > { %3873 = vmatprep.mubr.bf16.mxu0 %v5292_v34  ;;  %4037 = vmatprep.mubr.bf16.mxu1 %v5292_v34  ;;  %v4568_v34 = vcombine.low %v542_v58, %v546_v60  ;;  %v594_v48 = vld [vmem:[%s5173_s11 + $0xa78] sm:$0xff]  ;;  %v4615_v50 = vcombine.high %v589_v45, %v593_v46  ;;  %v4614_v57 = vcombine.low %v589_v45, %v593_v46 }
 0x1d8   : > { %v4617_v51 = vcombine.high %v590_v47, %v594_v48  ;;  %v4616_v63 = vcombine.low %v590_v47, %v594_v48 }
 0x1d9   : > { %3844 = vmatpush1.bf16.msra.mxu0 %v4550_v52  ;;  %4008 = vmatpush1.bf16.msra.mxu1 %v4552_v54  ;;  %v597_v52 = vld [vmem:[%s5173_s11 + $0xa90] sm:$0xff] }
 0x1da   : > { %3845 = vmatprep.subr.bf16.mxu0 %v4559_v55  ;;  %4009 = vmatprep.subr.bf16.mxu1 %v4561_v56  ;;  %v601_v54 = vld [vmem:[%s5173_s11 + $0xab0] sm:$0xff]  ;;  %v598_v55 = vld [vmem:[%s5173_s11 + $0xa98] sm:$0xff] }
 0x1db   : > { %v602_v56 = vld [vmem:[%s5173_s11 + $0xab8] sm:$0xff]  ;;  %v4623_v58 = vcombine.high %v597_v52, %v601_v54  ;;  %v4622_v1 = vcombine.low %v597_v52, %v601_v54 }
 0x1dc   : > { %v4625_v60 = vcombine.high %v598_v55, %v602_v56  ;;  %v4624_v3 = vcombine.low %v598_v55, %v602_v56 }
 0x1dd   : > { %3846 = vmatpush1.bf16.msra.mxu0 %v4558_v40  ;;  %4010 = vmatpush1.bf16.msra.mxu1 %v4560_v61  ;;  %v605_v40 = vld [vmem:[%s5173_s11 + $0xad0] sm:$0xff] }
 0x1de   : > { %3847 = vmatprep.subr.bf16.mxu0 %v4567_v62  ;;  %4011 = vmatprep.subr.bf16.mxu1 %v4569_v0  ;;  %v609_v61 = vld [vmem:[%s5173_s11 + $0xaf0] sm:$0xff]  ;;  %v606_v62 = vld [vmem:[%s5173_s11 + $0xad8] sm:$0xff] }
 0x1df   : > { %v610_v0 = vld [vmem:[%s5173_s11 + $0xaf8] sm:$0xff]  ;;  %v4631_v4 = vcombine.high %v605_v40, %v609_v61  ;;  %v4630_v10 = vcombine.low %v605_v40, %v609_v61 }
 0x1e0   : > { %v4633_v5 = vcombine.high %v606_v62, %v610_v0  ;;  %v4632_v11 = vcombine.low %v606_v62, %v610_v0 }
 0x1e1   : > { %3848 = vmatpush1.bf16.msra.mxu0 %v4566_v6  ;;  %4012 = vmatpush1.bf16.msra.mxu1 %v4568_v34  ;;  %v613_v6 = vld [vmem:[%s5173_s11 + $0xb10] sm:$0xff] }
 0x1e2   : > { %3849 = vmatprep.subr.bf16.mxu0 %v4575_v7  ;;  %4013 = vmatprep.subr.bf16.mxu1 %v4577_v8  ;;  %v617_v34 = vld [vmem:[%s5173_s11 + $0xb30] sm:$0xff]  ;;  %v614_v7 = vld [vmem:[%s5173_s11 + $0xb18] sm:$0xff] }
 0x1e3   : > { %v618_v8 = vld [vmem:[%s5173_s11 + $0xb38] sm:$0xff]  ;;  %v4639_v13 = vcombine.high %v613_v6, %v617_v34  ;;  %v4638_v19 = vcombine.low %v613_v6, %v617_v34 }
 0x1e4   : > { %v4641_v14 = vcombine.high %v614_v7, %v618_v8  ;;  %v4640_v20 = vcombine.low %v614_v7, %v618_v8  ;;  %v677_v8 = vld [vmem:[%s5173_s11 + $0xd10] sm:$0xff] }
 0x1e5   : > { %3850 = vmatpush1.bf16.msra.mxu0 %v4574_v15  ;;  %4014 = vmatpush1.bf16.msra.mxu1 %v4576_v16  ;;  %v621_v15 = vld [vmem:[%s5173_s11 + $0xb50] sm:$0xff] }
 0x1e6   : > { %3851 = vmatprep.subr.bf16.mxu0 %v4583_v17  ;;  %4015 = vmatprep.subr.bf16.mxu1 %v4585_v18  ;;  %v625_v16 = vld [vmem:[%s5173_s11 + $0xb70] sm:$0xff]  ;;  %v622_v17 = vld [vmem:[%s5173_s11 + $0xb58] sm:$0xff] }
 0x1e7   : > { %v626_v18 = vld [vmem:[%s5173_s11 + $0xb78] sm:$0xff]  ;;  %v4647_v21 = vcombine.high %v621_v15, %v625_v16  ;;  %v4646_v59 = vcombine.low %v621_v15, %v625_v16 }
 0x1e8   : > { %v4649_v22 = vcombine.high %v622_v17, %v626_v18  ;;  %v4648_v28 = vcombine.low %v622_v17, %v626_v18  ;;  %v685_v17 = vld [vmem:[%s5173_s11 + $0xd50] sm:$0xff] }
 0x1e9   : > { %3852 = vmatpush1.bf16.msra.mxu0 %v4582_v23  ;;  %4016 = vmatpush1.bf16.msra.mxu1 %v4584_v24  ;;  %v629_v23 = vld [vmem:[%s5173_s11 + $0xb90] sm:$0xff] }
 0x1ea   : > { %3853 = vmatprep.subr.bf16.mxu0 %v4591_v26  ;;  %4017 = vmatprep.subr.bf16.mxu1 %v4593_v27  ;;  %v633_v24 = vld [vmem:[%s5173_s11 + $0xbb0] sm:$0xff]  ;;  %v630_v26 = vld [vmem:[%s5173_s11 + $0xb98] sm:$0xff] }
 0x1eb   : > { %v634_v27 = vld [vmem:[%s5173_s11 + $0xbb8] sm:$0xff]  ;;  %v4655_v29 = vcombine.high %v629_v23, %v633_v24  ;;  %v4654_v37 = vcombine.low %v629_v23, %v633_v24  ;;  %v689_v18 = vld [vmem:[%s5173_s11 + $0xd70] sm:$0xff]  ;;  %v5737_v23 = vld [vmem:[%s5179_s6] sm:$0xff]  ;;  %v783_v24 = vsub.s32 2, %v5207_v43 }
 0x1ec   : > { %v4657_v30 = vcombine.high %v630_v26, %v634_v27  ;;  %v4656_v38 = vcombine.low %v630_v26, %v634_v27  ;;  %v779_v26 = vsub.s32 1, %v5207_v43 }
 0x1ed   : > { %3854 = vmatpush1.bf16.msra.mxu0 %v4590_v31  ;;  %4018 = vmatpush1.bf16.msra.mxu1 %v4592_v32  ;;  %v637_v31 = vld [vmem:[%s5173_s11 + $0xbd0] sm:$0xff] }
 0x1ee   : > { %3855 = vmatprep.subr.bf16.mxu0 %v4599_v33  ;;  %4019 = vmatprep.subr.bf16.mxu1 %v4601_v36  ;;  %v641_v32 = vld [vmem:[%s5173_s11 + $0xbf0] sm:$0xff]  ;;  %v638_v33 = vld [vmem:[%s5173_s11 + $0xbd8] sm:$0xff] }
 0x1ef   : > { %v642_v36 = vld [vmem:[%s5173_s11 + $0xbf8] sm:$0xff]  ;;  %v4663_v39 = vcombine.high %v637_v31, %v641_v32  ;;  %v4662_v45 = vcombine.low %v637_v31, %v641_v32  ;;  %v697_v31 = vld [vmem:[%s5173_s11 + $0xdb0] sm:$0xff] }
 0x1f0   : > { %v4665_v41 = vcombine.high %v638_v33, %v642_v36  ;;  %v4664_v46 = vcombine.low %v638_v33, %v642_v36  ;;  %v694_v33 = vld [vmem:[%s5173_s11 + $0xd98] sm:$0xff] }
 0x1f1   : > { %3856 = vmatpush1.bf16.msra.mxu0 %v4598_v53  ;;  %4020 = vmatpush1.bf16.msra.mxu1 %v4600_v9  ;;  %v645_v53 = vld [vmem:[%s5173_s11 + $0xc10] sm:$0xff]  ;;  %v698_v36 = vld [vmem:[%s5173_s11 + $0xdb8] sm:$0xff] }
 0x1f2   : > { %3857 = vmatprep.subr.bf16.mxu0 %v4607_v42  ;;  %4021 = vmatprep.subr.bf16.mxu1 %v4609_v44  ;;  %v649_v9 = vld [vmem:[%s5173_s11 + $0xc30] sm:$0xff]  ;;  %v646_v42 = vld [vmem:[%s5173_s11 + $0xc18] sm:$0xff] }
 0x1f3   : > { %v650_v44 = vld [vmem:[%s5173_s11 + $0xc38] sm:$0xff]  ;;  %v4671_v47 = vcombine.high %v645_v53, %v649_v9  ;;  %v4670_v52 = vcombine.low %v645_v53, %v649_v9 }
 0x1f4   : > { %v4673_v48 = vcombine.high %v646_v42, %v650_v44  ;;  %v4672_v54 = vcombine.low %v646_v42, %v650_v44  ;;  %v4721_v44 = vcombine.high %v694_v33, %v698_v36 }
 0x1f5   : > { %3858 = vmatpush1.bf16.msra.mxu0 %v4606_v25  ;;  %4022 = vmatpush1.bf16.msra.mxu1 %v4608_v49  ;;  %v653_v25 = vld [vmem:[%s5173_s11 + $0xc50] sm:$0xff] }
 0x1f6   : > { %3859 = vmatprep.subr.bf16.mxu0 %v4615_v50  ;;  %4023 = vmatprep.subr.bf16.mxu1 %v4617_v51  ;;  %v657_v49 = vld [vmem:[%s5173_s11 + $0xc70] sm:$0xff]  ;;  %v654_v50 = vld [vmem:[%s5173_s11 + $0xc58] sm:$0xff] }
 0x1f7   : > { %v658_v51 = vld [vmem:[%s5173_s11 + $0xc78] sm:$0xff]  ;;  %v4679_v55 = vcombine.high %v653_v25, %v657_v49  ;;  %v4678_v40 = vcombine.low %v653_v25, %v657_v49 }
 0x1f8   : > { %v4681_v56 = vcombine.high %v654_v50, %v658_v51  ;;  %v4680_v61 = vcombine.low %v654_v50, %v658_v51  ;;  %v702_v49 = vld [vmem:[%s5173_s11 + $0xdd8] sm:$0xff] }
 0x1f9   : > { %3860 = vmatpush1.bf16.msra.mxu0 %v4614_v57  ;;  %4024 = vmatpush1.bf16.msra.mxu1 %v4616_v63  ;;  %v661_v57 = vld [vmem:[%s5173_s11 + $0xc90] sm:$0xff]  ;;  %v706_v50 = vld [vmem:[%s5173_s11 + $0xdf8] sm:$0xff] }
 0x1fa   : > { %3861 = vmatprep.subr.bf16.mxu0 %v4623_v58  ;;  %4025 = vmatprep.subr.bf16.mxu1 %v4625_v60  ;;  %v665_v63 = vld [vmem:[%s5173_s11 + $0xcb0] sm:$0xff]  ;;  %v662_v58 = vld [vmem:[%s5173_s11 + $0xc98] sm:$0xff] }
 0x1fb   : > { %v666_v60 = vld [vmem:[%s5173_s11 + $0xcb8] sm:$0xff]  ;;  %v4687_v62 = vcombine.high %v661_v57, %v665_v63 }
 0x1fc   : > { %v4689_v0 = vcombine.high %v662_v58, %v666_v60  ;;  %v4688_v6 = vcombine.low %v662_v58, %v666_v60 }
 0x1fd   : > { %3862 = vmatpush1.bf16.msra.mxu0 %v4622_v1  ;;  %4026 = vmatpush1.bf16.msra.mxu1 %v4624_v3  ;;  %v669_v1 = vld [vmem:[%s5173_s11 + $0xcd0] sm:$0xff] }
 0x1fe   : > { %3863 = vmatprep.subr.bf16.mxu0 %v4631_v4  ;;  %4027 = vmatprep.subr.bf16.mxu1 %v4633_v5  ;;  %v673_v3 = vld [vmem:[%s5173_s11 + $0xcf0] sm:$0xff]  ;;  %v670_v4 = vld [vmem:[%s5173_s11 + $0xcd8] sm:$0xff] }
 0x1ff   : > { %v674_v5 = vld [vmem:[%s5173_s11 + $0xcf8] sm:$0xff]  ;;  %v4695_v34 = vcombine.high %v669_v1, %v673_v3 }
 0x200   : > { %v4697_v7 = vcombine.high %v670_v4, %v674_v5 }
 0x201   : > { %3864 = vmatpush1.bf16.msra.mxu0 %v4630_v10  ;;  %4028 = vmatpush1.bf16.msra.mxu1 %v4632_v11  ;;  %v681_v10 = vld [vmem:[%s5173_s11 + $0xd30] sm:$0xff]  ;;  %v678_v11 = vld [vmem:[%s5173_s11 + $0xd18] sm:$0xff] }
 0x202   : > { %3865 = vmatprep.subr.bf16.mxu0 %v4639_v13  ;;  %4029 = vmatprep.subr.bf16.mxu1 %v4641_v14  ;;  %v682_v13 = vld [vmem:[%s5173_s11 + $0xd38] sm:$0xff]  ;;  %v4694_v14 = vcombine.low %v669_v1, %v673_v3  ;;  %v4703_v15 = vcombine.high %v677_v8, %v681_v10  ;;  %v713_v1 = vld [vmem:[%s5173_s11 + $0xe30] sm:$0xff] }
 0x203   : > { %v4705_v16 = vcombine.high %v678_v11, %v682_v13  ;;  %v4704_v27 = vcombine.low %v678_v11, %v682_v13  ;;  %v710_v3 = vld [vmem:[%s5173_s11 + $0xe18] sm:$0xff]  ;;  %v721_v11 = vld [vmem:[%s5173_s11 + $0xe70] sm:$0xff] }
 0x204   : > { %v718_v13 = vld [vmem:[%s5173_s11 + $0xe58] sm:$0xff] }
 0x205   : > { %3866 = vmatpush1.bf16.msra.mxu0 %v4638_v19  ;;  %4030 = vmatpush1.bf16.msra.mxu1 %v4640_v20  ;;  %v775_v19 = vsub.s32 0, %v5207_v43  ;;  %v686_v20 = vld [vmem:[%s5173_s11 + $0xd58] sm:$0xff] }
 0x206   : > { %3867 = vmatprep.subr.bf16.mxu0 %v4647_v21  ;;  %4031 = vmatprep.subr.bf16.mxu1 %v4649_v22  ;;  %v690_v21 = vld [vmem:[%s5173_s11 + $0xd78] sm:$0xff]  ;;  %v4702_v22 = vcombine.low %v677_v8, %v681_v10  ;;  %v717_v10 = vld [vmem:[%s5173_s11 + $0xe50] sm:$0xff] }
 0x207   : > { %v776_v32 = vrot.slane %v5737_v23, %v775_v19  ;;  %v4712_v53 = vcombine.low %v686_v20, %v690_v21  ;;  %v725_v19 = vld [vmem:[%s5173_s11 + $0xe90] sm:$0xff] }
 0x209   : > { %3868 = vmatpush1.bf16.msra.mxu0 %v4646_v59  ;;  %4032 = vmatpush1.bf16.msra.mxu1 %v4648_v28  ;;  %v787_v59 = vsub.s32 3, %v5207_v43  ;;  %v4711_v28 = vcombine.high %v685_v17, %v689_v18 }
 0x20a   : > { %3869 = vmatprep.subr.bf16.mxu0 %v4655_v29  ;;  %4033 = vmatprep.subr.bf16.mxu1 %v4657_v30  ;;  %v4713_v29 = vcombine.high %v686_v20, %v690_v21  ;;  %v693_v30 = vld [vmem:[%s5173_s11 + $0xd90] sm:$0xff] }
 0x20b   : > { %v4719_v9 = vcombine.high %v693_v30, %v697_v31  ;;  %v729_v20 = vld [vmem:[%s5173_s11 + $0xeb0] sm:$0xff] }
 0x20d   : > { %3870 = vmatpush1.bf16.msra.mxu0 %v4654_v37  ;;  %4034 = vmatpush1.bf16.msra.mxu1 %v4656_v38  ;;  %v784_v37 = vrot.slane %v5737_v23, %v783_v24  ;;  %v780_v38 = vrot.slane %v5737_v23, %v779_v26  ;;  %v730_v24 = vld [vmem:[%s5173_s11 + $0xeb8] sm:$0xff] }
 0x20e   : > { %3871 = vmatprep.subr.bf16.mxu0 %v4663_v39  ;;  %4035 = vmatprep.subr.bf16.mxu1 %v4665_v41  ;;  %v4710_v39 = vcombine.low %v685_v17, %v689_v18  ;;  %v788_v41 = vrot.slane %v5737_v23, %v787_v59  ;;  %v4743_v17 = vcombine.high %v717_v10, %v721_v11 }
 0x211   : > { %3872 = vmatpush1.bf16.msra.mxu0 %v4662_v45  ;;  %4036 = vmatpush1.bf16.msra.mxu1 %v4664_v46  ;;  %v701_v45 = vld [vmem:[%s5173_s11 + $0xdd0] sm:$0xff] }
 0x212   : > { %3882 = vmatprep.subr.bf16.mxu0 %v4671_v47  ;;  %4046 = vmatprep.subr.bf16.mxu1 %v4673_v48  ;;  %v705_v46 = vld [vmem:[%s5173_s11 + $0xdf0] sm:$0xff] }
 0x214   : > { %3874 = vmatmul.mubr.bf16.vlgmr.msra.gmra.mrb[4].mxu0 %v5295_v35  ;;  %4038 = vmatmul.mubr.bf16.vlgmr.msra.gmra.mrb[4].mxu1 %v5295_v35  ;;  %v4686_v35 = vcombine.low %v661_v57, %v665_v63  ;;  %v4720_v57 = vcombine.low %v694_v33, %v698_v36 }
 0x215   : > { %3883 = vmatpush1.bf16.msra.mxu0 %v4670_v52  ;;  %4047 = vmatpush1.bf16.msra.mxu1 %v4672_v54 }
 0x216   : > { %3884 = vmatprep.subr.bf16.mxu0 %v4679_v55  ;;  %4048 = vmatprep.subr.bf16.mxu1 %v4681_v56  ;;  %v4718_v56 = vcombine.low %v693_v30, %v697_v31 }
 0x217   : > { %3914 = vmatprep.mubr.bf16.mxu0 %v5439_v2  ;;  %4078 = vmatprep.mubr.bf16.mxu1 %v5439_v2  ;;  %v4696_v2 = vcombine.low %v670_v4, %v674_v5  ;;  %v714_v4 = vld [vmem:[%s5173_s11 + $0xe38] sm:$0xff]  ;;  %v5025_v5 = vmov 1983009808  }
 0x218   : > { %v4737_v8 = vcombine.high %v710_v3, %v714_v4 }
 0x219   : > { %3885 = vmatpush1.bf16.msra.mxu0 %v4678_v40  ;;  %4049 = vmatpush1.bf16.msra.mxu1 %v4680_v61  ;;  %v4727_v40 = vcombine.high %v701_v45, %v705_v46 }
 0x21a   : > { %3886 = vmatprep.subr.bf16.mxu0 %v4687_v62  ;;  %4050 = vmatprep.subr.bf16.mxu1 %v4689_v0  ;;  %v4729_v62 = vcombine.high %v702_v49, %v706_v50  ;;  %v709_v0 = vld [vmem:[%s5173_s11 + $0xe10] sm:$0xff] }
 0x21d   : > { %3887 = vmatpush1.bf16.msra.mxu0 %v4686_v35  ;;  %4051 = vmatpush1.bf16.msra.mxu1 %v4688_v6  ;;  %v4111_v35 = vunpack.c.l.s4 %v5025_v5  ;;  %v4726_v6 = vcombine.low %v701_v45, %v705_v46  ;;  %v4750_v46 = vcombine.low %v725_v19, %v729_v20 }
 0x21e   : > { %3888 = vmatprep.subr.bf16.mxu0 %v4695_v34  ;;  %4052 = vmatprep.subr.bf16.mxu1 %v4697_v7  ;;  %v4728_v34 = vcombine.low %v702_v49, %v706_v50  ;;  %v4735_v7 = vcombine.high %v709_v0, %v713_v1  ;;  %v741_v50 = vld [vmem:[%s5173_s11 + $0xf10] sm:$0xff] }
 0x221   : > { %3889 = vmatpush1.bf16.msra.mxu0 %v4694_v14  ;;  %4053 = vmatpush1.bf16.msra.mxu1 %v4696_v2  ;;  %v722_v14 = vld [vmem:[%s5173_s11 + $0xe78] sm:$0xff]  ;;  %v4112_v2 = vunpack.c.0.s8 %v4111_v35 }
 0x222   : > { %3890 = vmatprep.subr.bf16.mxu0 %v4703_v15  ;;  %4054 = vmatprep.subr.bf16.mxu1 %v4705_v16  ;;  %v4734_v15 = vcombine.low %v709_v0, %v713_v1  ;;  %v4736_v16 = vcombine.low %v710_v3, %v714_v4  ;;  %v4745_v18 = vcombine.high %v718_v13, %v722_v14 }
 0x223   : > { %v5776_v59 = vsub.s32 %v4112_v2, %v5207_v43  ;;  %v4744_v31 = vcombine.low %v718_v13, %v722_v14 }
 0x225   : > { %3891 = vmatpush1.bf16.msra.mxu0 %v4702_v22  ;;  %4055 = vmatpush1.bf16.msra.mxu1 %v4704_v27  ;;  %v726_v22 = vld [vmem:[%s5173_s11 + $0xe98] sm:$0xff] }
 0x226   : > { %3892 = vmatprep.subr.bf16.mxu0 %v4711_v28  ;;  %4056 = vmatprep.subr.bf16.mxu1 %v4713_v29  ;;  %v4742_v28 = vcombine.low %v717_v10, %v721_v11  ;;  %v758_v10 = vld [vmem:[%s5173_s11 + $0xf98] sm:$0xff] }
 0x227   : > { %v3588_v42 = vpop.f32.mrb[0].mxu0  ;;  %v3752_v48 = vpop.f32.mrb[0].mxu1  ;;  %v762_v11 = vld [vmem:[%s5173_s11 + $0xfb8] sm:$0xff] }
 0x228   : > { %v4799_v47 = vadd.f32 %v3588_v42, %v776_v32  ;;  %v3590_v25 = vpop.f32.mrb[1].mxu0  ;;  %v4801_v51 = vadd.f32 %v3752_v48, %v784_v37  ;;  %v3754_v54 = vpop.f32.mrb[1].mxu1  ;;  %v4751_v32 = vcombine.high %v725_v19, %v729_v20  ;;  %v734_v42 = vld [vmem:[%s5173_s11 + $0xed8] sm:$0xff]  ;;  %v4752_v48 = vcombine.low %v726_v22, %v730_v24  ;;  %v765_v19 = vld [vmem:[%s5173_s11 + $0xfd0] sm:$0xff] }
 0x229   : > { %v4800_v52 = vadd.f32 %v3590_v25, %v780_v38  ;;  %v3592_v55 = vpop.f32.mrb[2].mxu0  ;;  %3893 = vmatpush1.bf16.msra.mxu0 %v4710_v39  ;;  %v4802_v63 = vadd.f32 %v3754_v54, %v788_v41  ;;  %v3756_v58 = vpop.f32.mrb[2].mxu1  ;;  %4057 = vmatpush1.bf16.msra.mxu1 %v4712_v53  ;;  %v4753_v38 = vcombine.high %v726_v22, %v730_v24  ;;  %v733_v39 = vld [vmem:[%s5173_s11 + $0xed0] sm:$0xff]  ;;  %v742_v54 = vld [vmem:[%s5173_s11 + $0xf18] sm:$0xff] }
 0x22a   : > { %4904 = vtanh.f32 %v4799_v47  ;;  %v3593_v60 = vpop.f32.mrb[3].mxu0  ;;  %3894 = vmatprep.subr.bf16.mxu0 %v4719_v9  ;;  %v3757_v61 = vpop.f32.mrb[3].mxu1  ;;  %4058 = vmatprep.subr.bf16.mxu1 %v4721_v44  ;;  %v737_v41 = vld [vmem:[%s5173_s11 + $0xef0] sm:$0xff]  ;;  %v738_v44 = vld [vmem:[%s5173_s11 + $0xef8] sm:$0xff] }
 0x22b   : > { %4906 = vtanh.f32 %v4801_v51  ;;  %v4759_v25 = vcombine.high %v733_v39, %v737_v41  ;;  %v4761_v49 = vcombine.high %v734_v42, %v738_v44  ;;  %v745_v51 = vld [vmem:[%s5173_s11 + $0xf30] sm:$0xff]  ;;  %v746_v55 = vld [vmem:[%s5173_s11 + $0xf38] sm:$0xff] }
 0x22c   : > { %4908 = vtanh.f32 %v4800_v52  ;;  %v4769_v58 = vcombine.high %v742_v54, %v746_v55  ;;  %v749_v60 = vld [vmem:[%s5173_s11 + $0xf50] sm:$0xff]  ;;  %v750_v61 = vld [vmem:[%s5173_s11 + $0xf58] sm:$0xff]  ;;  %v4766_v1 = vcombine.low %v741_v50, %v745_v51  ;;  %v4768_v4 = vcombine.low %v742_v54, %v746_v55  ;;  %v4095_v55 = vld [vmem:[%s4094_s27] sm:$0xff] }
 0x22d   : > { %4910 = vtanh.f32 %v4802_v63  ;;  %3895 = vmatpush1.bf16.msra.mxu0 %v4718_v56  ;;  %4059 = vmatpush1.bf16.msra.mxu1 %v4720_v57  ;;  %v4758_v56 = vcombine.low %v733_v39, %v737_v41  ;;  %v4760_v57 = vcombine.low %v734_v42, %v738_v44  ;;  %v4767_v63 = vcombine.high %v741_v50, %v745_v51  ;;  %v769_v20 = vld [vmem:[%s5173_s11 + $0xff0] sm:$0xff]  ;;  %v766_v22 = vld [vmem:[%s5173_s11 + $0xfd8] sm:$0xff] }
 0x22e   : > { %3896 = vmatprep.subr.bf16.mxu0 %v4727_v40  ;;  %4060 = vmatprep.subr.bf16.mxu1 %v4729_v62  ;;  %v753_v40 = vld [vmem:[%s5173_s11 + $0xf70] sm:$0xff]  ;;  %v754_v62 = vld [vmem:[%s5173_s11 + $0xf78] sm:$0xff] }
 0x22f   : > { %v4775_v5 = vcombine.high %v749_v60, %v753_v40  ;;  %v4774_v14 = vcombine.low %v749_v60, %v753_v40  ;;  %v770_v24 = vld [vmem:[%s5173_s11 + $0xff8] sm:$0xff] }
 0x231   : > { %3897 = vmatpush1.bf16.msra.mxu0 %v4726_v6  ;;  %4061 = vmatpush1.bf16.msra.mxu1 %v4728_v34  ;;  %v4777_v6 = vcombine.high %v750_v61, %v754_v62  ;;  %v757_v34 = vld [vmem:[%s5173_s11 + $0xf90] sm:$0xff] }
 0x232   : > { %3898 = vmatprep.subr.bf16.mxu0 %v4735_v7  ;;  %4062 = vmatprep.subr.bf16.mxu1 %v4737_v8  ;;  %v761_v7 = vld [vmem:[%s5173_s11 + $0xfb0] sm:$0xff] }
 0x234   : > { %v4905_v21 = vpop.eup %4904 }
 0x235   : > { %v4907_v26 = vpop.eup %4906  ;;  %v4096_v27 = vmul.f32 1.442695, %v4905_v21  ;;  %3899 = vmatpush1.bf16.msra.mxu0 %v4734_v15  ;;  %4063 = vmatpush1.bf16.msra.mxu1 %v4736_v16  ;;  %v4776_v15 = vcombine.low %v750_v61, %v754_v62  ;;  %v4783_v16 = vcombine.high %v757_v34, %v761_v7 }
 0x236   : > { %v4909_v29 = vpop.eup %4908  ;;  %v4100_v30 = vmul.f32 1.442695, %v4907_v26  ;;  %3900 = vmatprep.subr.bf16.mxu0 %v4743_v17  ;;  %4064 = vmatprep.subr.bf16.mxu1 %v4745_v18  ;;  %v4785_v18 = vcombine.high %v758_v10, %v762_v11 }
 0x237   : > { %v4911_v33 = vpop.eup %4910  ;;  %4912 = vpow2.f32 %v4096_v27  ;;  %v4098_v36 = vmul.f32 1.442695, %v4909_v29  ;;  %v4155_v37 = vcombine.low %v4905_v21, %v4909_v29  ;;  %v4791_v29 = vcombine.high %v765_v19, %v769_v20 }
 0x238   : > { %4914 = vpow2.f32 %v4100_v30  ;;  %v4102_v53 = vmul.f32 1.442695, %v4911_v33  ;;  %v4156_v9 = vcombine.low %v4907_v26, %v4911_v33  ;;  %v4782_v26 = vcombine.low %v757_v34, %v761_v7 }
 0x239   : > { %4916 = vpow2.f32 %v4098_v36  ;;  %v4163_v45 = vrot.slane %v4155_v37, %v5776_v59  ;;  %3901 = vmatpush1.bf16.msra.mxu0 %v4742_v28  ;;  %4065 = vmatpush1.bf16.msra.mxu1 %v4744_v31  ;;  %v4784_v28 = vcombine.low %v758_v10, %v762_v11  ;;  %v4793_v30 = vcombine.high %v766_v22, %v770_v24 }
 0x23a   : > { %4918 = vpow2.f32 %v4102_v53  ;;  %v4170_v47 = vrot.slane %v4156_v9, %v5776_v59  ;;  %3902 = vmatprep.subr.bf16.mxu0 %v4751_v32  ;;  %4066 = vmatprep.subr.bf16.mxu1 %v4753_v38  ;;  %v4790_v31 = vcombine.low %v765_v19, %v769_v20  ;;  %v4792_v32 = vcombine.low %v766_v22, %v770_v24 }
 0x23b   : > { %v791_v33 = vsub.s32 4, %v5207_v43  ;;  %v799_v36 = vsub.s32 6, %v5207_v43  ;;  %v795_v37 = vsub.s32 5, %v5207_v43  ;;  %v803_v38 = vsub.s32 7, %v5207_v43 }
 0x23c   : > { %v4171_v52 = vcombine.low %v4163_v45, %v4170_v47 }
 0x23d   : > { %3903 = vmatpush1.bf16.msra.mxu0 %v4750_v46  ;;  %4067 = vmatpush1.bf16.msra.mxu1 %v4752_v48  ;;  %v792_v39 = vrot.slane %v5737_v23, %v791_v33  ;;  %v800_v41 = vrot.slane %v5737_v23, %v799_v36  ;;  %v796_v53 = vrot.slane %v5737_v23, %v795_v37 }
 0x23e   : > { %3904 = vmatprep.subr.bf16.mxu0 %v4759_v25  ;;  %4173 = vst [vmem:[%s5790_s15 + $0x8] sm:$0xff] %v4171_v52  ;;  %4068 = vmatprep.subr.bf16.mxu1 %v4761_v49  ;;  %v804_v9 = vrot.slane %v5737_v23, %v803_v38 }
 0x241   : > { %v4913_v0 = vpop.eup %4912  ;;  %3905 = vmatpush1.bf16.msra.mxu0 %v4758_v56  ;;  %4069 = vmatpush1.bf16.msra.mxu1 %v4760_v57 }
 0x242   : > { %v4915_v3 = vpop.eup %4914  ;;  %3906 = vmatprep.subr.bf16.mxu0 %v4767_v63  ;;  %4070 = vmatprep.subr.bf16.mxu1 %v4769_v58 }
 0x243   : > { %v4917_v35 = vpop.eup %4916 }
 0x244   : > { %v4919_v8 = vpop.eup %4918  ;;  %v4108_v13 = vcombine.low %v4913_v0, %v4917_v35 }
 0x245   : > { %3907 = vmatpush1.bf16.msra.mxu0 %v4766_v1  ;;  %v4109_v2 = vcombine.low %v4915_v3, %v4919_v8  ;;  %4071 = vmatpush1.bf16.msra.mxu1 %v4768_v4 }
 0x246   : > { %3908 = vmatprep.subr.bf16.mxu0 %v4775_v5  ;;  %v4116_v17 = vrot.slane %v4108_v13, %v5776_v59  ;;  %4072 = vmatprep.subr.bf16.mxu1 %v4777_v6 }
 0x247   : > { %v4123_v21 = vrot.slane %v4109_v2, %v5776_v59 }
 0x249   : > { %3909 = vmatpush1.bf16.msra.mxu0 %v4774_v14  ;;  %v4124_v27 = vcombine.low %v4116_v17, %v4123_v21  ;;  %4073 = vmatpush1.bf16.msra.mxu1 %v4776_v15 }
 0x24a   : > { %3910 = vmatprep.subr.bf16.mxu0 %v4783_v16  ;;  %4074 = vmatprep.subr.bf16.mxu1 %v4785_v18 }
 0x24b   : > { %v4126_v57 = vmul.f32 %v4124_v27, %v4095_v55 }
 0x24d   : > { %3911 = vmatpush1.bf16.msra.mxu0 %v4782_v26  ;;  %4075 = vmatpush1.bf16.msra.mxu1 %v4784_v28 }
 0x24e   : > { %3912 = vmatprep.subr.bf16.mxu0 %v4791_v29  ;;  %4076 = vmatprep.subr.bf16.mxu1 %v4793_v30 }
 0x251   : > { %3913 = vmatpush1.bf16.msra.mxu0 %v4790_v31  ;;  %4077 = vmatpush1.bf16.msra.mxu1 %v4792_v32 }
 0x254   : > { %3915 = vmatmul.mubr.bf16.vlgmr.msra.gmra.mrb[4].mxu0 %v5507_v12  ;;  %4079 = vmatmul.mubr.bf16.vlgmr.msra.gmra.mrb[4].mxu1 %v5507_v12 }
 0x327   : > { %v3916_v42 = vpop.f32.mrb[4].mxu0  ;;  %v4080_v44 = vpop.f32.mrb[4].mxu1 }
 0x328   : > { %v4803_v12 = vadd.f32 %v3916_v42, %v792_v39  ;;  %v3918_v45 = vpop.f32.mrb[5].mxu0  ;;  %v4805_v46 = vadd.f32 %v4080_v44, %v800_v41  ;;  %v4082_v48 = vpop.f32.mrb[5].mxu1 }
 0x329   : > { %v4804_v47 = vadd.f32 %v3918_v45, %v796_v53  ;;  %v3920_v25 = vpop.f32.mrb[6].mxu0  ;;  %v4806_v43 = vadd.f32 %v4082_v48, %v804_v9  ;;  %v4084_v49 = vpop.f32.mrb[6].mxu1 }
 0x32a   : > { %v3921_v50 = vpop.f32.mrb[7].mxu0  ;;  %v4085_v52 = vpop.f32.mrb[7].mxu1 }
 0x32b   : > { %v4131_v51 = vcombine.low %v4803_v12, %v4804_v47  ;;  %v4132_v23 = vcombine.low %v4805_v46, %v4806_v43 }
 0x32d   : > { %v4139_v54 = vrot.slane %v4131_v51, %v5776_v59  ;;  %v4146_v56 = vrot.slane %v4132_v23, %v5776_v59 }
 0x32f   : > { %v4147_v63 = vcombine.low %v4139_v54, %v4146_v56 }
 0x331   : > { %v4149_v58 = vadd.f32 %v4147_v63, %v4126_v57 }
 0x333   : > { %4150 = vst [vmem:[%s5790_s15] sm:$0xff] %v4149_v58 }
 0x334 PF: > { %p17_p8 = scmp.ge.s32.totalorder %s5073_s20, 4   ;;  %s5852_s15 = smov %s5010_s16 }
 0x335   : > { %s5853_s16 = smov %s5014_s17  ;;  %s5854_s17 = smov %s5083_s23 }
 0x336   : > { %s5855_s18 = smov %s5073_s20  ;;  %19 = sbr.rel (!%p17_p8) target bundleno = 5 (0x5), region = 90 }
 0x33d   :  { %4196 = vsyncpa [#allocation3], 1 }
 0x33e   :  { %4198 = vsyncpa [#allocation3 + $0x1], 1 }
 0x33f   :  { %4199 = vsyncpa [#allocation5], 1 }
 0x340   :  { %4201 = vsyncpa [#allocation5 + $0x1], 1 }

</bundles_post_ra>
